<compile_context>
chip_gen: v6e
topology: v6e:2x2x1
jax: 0.10.0
libtpu: 0.0.40
codegen_flags: <defaults>
</compile_context>

<pallas_src>
import numpy as np

import jax
import jax.numpy as jnp
from jax.experimental import pallas as pl
from jax.experimental.pallas import tpu as pltpu


# Static geometry (the module's view(-1, 8*8*8) pins the input to 32x32).
H1, W1 = 32, 32                       # conv1 spatial
WP1 = W1 + 2                          # 34   padded row width
S1 = (H1 + 2) * WP1                   # 1156 padded image size (flat)
L1 = H1 * WP1                         # 1088 conv1 output lanes (i = y*34 + x)
M1 = L1 - WP1 - 1                     # 1053 pool1 candidate lanes

H2, W2 = 16, 16                       # conv2 spatial
WP2 = W2 + 2                          # 18
S2 = (H2 + 2) * WP2                   # 324
L2 = H2 * WP2                         # 288  conv2 output lanes (i = y*18 + x)
M2 = L2 - WP2 - 1                     # 269  pool2 candidate lanes

CIN1P = 8                             # conv1 in-channels padded 3 -> 8 (sublane align)
TB = 4                                # images per grid step

# 3x3 "same" conv taps as lane offsets into the padded flat layout.
OFFS1 = tuple(ky * WP1 + kx for ky in range(3) for kx in range(3))
OFFS2 = tuple(ky * WP2 + kx for ky in range(3) for kx in range(3))


def _net_kernel(x_ref, w1_ref, b1_ref, w2_ref, b2_ref, sel2_ref, sw1_ref,
                bf1_ref, wf2_ref, bf2_ref, o_ref):
    f32, bf16 = jnp.float32, jnp.bfloat16
    hs = []
    for img in range(TB):                                   # unrolled over the batch tile
        xi = x_ref[img]                                     # (8, 1158) bf16, pre-padded

        # ---- conv1: stack the 9 lane-shifted windows along sublanes and do a
        #      single (16,72)@(72,1088) MXU matmul (implicit im2col).
        stack1 = jnp.concatenate([xi[:, s:s + L1] for s in OFFS1], axis=0)   # (72,1088)
        t1 = jnp.tanh(jnp.dot(w1_ref[...], stack1, preferred_element_type=f32)
                      + b1_ref[...])                        # (16, 1088) f32

        # ---- maxpool 2x2: VPU tree of maxima over the 4 window taps.
        m1 = jnp.maximum(jnp.maximum(t1[:, 0:M1], t1[:, 1:M1 + 1]),
                         jnp.maximum(t1[:, WP1:WP1 + M1], t1[:, WP1 + 1:WP1 + 1 + M1]))

        # ---- pool1 subsample + zero re-pad for conv2: stack the 16 pooled row
        #      windows (32 lanes each) and apply one small selection matmul.
        mrows = jnp.concatenate([m1[:, 2 * y2 * WP1: 2 * y2 * WP1 + 2 * W2]
                                 for y2 in range(H2)], axis=1).astype(bf16)  # (16, 512)
        xp2 = jnp.dot(mrows, sel2_ref[...],
                      preferred_element_type=f32).astype(bf16)               # (16, 326)

        # ---- conv2: single (8,144)@(144,288) matmul over stacked windows.
        stack2 = jnp.concatenate([xp2[:, s:s + L2] for s in OFFS2], axis=0)  # (144,288)
        t2 = jnp.tanh(jnp.dot(w2_ref[...], stack2, preferred_element_type=f32)
                      + b2_ref[...])                        # (8, 288) f32

        # ---- maxpool 2x2
        m2 = jnp.maximum(jnp.maximum(t2[:, 0:M2], t2[:, 1:M2 + 1]),
                         jnp.maximum(t2[:, WP2:WP2 + M2], t2[:, WP2 + 1:WP2 + 1 + M2]))

        # ---- fc1: one matmul with channel-block-expanded weights; the valid
        #      contributions sit in the diagonal (c, c*32:(c+1)*32) blocks.
        p = jnp.dot(m2.astype(bf16), sw1_ref[...], preferred_element_type=f32)  # (8,256)
        h = p[0:1, 0:32]
        for c in range(1, 8):
            h = h + p[c:c + 1, c * 32:(c + 1) * 32]
        hs.append(h)                                        # (1, 32) f32

    # ---- fc1 bias/tanh and fc2 once per grid step over all TB images.
    hb = jnp.tanh(jnp.concatenate(hs, axis=0) + bf1_ref[...])          # (TB, 32)
    o_ref[0] = (jnp.dot(hb.astype(jnp.bfloat16), wf2_ref[...],
                        preferred_element_type=jnp.float32) + bf2_ref[...])


def _full_spec(a):
    nd = a.ndim
    return pl.BlockSpec(a.shape, lambda b: (0,) * nd)


def net_forward(x_nchw, prep):
    """x_nchw: (B, 3, 32, 32) float32; prep: output of prepare_params()."""
    B = x_nchw.shape[0]
    Bp = ((B + TB - 1) // TB) * TB
    x = x_nchw.astype(jnp.float32)
    if Bp != B:
        x = jnp.pad(x, ((0, Bp - B), (0, 0), (0, 0), (0, 0)))

    # Host-side prep: zero-pad spatial to 34x34, pad channels 3->8, flatten,
    # add 2 guard lanes, cast to bf16 (lane-dense, half-size input DMA).
    xp = jnp.pad(x, ((0, 0), (0, CIN1P - 3), (1, 1), (1, 1)))          # (Bp,8,34,34)
    xflat = jnp.pad(xp.reshape(Bp, CIN1P, S1), ((0, 0), (0, 0), (0, 2)))
    xflat = xflat.astype(jnp.bfloat16)                                  # (Bp,8,1158)

    consts = (prep["w1"], prep["b1"], prep["w2"], prep["b2"], prep["sel2"],
              prep["sw1"], prep["bf1"], prep["wf2"], prep["bf2"])

    out = pl.pallas_call(
        _net_kernel,
        out_shape=jax.ShapeDtypeStruct((Bp // TB, TB, 2), jnp.float32),
        grid=(Bp // TB,),
        in_specs=[pl.BlockSpec((TB, CIN1P, S1 + 2), lambda b: (b, 0, 0))]
                 + [_full_spec(c) for c in consts],
        out_specs=pl.BlockSpec((1, TB, 2), lambda b: (b, 0, 0)),
        compiler_params=pltpu.CompilerParams(
            dimension_semantics=("parallel",),
            vmem_limit_bytes=32 * 1024 * 1024),
    )(xflat, *consts)
    return out.reshape(Bp, 2)[:B]


# ----------------------------------------------------------------------------
# Parameters: deterministic synthetic init in torch layouts + one-time prep
# ----------------------------------------------------------------------------

def init_params(key):
    ks = jax.random.split(key, 8)
    return {
        "conv1_w": jax.random.normal(ks[0], (16, 3, 3, 3), jnp.float32) * 0.1,
        "conv1_b": jax.random.normal(ks[1], (16,), jnp.float32) * 0.01,
        "conv2_w": jax.random.normal(ks[2], (8, 16, 3, 3), jnp.float32) * 0.1,
        "conv2_b": jax.random.normal(ks[3], (8,), jnp.float32) * 0.01,
        "fc1_w": jax.random.normal(ks[4], (32, 512), jnp.float32) * 0.05,
        "fc1_b": jax.random.normal(ks[5], (32,), jnp.float32) * 0.01,
        "fc2_w": jax.random.normal(ks[6], (2, 32), jnp.float32) * 0.05,
        "fc2_b": jax.random.normal(ks[7], (2,), jnp.float32) * 0.01,
    }


def prepare_params(p):
    """One-time conversion of torch-layout weights into kernel layouts (bf16
    MXU operands) plus the constant selection matrices, all off the hot path."""
    bf16 = jnp.bfloat16

    # conv1 (16,3,3,3) -> (16, 9 taps, 8 padded cin) -> (16, 72)
    w1 = jnp.transpose(p["conv1_w"], (0, 2, 3, 1)).reshape(16, 9, 3)
    w1 = jnp.pad(w1, ((0, 0), (0, 0), (0, CIN1P - 3))).reshape(16, 72).astype(bf16)

    # conv2 (8,16,3,3) -> (8, 9*16) = (8, 144)
    w2 = jnp.transpose(p["conv2_w"], (0, 2, 3, 1)).reshape(8, 144).astype(bf16)

    # sel2[y2*32 + 2*x2, (y2+1)*18 + (x2+1)] = 1: deinterleaves the stacked
    # pooled row windows and places them into conv2's zero-padded flat layout.
    sel2 = np.zeros((2 * W2 * H2, S2 + 2), np.float32)
    for y2 in range(H2):
        for x2 in range(W2):
            sel2[y2 * 2 * W2 + 2 * x2, (y2 + 1) * WP2 + (x2 + 1)] = 1.0
    sel2 = jnp.asarray(sel2, bf16)

    # sw1[q, c*32 + o] = fc1_w[o, c*64 + y3*8 + x3] with q = 2*y3*18 + 2*x3:
    # pool2 subsample + torch (C,H,W) flatten + per-channel block expansion so
    # fc1 becomes a single (8,269)@(269,256) matmul.
    fc1 = np.asarray(p["fc1_w"], np.float32)                 # (32, 512)
    sw1 = np.zeros((M2, 256), np.float32)
    for c in range(8):
        for y3 in range(8):
            for x3 in range(8):
                q = 2 * y3 * WP2 + 2 * x3
                sw1[q, c * 32:(c + 1) * 32] = fc1[:, c * 64 + y3 * 8 + x3]
    sw1 = jnp.asarray(sw1, bf16)

    return {
        "w1": w1, "b1": p["conv1_b"].reshape(16, 1),
        "w2": w2, "b2": p["conv2_b"].reshape(8, 1),
        "sel2": sel2, "sw1": sw1,
        "bf1": p["fc1_b"].reshape(1, 32),
        "wf2": jnp.transpose(p["fc2_w"]).astype(bf16),       # (32, 2)
        "bf2": p["fc2_b"].reshape(1, 2),
    }


# ----------------------------------------------------------------------------
# Pure-JAX f32 reference of the PyTorch forward pass (for a tolerance check)
# ----------------------------------------------------------------------------

def net_reference(x, p):
    y = jax.lax.conv_general_dilated(x, p["conv1_w"], (1, 1), ((1, 1), (1, 1)),
                                     dimension_numbers=("NCHW", "OIHW", "NCHW"))
    y = jnp.tanh(y + p["conv1_b"][None, :, None, None])
    y = jax.lax.reduce_window(y, -jnp.inf, jax.lax.max, (1, 1, 2, 2), (1, 1, 2, 2), "VALID")
    y = jax.lax.conv_general_dilated(y, p["conv2_w"], (1, 1), ((1, 1), (1, 1)),
                                     dimension_numbers=("NCHW", "OIHW", "NCHW"))
    y = jnp.tanh(y + p["conv2_b"][None, :, None, None])
    y = jax.lax.reduce_window(y, -jnp.inf, jax.lax.max, (1, 1, 2, 2), (1, 1, 2, 2), "VALID")
    y = y.reshape(y.shape[0], -1)                            # torch view(-1, 512)
    y = jnp.tanh(y @ p["fc1_w"].T + p["fc1_b"])
    return y @ p["fc2_w"].T + p["fc2_b"]


if __name__ == "__main__":
    key = jax.random.PRNGKey(0)
    k_x, k_p = jax.random.split(key)
    # The module's view(-1, 8*8*8) forces 32x32 spatial input; B=8 -> grid=(2,).
    x = jax.random.normal(k_x, (8, 3, 32, 32), jnp.float32)
    params = init_params(k_p)
    prep = prepare_params(params)

    fwd = jax.jit(net_forward)
    out = jax.block_until_ready(fwd(x, prep))
    assert out.shape == (8, 2) and out.dtype == jnp.float32
    assert bool(jnp.all(jnp.isfinite(out)))

    # bf16 MXU operands -> allow ~1e-1-level absolute deviation vs f32 reference.
    ref = net_reference(x, params)
    err = float(jnp.max(jnp.abs(out - ref)))
    assert err < 0.15, f"max abs error vs reference: {err}"
    print("KERNEL_OK")
</pallas_src>

<mosaic_0001>
module attributes {stable_mosaic.version = 11 : i64} {
  func.func @_net_kernel(%arg0: i32, %arg1: memref<4x8x1158xbf16, #tpu.memory_space<vmem>>, %arg2: memref<16x72xbf16, #tpu.memory_space<vmem>>, %arg3: memref<16x1xf32, #tpu.memory_space<vmem>>, %arg4: memref<8x144xbf16, #tpu.memory_space<vmem>>, %arg5: memref<8x1xf32, #tpu.memory_space<vmem>>, %arg6: memref<512x326xbf16, #tpu.memory_space<vmem>>, %arg7: memref<269x256xbf16, #tpu.memory_space<vmem>>, %arg8: memref<1x32xf32, #tpu.memory_space<vmem>>, %arg9: memref<32x2xbf16, #tpu.memory_space<vmem>>, %arg10: memref<1x2xf32, #tpu.memory_space<vmem>>, %arg11: memref<1x4x2xf32, #tpu.memory_space<vmem>>) attributes {dimension_semantics = [#tpu.dimension_semantics<parallel>], iteration_bounds = array<i64: 2>, scalar_prefetch = 0 : i64, scratch_operands = 0 : i64, tpu.core_type = #tpu.core_type<tc>, window_params = [{transform_indices = @transform_0, window_bounds = array<i64: 4, 8, 1158>}, {pipeline_mode = #tpu.pipeline_mode<synchronous>, transform_indices = @transform_1, window_bounds = array<i64: 16, 72>}, {pipeline_mode = #tpu.pipeline_mode<synchronous>, transform_indices = @transform_2, window_bounds = array<i64: 16, 1>}, {pipeline_mode = #tpu.pipeline_mode<synchronous>, transform_indices = @transform_3, window_bounds = array<i64: 8, 144>}, {pipeline_mode = #tpu.pipeline_mode<synchronous>, transform_indices = @transform_4, window_bounds = array<i64: 8, 1>}, {pipeline_mode = #tpu.pipeline_mode<synchronous>, transform_indices = @transform_5, window_bounds = array<i64: 512, 326>}, {pipeline_mode = #tpu.pipeline_mode<synchronous>, transform_indices = @transform_6, window_bounds = array<i64: 269, 256>}, {pipeline_mode = #tpu.pipeline_mode<synchronous>, transform_indices = @transform_7, window_bounds = array<i64: 1, 32>}, {pipeline_mode = #tpu.pipeline_mode<synchronous>, transform_indices = @transform_8, window_bounds = array<i64: 32, 2>}, {pipeline_mode = #tpu.pipeline_mode<synchronous>, transform_indices = @transform_9, window_bounds = array<i64: 1, 2>}, {transform_indices = @transform_10, window_bounds = array<i64: 1, 4, 2>}]} {
    %c0 = arith.constant 0 : index
    %c0_0 = arith.constant 0 : index
    %c0_1 = arith.constant 0 : index
    %0 = vector.load %arg1[%c0, %c0_0, %c0_1] : memref<4x8x1158xbf16, #tpu.memory_space<vmem>>, vector<1x8x1158xbf16>
    %1 = vector.shape_cast %0 : vector<1x8x1158xbf16> to vector<8x1158xbf16>
    %2 = vector.extract_strided_slice %1 {offsets = [0, 0], sizes = [8, 1088], strides = [1, 1]} : vector<8x1158xbf16> to vector<8x1088xbf16>
    %3 = vector.extract_strided_slice %1 {offsets = [0, 1], sizes = [8, 1088], strides = [1, 1]} : vector<8x1158xbf16> to vector<8x1088xbf16>
    %4 = vector.extract_strided_slice %1 {offsets = [0, 2], sizes = [8, 1088], strides = [1, 1]} : vector<8x1158xbf16> to vector<8x1088xbf16>
    %5 = vector.extract_strided_slice %1 {offsets = [0, 34], sizes = [8, 1088], strides = [1, 1]} : vector<8x1158xbf16> to vector<8x1088xbf16>
    %6 = vector.extract_strided_slice %1 {offsets = [0, 35], sizes = [8, 1088], strides = [1, 1]} : vector<8x1158xbf16> to vector<8x1088xbf16>
    %7 = vector.extract_strided_slice %1 {offsets = [0, 36], sizes = [8, 1088], strides = [1, 1]} : vector<8x1158xbf16> to vector<8x1088xbf16>
    %8 = vector.extract_strided_slice %1 {offsets = [0, 68], sizes = [8, 1088], strides = [1, 1]} : vector<8x1158xbf16> to vector<8x1088xbf16>
    %9 = vector.extract_strided_slice %1 {offsets = [0, 69], sizes = [8, 1088], strides = [1, 1]} : vector<8x1158xbf16> to vector<8x1088xbf16>
    %10 = vector.extract_strided_slice %1 {offsets = [0, 70], sizes = [8, 1088], strides = [1, 1]} : vector<8x1158xbf16> to vector<8x1088xbf16>
    %11 = tpu.concatenate %2, %3, %4, %5, %6, %7, %8, %9, %10 in 0 : vector<8x1088xbf16>, vector<8x1088xbf16>, vector<8x1088xbf16>, vector<8x1088xbf16>, vector<8x1088xbf16>, vector<8x1088xbf16>, vector<8x1088xbf16>, vector<8x1088xbf16>, vector<8x1088xbf16> -> vector<72x1088xbf16>
    %c0_2 = arith.constant 0 : index
    %c0_3 = arith.constant 0 : index
    %12 = vector.load %arg2[%c0_2, %c0_3] : memref<16x72xbf16, #tpu.memory_space<vmem>>, vector<16x72xbf16>
    %cst = arith.constant dense<0.000000e+00> : vector<16x1088xf32>
    %13 = tpu.matmul %12, %11, %cst {dimension_numbers = #tpu.dot_dimension_numbers<[1], [0], [0], [1], [0, 0, 1, 1], [], []>} : vector<16x72xbf16>, vector<72x1088xbf16>, vector<16x1088xf32> -> vector<16x1088xf32>
    %c0_4 = arith.constant 0 : index
    %c0_5 = arith.constant 0 : index
    %14 = vector.load %arg3[%c0_4, %c0_5] : memref<16x1xf32, #tpu.memory_space<vmem>>, vector<16x1xf32>
    %15 = vector.broadcast %14 : vector<16x1xf32> to vector<16x1088xf32>
    %16 = arith.addf %13, %15 : vector<16x1088xf32>
    %17 = math.tanh %16 : vector<16x1088xf32>
    %18 = vector.extract_strided_slice %17 {offsets = [0, 0], sizes = [16, 1053], strides = [1, 1]} : vector<16x1088xf32> to vector<16x1053xf32>
    %19 = vector.extract_strided_slice %17 {offsets = [0, 1], sizes = [16, 1053], strides = [1, 1]} : vector<16x1088xf32> to vector<16x1053xf32>
    %20 = arith.maximumf %18, %19 : vector<16x1053xf32>
    %21 = vector.extract_strided_slice %17 {offsets = [0, 34], sizes = [16, 1053], strides = [1, 1]} : vector<16x1088xf32> to vector<16x1053xf32>
    %22 = vector.extract_strided_slice %17 {offsets = [0, 35], sizes = [16, 1053], strides = [1, 1]} : vector<16x1088xf32> to vector<16x1053xf32>
    %23 = arith.maximumf %21, %22 : vector<16x1053xf32>
    %24 = arith.maximumf %20, %23 : vector<16x1053xf32>
    %25 = vector.extract_strided_slice %24 {offsets = [0, 0], sizes = [16, 32], strides = [1, 1]} : vector<16x1053xf32> to vector<16x32xf32>
    %26 = vector.extract_strided_slice %24 {offsets = [0, 68], sizes = [16, 32], strides = [1, 1]} : vector<16x1053xf32> to vector<16x32xf32>
    %27 = vector.extract_strided_slice %24 {offsets = [0, 136], sizes = [16, 32], strides = [1, 1]} : vector<16x1053xf32> to vector<16x32xf32>
    %28 = vector.extract_strided_slice %24 {offsets = [0, 204], sizes = [16, 32], strides = [1, 1]} : vector<16x1053xf32> to vector<16x32xf32>
    %29 = vector.extract_strided_slice %24 {offsets = [0, 272], sizes = [16, 32], strides = [1, 1]} : vector<16x1053xf32> to vector<16x32xf32>
    %30 = vector.extract_strided_slice %24 {offsets = [0, 340], sizes = [16, 32], strides = [1, 1]} : vector<16x1053xf32> to vector<16x32xf32>
    %31 = vector.extract_strided_slice %24 {offsets = [0, 408], sizes = [16, 32], strides = [1, 1]} : vector<16x1053xf32> to vector<16x32xf32>
    %32 = vector.extract_strided_slice %24 {offsets = [0, 476], sizes = [16, 32], strides = [1, 1]} : vector<16x1053xf32> to vector<16x32xf32>
    %33 = vector.extract_strided_slice %24 {offsets = [0, 544], sizes = [16, 32], strides = [1, 1]} : vector<16x1053xf32> to vector<16x32xf32>
    %34 = vector.extract_strided_slice %24 {offsets = [0, 612], sizes = [16, 32], strides = [1, 1]} : vector<16x1053xf32> to vector<16x32xf32>
    %35 = vector.extract_strided_slice %24 {offsets = [0, 680], sizes = [16, 32], strides = [1, 1]} : vector<16x1053xf32> to vector<16x32xf32>
    %36 = vector.extract_strided_slice %24 {offsets = [0, 748], sizes = [16, 32], strides = [1, 1]} : vector<16x1053xf32> to vector<16x32xf32>
    %37 = vector.extract_strided_slice %24 {offsets = [0, 816], sizes = [16, 32], strides = [1, 1]} : vector<16x1053xf32> to vector<16x32xf32>
    %38 = vector.extract_strided_slice %24 {offsets = [0, 884], sizes = [16, 32], strides = [1, 1]} : vector<16x1053xf32> to vector<16x32xf32>
    %39 = vector.extract_strided_slice %24 {offsets = [0, 952], sizes = [16, 32], strides = [1, 1]} : vector<16x1053xf32> to vector<16x32xf32>
    %40 = vector.extract_strided_slice %24 {offsets = [0, 1020], sizes = [16, 32], strides = [1, 1]} : vector<16x1053xf32> to vector<16x32xf32>
    %41 = tpu.concatenate %25, %26, %27, %28, %29, %30, %31, %32, %33, %34, %35, %36, %37, %38, %39, %40 in 1 : vector<16x32xf32>, vector<16x32xf32>, vector<16x32xf32>, vector<16x32xf32>, vector<16x32xf32>, vector<16x32xf32>, vector<16x32xf32>, vector<16x32xf32>, vector<16x32xf32>, vector<16x32xf32>, vector<16x32xf32>, vector<16x32xf32>, vector<16x32xf32>, vector<16x32xf32>, vector<16x32xf32>, vector<16x32xf32> -> vector<16x512xf32>
    %42 = arith.truncf %41 : vector<16x512xf32> to vector<16x512xbf16>
    %c0_6 = arith.constant 0 : index
    %c0_7 = arith.constant 0 : index
    %43 = vector.load %arg6[%c0_6, %c0_7] : memref<512x326xbf16, #tpu.memory_space<vmem>>, vector<512x326xbf16>
    %cst_8 = arith.constant dense<0.000000e+00> : vector<16x326xf32>
    %44 = tpu.matmul %42, %43, %cst_8 {dimension_numbers = #tpu.dot_dimension_numbers<[1], [0], [0], [1], [0, 0, 1, 1], [], []>} : vector<16x512xbf16>, vector<512x326xbf16>, vector<16x326xf32> -> vector<16x326xf32>
    %45 = arith.truncf %44 : vector<16x326xf32> to vector<16x326xbf16>
    %46 = vector.extract_strided_slice %45 {offsets = [0, 0], sizes = [16, 288], strides = [1, 1]} : vector<16x326xbf16> to vector<16x288xbf16>
    %47 = vector.extract_strided_slice %45 {offsets = [0, 1], sizes = [16, 288], strides = [1, 1]} : vector<16x326xbf16> to vector<16x288xbf16>
    %48 = vector.extract_strided_slice %45 {offsets = [0, 2], sizes = [16, 288], strides = [1, 1]} : vector<16x326xbf16> to vector<16x288xbf16>
    %49 = vector.extract_strided_slice %45 {offsets = [0, 18], sizes = [16, 288], strides = [1, 1]} : vector<16x326xbf16> to vector<16x288xbf16>
    %50 = vector.extract_strided_slice %45 {offsets = [0, 19], sizes = [16, 288], strides = [1, 1]} : vector<16x326xbf16> to vector<16x288xbf16>
    %51 = vector.extract_strided_slice %45 {offsets = [0, 20], sizes = [16, 288], strides = [1, 1]} : vector<16x326xbf16> to vector<16x288xbf16>
    %52 = vector.extract_strided_slice %45 {offsets = [0, 36], sizes = [16, 288], strides = [1, 1]} : vector<16x326xbf16> to vector<16x288xbf16>
    %53 = vector.extract_strided_slice %45 {offsets = [0, 37], sizes = [16, 288], strides = [1, 1]} : vector<16x326xbf16> to vector<16x288xbf16>
    %54 = vector.extract_strided_slice %45 {offsets = [0, 38], sizes = [16, 288], strides = [1, 1]} : vector<16x326xbf16> to vector<16x288xbf16>
    %55 = tpu.concatenate %46, %47, %48, %49, %50, %51, %52, %53, %54 in 0 : vector<16x288xbf16>, vector<16x288xbf16>, vector<16x288xbf16>, vector<16x288xbf16>, vector<16x288xbf16>, vector<16x288xbf16>, vector<16x288xbf16>, vector<16x288xbf16>, vector<16x288xbf16> -> vector<144x288xbf16>
    %c0_9 = arith.constant 0 : index
    %c0_10 = arith.constant 0 : index
    %56 = vector.load %arg4[%c0_9, %c0_10] : memref<8x144xbf16, #tpu.memory_space<vmem>>, vector<8x144xbf16>
    %cst_11 = arith.constant dense<0.000000e+00> : vector<8x288xf32>
    %57 = tpu.matmul %56, %55, %cst_11 {dimension_numbers = #tpu.dot_dimension_numbers<[1], [0], [0], [1], [0, 0, 1, 1], [], []>} : vector<8x144xbf16>, vector<144x288xbf16>, vector<8x288xf32> -> vector<8x288xf32>
    %c0_12 = arith.constant 0 : index
    %c0_13 = arith.constant 0 : index
    %58 = vector.load %arg5[%c0_12, %c0_13] : memref<8x1xf32, #tpu.memory_space<vmem>>, vector<8x1xf32>
    %59 = vector.broadcast %58 : vector<8x1xf32> to vector<8x288xf32>
    %60 = arith.addf %57, %59 : vector<8x288xf32>
    %61 = math.tanh %60 : vector<8x288xf32>
    %62 = vector.extract_strided_slice %61 {offsets = [0, 0], sizes = [8, 269], strides = [1, 1]} : vector<8x288xf32> to vector<8x269xf32>
    %63 = vector.extract_strided_slice %61 {offsets = [0, 1], sizes = [8, 269], strides = [1, 1]} : vector<8x288xf32> to vector<8x269xf32>
    %64 = arith.maximumf %62, %63 : vector<8x269xf32>
    %65 = vector.extract_strided_slice %61 {offsets = [0, 18], sizes = [8, 269], strides = [1, 1]} : vector<8x288xf32> to vector<8x269xf32>
    %66 = vector.extract_strided_slice %61 {offsets = [0, 19], sizes = [8, 269], strides = [1, 1]} : vector<8x288xf32> to vector<8x269xf32>
    %67 = arith.maximumf %65, %66 : vector<8x269xf32>
    %68 = arith.maximumf %64, %67 : vector<8x269xf32>
    %69 = arith.truncf %68 : vector<8x269xf32> to vector<8x269xbf16>
    %c0_14 = arith.constant 0 : index
    %c0_15 = arith.constant 0 : index
    %70 = vector.load %arg7[%c0_14, %c0_15] : memref<269x256xbf16, #tpu.memory_space<vmem>>, vector<269x256xbf16>
    %cst_16 = arith.constant dense<0.000000e+00> : vector<8x256xf32>
    %71 = tpu.matmul %69, %70, %cst_16 {dimension_numbers = #tpu.dot_dimension_numbers<[1], [0], [0], [1], [0, 0, 1, 1], [], []>} : vector<8x269xbf16>, vector<269x256xbf16>, vector<8x256xf32> -> vector<8x256xf32>
    %72 = vector.extract_strided_slice %71 {offsets = [0, 0], sizes = [1, 32], strides = [1, 1]} : vector<8x256xf32> to vector<1x32xf32>
    %73 = vector.extract_strided_slice %71 {offsets = [1, 32], sizes = [1, 32], strides = [1, 1]} : vector<8x256xf32> to vector<1x32xf32>
    %74 = arith.addf %72, %73 : vector<1x32xf32>
    %75 = vector.extract_strided_slice %71 {offsets = [2, 64], sizes = [1, 32], strides = [1, 1]} : vector<8x256xf32> to vector<1x32xf32>
    %76 = arith.addf %74, %75 : vector<1x32xf32>
    %77 = vector.extract_strided_slice %71 {offsets = [3, 96], sizes = [1, 32], strides = [1, 1]} : vector<8x256xf32> to vector<1x32xf32>
    %78 = arith.addf %76, %77 : vector<1x32xf32>
    %79 = vector.extract_strided_slice %71 {offsets = [4, 128], sizes = [1, 32], strides = [1, 1]} : vector<8x256xf32> to vector<1x32xf32>
    %80 = arith.addf %78, %79 : vector<1x32xf32>
    %81 = vector.extract_strided_slice %71 {offsets = [5, 160], sizes = [1, 32], strides = [1, 1]} : vector<8x256xf32> to vector<1x32xf32>
    %82 = arith.addf %80, %81 : vector<1x32xf32>
    %83 = vector.extract_strided_slice %71 {offsets = [6, 192], sizes = [1, 32], strides = [1, 1]} : vector<8x256xf32> to vector<1x32xf32>
    %84 = arith.addf %82, %83 : vector<1x32xf32>
    %85 = vector.extract_strided_slice %71 {offsets = [7, 224], sizes = [1, 32], strides = [1, 1]} : vector<8x256xf32> to vector<1x32xf32>
    %86 = arith.addf %84, %85 : vector<1x32xf32>
    %c1 = arith.constant 1 : index
    %c0_17 = arith.constant 0 : index
    %c0_18 = arith.constant 0 : index
    %87 = vector.load %arg1[%c1, %c0_17, %c0_18] : memref<4x8x1158xbf16, #tpu.memory_space<vmem>>, vector<1x8x1158xbf16>
    %88 = vector.shape_cast %87 : vector<1x8x1158xbf16> to vector<8x1158xbf16>
    %89 = vector.extract_strided_slice %88 {offsets = [0, 0], sizes = [8, 1088], strides = [1, 1]} : vector<8x1158xbf16> to vector<8x1088xbf16>
    %90 = vector.extract_strided_slice %88 {offsets = [0, 1], sizes = [8, 1088], strides = [1, 1]} : vector<8x1158xbf16> to vector<8x1088xbf16>
    %91 = vector.extract_strided_slice %88 {offsets = [0, 2], sizes = [8, 1088], strides = [1, 1]} : vector<8x1158xbf16> to vector<8x1088xbf16>
    %92 = vector.extract_strided_slice %88 {offsets = [0, 34], sizes = [8, 1088], strides = [1, 1]} : vector<8x1158xbf16> to vector<8x1088xbf16>
    %93 = vector.extract_strided_slice %88 {offsets = [0, 35], sizes = [8, 1088], strides = [1, 1]} : vector<8x1158xbf16> to vector<8x1088xbf16>
    %94 = vector.extract_strided_slice %88 {offsets = [0, 36], sizes = [8, 1088], strides = [1, 1]} : vector<8x1158xbf16> to vector<8x1088xbf16>
    %95 = vector.extract_strided_slice %88 {offsets = [0, 68], sizes = [8, 1088], strides = [1, 1]} : vector<8x1158xbf16> to vector<8x1088xbf16>
    %96 = vector.extract_strided_slice %88 {offsets = [0, 69], sizes = [8, 1088], strides = [1, 1]} : vector<8x1158xbf16> to vector<8x1088xbf16>
    %97 = vector.extract_strided_slice %88 {offsets = [0, 70], sizes = [8, 1088], strides = [1, 1]} : vector<8x1158xbf16> to vector<8x1088xbf16>
    %98 = tpu.concatenate %89, %90, %91, %92, %93, %94, %95, %96, %97 in 0 : vector<8x1088xbf16>, vector<8x1088xbf16>, vector<8x1088xbf16>, vector<8x1088xbf16>, vector<8x1088xbf16>, vector<8x1088xbf16>, vector<8x1088xbf16>, vector<8x1088xbf16>, vector<8x1088xbf16> -> vector<72x1088xbf16>
    %c0_19 = arith.constant 0 : index
    %c0_20 = arith.constant 0 : index
    %99 = vector.load %arg2[%c0_19, %c0_20] : memref<16x72xbf16, #tpu.memory_space<vmem>>, vector<16x72xbf16>
    %cst_21 = arith.constant dense<0.000000e+00> : vector<16x1088xf32>
    %100 = tpu.matmul %99, %98, %cst_21 {dimension_numbers = #tpu.dot_dimension_numbers<[1], [0], [0], [1], [0, 0, 1, 1], [], []>} : vector<16x72xbf16>, vector<72x1088xbf16>, vector<16x1088xf32> -> vector<16x1088xf32>
    %c0_22 = arith.constant 0 : index
    %c0_23 = arith.constant 0 : index
    %101 = vector.load %arg3[%c0_22, %c0_23] : memref<16x1xf32, #tpu.memory_space<vmem>>, vector<16x1xf32>
    %102 = vector.broadcast %101 : vector<16x1xf32> to vector<16x1088xf32>
    %103 = arith.addf %100, %102 : vector<16x1088xf32>
    %104 = math.tanh %103 : vector<16x1088xf32>
    %105 = vector.extract_strided_slice %104 {offsets = [0, 0], sizes = [16, 1053], strides = [1, 1]} : vector<16x1088xf32> to vector<16x1053xf32>
    %106 = vector.extract_strided_slice %104 {offsets = [0, 1], sizes = [16, 1053], strides = [1, 1]} : vector<16x1088xf32> to vector<16x1053xf32>
    %107 = arith.maximumf %105, %106 : vector<16x1053xf32>
    %108 = vector.extract_strided_slice %104 {offsets = [0, 34], sizes = [16, 1053], strides = [1, 1]} : vector<16x1088xf32> to vector<16x1053xf32>
    %109 = vector.extract_strided_slice %104 {offsets = [0, 35], sizes = [16, 1053], strides = [1, 1]} : vector<16x1088xf32> to vector<16x1053xf32>
    %110 = arith.maximumf %108, %109 : vector<16x1053xf32>
    %111 = arith.maximumf %107, %110 : vector<16x1053xf32>
    %112 = vector.extract_strided_slice %111 {offsets = [0, 0], sizes = [16, 32], strides = [1, 1]} : vector<16x1053xf32> to vector<16x32xf32>
    %113 = vector.extract_strided_slice %111 {offsets = [0, 68], sizes = [16, 32], strides = [1, 1]} : vector<16x1053xf32> to vector<16x32xf32>
    %114 = vector.extract_strided_slice %111 {offsets = [0, 136], sizes = [16, 32], strides = [1, 1]} : vector<16x1053xf32> to vector<16x32xf32>
    %115 = vector.extract_strided_slice %111 {offsets = [0, 204], sizes = [16, 32], strides = [1, 1]} : vector<16x1053xf32> to vector<16x32xf32>
    %116 = vector.extract_strided_slice %111 {offsets = [0, 272], sizes = [16, 32], strides = [1, 1]} : vector<16x1053xf32> to vector<16x32xf32>
    %117 = vector.extract_strided_slice %111 {offsets = [0, 340], sizes = [16, 32], strides = [1, 1]} : vector<16x1053xf32> to vector<16x32xf32>
    %118 = vector.extract_strided_slice %111 {offsets = [0, 408], sizes = [16, 32], strides = [1, 1]} : vector<16x1053xf32> to vector<16x32xf32>
    %119 = vector.extract_strided_slice %111 {offsets = [0, 476], sizes = [16, 32], strides = [1, 1]} : vector<16x1053xf32> to vector<16x32xf32>
    %120 = vector.extract_strided_slice %111 {offsets = [0, 544], sizes = [16, 32], strides = [1, 1]} : vector<16x1053xf32> to vector<16x32xf32>
    %121 = vector.extract_strided_slice %111 {offsets = [0, 612], sizes = [16, 32], strides = [1, 1]} : vector<16x1053xf32> to vector<16x32xf32>
    %122 = vector.extract_strided_slice %111 {offsets = [0, 680], sizes = [16, 32], strides = [1, 1]} : vector<16x1053xf32> to vector<16x32xf32>
    %123 = vector.extract_strided_slice %111 {offsets = [0, 748], sizes = [16, 32], strides = [1, 1]} : vector<16x1053xf32> to vector<16x32xf32>
    %124 = vector.extract_strided_slice %111 {offsets = [0, 816], sizes = [16, 32], strides = [1, 1]} : vector<16x1053xf32> to vector<16x32xf32>
    %125 = vector.extract_strided_slice %111 {offsets = [0, 884], sizes = [16, 32], strides = [1, 1]} : vector<16x1053xf32> to vector<16x32xf32>
    %126 = vector.extract_strided_slice %111 {offsets = [0, 952], sizes = [16, 32], strides = [1, 1]} : vector<16x1053xf32> to vector<16x32xf32>
    %127 = vector.extract_strided_slice %111 {offsets = [0, 1020], sizes = [16, 32], strides = [1, 1]} : vector<16x1053xf32> to vector<16x32xf32>
    %128 = tpu.concatenate %112, %113, %114, %115, %116, %117, %118, %119, %120, %121, %122, %123, %124, %125, %126, %127 in 1 : vector<16x32xf32>, vector<16x32xf32>, vector<16x32xf32>, vector<16x32xf32>, vector<16x32xf32>, vector<16x32xf32>, vector<16x32xf32>, vector<16x32xf32>, vector<16x32xf32>, vector<16x32xf32>, vector<16x32xf32>, vector<16x32xf32>, vector<16x32xf32>, vector<16x32xf32>, vector<16x32xf32>, vector<16x32xf32> -> vector<16x512xf32>
    %129 = arith.truncf %128 : vector<16x512xf32> to vector<16x512xbf16>
    %c0_24 = arith.constant 0 : index
    %c0_25 = arith.constant 0 : index
    %130 = vector.load %arg6[%c0_24, %c0_25] : memref<512x326xbf16, #tpu.memory_space<vmem>>, vector<512x326xbf16>
    %cst_26 = arith.constant dense<0.000000e+00> : vector<16x326xf32>
    %131 = tpu.matmul %129, %130, %cst_26 {dimension_numbers = #tpu.dot_dimension_numbers<[1], [0], [0], [1], [0, 0, 1, 1], [], []>} : vector<16x512xbf16>, vector<512x326xbf16>, vector<16x326xf32> -> vector<16x326xf32>
    %132 = arith.truncf %131 : vector<16x326xf32> to vector<16x326xbf16>
    %133 = vector.extract_strided_slice %132 {offsets = [0, 0], sizes = [16, 288], strides = [1, 1]} : vector<16x326xbf16> to vector<16x288xbf16>
    %134 = vector.extract_strided_slice %132 {offsets = [0, 1], sizes = [16, 288], strides = [1, 1]} : vector<16x326xbf16> to vector<16x288xbf16>
    %135 = vector.extract_strided_slice %132 {offsets = [0, 2], sizes = [16, 288], strides = [1, 1]} : vector<16x326xbf16> to vector<16x288xbf16>
    %136 = vector.extract_strided_slice %132 {offsets = [0, 18], sizes = [16, 288], strides = [1, 1]} : vector<16x326xbf16> to vector<16x288xbf16>
    %137 = vector.extract_strided_slice %132 {offsets = [0, 19], sizes = [16, 288], strides = [1, 1]} : vector<16x326xbf16> to vector<16x288xbf16>
    %138 = vector.extract_strided_slice %132 {offsets = [0, 20], sizes = [16, 288], strides = [1, 1]} : vector<16x326xbf16> to vector<16x288xbf16>
    %139 = vector.extract_strided_slice %132 {offsets = [0, 36], sizes = [16, 288], strides = [1, 1]} : vector<16x326xbf16> to vector<16x288xbf16>
    %140 = vector.extract_strided_slice %132 {offsets = [0, 37], sizes = [16, 288], strides = [1, 1]} : vector<16x326xbf16> to vector<16x288xbf16>
    %141 = vector.extract_strided_slice %132 {offsets = [0, 38], sizes = [16, 288], strides = [1, 1]} : vector<16x326xbf16> to vector<16x288xbf16>
    %142 = tpu.concatenate %133, %134, %135, %136, %137, %138, %139, %140, %141 in 0 : vector<16x288xbf16>, vector<16x288xbf16>, vector<16x288xbf16>, vector<16x288xbf16>, vector<16x288xbf16>, vector<16x288xbf16>, vector<16x288xbf16>, vector<16x288xbf16>, vector<16x288xbf16> -> vector<144x288xbf16>
    %c0_27 = arith.constant 0 : index
    %c0_28 = arith.constant 0 : index
    %143 = vector.load %arg4[%c0_27, %c0_28] : memref<8x144xbf16, #tpu.memory_space<vmem>>, vector<8x144xbf16>
    %cst_29 = arith.constant dense<0.000000e+00> : vector<8x288xf32>
    %144 = tpu.matmul %143, %142, %cst_29 {dimension_numbers = #tpu.dot_dimension_numbers<[1], [0], [0], [1], [0, 0, 1, 1], [], []>} : vector<8x144xbf16>, vector<144x288xbf16>, vector<8x288xf32> -> vector<8x288xf32>
    %c0_30 = arith.constant 0 : index
    %c0_31 = arith.constant 0 : index
    %145 = vector.load %arg5[%c0_30, %c0_31] : memref<8x1xf32, #tpu.memory_space<vmem>>, vector<8x1xf32>
    %146 = vector.broadcast %145 : vector<8x1xf32> to vector<8x288xf32>
    %147 = arith.addf %144, %146 : vector<8x288xf32>
    %148 = math.tanh %147 : vector<8x288xf32>
    %149 = vector.extract_strided_slice %148 {offsets = [0, 0], sizes = [8, 269], strides = [1, 1]} : vector<8x288xf32> to vector<8x269xf32>
    %150 = vector.extract_strided_slice %148 {offsets = [0, 1], sizes = [8, 269], strides = [1, 1]} : vector<8x288xf32> to vector<8x269xf32>
    %151 = arith.maximumf %149, %150 : vector<8x269xf32>
    %152 = vector.extract_strided_slice %148 {offsets = [0, 18], sizes = [8, 269], strides = [1, 1]} : vector<8x288xf32> to vector<8x269xf32>
    %153 = vector.extract_strided_slice %148 {offsets = [0, 19], sizes = [8, 269], strides = [1, 1]} : vector<8x288xf32> to vector<8x269xf32>
    %154 = arith.maximumf %152, %153 : vector<8x269xf32>
    %155 = arith.maximumf %151, %154 : vector<8x269xf32>
    %156 = arith.truncf %155 : vector<8x269xf32> to vector<8x269xbf16>
    %c0_32 = arith.constant 0 : index
    %c0_33 = arith.constant 0 : index
    %157 = vector.load %arg7[%c0_32, %c0_33] : memref<269x256xbf16, #tpu.memory_space<vmem>>, vector<269x256xbf16>
    %cst_34 = arith.constant dense<0.000000e+00> : vector<8x256xf32>
    %158 = tpu.matmul %156, %157, %cst_34 {dimension_numbers = #tpu.dot_dimension_numbers<[1], [0], [0], [1], [0, 0, 1, 1], [], []>} : vector<8x269xbf16>, vector<269x256xbf16>, vector<8x256xf32> -> vector<8x256xf32>
    %159 = vector.extract_strided_slice %158 {offsets = [0, 0], sizes = [1, 32], strides = [1, 1]} : vector<8x256xf32> to vector<1x32xf32>
    %160 = vector.extract_strided_slice %158 {offsets = [1, 32], sizes = [1, 32], strides = [1, 1]} : vector<8x256xf32> to vector<1x32xf32>
    %161 = arith.addf %159, %160 : vector<1x32xf32>
    %162 = vector.extract_strided_slice %158 {offsets = [2, 64], sizes = [1, 32], strides = [1, 1]} : vector<8x256xf32> to vector<1x32xf32>
    %163 = arith.addf %161, %162 : vector<1x32xf32>
    %164 = vector.extract_strided_slice %158 {offsets = [3, 96], sizes = [1, 32], strides = [1, 1]} : vector<8x256xf32> to vector<1x32xf32>
    %165 = arith.addf %163, %164 : vector<1x32xf32>
    %166 = vector.extract_strided_slice %158 {offsets = [4, 128], sizes = [1, 32], strides = [1, 1]} : vector<8x256xf32> to vector<1x32xf32>
    %167 = arith.addf %165, %166 : vector<1x32xf32>
    %168 = vector.extract_strided_slice %158 {offsets = [5, 160], sizes = [1, 32], strides = [1, 1]} : vector<8x256xf32> to vector<1x32xf32>
    %169 = arith.addf %167, %168 : vector<1x32xf32>
    %170 = vector.extract_strided_slice %158 {offsets = [6, 192], sizes = [1, 32], strides = [1, 1]} : vector<8x256xf32> to vector<1x32xf32>
    %171 = arith.addf %169, %170 : vector<1x32xf32>
    %172 = vector.extract_strided_slice %158 {offsets = [7, 224], sizes = [1, 32], strides = [1, 1]} : vector<8x256xf32> to vector<1x32xf32>
    %173 = arith.addf %171, %172 : vector<1x32xf32>
    %c2 = arith.constant 2 : index
    %c0_35 = arith.constant 0 : index
    %c0_36 = arith.constant 0 : index
    %174 = vector.load %arg1[%c2, %c0_35, %c0_36] : memref<4x8x1158xbf16, #tpu.memory_space<vmem>>, vector<1x8x1158xbf16>
    %175 = vector.shape_cast %174 : vector<1x8x1158xbf16> to vector<8x1158xbf16>
    %176 = vector.extract_strided_slice %175 {offsets = [0, 0], sizes = [8, 1088], strides = [1, 1]} : vector<8x1158xbf16> to vector<8x1088xbf16>
    %177 = vector.extract_strided_slice %175 {offsets = [0, 1], sizes = [8, 1088], strides = [1, 1]} : vector<8x1158xbf16> to vector<8x1088xbf16>
    %178 = vector.extract_strided_slice %175 {offsets = [0, 2], sizes = [8, 1088], strides = [1, 1]} : vector<8x1158xbf16> to vector<8x1088xbf16>
    %179 = vector.extract_strided_slice %175 {offsets = [0, 34], sizes = [8, 1088], strides = [1, 1]} : vector<8x1158xbf16> to vector<8x1088xbf16>
    %180 = vector.extract_strided_slice %175 {offsets = [0, 35], sizes = [8, 1088], strides = [1, 1]} : vector<8x1158xbf16> to vector<8x1088xbf16>
    %181 = vector.extract_strided_slice %175 {offsets = [0, 36], sizes = [8, 1088], strides = [1, 1]} : vector<8x1158xbf16> to vector<8x1088xbf16>
    %182 = vector.extract_strided_slice %175 {offsets = [0, 68], sizes = [8, 1088], strides = [1, 1]} : vector<8x1158xbf16> to vector<8x1088xbf16>
    %183 = vector.extract_strided_slice %175 {offsets = [0, 69], sizes = [8, 1088], strides = [1, 1]} : vector<8x1158xbf16> to vector<8x1088xbf16>
    %184 = vector.extract_strided_slice %175 {offsets = [0, 70], sizes = [8, 1088], strides = [1, 1]} : vector<8x1158xbf16> to vector<8x1088xbf16>
    %185 = tpu.concatenate %176, %177, %178, %179, %180, %181, %182, %183, %184 in 0 : vector<8x1088xbf16>, vector<8x1088xbf16>, vector<8x1088xbf16>, vector<8x1088xbf16>, vector<8x1088xbf16>, vector<8x1088xbf16>, vector<8x1088xbf16>, vector<8x1088xbf16>, vector<8x1088xbf16> -> vector<72x1088xbf16>
    %c0_37 = arith.constant 0 : index
    %c0_38 = arith.constant 0 : index
    %186 = vector.load %arg2[%c0_37, %c0_38] : memref<16x72xbf16, #tpu.memory_space<vmem>>, vector<16x72xbf16>
    %cst_39 = arith.constant dense<0.000000e+00> : vector<16x1088xf32>
    %187 = tpu.matmul %186, %185, %cst_39 {dimension_numbers = #tpu.dot_dimension_numbers<[1], [0], [0], [1], [0, 0, 1, 1], [], []>} : vector<16x72xbf16>, vector<72x1088xbf16>, vector<16x1088xf32> -> vector<16x1088xf32>
    %c0_40 = arith.constant 0 : index
    %c0_41 = arith.constant 0 : index
    %188 = vector.load %arg3[%c0_40, %c0_41] : memref<16x1xf32, #tpu.memory_space<vmem>>, vector<16x1xf32>
    %189 = vector.broadcast %188 : vector<16x1xf32> to vector<16x1088xf32>
    %190 = arith.addf %187, %189 : vector<16x1088xf32>
    %191 = math.tanh %190 : vector<16x1088xf32>
    %192 = vector.extract_strided_slice %191 {offsets = [0, 0], sizes = [16, 1053], strides = [1, 1]} : vector<16x1088xf32> to vector<16x1053xf32>
    %193 = vector.extract_strided_slice %191 {offsets = [0, 1], sizes = [16, 1053], strides = [1, 1]} : vector<16x1088xf32> to vector<16x1053xf32>
    %194 = arith.maximumf %192, %193 : vector<16x1053xf32>
    %195 = vector.extract_strided_slice %191 {offsets = [0, 34], sizes = [16, 1053], strides = [1, 1]} : vector<16x1088xf32> to vector<16x1053xf32>
    %196 = vector.extract_strided_slice %191 {offsets = [0, 35], sizes = [16, 1053], strides = [1, 1]} : vector<16x1088xf32> to vector<16x1053xf32>
    %197 = arith.maximumf %195, %196 : vector<16x1053xf32>
    %198 = arith.maximumf %194, %197 : vector<16x1053xf32>
    %199 = vector.extract_strided_slice %198 {offsets = [0, 0], sizes = [16, 32], strides = [1, 1]} : vector<16x1053xf32> to vector<16x32xf32>
    %200 = vector.extract_strided_slice %198 {offsets = [0, 68], sizes = [16, 32], strides = [1, 1]} : vector<16x1053xf32> to vector<16x32xf32>
    %201 = vector.extract_strided_slice %198 {offsets = [0, 136], sizes = [16, 32], strides = [1, 1]} : vector<16x1053xf32> to vector<16x32xf32>
    %202 = vector.extract_strided_slice %198 {offsets = [0, 204], sizes = [16, 32], strides = [1, 1]} : vector<16x1053xf32> to vector<16x32xf32>
    %203 = vector.extract_strided_slice %198 {offsets = [0, 272], sizes = [16, 32], strides = [1, 1]} : vector<16x1053xf32> to vector<16x32xf32>
    %204 = vector.extract_strided_slice %198 {offsets = [0, 340], sizes = [16, 32], strides = [1, 1]} : vector<16x1053xf32> to vector<16x32xf32>
    %205 = vector.extract_strided_slice %198 {offsets = [0, 408], sizes = [16, 32], strides = [1, 1]} : vector<16x1053xf32> to vector<16x32xf32>
    %206 = vector.extract_strided_slice %198 {offsets = [0, 476], sizes = [16, 32], strides = [1, 1]} : vector<16x1053xf32> to vector<16x32xf32>
    %207 = vector.extract_strided_slice %198 {offsets = [0, 544], sizes = [16, 32], strides = [1, 1]} : vector<16x1053xf32> to vector<16x32xf32>
    %208 = vector.extract_strided_slice %198 {offsets = [0, 612], sizes = [16, 32], strides = [1, 1]} : vector<16x1053xf32> to vector<16x32xf32>
    %209 = vector.extract_strided_slice %198 {offsets = [0, 680], sizes = [16, 32], strides = [1, 1]} : vector<16x1053xf32> to vector<16x32xf32>
    %210 = vector.extract_strided_slice %198 {offsets = [0, 748], sizes = [16, 32], strides = [1, 1]} : vector<16x1053xf32> to vector<16x32xf32>
    %211 = vector.extract_strided_slice %198 {offsets = [0, 816], sizes = [16, 32], strides = [1, 1]} : vector<16x1053xf32> to vector<16x32xf32>
    %212 = vector.extract_strided_slice %198 {offsets = [0, 884], sizes = [16, 32], strides = [1, 1]} : vector<16x1053xf32> to vector<16x32xf32>
    %213 = vector.extract_strided_slice %198 {offsets = [0, 952], sizes = [16, 32], strides = [1, 1]} : vector<16x1053xf32> to vector<16x32xf32>
    %214 = vector.extract_strided_slice %198 {offsets = [0, 1020], sizes = [16, 32], strides = [1, 1]} : vector<16x1053xf32> to vector<16x32xf32>
    %215 = tpu.concatenate %199, %200, %201, %202, %203, %204, %205, %206, %207, %208, %209, %210, %211, %212, %213, %214 in 1 : vector<16x32xf32>, vector<16x32xf32>, vector<16x32xf32>, vector<16x32xf32>, vector<16x32xf32>, vector<16x32xf32>, vector<16x32xf32>, vector<16x32xf32>, vector<16x32xf32>, vector<16x32xf32>, vector<16x32xf32>, vector<16x32xf32>, vector<16x32xf32>, vector<16x32xf32>, vector<16x32xf32>, vector<16x32xf32> -> vector<16x512xf32>
    %216 = arith.truncf %215 : vector<16x512xf32> to vector<16x512xbf16>
    %c0_42 = arith.constant 0 : index
    %c0_43 = arith.constant 0 : index
    %217 = vector.load %arg6[%c0_42, %c0_43] : memref<512x326xbf16, #tpu.memory_space<vmem>>, vector<512x326xbf16>
    %cst_44 = arith.constant dense<0.000000e+00> : vector<16x326xf32>
    %218 = tpu.matmul %216, %217, %cst_44 {dimension_numbers = #tpu.dot_dimension_numbers<[1], [0], [0], [1], [0, 0, 1, 1], [], []>} : vector<16x512xbf16>, vector<512x326xbf16>, vector<16x326xf32> -> vector<16x326xf32>
    %219 = arith.truncf %218 : vector<16x326xf32> to vector<16x326xbf16>
    %220 = vector.extract_strided_slice %219 {offsets = [0, 0], sizes = [16, 288], strides = [1, 1]} : vector<16x326xbf16> to vector<16x288xbf16>
    %221 = vector.extract_strided_slice %219 {offsets = [0, 1], sizes = [16, 288], strides = [1, 1]} : vector<16x326xbf16> to vector<16x288xbf16>
    %222 = vector.extract_strided_slice %219 {offsets = [0, 2], sizes = [16, 288], strides = [1, 1]} : vector<16x326xbf16> to vector<16x288xbf16>
    %223 = vector.extract_strided_slice %219 {offsets = [0, 18], sizes = [16, 288], strides = [1, 1]} : vector<16x326xbf16> to vector<16x288xbf16>
    %224 = vector.extract_strided_slice %219 {offsets = [0, 19], sizes = [16, 288], strides = [1, 1]} : vector<16x326xbf16> to vector<16x288xbf16>
    %225 = vector.extract_strided_slice %219 {offsets = [0, 20], sizes = [16, 288], strides = [1, 1]} : vector<16x326xbf16> to vector<16x288xbf16>
    %226 = vector.extract_strided_slice %219 {offsets = [0, 36], sizes = [16, 288], strides = [1, 1]} : vector<16x326xbf16> to vector<16x288xbf16>
    %227 = vector.extract_strided_slice %219 {offsets = [0, 37], sizes = [16, 288], strides = [1, 1]} : vector<16x326xbf16> to vector<16x288xbf16>
    %228 = vector.extract_strided_slice %219 {offsets = [0, 38], sizes = [16, 288], strides = [1, 1]} : vector<16x326xbf16> to vector<16x288xbf16>
    %229 = tpu.concatenate %220, %221, %222, %223, %224, %225, %226, %227, %228 in 0 : vector<16x288xbf16>, vector<16x288xbf16>, vector<16x288xbf16>, vector<16x288xbf16>, vector<16x288xbf16>, vector<16x288xbf16>, vector<16x288xbf16>, vector<16x288xbf16>, vector<16x288xbf16> -> vector<144x288xbf16>
    %c0_45 = arith.constant 0 : index
    %c0_46 = arith.constant 0 : index
    %230 = vector.load %arg4[%c0_45, %c0_46] : memref<8x144xbf16, #tpu.memory_space<vmem>>, vector<8x144xbf16>
    %cst_47 = arith.constant dense<0.000000e+00> : vector<8x288xf32>
    %231 = tpu.matmul %230, %229, %cst_47 {dimension_numbers = #tpu.dot_dimension_numbers<[1], [0], [0], [1], [0, 0, 1, 1], [], []>} : vector<8x144xbf16>, vector<144x288xbf16>, vector<8x288xf32> -> vector<8x288xf32>
    %c0_48 = arith.constant 0 : index
    %c0_49 = arith.constant 0 : index
    %232 = vector.load %arg5[%c0_48, %c0_49] : memref<8x1xf32, #tpu.memory_space<vmem>>, vector<8x1xf32>
    %233 = vector.broadcast %232 : vector<8x1xf32> to vector<8x288xf32>
    %234 = arith.addf %231, %233 : vector<8x288xf32>
    %235 = math.tanh %234 : vector<8x288xf32>
    %236 = vector.extract_strided_slice %235 {offsets = [0, 0], sizes = [8, 269], strides = [1, 1]} : vector<8x288xf32> to vector<8x269xf32>
    %237 = vector.extract_strided_slice %235 {offsets = [0, 1], sizes = [8, 269], strides = [1, 1]} : vector<8x288xf32> to vector<8x269xf32>
    %238 = arith.maximumf %236, %237 : vector<8x269xf32>
    %239 = vector.extract_strided_slice %235 {offsets = [0, 18], sizes = [8, 269], strides = [1, 1]} : vector<8x288xf32> to vector<8x269xf32>
    %240 = vector.extract_strided_slice %235 {offsets = [0, 19], sizes = [8, 269], strides = [1, 1]} : vector<8x288xf32> to vector<8x269xf32>
    %241 = arith.maximumf %239, %240 : vector<8x269xf32>
    %242 = arith.maximumf %238, %241 : vector<8x269xf32>
    %243 = arith.truncf %242 : vector<8x269xf32> to vector<8x269xbf16>
    %c0_50 = arith.constant 0 : index
    %c0_51 = arith.constant 0 : index
    %244 = vector.load %arg7[%c0_50, %c0_51] : memref<269x256xbf16, #tpu.memory_space<vmem>>, vector<269x256xbf16>
    %cst_52 = arith.constant dense<0.000000e+00> : vector<8x256xf32>
    %245 = tpu.matmul %243, %244, %cst_52 {dimension_numbers = #tpu.dot_dimension_numbers<[1], [0], [0], [1], [0, 0, 1, 1], [], []>} : vector<8x269xbf16>, vector<269x256xbf16>, vector<8x256xf32> -> vector<8x256xf32>
    %246 = vector.extract_strided_slice %245 {offsets = [0, 0], sizes = [1, 32], strides = [1, 1]} : vector<8x256xf32> to vector<1x32xf32>
    %247 = vector.extract_strided_slice %245 {offsets = [1, 32], sizes = [1, 32], strides = [1, 1]} : vector<8x256xf32> to vector<1x32xf32>
    %248 = arith.addf %246, %247 : vector<1x32xf32>
    %249 = vector.extract_strided_slice %245 {offsets = [2, 64], sizes = [1, 32], strides = [1, 1]} : vector<8x256xf32> to vector<1x32xf32>
    %250 = arith.addf %248, %249 : vector<1x32xf32>
    %251 = vector.extract_strided_slice %245 {offsets = [3, 96], sizes = [1, 32], strides = [1, 1]} : vector<8x256xf32> to vector<1x32xf32>
    %252 = arith.addf %250, %251 : vector<1x32xf32>
    %253 = vector.extract_strided_slice %245 {offsets = [4, 128], sizes = [1, 32], strides = [1, 1]} : vector<8x256xf32> to vector<1x32xf32>
    %254 = arith.addf %252, %253 : vector<1x32xf32>
    %255 = vector.extract_strided_slice %245 {offsets = [5, 160], sizes = [1, 32], strides = [1, 1]} : vector<8x256xf32> to vector<1x32xf32>
    %256 = arith.addf %254, %255 : vector<1x32xf32>
    %257 = vector.extract_strided_slice %245 {offsets = [6, 192], sizes = [1, 32], strides = [1, 1]} : vector<8x256xf32> to vector<1x32xf32>
    %258 = arith.addf %256, %257 : vector<1x32xf32>
    %259 = vector.extract_strided_slice %245 {offsets = [7, 224], sizes = [1, 32], strides = [1, 1]} : vector<8x256xf32> to vector<1x32xf32>
    %260 = arith.addf %258, %259 : vector<1x32xf32>
    %c3 = arith.constant 3 : index
    %c0_53 = arith.constant 0 : index
    %c0_54 = arith.constant 0 : index
    %261 = vector.load %arg1[%c3, %c0_53, %c0_54] : memref<4x8x1158xbf16, #tpu.memory_space<vmem>>, vector<1x8x1158xbf16>
    %262 = vector.shape_cast %261 : vector<1x8x1158xbf16> to vector<8x1158xbf16>
    %263 = vector.extract_strided_slice %262 {offsets = [0, 0], sizes = [8, 1088], strides = [1, 1]} : vector<8x1158xbf16> to vector<8x1088xbf16>
    %264 = vector.extract_strided_slice %262 {offsets = [0, 1], sizes = [8, 1088], strides = [1, 1]} : vector<8x1158xbf16> to vector<8x1088xbf16>
    %265 = vector.extract_strided_slice %262 {offsets = [0, 2], sizes = [8, 1088], strides = [1, 1]} : vector<8x1158xbf16> to vector<8x1088xbf16>
    %266 = vector.extract_strided_slice %262 {offsets = [0, 34], sizes = [8, 1088], strides = [1, 1]} : vector<8x1158xbf16> to vector<8x1088xbf16>
    %267 = vector.extract_strided_slice %262 {offsets = [0, 35], sizes = [8, 1088], strides = [1, 1]} : vector<8x1158xbf16> to vector<8x1088xbf16>
    %268 = vector.extract_strided_slice %262 {offsets = [0, 36], sizes = [8, 1088], strides = [1, 1]} : vector<8x1158xbf16> to vector<8x1088xbf16>
    %269 = vector.extract_strided_slice %262 {offsets = [0, 68], sizes = [8, 1088], strides = [1, 1]} : vector<8x1158xbf16> to vector<8x1088xbf16>
    %270 = vector.extract_strided_slice %262 {offsets = [0, 69], sizes = [8, 1088], strides = [1, 1]} : vector<8x1158xbf16> to vector<8x1088xbf16>
    %271 = vector.extract_strided_slice %262 {offsets = [0, 70], sizes = [8, 1088], strides = [1, 1]} : vector<8x1158xbf16> to vector<8x1088xbf16>
    %272 = tpu.concatenate %263, %264, %265, %266, %267, %268, %269, %270, %271 in 0 : vector<8x1088xbf16>, vector<8x1088xbf16>, vector<8x1088xbf16>, vector<8x1088xbf16>, vector<8x1088xbf16>, vector<8x1088xbf16>, vector<8x1088xbf16>, vector<8x1088xbf16>, vector<8x1088xbf16> -> vector<72x1088xbf16>
    %c0_55 = arith.constant 0 : index
    %c0_56 = arith.constant 0 : index
    %273 = vector.load %arg2[%c0_55, %c0_56] : memref<16x72xbf16, #tpu.memory_space<vmem>>, vector<16x72xbf16>
    %cst_57 = arith.constant dense<0.000000e+00> : vector<16x1088xf32>
    %274 = tpu.matmul %273, %272, %cst_57 {dimension_numbers = #tpu.dot_dimension_numbers<[1], [0], [0], [1], [0, 0, 1, 1], [], []>} : vector<16x72xbf16>, vector<72x1088xbf16>, vector<16x1088xf32> -> vector<16x1088xf32>
    %c0_58 = arith.constant 0 : index
    %c0_59 = arith.constant 0 : index
    %275 = vector.load %arg3[%c0_58, %c0_59] : memref<16x1xf32, #tpu.memory_space<vmem>>, vector<16x1xf32>
    %276 = vector.broadcast %275 : vector<16x1xf32> to vector<16x1088xf32>
    %277 = arith.addf %274, %276 : vector<16x1088xf32>
    %278 = math.tanh %277 : vector<16x1088xf32>
    %279 = vector.extract_strided_slice %278 {offsets = [0, 0], sizes = [16, 1053], strides = [1, 1]} : vector<16x1088xf32> to vector<16x1053xf32>
    %280 = vector.extract_strided_slice %278 {offsets = [0, 1], sizes = [16, 1053], strides = [1, 1]} : vector<16x1088xf32> to vector<16x1053xf32>
    %281 = arith.maximumf %279, %280 : vector<16x1053xf32>
    %282 = vector.extract_strided_slice %278 {offsets = [0, 34], sizes = [16, 1053], strides = [1, 1]} : vector<16x1088xf32> to vector<16x1053xf32>
    %283 = vector.extract_strided_slice %278 {offsets = [0, 35], sizes = [16, 1053], strides = [1, 1]} : vector<16x1088xf32> to vector<16x1053xf32>
    %284 = arith.maximumf %282, %283 : vector<16x1053xf32>
    %285 = arith.maximumf %281, %284 : vector<16x1053xf32>
    %286 = vector.extract_strided_slice %285 {offsets = [0, 0], sizes = [16, 32], strides = [1, 1]} : vector<16x1053xf32> to vector<16x32xf32>
    %287 = vector.extract_strided_slice %285 {offsets = [0, 68], sizes = [16, 32], strides = [1, 1]} : vector<16x1053xf32> to vector<16x32xf32>
    %288 = vector.extract_strided_slice %285 {offsets = [0, 136], sizes = [16, 32], strides = [1, 1]} : vector<16x1053xf32> to vector<16x32xf32>
    %289 = vector.extract_strided_slice %285 {offsets = [0, 204], sizes = [16, 32], strides = [1, 1]} : vector<16x1053xf32> to vector<16x32xf32>
    %290 = vector.extract_strided_slice %285 {offsets = [0, 272], sizes = [16, 32], strides = [1, 1]} : vector<16x1053xf32> to vector<16x32xf32>
    %291 = vector.extract_strided_slice %285 {offsets = [0, 340], sizes = [16, 32], strides = [1, 1]} : vector<16x1053xf32> to vector<16x32xf32>
    %292 = vector.extract_strided_slice %285 {offsets = [0, 408], sizes = [16, 32], strides = [1, 1]} : vector<16x1053xf32> to vector<16x32xf32>
    %293 = vector.extract_strided_slice %285 {offsets = [0, 476], sizes = [16, 32], strides = [1, 1]} : vector<16x1053xf32> to vector<16x32xf32>
    %294 = vector.extract_strided_slice %285 {offsets = [0, 544], sizes = [16, 32], strides = [1, 1]} : vector<16x1053xf32> to vector<16x32xf32>
    %295 = vector.extract_strided_slice %285 {offsets = [0, 612], sizes = [16, 32], strides = [1, 1]} : vector<16x1053xf32> to vector<16x32xf32>
    %296 = vector.extract_strided_slice %285 {offsets = [0, 680], sizes = [16, 32], strides = [1, 1]} : vector<16x1053xf32> to vector<16x32xf32>
    %297 = vector.extract_strided_slice %285 {offsets = [0, 748], sizes = [16, 32], strides = [1, 1]} : vector<16x1053xf32> to vector<16x32xf32>
    %298 = vector.extract_strided_slice %285 {offsets = [0, 816], sizes = [16, 32], strides = [1, 1]} : vector<16x1053xf32> to vector<16x32xf32>
    %299 = vector.extract_strided_slice %285 {offsets = [0, 884], sizes = [16, 32], strides = [1, 1]} : vector<16x1053xf32> to vector<16x32xf32>
    %300 = vector.extract_strided_slice %285 {offsets = [0, 952], sizes = [16, 32], strides = [1, 1]} : vector<16x1053xf32> to vector<16x32xf32>
    %301 = vector.extract_strided_slice %285 {offsets = [0, 1020], sizes = [16, 32], strides = [1, 1]} : vector<16x1053xf32> to vector<16x32xf32>
    %302 = tpu.concatenate %286, %287, %288, %289, %290, %291, %292, %293, %294, %295, %296, %297, %298, %299, %300, %301 in 1 : vector<16x32xf32>, vector<16x32xf32>, vector<16x32xf32>, vector<16x32xf32>, vector<16x32xf32>, vector<16x32xf32>, vector<16x32xf32>, vector<16x32xf32>, vector<16x32xf32>, vector<16x32xf32>, vector<16x32xf32>, vector<16x32xf32>, vector<16x32xf32>, vector<16x32xf32>, vector<16x32xf32>, vector<16x32xf32> -> vector<16x512xf32>
    %303 = arith.truncf %302 : vector<16x512xf32> to vector<16x512xbf16>
    %c0_60 = arith.constant 0 : index
    %c0_61 = arith.constant 0 : index
    %304 = vector.load %arg6[%c0_60, %c0_61] : memref<512x326xbf16, #tpu.memory_space<vmem>>, vector<512x326xbf16>
    %cst_62 = arith.constant dense<0.000000e+00> : vector<16x326xf32>
    %305 = tpu.matmul %303, %304, %cst_62 {dimension_numbers = #tpu.dot_dimension_numbers<[1], [0], [0], [1], [0, 0, 1, 1], [], []>} : vector<16x512xbf16>, vector<512x326xbf16>, vector<16x326xf32> -> vector<16x326xf32>
    %306 = arith.truncf %305 : vector<16x326xf32> to vector<16x326xbf16>
    %307 = vector.extract_strided_slice %306 {offsets = [0, 0], sizes = [16, 288], strides = [1, 1]} : vector<16x326xbf16> to vector<16x288xbf16>
    %308 = vector.extract_strided_slice %306 {offsets = [0, 1], sizes = [16, 288], strides = [1, 1]} : vector<16x326xbf16> to vector<16x288xbf16>
    %309 = vector.extract_strided_slice %306 {offsets = [0, 2], sizes = [16, 288], strides = [1, 1]} : vector<16x326xbf16> to vector<16x288xbf16>
    %310 = vector.extract_strided_slice %306 {offsets = [0, 18], sizes = [16, 288], strides = [1, 1]} : vector<16x326xbf16> to vector<16x288xbf16>
    %311 = vector.extract_strided_slice %306 {offsets = [0, 19], sizes = [16, 288], strides = [1, 1]} : vector<16x326xbf16> to vector<16x288xbf16>
    %312 = vector.extract_strided_slice %306 {offsets = [0, 20], sizes = [16, 288], strides = [1, 1]} : vector<16x326xbf16> to vector<16x288xbf16>
    %313 = vector.extract_strided_slice %306 {offsets = [0, 36], sizes = [16, 288], strides = [1, 1]} : vector<16x326xbf16> to vector<16x288xbf16>
    %314 = vector.extract_strided_slice %306 {offsets = [0, 37], sizes = [16, 288], strides = [1, 1]} : vector<16x326xbf16> to vector<16x288xbf16>
    %315 = vector.extract_strided_slice %306 {offsets = [0, 38], sizes = [16, 288], strides = [1, 1]} : vector<16x326xbf16> to vector<16x288xbf16>
    %316 = tpu.concatenate %307, %308, %309, %310, %311, %312, %313, %314, %315 in 0 : vector<16x288xbf16>, vector<16x288xbf16>, vector<16x288xbf16>, vector<16x288xbf16>, vector<16x288xbf16>, vector<16x288xbf16>, vector<16x288xbf16>, vector<16x288xbf16>, vector<16x288xbf16> -> vector<144x288xbf16>
    %c0_63 = arith.constant 0 : index
    %c0_64 = arith.constant 0 : index
    %317 = vector.load %arg4[%c0_63, %c0_64] : memref<8x144xbf16, #tpu.memory_space<vmem>>, vector<8x144xbf16>
    %cst_65 = arith.constant dense<0.000000e+00> : vector<8x288xf32>
    %318 = tpu.matmul %317, %316, %cst_65 {dimension_numbers = #tpu.dot_dimension_numbers<[1], [0], [0], [1], [0, 0, 1, 1], [], []>} : vector<8x144xbf16>, vector<144x288xbf16>, vector<8x288xf32> -> vector<8x288xf32>
    %c0_66 = arith.constant 0 : index
    %c0_67 = arith.constant 0 : index
    %319 = vector.load %arg5[%c0_66, %c0_67] : memref<8x1xf32, #tpu.memory_space<vmem>>, vector<8x1xf32>
    %320 = vector.broadcast %319 : vector<8x1xf32> to vector<8x288xf32>
    %321 = arith.addf %318, %320 : vector<8x288xf32>
    %322 = math.tanh %321 : vector<8x288xf32>
    %323 = vector.extract_strided_slice %322 {offsets = [0, 0], sizes = [8, 269], strides = [1, 1]} : vector<8x288xf32> to vector<8x269xf32>
    %324 = vector.extract_strided_slice %322 {offsets = [0, 1], sizes = [8, 269], strides = [1, 1]} : vector<8x288xf32> to vector<8x269xf32>
    %325 = arith.maximumf %323, %324 : vector<8x269xf32>
    %326 = vector.extract_strided_slice %322 {offsets = [0, 18], sizes = [8, 269], strides = [1, 1]} : vector<8x288xf32> to vector<8x269xf32>
    %327 = vector.extract_strided_slice %322 {offsets = [0, 19], sizes = [8, 269], strides = [1, 1]} : vector<8x288xf32> to vector<8x269xf32>
    %328 = arith.maximumf %326, %327 : vector<8x269xf32>
    %329 = arith.maximumf %325, %328 : vector<8x269xf32>
    %330 = arith.truncf %329 : vector<8x269xf32> to vector<8x269xbf16>
    %c0_68 = arith.constant 0 : index
    %c0_69 = arith.constant 0 : index
    %331 = vector.load %arg7[%c0_68, %c0_69] : memref<269x256xbf16, #tpu.memory_space<vmem>>, vector<269x256xbf16>
    %cst_70 = arith.constant dense<0.000000e+00> : vector<8x256xf32>
    %332 = tpu.matmul %330, %331, %cst_70 {dimension_numbers = #tpu.dot_dimension_numbers<[1], [0], [0], [1], [0, 0, 1, 1], [], []>} : vector<8x269xbf16>, vector<269x256xbf16>, vector<8x256xf32> -> vector<8x256xf32>
    %333 = vector.extract_strided_slice %332 {offsets = [0, 0], sizes = [1, 32], strides = [1, 1]} : vector<8x256xf32> to vector<1x32xf32>
    %334 = vector.extract_strided_slice %332 {offsets = [1, 32], sizes = [1, 32], strides = [1, 1]} : vector<8x256xf32> to vector<1x32xf32>
    %335 = arith.addf %333, %334 : vector<1x32xf32>
    %336 = vector.extract_strided_slice %332 {offsets = [2, 64], sizes = [1, 32], strides = [1, 1]} : vector<8x256xf32> to vector<1x32xf32>
    %337 = arith.addf %335, %336 : vector<1x32xf32>
    %338 = vector.extract_strided_slice %332 {offsets = [3, 96], sizes = [1, 32], strides = [1, 1]} : vector<8x256xf32> to vector<1x32xf32>
    %339 = arith.addf %337, %338 : vector<1x32xf32>
    %340 = vector.extract_strided_slice %332 {offsets = [4, 128], sizes = [1, 32], strides = [1, 1]} : vector<8x256xf32> to vector<1x32xf32>
    %341 = arith.addf %339, %340 : vector<1x32xf32>
    %342 = vector.extract_strided_slice %332 {offsets = [5, 160], sizes = [1, 32], strides = [1, 1]} : vector<8x256xf32> to vector<1x32xf32>
    %343 = arith.addf %341, %342 : vector<1x32xf32>
    %344 = vector.extract_strided_slice %332 {offsets = [6, 192], sizes = [1, 32], strides = [1, 1]} : vector<8x256xf32> to vector<1x32xf32>
    %345 = arith.addf %343, %344 : vector<1x32xf32>
    %346 = vector.extract_strided_slice %332 {offsets = [7, 224], sizes = [1, 32], strides = [1, 1]} : vector<8x256xf32> to vector<1x32xf32>
    %347 = arith.addf %345, %346 : vector<1x32xf32>
    %348 = tpu.concatenate %86, %173, %260, %347 in 0 : vector<1x32xf32>, vector<1x32xf32>, vector<1x32xf32>, vector<1x32xf32> -> vector<4x32xf32>
    %c0_71 = arith.constant 0 : index
    %c0_72 = arith.constant 0 : index
    %349 = vector.load %arg8[%c0_71, %c0_72] : memref<1x32xf32, #tpu.memory_space<vmem>>, vector<1x32xf32>
    %350 = vector.broadcast %349 : vector<1x32xf32> to vector<4x32xf32>
    %351 = arith.addf %348, %350 : vector<4x32xf32>
    %352 = math.tanh %351 : vector<4x32xf32>
    %353 = arith.truncf %352 : vector<4x32xf32> to vector<4x32xbf16>
    %c0_73 = arith.constant 0 : index
    %c0_74 = arith.constant 0 : index
    %354 = vector.load %arg9[%c0_73, %c0_74] : memref<32x2xbf16, #tpu.memory_space<vmem>>, vector<32x2xbf16>
    %cst_75 = arith.constant dense<0.000000e+00> : vector<4x2xf32>
    %355 = tpu.matmul %353, %354, %cst_75 {dimension_numbers = #tpu.dot_dimension_numbers<[1], [0], [0], [1], [0, 0, 1, 1], [], []>} : vector<4x32xbf16>, vector<32x2xbf16>, vector<4x2xf32> -> vector<4x2xf32>
    %c0_76 = arith.constant 0 : index
    %c0_77 = arith.constant 0 : index
    %356 = vector.load %arg10[%c0_76, %c0_77] : memref<1x2xf32, #tpu.memory_space<vmem>>, vector<1x2xf32>
    %357 = vector.broadcast %356 : vector<1x2xf32> to vector<4x2xf32>
    %358 = arith.addf %355, %357 : vector<4x2xf32>
    %c0_78 = arith.constant 0 : index
    %c0_79 = arith.constant 0 : index
    %c0_80 = arith.constant 0 : index
    %359 = vector.load %arg11[%c0_78, %c0_79, %c0_80] : memref<1x4x2xf32, #tpu.memory_space<vmem>>, vector<1x4x2xf32>
    %360 = vector.shape_cast %359 : vector<1x4x2xf32> to vector<4x2xf32>
    %361 = vector.shape_cast %358 : vector<4x2xf32> to vector<1x4x2xf32>
    tpu.vector_store %arg11[%c0_78, %c0_79, %c0_80], %361 {strides = array<i32>} : memref<1x4x2xf32, #tpu.memory_space<vmem>>, vector<1x4x2xf32>,
    return
  }
  func.func @transform_0(%arg0: i32) -> (i32, i32, i32) {
    %c0_i32 = arith.constant 0 : i32
    %c0_i32_0 = arith.constant 0 : i32
    %c0_i32_1 = arith.constant 0 : i32
    return %arg0, %c0_i32, %c0_i32_0 : i32, i32, i32
  }
  func.func @transform_1(%arg0: i32) -> (i32, i32) {
    %c0_i32 = arith.constant 0 : i32
    %c0_i32_0 = arith.constant 0 : i32
    %c0_i32_1 = arith.constant 0 : i32
    return %c0_i32, %c0_i32_0 : i32, i32
  }
  func.func @transform_2(%arg0: i32) -> (i32, i32) {
    %c0_i32 = arith.constant 0 : i32
    %c0_i32_0 = arith.constant 0 : i32
    %c0_i32_1 = arith.constant 0 : i32
    return %c0_i32, %c0_i32_0 : i32, i32
  }
  func.func @transform_3(%arg0: i32) -> (i32, i32) {
    %c0_i32 = arith.constant 0 : i32
    %c0_i32_0 = arith.constant 0 : i32
    %c0_i32_1 = arith.constant 0 : i32
    return %c0_i32, %c0_i32_0 : i32, i32
  }
  func.func @transform_4(%arg0: i32) -> (i32, i32) {
    %c0_i32 = arith.constant 0 : i32
    %c0_i32_0 = arith.constant 0 : i32
    %c0_i32_1 = arith.constant 0 : i32
    return %c0_i32, %c0_i32_0 : i32, i32
  }
  func.func @transform_5(%arg0: i32) -> (i32, i32) {
    %c0_i32 = arith.constant 0 : i32
    %c0_i32_0 = arith.constant 0 : i32
    %c0_i32_1 = arith.constant 0 : i32
    return %c0_i32, %c0_i32_0 : i32, i32
  }
  func.func @transform_6(%arg0: i32) -> (i32, i32) {
    %c0_i32 = arith.constant 0 : i32
    %c0_i32_0 = arith.constant 0 : i32
    %c0_i32_1 = arith.constant 0 : i32
    return %c0_i32, %c0_i32_0 : i32, i32
  }
  func.func @transform_7(%arg0: i32) -> (i32, i32) {
    %c0_i32 = arith.constant 0 : i32
    %c0_i32_0 = arith.constant 0 : i32
    %c0_i32_1 = arith.constant 0 : i32
    return %c0_i32, %c0_i32_0 : i32, i32
  }
  func.func @transform_8(%arg0: i32) -> (i32, i32) {
    %c0_i32 = arith.constant 0 : i32
    %c0_i32_0 = arith.constant 0 : i32
    %c0_i32_1 = arith.constant 0 : i32
    return %c0_i32, %c0_i32_0 : i32, i32
  }
  func.func @transform_9(%arg0: i32) -> (i32, i32) {
    %c0_i32 = arith.constant 0 : i32
    %c0_i32_0 = arith.constant 0 : i32
    %c0_i32_1 = arith.constant 0 : i32
    return %c0_i32, %c0_i32_0 : i32, i32
  }
  func.func @transform_10(%arg0: i32) -> (i32, i32, i32) {
    %c0_i32 = arith.constant 0 : i32
    %c0_i32_0 = arith.constant 0 : i32
    %c0_i32_1 = arith.constant 0 : i32
    return %arg0, %c0_i32, %c0_i32_0 : i32, i32, i32
  }
}

</mosaic_0001>

<bundles_post_ra>
// kernel: net_forward.1
= control target key start
LH: loop header
LB: loop body
LE: loop exit
PB: predicated region body
PF: predicated region fallthrough
CT: control target
= control target key end

     0   :  { %s9743_s13 = smov 0   ;;  %s15098_s0 = inlined_call_operand.vmem [shape: bf16[8,8,1158], index: 0, kind: input, shape index: {}]   ;;  %s15099_s1 = inlined_call_operand.vmem [shape: bf16[16,72], index: 1, kind: input, shape index: {}]   ;;  %s15100_s2 = inlined_call_operand.vmem [shape: f32[16,1], index: 2, kind: input, shape index: {}]   ;;  %s15101_s3 = inlined_call_operand.vmem [shape: bf16[8,144], index: 3, kind: input, shape index: {}]   ;;  %s15102_s4 = inlined_call_operand.vmem [shape: f32[8,1], index: 4, kind: input, shape index: {}]   ;;  %s15103_s5 = inlined_call_operand.vmem [shape: bf16[512,326], index: 5, kind: input, shape index: {}]   ;;  %s15104_s6 = inlined_call_operand.vmem [shape: bf16[269,256], index: 6, kind: input, shape index: {}]   ;;  %s15105_s7 = inlined_call_operand.vmem [shape: f32[1,32], index: 7, kind: input, shape index: {}]   ;;  %s15106_s8 = inlined_call_operand.vmem [shape: bf16[32,2], index: 8, kind: input, shape index: {}]   ;;  %s15107_s9 = inlined_call_operand.vmem [shape: f32[1,2], index: 9, kind: input, shape index: {}]   ;;  %s15108_s10 = inlined_call_operand.vmem [shape: f32[2,4,2], index: 10, kind: output, shape index: {}]  }
   0x1   :  { %15259 = sst [smem:[#allocation26_spill]] %s15098_s0 }
   0x2   :  { %15260 = sst [smem:[#allocation27_spill]] %s15100_s2 }
   0x3   :  { %15261 = sst [smem:[#allocation28_spill]] %s15101_s3 }
   0x4   :  { %15262 = sst [smem:[#allocation29_spill]] %s15102_s4 }
   0x5   :  { %15263 = sst [smem:[#allocation30_spill]] %s15105_s7 }
   0x6   :  { %15264 = sst [smem:[#allocation31_spill]] %s15106_s8 }
   0x7   :  { %15265 = sst [smem:[#allocation32_spill]] %s15107_s9 }
   0x8   :  { %15266 = sst [smem:[#allocation33_spill]] %s15108_s10 }
   0x9 LB: > { %15267 = sst [smem:[#allocation2_spill]] %s9654_s13  ;;  %s9749_s14 = sadd.s32 4294967295, %s9654_s13   ;;  %s9654_s13 = sphi %s9743_s13, %s20_s13  }
   0xa   : > { %15268 = sst [smem:[#allocation3_spill]] %s9749_s14  ;;  %p7530_p0 = scmp.ge.s32.totalorder %s9654_s13, 1 }
   0xb   : > { %p314_p1 = scmp.lt.s32.totalorder %s9654_s13, 3 }
   0xd   : > { %p315_p2 = pnand %p7530_p0, %p314_p1 }
   0xf   : > { %318 = sbr.rel (%p315_p2) target bundleno = 6963 (0x1b33), region = 60 }
  0x14   : > { %s7531_s15 = sshll.u32 %s9749_s14, 2  ;;  %s15269_s0 = sld [smem:[#allocation26_spill]]  ;;  %v15160_v5 = vmov 0   ;;  %vm15234_vm0 = vcmask 474112   ;;  %vm15203_vm1 = vcmask 1043456   ;;  %vm549_vm2 = vcmask 490496  }
  0x15   : > { %p353_p3 = scmp.lt.s32.totalorder %s7531_s15, 7  ;;  %s15186_s20 = smov 58   ;;  %846 = vmatprep.mubr.bf16.mxu1 %v15160_v5  ;;  %932 = vmatprep.mubr.bf16.mxu0 %v15160_v5  ;;  %vm15202_vm3 = vcmask 482304   ;;  %vm15200_vm4 = vcmask 760832   ;;  %vm518_vm5 = vcmask 752640   ;;  %vm437_vm6 = vcmask 1031168  }
  0x16   : > { %s15204_s21 = smov 60   ;;  %s15123_s22 = smov 59   ;;  %8085 = vset.pattern.permute.xlu1 %v15160_v5  ;;  %8086 = vset.pattern.permute.xlu0 %v15160_v5  ;;  %vm15199_vm7 = vcmask 769024   ;;  %vm410_vm8 = vcmask 1039360   ;;  %vm15198_vm9 = vcmask 588800   ;;  %vm15196_vm10 = vmmov 0  }
  0x17   : > { %s15695_s15 = smov (!%p353_p3, %s7531_s15), 7  ;;  %s15119_s23 = smov 93   ;;  %vm15145_vm11 = vcmask 523264   ;;  %vm1395_vm12 = vcmask 261120   ;;  %vm15142_vm13 = vcmask 785408   ;;  %vm15140_vm14 = vcmask 359424  }
  0x18   : > { %s8044_s16 = smul.u32 40, %s15695_s15  ;;  %s15194_s24 = smov 92   ;;  %vm15127_vm15 = vcmask 818176  }
  0x19   : > { %s15188_s25 = smov 126   ;;  %s15109_s26 = smov 94  }
  0x1a   : > { %s9757_s19 = scalar_lea.vmem %s15269_s0, %s8044_s16  ;;  %s15190_s27 = smov 127  }
  0x1b   : > { %v365_v0 = vld [vmem:[%s9757_s19 + $0x8] sm:$0xff]  ;;  %v364_v1 = vld [vmem:[%s9757_s19] sm:$0xff]  ;;  %v366_v6 = vld [vmem:[%s9757_s19 + $0x10] sm:$0xff]  ;;  %s15270_s2 = sld [smem:[#allocation27_spill]]  ;;  %s15111_s18 = smov 112  }
  0x1c   : > { %v9761_v2 = vcombine.low %v365_v0, %v365_v0  ;;  %v9763_v3 = vcombine.low %v364_v1, %v364_v1  ;;  %v9769_v4 = vcombine.high %v364_v1, %v364_v1  ;;  %v367_v7 = vld [vmem:[%s9757_s19 + $0x18] sm:$0xff]  ;;  %v9821_v8 = vcombine.low %v366_v6, %v366_v6  ;;  %v368_v12 = vld [vmem:[%s9757_s19 + $0x20] sm:$0xff]  ;;  %s15115_s28 = smov 40   ;;  %s15113_s17 = smov 4  }
  0x1d   : > { %v9823_v9 = vcombine.high %v365_v0, %v365_v0  ;;  %v9829_v10 = vcombine.low %v367_v7, %v367_v7  ;;  %v9831_v11 = vcombine.high %v366_v6, %v366_v6  ;;  %v9894_v13 = vcombine.low %v368_v12, %v368_v12  ;;  %s15156_s29 = smov 44   ;;  %s15117_s30 = smov 76  }
  0x1e   : > { %593 = vrot.lane.b32.xlu1 %v9761_v2, %s15186_s20  ;;  %589 = vrot.lane.b32.xlu0 %v9763_v3, %s15186_s20  ;;  %v9896_v14 = vcombine.high %v367_v7, %v367_v7  ;;  %v7543_v15 = vcombine.high %v368_v12, %v368_v12  ;;  %v9994_v7 = vld [vmem:[%s15099_s1] sm:$0xff]   ;;  %s15136_s11 = smov 80   ;;  %s15134_s12 = smov 100  }
  0x1f   : > { %s15130_s15 = smov 20   ;;  %s15273_s3 = sld [smem:[#allocation28_spill]] }
  0x20   : > { %s15275_s4 = sld [smem:[#allocation29_spill]]  ;;  %s15318_s16 = smov 8  }
  0x21   : > { %v766_v47 = vld [vmem:[%s15270_s2] sm:$0xff]  ;;  %v767_v50 = vld [vmem:[%s15270_s2 + $0x8] sm:$0xff]  ;;  %s15347_s14 = smov 92   ;;  %s15348_s0 = smov 91  }
  0x22   : > { %531 = vrot.lane.b32.xlu1 %v9769_v4, %s15204_s21  ;;  %591 = vrot.lane.b32.xlu0 %v9769_v4, %s15186_s20  ;;  %s15350_s2 = smov 109   ;;  %s15351_s9 = smov 110  }
  0x23   : > { %s15354_s13 = smov 90   ;;  %s15355_s7 = smov 58  }
  0x24   : > { %s15357_s10 = smov 60   ;;  %s15479_s8 = smov 100  }
  0x26   : > { %561 = vrot.lane.b32.xlu1 %v9769_v4, %s15123_s22  ;;  %533 = vrot.lane.b32.xlu0 %v9761_v2, %s15204_s21 }
  0x2a   : > { %529 = vrot.lane.b32.xlu1 %v9763_v3, %s15204_s21  ;;  %563 = vrot.lane.b32.xlu0 %v9761_v2, %s15123_s22 }
  0x2e   : > { %475 = vrot.lane.b32.xlu1 %v9769_v4, %s15119_s23  ;;  %559 = vrot.lane.b32.xlu0 %v9763_v3, %s15123_s22 }
  0x32   : > { %502 = vrot.lane.b32.xlu1 %v9769_v4, %s15194_s24  ;;  %477 = vrot.lane.b32.xlu0 %v9761_v2, %s15119_s23 }
  0x36   : > { %473 = vrot.lane.b32.xlu1 %v9763_v3, %s15119_s23  ;;  %504 = vrot.lane.b32.xlu0 %v9761_v2, %s15194_s24 }
  0x3a   : > { %421 = vrot.lane.b32.xlu1 %v9769_v4, %s15188_s25  ;;  %500 = vrot.lane.b32.xlu0 %v9763_v3, %s15194_s24 }
  0x3e   : > { %448 = vrot.lane.b32.xlu1 %v9769_v4, %s15109_s26  ;;  %423 = vrot.lane.b32.xlu0 %v9761_v2, %s15188_s25 }
  0x42   : > { %419 = vrot.lane.b32.xlu1 %v9763_v3, %s15188_s25  ;;  %450 = vrot.lane.b32.xlu0 %v9761_v2, %s15109_s26 }
  0x46   : > { %394 = vrot.lane.b32.xlu1 %v9769_v4, %s15190_s27  ;;  %446 = vrot.lane.b32.xlu0 %v9763_v3, %s15109_s26 }
  0x4a   : > { %392 = vrot.lane.b32.xlu1 %v9763_v3, %s15190_s27  ;;  %396 = vrot.lane.b32.xlu0 %v9761_v2, %s15190_s27 }
  0x4e   : > { %597 = vrot.lane.b32.xlu1 %v9821_v8, %s15186_s20  ;;  %595 = vrot.lane.b32.xlu0 %v9823_v9, %s15186_s20 }
  0x52   : > { %601 = vrot.lane.b32.xlu1 %v9829_v10, %s15186_s20  ;;  %599 = vrot.lane.b32.xlu0 %v9831_v11, %s15186_s20 }
  0x56   : > { %537 = vrot.lane.b32.xlu1 %v9821_v8, %s15204_s21  ;;  %535 = vrot.lane.b32.xlu0 %v9823_v9, %s15204_s21 }
  0x5a   : > { %567 = vrot.lane.b32.xlu1 %v9821_v8, %s15123_s22  ;;  %565 = vrot.lane.b32.xlu0 %v9823_v9, %s15123_s22 }
  0x5e   : > { %541 = vrot.lane.b32.xlu1 %v9829_v10, %s15204_s21  ;;  %539 = vrot.lane.b32.xlu0 %v9831_v11, %s15204_s21 }
  0x62   : > { %571 = vrot.lane.b32.xlu1 %v9829_v10, %s15123_s22  ;;  %569 = vrot.lane.b32.xlu0 %v9831_v11, %s15123_s22 }
  0x66   : > { %481 = vrot.lane.b32.xlu1 %v9821_v8, %s15119_s23  ;;  %479 = vrot.lane.b32.xlu0 %v9823_v9, %s15119_s23 }
  0x6a   : > { %508 = vrot.lane.b32.xlu1 %v9821_v8, %s15194_s24  ;;  %506 = vrot.lane.b32.xlu0 %v9823_v9, %s15194_s24 }
  0x6e   : > { %485 = vrot.lane.b32.xlu1 %v9829_v10, %s15119_s23  ;;  %483 = vrot.lane.b32.xlu0 %v9831_v11, %s15119_s23 }
  0x72   : > { %512 = vrot.lane.b32.xlu1 %v9829_v10, %s15194_s24  ;;  %510 = vrot.lane.b32.xlu0 %v9831_v11, %s15194_s24 }
  0x76   : > { %427 = vrot.lane.b32.xlu1 %v9821_v8, %s15188_s25  ;;  %425 = vrot.lane.b32.xlu0 %v9823_v9, %s15188_s25 }
  0x7a   : > { %454 = vrot.lane.b32.xlu1 %v9821_v8, %s15109_s26  ;;  %452 = vrot.lane.b32.xlu0 %v9823_v9, %s15109_s26 }
  0x7e   : > { %431 = vrot.lane.b32.xlu1 %v9829_v10, %s15188_s25  ;;  %429 = vrot.lane.b32.xlu0 %v9831_v11, %s15188_s25 }
  0x82   : > { %458 = vrot.lane.b32.xlu1 %v9829_v10, %s15109_s26  ;;  %456 = vrot.lane.b32.xlu0 %v9831_v11, %s15109_s26 }
  0x86   : > { %400 = vrot.lane.b32.xlu1 %v9821_v8, %s15190_s27  ;;  %398 = vrot.lane.b32.xlu0 %v9823_v9, %s15190_s27 }
  0x8a   : > { %404 = vrot.lane.b32.xlu1 %v9829_v10, %s15190_s27  ;;  %402 = vrot.lane.b32.xlu0 %v9831_v11, %s15190_s27 }
  0x8e   : > { %605 = vrot.lane.b32.xlu1 %v9894_v13, %s15186_s20  ;;  %603 = vrot.lane.b32.xlu0 %v9896_v14, %s15186_s20 }
  0x90   : > { %v9902_v16 = vpop.permute.xlu1 %593  ;;  %v590_v17 = vpop.permute.xlu0 %589 }
  0x92   : > { %543 = vrot.lane.b32.xlu1 %v9896_v14, %s15204_s21  ;;  %607 = vrot.lane.b32.xlu0 %v7543_v15, %s15186_s20 }
  0x94   : > { %v532_v18 = vpop.permute.xlu1 %531  ;;  %v592_v19 = vpop.permute.xlu0 %591 }
  0x95   : > { %v611_v20 = vsel %vm15234_vm0, %v592_v19, %v9902_v16  ;;  %v610_v21 = vsel %vm15234_vm0, %v590_v17, %v592_v19 }
  0x96   : > { %573 = vrot.lane.b32.xlu1 %v9896_v14, %s15123_s22  ;;  %545 = vrot.lane.b32.xlu0 %v9894_v13, %s15204_s21  ;;  %v788_v22 = vsel %vm15203_vm1, %v610_v21, 0 }
  0x97   : > { %7545 = vmatprep.subr.msk.bf16.mxu1 %vm15203_vm1, %v611_v20 }
  0x98   : > { %821 = vmatpush1.bf16.msra.mxu1 %v788_v22  ;;  %v562_v23 = vpop.permute.xlu1 %561  ;;  %v9916_v24 = vpop.permute.xlu0 %533 }
  0x99   : > { %v551_v27 = vsel %vm549_vm2, %v532_v18, %v9916_v24 }
  0x9a   : > { %547 = vrot.lane.b32.xlu1 %v7543_v15, %s15204_s21  ;;  %575 = vrot.lane.b32.xlu0 %v9894_v13, %s15123_s22 }
  0x9c   : > { %v530_v25 = vpop.permute.xlu1 %529  ;;  %v9921_v26 = vpop.permute.xlu0 %563 }
  0x9d   : > { %v581_v28 = vsel %vm15202_vm3, %v562_v23, %v9921_v26  ;;  %v550_v32 = vsel %vm549_vm2, %v530_v25, %v532_v18 }
  0x9e   : > { %487 = vrot.lane.b32.xlu1 %v9896_v14, %s15119_s23  ;;  %577 = vrot.lane.b32.xlu0 %v7543_v15, %s15123_s22  ;;  %v734_v29 = vsel %vm15203_vm1, %v551_v27, %v581_v28  ;;  %s15150_s22 = smov 108  }
  0x9f   : > { %822 = vmatprep.subr.bf16.mxu1 %v734_v29 }
  0xa0   : > { %v476_v30 = vpop.permute.xlu1 %475  ;;  %v560_v31 = vpop.permute.xlu0 %559 }
  0xa1   : > { %v580_v33 = vsel %vm15202_vm3, %v560_v31, %v562_v23 }
  0xa2   : > { %514 = vrot.lane.b32.xlu1 %v9896_v14, %s15194_s24  ;;  %489 = vrot.lane.b32.xlu0 %v9894_v13, %s15119_s23  ;;  %v730_v34 = vsel %vm15203_vm1, %v550_v32, %v580_v33  ;;  %s15132_s23 = smov 8  }
  0xa3   : > { %823 = vmatpush1.bf16.msra.mxu1 %v730_v34 }
  0xa4   : > { %v503_v35 = vpop.permute.xlu1 %502  ;;  %v9938_v36 = vpop.permute.xlu0 %477 }
  0xa5   : > { %v493_v39 = vsel %vm15200_vm4, %v476_v30, %v9938_v36 }
  0xa6   : > { %433 = vrot.lane.b32.xlu1 %v9896_v14, %s15188_s25  ;;  %516 = vrot.lane.b32.xlu0 %v9894_v13, %s15194_s24 }
  0xa8   : > { %v474_v37 = vpop.permute.xlu1 %473  ;;  %v9944_v38 = vpop.permute.xlu0 %504 }
  0xa9   : > { %v520_v40 = vsel %vm518_vm5, %v503_v35, %v9944_v38  ;;  %v492_v44 = vsel %vm15200_vm4, %v474_v37, %v476_v30 }
  0xaa   : > { %460 = vrot.lane.b32.xlu1 %v9896_v14, %s15109_s26  ;;  %435 = vrot.lane.b32.xlu0 %v9894_v13, %s15188_s25  ;;  %v698_v41 = vsel %vm15203_vm1, %v493_v39, %v520_v40 }
  0xab   : > { %824 = vmatprep.subr.bf16.mxu1 %v698_v41 }
  0xac   : > { %v422_v42 = vpop.permute.xlu1 %421  ;;  %v501_v43 = vpop.permute.xlu0 %500 }
  0xad   : > { %v519_v45 = vsel %vm518_vm5, %v501_v43, %v503_v35 }
  0xae   : > { %406 = vrot.lane.b32.xlu1 %v9896_v14, %s15190_s27  ;;  %462 = vrot.lane.b32.xlu0 %v9894_v13, %s15109_s26  ;;  %v694_v46 = vsel %vm15203_vm1, %v492_v44, %v519_v45 }
  0xaf   : > { %825 = vmatpush1.bf16.msra.mxu1 %v694_v46 }
  0xb0   : > { %v449_v48 = vpop.permute.xlu1 %448  ;;  %v9965_v49 = vpop.permute.xlu0 %423 }
  0xb1   : > { %v439_v53 = vsel %vm437_vm6, %v422_v42, %v9965_v49 }
  0xb2   : > { %408 = vrot.lane.b32.xlu0 %v9894_v13, %s15190_s27  ;;  %770 = vperm.xlu1 %8085, %v766_v47  }
  0xb4   : > { %v420_v51 = vpop.permute.xlu1 %419  ;;  %v9972_v52 = vpop.permute.xlu0 %450 }
  0xb5   : > { %v466_v54 = vsel %vm15199_vm7, %v449_v48, %v9972_v52  ;;  %v438_v58 = vsel %vm437_vm6, %v420_v51, %v422_v42 }
  0xb6   : > { %v662_v55 = vsel %vm15203_vm1, %v439_v53, %v466_v54  ;;  %775 = vperm.xlu0 %8086, %v767_v50  }
  0xb7   : > { %826 = vmatprep.subr.bf16.mxu1 %v662_v55 }
  0xb8   : > { %v395_v56 = vpop.permute.xlu1 %394  ;;  %v447_v57 = vpop.permute.xlu0 %446 }
  0xb9   : > { %v465_v59 = vsel %vm15199_vm7, %v447_v57, %v449_v48 }
  0xba   : > { %v658_v60 = vsel %vm15203_vm1, %v438_v58, %v465_v59 }
  0xbb   : > { %827 = vmatpush1.bf16.msra.mxu1 %v658_v60 }
  0xbc   : > { %v393_v61 = vpop.permute.xlu1 %392  ;;  %v9982_v62 = vpop.permute.xlu0 %396 }
  0xbd   : > { %v411_v63 = vsel %vm410_vm8, %v393_v61, %v395_v56  ;;  %v412_v0 = vsel %vm410_vm8, %v395_v56, %v9982_v62 }
  0xbe   : > { %v626_v1 = vsel %vm15203_vm1, %v9769_v4, %v412_v0  ;;  %v622_v6 = vsel %vm15203_vm1, %v9763_v3, %v411_v63 }
  0xbf   : > { %828 = vmatprep.subr.bf16.mxu1 %v626_v1 }
  0xc0   : > { %v598_v12 = vpop.permute.xlu1 %597  ;;  %829 = vmatpush1.bf16.msra.mxu1 %v622_v6  ;;  %v596_v15 = vpop.permute.xlu0 %595 }
  0xc1   : > { %v612_v17 = vsel %vm15234_vm0, %v9902_v16, %v596_v15  ;;  %v613_v18 = vsel %vm15234_vm0, %v596_v15, %v598_v12 }
  0xc2   : > { %7547 = vmatprep.subr.msk.bf16.mxu1 %vm15203_vm1, %v613_v18  ;;  %v794_v4 = vsel %vm15203_vm1, %v612_v17, 0 }
  0xc3   : > { %7546 = vmatmul.mubr.msk.bf16.vlgmr.msra.gmra.mxu1 %vm15198_vm9, %v9994_v7 }
  0xc4   : > { %v10003_v3 = vpop.permute.xlu1 %601  ;;  %864 = vmatpush1.bf16.msra.mxu1 %v794_v4  ;;  %v600_v19 = vpop.permute.xlu0 %599  ;;  %889 = vmatprep.mubr.bf16.mxu1 %v15160_v5 }
  0xc5   : > { %v615_v20 = vsel %vm15234_vm0, %v600_v19, %v10003_v3  ;;  %v614_v16 = vsel %vm15234_vm0, %v598_v12, %v600_v19 }
  0xc6   : > { %7549 = vmatprep.subr.msk.bf16.mxu0 %vm15203_vm1, %v615_v20  ;;  %v800_v21 = vsel %vm15203_vm1, %v614_v16, 0 }
  0xc7   : > { %907 = vmatpush1.bf16.msra.mxu0 %v800_v21 }
  0xc8   : > { %v538_v22 = vpop.permute.xlu1 %537  ;;  %v536_v23 = vpop.permute.xlu0 %535 }
  0xc9   : > { %v552_v28 = vsel %vm549_vm2, %v9916_v24, %v536_v23  ;;  %v553_v29 = vsel %vm549_vm2, %v536_v23, %v538_v22 }
  0xcc   : > { %v568_v25 = vpop.permute.xlu1 %567  ;;  %v566_v27 = vpop.permute.xlu0 %565 }
  0xcd   : > { %v582_v30 = vsel %vm15202_vm3, %v9921_v26, %v566_v27  ;;  %v583_v31 = vsel %vm15202_vm3, %v566_v27, %v568_v25 }
  0xce   : > { %v742_v32 = vsel %vm15203_vm1, %v553_v29, %v583_v31  ;;  %v738_v33 = vsel %vm15203_vm1, %v552_v28, %v582_v30 }
  0xcf   : > { %865 = vmatprep.subr.bf16.mxu1 %v742_v32 }
  0xd0   : > { %v10019_v34 = vpop.permute.xlu1 %541  ;;  %866 = vmatpush1.bf16.msra.mxu1 %v738_v33  ;;  %v540_v35 = vpop.permute.xlu0 %539 }
  0xd1   : > { %v554_v24 = vsel %vm549_vm2, %v538_v22, %v540_v35  ;;  %v555_v40 = vsel %vm549_vm2, %v540_v35, %v10019_v34 }
  0xd4   : > { %v10021_v37 = vpop.permute.xlu1 %571  ;;  %v570_v39 = vpop.permute.xlu0 %569 }
  0xd5   : > { %v584_v26 = vsel %vm15202_vm3, %v568_v25, %v570_v39  ;;  %v585_v41 = vsel %vm15202_vm3, %v570_v39, %v10021_v37 }
  0xd6   : > { %v750_v42 = vsel %vm15203_vm1, %v555_v40, %v585_v41  ;;  %v746_v43 = vsel %vm15203_vm1, %v554_v24, %v584_v26 }
  0xd7   : > { %908 = vmatprep.subr.bf16.mxu0 %v750_v42 }
  0xd8   : > { %v482_v44 = vpop.permute.xlu1 %481  ;;  %909 = vmatpush1.bf16.msra.mxu0 %v746_v43  ;;  %v480_v45 = vpop.permute.xlu0 %479 }
  0xd9   : > { %v494_v48 = vsel %vm15200_vm4, %v9938_v36, %v480_v45  ;;  %v495_v50 = vsel %vm15200_vm4, %v480_v45, %v482_v44 }
  0xdc   : > { %v509_v46 = vpop.permute.xlu1 %508  ;;  %v507_v47 = vpop.permute.xlu0 %506 }
  0xdd   : > { %v521_v51 = vsel %vm518_vm5, %v9944_v38, %v507_v47  ;;  %v522_v53 = vsel %vm518_vm5, %v507_v47, %v509_v46 }
  0xde   : > { %v706_v54 = vsel %vm15203_vm1, %v495_v50, %v522_v53  ;;  %v702_v55 = vsel %vm15203_vm1, %v494_v48, %v521_v51 }
  0xdf   : > { %867 = vmatprep.subr.bf16.mxu1 %v706_v54 }
  0xe0   : > { %v10039_v56 = vpop.permute.xlu1 %485  ;;  %868 = vmatpush1.bf16.msra.mxu1 %v702_v55  ;;  %v484_v57 = vpop.permute.xlu0 %483 }
  0xe1   : > { %v496_v36 = vsel %vm15200_vm4, %v482_v44, %v484_v57  ;;  %v497_v60 = vsel %vm15200_vm4, %v484_v57, %v10039_v56 }
  0xe4   : > { %v10041_v58 = vpop.permute.xlu1 %512  ;;  %v511_v59 = vpop.permute.xlu0 %510 }
  0xe5   : > { %v523_v38 = vsel %vm518_vm5, %v509_v46, %v511_v59  ;;  %v524_v61 = vsel %vm518_vm5, %v511_v59, %v10041_v58  ;;  %v15158_v46 = vmov 0.0  }
  0xe6   : > { %v714_v63 = vsel %vm15203_vm1, %v497_v60, %v524_v61  ;;  %v710_v0 = vsel %vm15203_vm1, %v496_v36, %v523_v38 }
  0xe7   : > { %910 = vmatprep.subr.bf16.mxu0 %v714_v63 }
  0xe8   : > { %v428_v1 = vpop.permute.xlu1 %427  ;;  %911 = vmatpush1.bf16.msra.mxu0 %v710_v0  ;;  %v426_v6 = vpop.permute.xlu0 %425 }
  0xe9   : > { %v440_v17 = vsel %vm437_vm6, %v9965_v49, %v426_v6  ;;  %v441_v18 = vsel %vm437_vm6, %v426_v6, %v428_v1 }
  0xec   : > { %v455_v12 = vpop.permute.xlu1 %454  ;;  %v453_v15 = vpop.permute.xlu0 %452 }
  0xed   : > { %v467_v4 = vsel %vm15199_vm7, %v9972_v52, %v453_v15  ;;  %v468_v19 = vsel %vm15199_vm7, %v453_v15, %v455_v12 }
  0xee   : > { %v670_v20 = vsel %vm15203_vm1, %v441_v18, %v468_v19  ;;  %v666_v16 = vsel %vm15203_vm1, %v440_v17, %v467_v4 }
  0xef   : > { %869 = vmatprep.subr.bf16.mxu1 %v670_v20 }
  0xf0   : > { %v10059_v21 = vpop.permute.xlu1 %431  ;;  %870 = vmatpush1.bf16.msra.mxu1 %v666_v16  ;;  %v430_v22 = vpop.permute.xlu0 %429 }
  0xf1   : > { %v442_v49 = vsel %vm437_vm6, %v428_v1, %v430_v22  ;;  %v443_v27 = vsel %vm437_vm6, %v430_v22, %v10059_v21 }
  0xf4   : > { %v10061_v23 = vpop.permute.xlu1 %458  ;;  %v457_v25 = vpop.permute.xlu0 %456 }
  0xf5   : > { %v469_v52 = vsel %vm15199_vm7, %v455_v12, %v457_v25  ;;  %v470_v28 = vsel %vm15199_vm7, %v457_v25, %v10061_v23 }
  0xf6   : > { %v678_v29 = vsel %vm15203_vm1, %v443_v27, %v470_v28  ;;  %v674_v30 = vsel %vm15203_vm1, %v442_v49, %v469_v52 }
  0xf7   : > { %912 = vmatprep.subr.bf16.mxu0 %v678_v29 }
  0xf8   : > { %v401_v31 = vpop.permute.xlu1 %400  ;;  %913 = vmatpush1.bf16.msra.mxu0 %v674_v30  ;;  %v399_v32 = vpop.permute.xlu0 %398 }
  0xf9   : > { %v413_v33 = vsel %vm410_vm8, %v9982_v62, %v399_v32  ;;  %v414_v35 = vsel %vm410_vm8, %v399_v32, %v401_v31 }
  0xfa   : > { %v634_v39 = vsel %vm15203_vm1, %v9823_v9, %v414_v35  ;;  %v630_v24 = vsel %vm15203_vm1, %v9761_v2, %v413_v33 }
  0xfb   : > { %871 = vmatprep.subr.bf16.mxu1 %v634_v39 }
  0xfc   : > { %v10078_v40 = vpop.permute.xlu1 %404  ;;  %872 = vmatpush1.bf16.msra.mxu1 %v630_v24  ;;  %v403_v26 = vpop.permute.xlu0 %402 }
  0xfd   : > { %v415_v41 = vsel %vm410_vm8, %v401_v31, %v403_v26  ;;  %v416_v42 = vsel %vm410_vm8, %v403_v26, %v10078_v40 }
  0xfe   : > { %v642_v62 = vsel %vm15203_vm1, %v9831_v11, %v416_v42  ;;  %v638_v43 = vsel %vm15203_vm1, %v9821_v8, %v415_v41 }
  0xff   : > { %7548 = vmatmul.mubr.msk.bf16.vlgmr.msra.gmra.mxu1 %vm15198_vm9, %v9994_v7  ;;  %914 = vmatprep.subr.bf16.mxu0 %v642_v62 }
 0x100   : > { %v606_v2 = vpop.permute.xlu1 %605  ;;  %915 = vmatpush1.bf16.msra.mxu0 %v638_v43  ;;  %v604_v9 = vpop.permute.xlu0 %603  ;;  %975 = vmatprep.mubr.bf16.mxu1 %v15160_v5 }
 0x101   : > { %v616_v44 = vsel %vm15234_vm0, %v10003_v3, %v604_v9  ;;  %v617_v45 = vsel %vm15234_vm0, %v604_v9, %v606_v2  ;;  %7980 = vmatprep.subr.bf16.mxu0 %v15158_v46 }
 0x102   : > { %7551 = vmatprep.subr.msk.bf16.mxu1 %vm15203_vm1, %v617_v45  ;;  %v806_v8 = vsel %vm15203_vm1, %v616_v44, 0 }
 0x103   : > { %7550 = vmatmul.mubr.msk.bf16.vlgmr.msra.gmra.mxu0 %vm15198_vm9, %v9994_v7  ;;  %950 = vmatpush1.bf16.msra.mxu1 %v806_v8 }
 0x104   : > { %v544_v11 = vpop.permute.xlu1 %543  ;;  %v608_v47 = vpop.permute.xlu0 %607  ;;  %7990 = vmatprep.mubr.msk.bf16.mxu0 %vm15196_vm10, %v15158_v46 }
 0x105   : > { %v618_v3 = vsel %vm15234_vm0, %v606_v2, %v608_v47  ;;  %v556_v36 = vsel %vm549_vm2, %v10019_v34, %v544_v11 }
 0x106   : > { %v812_v48 = vsel %vm15203_vm1, %v618_v3, 0 }
 0x107   : > { %7981 = vmatpush3.bf16.msra.mxu0 %v812_v48 }
 0x108   : > { %v574_v50 = vpop.permute.xlu1 %573  ;;  %v546_v51 = vpop.permute.xlu0 %545  ;;  %7982 = vmatprep.subr.bf16.mxu0 %v15158_v46 }
 0x109   : > { %v586_v53 = vsel %vm15202_vm3, %v10021_v37, %v574_v50  ;;  %v557_v57 = vsel %vm549_vm2, %v544_v11, %v546_v51 }
 0x10a   : > { %v754_v38 = vsel %vm15203_vm1, %v556_v36, %v586_v53 }
 0x10c   : > { %v548_v54 = vpop.permute.xlu1 %547  ;;  %v576_v55 = vpop.permute.xlu0 %575 }
 0x10d   : > { %v587_v59 = vsel %vm15202_vm3, %v574_v50, %v576_v55  ;;  %v558_v0 = vsel %vm549_vm2, %v546_v51, %v548_v54 }
 0x10e   : > { %v758_v60 = vsel %vm15203_vm1, %v557_v57, %v587_v59 }
 0x10f   : > { %951 = vmatprep.subr.bf16.mxu1 %v758_v60 }
 0x110   : > { %v488_v61 = vpop.permute.xlu1 %487  ;;  %952 = vmatpush1.bf16.msra.mxu1 %v754_v38  ;;  %v578_v63 = vpop.permute.xlu0 %577 }
 0x111   : > { %v588_v37 = vsel %vm15202_vm3, %v576_v55, %v578_v63  ;;  %v498_v20 = vsel %vm15200_vm4, %v10039_v56, %v488_v61 }
 0x112   : > { %v762_v1 = vsel %vm15203_vm1, %v558_v0, %v588_v37 }
 0x113   : > { %7983 = vmatpush3.bf16.msra.mxu0 %v762_v1 }
 0x114   : > { %v515_v6 = vpop.permute.xlu1 %514  ;;  %v490_v12 = vpop.permute.xlu0 %489  ;;  %7984 = vmatprep.subr.bf16.mxu0 %v15158_v46 }
 0x115   : > { %v525_v34 = vsel %vm518_vm5, %v10041_v58, %v515_v6  ;;  %v499_v18 = vsel %vm15200_vm4, %v488_v61, %v490_v12 }
 0x116   : > { %v718_v22 = vsel %vm15203_vm1, %v498_v20, %v525_v34 }
 0x118   : > { %v434_v15 = vpop.permute.xlu1 %433  ;;  %v517_v17 = vpop.permute.xlu0 %516 }
 0x119   : > { %v526_v4 = vsel %vm518_vm5, %v515_v6, %v517_v17  ;;  %v726_v19 = vsel %vm15203_vm1, %v490_v12, %v517_v17  ;;  %v444_v30 = vsel %vm437_vm6, %v10059_v21, %v434_v15 }
 0x11a   : > { %7985 = vmatpush3.bf16.msra.mxu0 %v726_v19  ;;  %v722_v16 = vsel %vm15203_vm1, %v499_v18, %v526_v4 }
 0x11b   : > { %953 = vmatprep.subr.bf16.mxu1 %v722_v16  ;;  %7986 = vmatprep.subr.bf16.mxu0 %v15158_v46 }
 0x11c   : > { %v461_v58 = vpop.permute.xlu1 %460  ;;  %954 = vmatpush1.bf16.msra.mxu1 %v718_v22  ;;  %v436_v25 = vpop.permute.xlu0 %435 }
 0x11d   : > { %v471_v49 = vsel %vm15199_vm7, %v10061_v23, %v461_v58  ;;  %v445_v52 = vsel %vm437_vm6, %v434_v15, %v436_v25 }
 0x11e   : > { %v682_v32 = vsel %vm15203_vm1, %v444_v30, %v471_v49 }
 0x120   : > { %v463_v27 = vpop.permute.xlu0 %462  ;;  %v407_v28 = vpop.permute.xlu1 %406 }
 0x121   : > { %v472_v56 = vsel %vm15199_vm7, %v461_v58, %v463_v27  ;;  %v690_v29 = vsel %vm15203_vm1, %v436_v25, %v463_v27  ;;  %v417_v23 = vsel %vm410_vm8, %v10078_v40, %v407_v28 }
 0x122   : > { %7987 = vmatpush3.bf16.msra.mxu0 %v690_v29  ;;  %v686_v31 = vsel %vm15203_vm1, %v445_v52, %v472_v56  ;;  %v646_v24 = vsel %vm15203_vm1, %v9829_v10, %v417_v23 }
 0x123   : > { %955 = vmatprep.subr.bf16.mxu1 %v686_v31  ;;  %7988 = vmatprep.subr.bf16.mxu0 %v15158_v46 }
 0x124   : > { %956 = vmatpush1.bf16.msra.mxu1 %v682_v32  ;;  %v409_v33 = vpop.permute.xlu0 %408 }
 0x125   : > { %v418_v35 = vsel %vm410_vm8, %v407_v28, %v409_v33  ;;  %v654_v39 = vsel %vm15203_vm1, %v9894_v13, %v409_v33 }
 0x126   : > { %7989 = vmatpush3.bf16.msra.mxu0 %v654_v39  ;;  %v650_v21 = vsel %vm15203_vm1, %v9896_v14, %v418_v35 }
 0x127   : > { %957 = vmatprep.subr.bf16.mxu1 %v650_v21 }
 0x128   : > { %958 = vmatpush1.bf16.msra.mxu1 %v646_v24 }
 0x129   : > { %7991 = vmatmul.mubr.msk.bf16.vlgmr.msra.gmra.mxu0 %vm15198_vm9, %v9994_v7 }
 0x12b   : > { %7552 = vmatmul.mubr.msk.bf16.vlgmr.msra.gmra.mxu1 %vm15198_vm9, %v9994_v7 }
 0x12d   : > { %v10152_v42 = vpop.permute.xlu1 %770 }
 0x12e   : > { %15271 = vst [vmem:[#allocation4_spill] sm:$0xff] %v10152_v42 }
 0x131   : > { %v10155_v10 = vpop.permute.xlu0 %775 }
 0x132   : > { %15272 = vst [vmem:[#allocation5_spill] sm:$0xff] %v10155_v10 }
 0x183   : > { %v848_v40 = vpop.f32.mrf.mxu1 }
 0x184   : > { %v849_v12 = vadd.f32 %v848_v40, %v10152_v42 }
 0x185   : > { %v850_v26 = vpop.f32.mrf.mxu1 }
 0x186   : > { %v851_v34 = vadd.f32 %v850_v26, %v10152_v42 }
 0x187   : > { %v10148_v41 = vpop.f32.mrf.mxu1 }
 0x188   : > { %v853_v52 = vadd.f32 %v10148_v41, %v10155_v10 }
 0x189   : > { %v10150_v13 = vpop.f32.mrf.mxu1 }
 0x18a   : > { %v855_v56 = vadd.f32 %v10150_v13, %v10155_v10 }
 0x1bf   : > { %v891_v14 = vpop.f32.mrf.mxu1 }
 0x1c0   : > { %v892_v62 = vadd.f32 %v891_v14, %v10152_v42 }
 0x1c1   : > { %v893_v43 = vpop.f32.mrf.mxu1 }
 0x1c2   : > { %v894_v2 = vadd.f32 %v893_v43, %v10152_v42  ;;  %9091 = vtanh.f32 %v892_v62 }
 0x1c3   : > { %v895_v9 = vpop.f32.mrf.mxu1  ;;  %v934_v44 = vpop.f32.mrf.mxu0 }
 0x1c4   : > { %9093 = vtanh.f32 %v894_v2  ;;  %v935_v7 = vadd.f32 %v934_v44, %v10152_v42  ;;  %v896_v45 = vadd.f32 %v895_v9, %v10155_v10 }
 0x1c5   : > { %v897_v8 = vpop.f32.mrf.mxu1  ;;  %v936_v11 = vpop.f32.mrf.mxu0 }
 0x1c6   : > { %9095 = vtanh.f32 %v935_v7  ;;  %v898_v47 = vadd.f32 %v897_v8, %v10155_v10  ;;  %v937_v3 = vadd.f32 %v936_v11, %v10152_v42 }
 0x1c7   : > { %v938_v48 = vpop.f32.mrf.mxu0  ;;  %9097 = vtanh.f32 %v896_v45 }
 0x1c8   : > { %9099 = vtanh.f32 %v898_v47  ;;  %v939_v50 = vadd.f32 %v938_v48, %v10155_v10 }
 0x1c9   : > { %9101 = vtanh.f32 %v937_v3  ;;  %v940_v51 = vpop.f32.mrf.mxu0 }
 0x1ca   : > { %9103 = vtanh.f32 %v939_v50  ;;  %v941_v53 = vadd.f32 %v940_v51, %v10155_v10 }
 0x1cc   : > { %9105 = vtanh.f32 %v941_v53 }
 0x1cd   : > { %9107 = vtanh.f32 %v849_v12 }
 0x1ce   : > { %9109 = vtanh.f32 %v851_v34 }
 0x1cf   : > { %v10164_v54 = vpop.eup %9091 }
 0x1d1   : > { %v10166_v55 = vpop.eup %9093 }
 0x1d2   : > { %v8097_v57 = vpack.i.bf16 %v10166_v55, %v10164_v54 }
 0x1d3   : > { %v10170_v59 = vpop.eup %9095 }
 0x1d4   : > { %v10172_v36 = vpop.eup %9097  ;;  %8098 = vrot.lane.b32.xlu1 %v8097_v57, %s15190_s27 }
 0x1d5   : > { %v10175_v60 = vpop.eup %9099 }
 0x1d6   : > { %v10177_v38 = vpop.eup %9101  ;;  %v8102_v61 = vpack.i.bf16 %v10175_v60, %v10172_v36 }
 0x1d7   : > { %v10181_v63 = vpop.eup %9103  ;;  %v8087_v0 = vpack.i.bf16 %v10177_v38, %v10170_v59 }
 0x1d8   : > { %8103 = vrot.lane.b32.xlu1 %v8102_v61, %s15190_s27 }
 0x1d9   : > { %v10186_v37 = vpop.eup %9105  ;;  %8088 = vrot.lane.b32.xlu0 %v8087_v0, %s15190_s27 }
 0x1da   : > { %v8092_v1 = vpack.i.bf16 %v10186_v37, %v10181_v63  ;;  %v10204_v29 = vpop.eup %9107 }
 0x1db   : > { %v10206_v30 = vpop.eup %9109 }
 0x1dc   : > { %v8117_v13 = vpack.i.bf16 %v10206_v30, %v10204_v29 }
 0x1dd   : > { %8093 = vrot.lane.b32.xlu0 %v8092_v1, %s15190_s27 }
 0x1e9   : > { %v1020_v6 = vpop.f32.mrf.mxu0 }
 0x1ea   : > { %v1021_v4 = vadd.f32 %v1020_v6, %v10152_v42 }
 0x1eb   : > { %v977_v15 = vpop.f32.mrf.mxu1  ;;  %v7992_v17 = vpop.f32.mrf.mxu0 }
 0x1ec   : > { %v978_v18 = vadd.f32 %v977_v15, %v10152_v42 }
 0x1ed   : > { %v979_v19 = vpop.f32.mrf.mxu1  ;;  %v1023_v20 = vpop.f32.mrf.mxu0 }
 0x1ee   : > { %v980_v16 = vadd.f32 %v979_v19, %v10152_v42  ;;  %9111 = vtanh.f32 %v978_v18  ;;  %v1024_v22 = vadd.f32 %v1023_v20, %v10155_v10 }
 0x1ef   : > { %v981_v58 = vpop.f32.mrf.mxu1  ;;  %v7993_v25 = vpop.f32.mrf.mxu0 }
 0x1f0   : > { %9113 = vtanh.f32 %v980_v16  ;;  %v982_v49 = vadd.f32 %v981_v58, %v10155_v10 }
 0x1f1   : > { %9115 = vtanh.f32 %v1021_v4  ;;  %v983_v27 = vpop.f32.mrf.mxu1 }
 0x1f2   : > { %9117 = vtanh.f32 %v982_v49  ;;  %v984_v28 = vadd.f32 %v983_v27, %v10155_v10 }
 0x1f3   : > { %9119 = vtanh.f32 %v1024_v22 }
 0x1f4   : > { %9121 = vtanh.f32 %v984_v28 }
 0x1f5   : > { %9123 = vtanh.f32 %v853_v52 }
 0x1f6   : > { %9125 = vtanh.f32 %v855_v56 }
 0x1fb   : > { %v10208_v31 = vpop.eup %9111 }
 0x1fd   : > { %v10210_v32 = vpop.eup %9113 }
 0x1fe   : > { %v9116_v23 = vpop.eup %9115  ;;  %v8107_v33 = vpack.i.bf16 %v10210_v32, %v10208_v31 }
 0x1ff   : > { %v9118_v35 = vpop.eup %9117 }
 0x200   : > { %v10214_v39 = vpop.eup %9119  ;;  %8108 = vrot.lane.b32.xlu1 %v8107_v33, %s15190_s27  ;;  %v8112_v26 = vpack.i.bf16 %v9118_v35, %v9116_v23 }
 0x201   : > { %v10217_v21 = vpop.eup %9121 }
 0x202   : > { %v10219_v24 = vpop.eup %9123  ;;  %v8122_v40 = vpack.i.bf16 %v10214_v39, %v10217_v21 }
 0x203   : > { %v10223_v41 = vpop.eup %9125 }
 0x204   : > { %8123 = vrot.lane.b32.xlu0 %v8122_v40, %s15190_s27  ;;  %8113 = vrot.lane.b32.xlu1 %v8112_v26, %s15190_s27  ;;  %v8127_v14 = vpack.i.bf16 %v10223_v41, %v10219_v24 }
 0x208   : > { %8118 = vrot.lane.b32.xlu1 %v8117_v13, %s15190_s27  ;;  %8128 = vrot.lane.b32.xlu0 %v8127_v14, %s15190_s27 }
 0x246   : > { %v8099_v62 = vpop.permute.xlu1 %8098 }
 0x247   : > { %v8101_v43 = vunpack.i.h.bf16 %v8099_v62  ;;  %v8100_v2 = vunpack.i.l.bf16 %v8099_v62 }
 0x249   : > { %v1102_v11 = vsel %vm410_vm8, %v8100_v2, %v8101_v43 }
 0x24a   : > { %v10233_v9 = vpop.permute.xlu1 %8103  ;;  %v10240_v48 = vmax.f32 %v10164_v54, %v1102_v11 }
 0x24b   : > { %v8089_v44 = vpop.permute.xlu0 %8088  ;;  %v8106_v7 = vunpack.i.h.bf16 %v10233_v9  ;;  %v8105_v45 = vunpack.i.l.bf16 %v10233_v9  ;;  %v8878_v9 = vld [vmem:[%s15103_s5 + $0xac] ss:$12 sps:$4 sm:$0xff]  }
 0x24c   : > { %v8090_v8 = vunpack.i.l.bf16 %v8089_v44  ;;  %v8091_v1 = vunpack.i.h.bf16 %v8089_v44  ;;  %2066 = vmatprep.subr.bf16.mxu1 %v8878_v9  ;;  %v8922_v9 = vld [vmem:[%s15103_s5 + $0x168] ss:$12 sps:$4 sm:$0xff]  }
 0x24d   : > { %v1110_v53 = vsel %vm410_vm8, %v8105_v45, %v8106_v7 }
 0x24e   : > { %v1103_v47 = vsel %vm410_vm8, %v8101_v43, %v8090_v8  ;;  %v10253_v0 = vmax.f32 %v10172_v36, %v1110_v53  ;;  %v1104_v15 = vsel %vm410_vm8, %v8090_v8, %v8091_v1 }
 0x24f   : > { %v8094_v3 = vpop.permute.xlu0 %8093  ;;  %v10243_v50 = vmax.f32 %v10166_v55, %v1103_v47  ;;  %v10264_v19 = vmax.f32 %v10170_v59, %v1104_v15  ;;  %v8884_v15 = vld [vmem:[%s15103_s5 + $0x7c] ss:$12 sps:$4 sm:$0xff]  }
 0x250   : > { %v8095_v51 = vunpack.i.l.bf16 %v8094_v3  ;;  %v8096_v18 = vunpack.i.h.bf16 %v8094_v3 }
 0x251   : > { %v8132_v57 = vpack.i.bf16 %v10243_v50, %v10240_v48 }
 0x252   : > { %v1111_v61 = vsel %vm410_vm8, %v8106_v7, %v8095_v51  ;;  %v1112_v14 = vsel %vm410_vm8, %v8095_v51, %v8096_v18 }
 0x253   : > { %8133 = vrot.lane.b32.xlu0 %v8132_v57, %s15109_s26  ;;  %v10256_v54 = vmax.f32 %v10175_v60, %v1111_v61  ;;  %v10300_v11 = vmax.f32 %v10181_v63, %v1112_v14  ;;  %v8902_v14 = vld [vmem:[%s15103_s5 + $0x34] ss:$12 sps:$4 sm:$0xff]  }
 0x255   : > { %v8137_v55 = vpack.i.bf16 %v10256_v54, %v10253_v0 }
 0x257   : > { %8138 = vrot.lane.b32.xlu0 %v8137_v55, %s15109_s26 }
 0x272   : > { %v8109_v6 = vpop.permute.xlu1 %8108 }
 0x273   : > { %v8111_v12 = vunpack.i.h.bf16 %v8109_v6  ;;  %v8110_v34 = vunpack.i.l.bf16 %v8109_v6  ;;  %v8889_v6 = vld [vmem:[%s15103_s5 + $0x228] ss:$12 sps:$4 sm:$0xff]  }
 0x275   : > { %v1105_v17 = vsel %vm410_vm8, %v8091_v1, %v8110_v34  ;;  %v1106_v58 = vsel %vm410_vm8, %v8110_v34, %v8111_v12  ;;  %v8887_v1 = vld [vmem:[%s15103_s5 + $0x22c] ss:$12 sps:$4 sm:$0xff]   ;;  %v8893_v34 = vld [vmem:[%s15103_s5 + $0x214] ss:$12 sps:$4 sm:$0xff]  }
 0x276   : > { %v8114_v4 = vpop.permute.xlu1 %8113  ;;  %v8124_v36 = vpop.permute.xlu0 %8123  ;;  %v10267_v60 = vmax.f32 %v10177_v38, %v1105_v17  ;;  %v10278_v38 = vmax.f32 %v10208_v31, %v1106_v58  ;;  %2109 = vmatprep.subr.bf16.mxu0 %v8887_v1  ;;  %v8925_v1 = vld [vmem:[%s15103_s5 + $0x198] ss:$12 sps:$4 sm:$0xff]  }
 0x277   : > { %v8116_v20 = vunpack.i.h.bf16 %v8114_v4  ;;  %v8115_v16 = vunpack.i.l.bf16 %v8114_v4  ;;  %v8125_v22 = vunpack.i.l.bf16 %v8124_v36  ;;  %v8126_v25 = vunpack.i.h.bf16 %v8124_v36  ;;  %2110 = vmatpush1.bf16.msra.mxu0 %v8889_v6 }
 0x278   : > { %v8142_v49 = vpack.i.bf16 %v10267_v60, %v10264_v19  ;;  %2111 = vmatprep.subr.bf16.mxu0 %v8893_v34 }
 0x279   : > { %v10272_v27 = vmax.f32 %v9116_v23, %v8115_v16  ;;  %v1107_v52 = vsel %vm410_vm8, %v8111_v12, %v8115_v16  ;;  %v1114_v28 = vsel %vm410_vm8, %v8116_v20, %v8125_v22  ;;  %v1113_v26 = vsel %vm410_vm8, %v8096_v18, %v8116_v20  ;;  %v8883_v12 = vld [vmem:[%s15103_s5 + $0x90] ss:$12 sps:$4 sm:$0xff]  }
 0x27a   : > { %v8119_v59 = vpop.permute.xlu1 %8118  ;;  %v8129_v56 = vpop.permute.xlu0 %8128  ;;  %8143 = vrot.lane.b32.xlu1 %v8142_v49, %s15109_s26  ;;  %v10281_v33 = vmax.f32 %v10210_v32, %v1107_v52  ;;  %v10283_v40 = vmax.f32 %v9118_v35, %v1114_v28  ;;  %v10292_v31 = vmax.f32 %v10186_v37, %v1113_v26  ;;  %v1115_v32 = vsel %vm410_vm8, %v8125_v22, %v8126_v25  ;;  %v8895_v18 = vld [vmem:[%s15103_s5 + $0x210] ss:$12 sps:$4 sm:$0xff]   ;;  %v8886_v22 = vld [vmem:[%s15103_s5 + $0x78] ss:$12 sps:$4 sm:$0xff]   ;;  %v8892_v26 = vld [vmem:[%s15103_s5 + $0x60] ss:$12 sps:$4 sm:$0xff]  }
 0x27b   : > { %v8121_v23 = vunpack.i.h.bf16 %v8119_v59  ;;  %v8120_v13 = vunpack.i.l.bf16 %v8119_v59  ;;  %v8131_v44 = vunpack.i.h.bf16 %v8129_v56  ;;  %v8130_v35 = vunpack.i.l.bf16 %v8129_v56  ;;  %v8899_v16 = vld [vmem:[%s15103_s5 + $0x1fc] ss:$12 sps:$4 sm:$0xff]   ;;  %2112 = vmatpush1.bf16.msra.mxu0 %v8895_v18  ;;  %v8901_v28 = vld [vmem:[%s15103_s5 + $0x1f8] ss:$12 sps:$4 sm:$0xff]  }
 0x27c   : > { %v8147_v62 = vpack.i.bf16 %v10281_v33, %v10278_v38  ;;  %v8157_v43 = vpack.i.bf16 %v10283_v40, %v10272_v27  ;;  %v10309_v3 = vmax.f32 %v10214_v39, %v8126_v25  ;;  %v8152_v51 = vpack.i.bf16 %v10292_v31, %v10300_v11  ;;  %v8890_v25 = vld [vmem:[%s15103_s5 + $0x64] ss:$12 sps:$4 sm:$0xff]   ;;  %2113 = vmatprep.subr.bf16.mxu0 %v8899_v16 }
 0x27d   : > { %v1100_v7 = vsel %vm410_vm8, %v8120_v13, %v8121_v23  ;;  %v1101_v8 = vsel %vm410_vm8, %v8121_v23, %v8100_v2  ;;  %v10316_v53 = vmax.f32 %v10217_v21, %v1115_v32  ;;  %v1108_v63 = vsel %vm410_vm8, %v8130_v35, %v8131_v44  ;;  %v8905_v59 = vld [vmem:[%s15103_s5 + $0x1e4] ss:$12 sps:$4 sm:$0xff]   ;;  %v8911_v23 = vld [vmem:[%s15103_s5 + $0x1cc] ss:$12 sps:$4 sm:$0xff]   ;;  %v8898_v13 = vld [vmem:[%s15103_s5 + $0x48] ss:$12 sps:$4 sm:$0xff]  }
 0x27e   : > { %8148 = vrot.lane.b32.xlu1 %v8147_v62, %s15109_s26  ;;  %8158 = vrot.lane.b32.xlu0 %v8157_v43, %s15109_s26  ;;  %v10303_v47 = vmax.f32 %v10204_v29, %v1100_v7  ;;  %v10306_v37 = vmax.f32 %v10206_v30, %v1101_v8  ;;  %v1109_v29 = vsel %vm410_vm8, %v8131_v44, %v8105_v45  ;;  %v8880_v45 = vld [vmem:[%s15103_s5 + $0xa8] ss:$12 sps:$4 sm:$0xff]   ;;  %v8904_v43 = vld [vmem:[%s15103_s5 + $0x30] ss:$12 sps:$4 sm:$0xff]  }
 0x27f   : > { %v8167_v30 = vpack.i.bf16 %v10309_v3, %v10316_v53  ;;  %v10327_v39 = vmax.f32 %v10219_v24, %v1108_v63  ;;  %v10330_v57 = vmax.f32 %v10223_v41, %v1109_v29  ;;  %v8881_v24 = vld [vmem:[%s15103_s5 + $0x94] ss:$12 sps:$4 sm:$0xff]   ;;  %2067 = vmatpush1.bf16.msra.mxu1 %v8880_v45  ;;  %2114 = vmatpush1.bf16.msra.mxu0 %v8901_v28  ;;  %v8908_v32 = vld [vmem:[%s15103_s5 + $0x1c] ss:$12 sps:$4 sm:$0xff]   ;;  %v8910_v44 = vld [vmem:[%s15103_s5 + $0x18] ss:$12 sps:$4 sm:$0xff]  }
 0x280   : > { %v8162_v2 = vpack.i.bf16 %v10306_v37, %v10303_v47  ;;  %2068 = vmatprep.subr.bf16.mxu1 %v8881_v24  ;;  %2115 = vmatprep.subr.bf16.mxu0 %v8905_v59  ;;  %v8913_v62 = vld [vmem:[%s15103_s5 + $0x1c8] ss:$12 sps:$4 sm:$0xff]   ;;  %v8914_v7 = vld [vmem:[%s15103_s5 + $0x4] ss:$12 sps:$4 sm:$0xff]   ;;  %v8916_v8 = vld [vmem:[%s15103_s5] ss:$12 sps:$4 sm:$0xff]  }
 0x281   : > { %v8172_v21 = vpack.i.bf16 %v10330_v57, %v10327_v39  ;;  %v8919_v29 = vld [vmem:[%s15103_s5 + $0x1b0] ss:$12 sps:$4 sm:$0xff]  }
 0x282   : > { %8153 = vrot.lane.b32.xlu1 %v8152_v51, %s15109_s26  ;;  %8163 = vrot.lane.b32.xlu0 %v8162_v2, %s15109_s26  ;;  %v8917_v51 = vld [vmem:[%s15103_s5 + $0x1b4] ss:$12 sps:$4 sm:$0xff]   ;;  %v8923_v45 = vld [vmem:[%s15103_s5 + $0x19c] ss:$12 sps:$4 sm:$0xff]  }
 0x283   : > { %2069 = vmatpush1.bf16.msra.mxu1 %v8883_v12  ;;  %v8928_v28 = vld [vmem:[%s15103_s5 + $0x150] ss:$12 sps:$4 sm:$0xff]  }
 0x284   : > { %2070 = vmatprep.subr.bf16.mxu1 %v8884_v15 }
 0x286   : > { %8168 = vrot.lane.b32.xlu1 %v8167_v30, %s15109_s26 }
 0x287   : > { %2071 = vmatpush1.bf16.msra.mxu1 %v8886_v22 }
 0x288   : > { %2072 = vmatprep.subr.bf16.mxu1 %v8890_v25  ;;  %v8926_v25 = vld [vmem:[%s15103_s5 + $0x154] ss:$12 sps:$4 sm:$0xff]  }
 0x28a   : > { %8173 = vrot.lane.b32.xlu1 %v8172_v21, %s15109_s26  ;;  %v8920_v21 = vld [vmem:[%s15103_s5 + $0x16c] ss:$12 sps:$4 sm:$0xff]   ;;  %s15128_s26 = smov 24  }
 0x28b   : > { %2073 = vmatpush1.bf16.msra.mxu1 %v8892_v26 }
 0x2c5   : > { %v10345_v41 = vpop.permute.xlu0 %8133 }
 0x2c6   : > { %v8136_v61 = vunpack.i.h.bf16 %v10345_v41  ;;  %v8135_v55 = vunpack.i.l.bf16 %v10345_v41 }
 0x2c8   : > { %v1209_v20 = vsel %vm15199_vm7, %v8135_v55, %v8136_v61 }
 0x2c9   : > { %v10364_v17 = vpop.permute.xlu0 %8138  ;;  %v1243_v49 = vmax.f32 %v10240_v48, %v1209_v20  ;;  %v8896_v48 = vld [vmem:[%s15103_s5 + $0x4c] ss:$12 sps:$4 sm:$0xff]  }
 0x2ca   : > { %v8141_v4 = vunpack.i.h.bf16 %v10364_v17  ;;  %v8140_v36 = vunpack.i.l.bf16 %v10364_v17  ;;  %2074 = vmatprep.subr.bf16.mxu1 %v8896_v48 }
 0x2cb   : > { %2075 = vmatpush1.bf16.msra.mxu1 %v8898_v13 }
 0x2cc   : > { %v1217_v58 = vsel %vm15199_vm7, %v8140_v36, %v8141_v4  ;;  %2076 = vmatprep.subr.bf16.mxu1 %v8902_v14 }
 0x2cd   : > { %v1252_v52 = vmax.f32 %v10253_v0, %v1217_v58  ;;  %v8907_v0 = vld [vmem:[%s15103_s5 + $0x1e0] ss:$12 sps:$4 sm:$0xff]  }
 0x2ce   : > { %2116 = vmatpush1.bf16.msra.mxu0 %v8907_v0  ;;  %v8932_v0 = vld [vmem:[%s15103_s5 + $0x13c] ss:$12 sps:$4 sm:$0xff]  }
 0x2cf   : > { %v10398_v56 = vpack.i.bf16 %v1252_v52, %v1243_v49  ;;  %2117 = vmatprep.subr.bf16.mxu0 %v8911_v23  ;;  %2077 = vmatpush1.bf16.msra.mxu1 %v8904_v43  ;;  %v8934_v43 = vld [vmem:[%s15103_s5 + $0x138] ss:$12 sps:$4 sm:$0xff]  }
 0x2d0   : > { %2078 = vmatprep.subr.bf16.mxu1 %v8908_v32  ;;  %v8935_v32 = vld [vmem:[%s15103_s5 + $0x2ec] ss:$12 sps:$4 sm:$0xff]  }
 0x2d1   : > { %8183 = vrot.lane.b32.xlu0 %v10398_v56, %s15111_s18  ;;  %s15146_s18 = smov 90  }
 0x2d2   : > { %2118 = vmatpush1.bf16.msra.mxu0 %v8913_v62 }
 0x2d3   : > { %2079 = vmatpush1.bf16.msra.mxu1 %v8910_v44  ;;  %2119 = vmatprep.subr.bf16.mxu0 %v8917_v51  ;;  %v8937_v44 = vld [vmem:[%s15103_s5 + $0x2e8] ss:$12 sps:$4 sm:$0xff]  }
 0x2d4   : > { %2080 = vmatprep.subr.bf16.mxu1 %v8914_v7 }
 0x2d6   : > { %2120 = vmatpush1.bf16.msra.mxu0 %v8919_v29 }
 0x2d7   : > { %2081 = vmatpush1.bf16.msra.mxu1 %v8916_v8  ;;  %2121 = vmatprep.subr.bf16.mxu0 %v8923_v45 }
 0x2d8   : > { %2082 = vmatprep.subr.bf16.mxu1 %v8920_v21  ;;  %v8940_v21 = vld [vmem:[%s15103_s5 + $0x120] ss:$12 sps:$4 sm:$0xff]  }
 0x2da   : > { %2122 = vmatpush1.bf16.msra.mxu0 %v8925_v1 }
 0x2db   : > { %2083 = vmatpush2.bf16.msra.mxu1 %v8922_v9  ;;  %v8941_v9 = vld [vmem:[%s15103_s5 + $0x2d4] ss:$12 sps:$4 sm:$0xff]  }
 0x2dc   : > { %2084 = vmatprep.subr.bf16.mxu1 %v8926_v25 }
 0x2df   : > { %2085 = vmatpush2.bf16.msra.mxu1 %v8928_v28 }
 0x2e0   : > { %2086 = vmatprep.subr.bf16.mxu1 %v8932_v0  ;;  %v8967_v0 = vld [vmem:[%s15103_s5 + $0x270] ss:$12 sps:$4 sm:$0xff]  }
 0x2e3   : > { %2087 = vmatpush2.bf16.msra.mxu1 %v8934_v43  ;;  %v8968_v43 = vld [vmem:[%s15103_s5 + $0x170] ss:$12 sps:$4 sm:$0xff]  }
 0x2ec   : > { %v10432_v35 = vpop.permute.xlu1 %8143 }
 0x2ed   : > { %v8145_v30 = vunpack.i.l.bf16 %v10432_v35  ;;  %v8146_v23 = vunpack.i.h.bf16 %v10432_v35 }
 0x2ef   : > { %v1210_v12 = vsel %vm15199_vm7, %v8136_v61, %v8145_v30 }
 0x2f0   : > { %v8149_v2 = vpop.permute.xlu1 %8148  ;;  %v10443_v63 = vpop.permute.xlu0 %8158  ;;  %v1244_v61 = vmax.f32 %v10243_v50, %v1210_v12  ;;  %v8931_v50 = vld [vmem:[%s15103_s5 + $0x180] ss:$12 sps:$4 sm:$0xff]  }
 0x2f1   : > { %v8151_v15 = vunpack.i.h.bf16 %v8149_v2  ;;  %v8150_v18 = vunpack.i.l.bf16 %v8149_v2  ;;  %v8160_v20 = vunpack.i.l.bf16 %v10443_v63 }
 0x2f3   : > { %v1214_v26 = vsel %vm15199_vm7, %v8151_v15, %v8160_v20  ;;  %v1212_v8 = vsel %vm15199_vm7, %v8146_v23, %v8150_v18 }
 0x2f4   : > { %v10458_v24 = vpop.permute.xlu1 %8153  ;;  %v10467_v34 = vpop.permute.xlu0 %8163  ;;  %v10516_v35 = vmax.f32 %v10281_v33, %v1214_v26  ;;  %v1211_v33 = vsel %vm15199_vm7, %v8145_v30, %v8146_v23 }
 0x2f5   : > { %v8155_v6 = vunpack.i.l.bf16 %v10458_v24  ;;  %v8166_v49 = vunpack.i.h.bf16 %v10467_v34  ;;  %v8165_v52 = vunpack.i.l.bf16 %v10467_v34  ;;  %v10552_v34 = vmax.f32 %v10264_v19, %v1211_v33  ;;  %v8946_v19 = vld [vmem:[%s15103_s5 + $0x108] ss:$12 sps:$4 sm:$0xff]  }
 0x2f7   : > { %v1218_v16 = vsel %vm15199_vm7, %v8141_v4, %v8155_v6  ;;  %v8929_v4 = vld [vmem:[%s15103_s5 + $0x184] ss:$12 sps:$4 sm:$0xff]   ;;  %v1207_v62 = vsel %vm15199_vm7, %v8165_v52, %v8166_v49  ;;  %v1208_v17 = vsel %vm15199_vm7, %v8166_v49, %v8135_v55  ;;  %v8156_v55 = vunpack.i.h.bf16 %v10458_v24  ;;  %v8961_v24 = vld [vmem:[%s15103_s5 + $0x288] ss:$12 sps:$4 sm:$0xff]  }
 0x2f8   : > { %v10475_v22 = vpop.permute.xlu1 %8168  ;;  %v1253_v58 = vmax.f32 %v10256_v54, %v1218_v16  ;;  %v1213_v54 = vsel %vm15199_vm7, %v8150_v18, %v8151_v15  ;;  %2123 = vmatprep.subr.bf16.mxu0 %v8929_v4  ;;  %v10522_v2 = vmax.f32 %v10303_v47, %v1207_v62  ;;  %v8943_v47 = vld [vmem:[%s15103_s5 + $0x2d0] ss:$12 sps:$4 sm:$0xff]   ;;  %v8161_v15 = vunpack.i.h.bf16 %v10443_v63  ;;  %v8949_v18 = vld [vmem:[%s15103_s5 + $0x2b8] ss:$12 sps:$4 sm:$0xff]  }
 0x2f9   : > { %2124 = vmatpush1.bf16.msra.mxu0 %v8931_v50  ;;  %v10513_v7 = vmax.f32 %v10278_v38, %v1213_v54  ;;  %v8938_v38 = vld [vmem:[%s15103_s5 + $0x124] ss:$12 sps:$4 sm:$0xff]   ;;  %v8170_v1 = vunpack.i.l.bf16 %v10475_v22  ;;  %v1242_v25 = vmax.f32 %v10306_v37, %v1208_v17  ;;  %v8955_v37 = vld [vmem:[%s15103_s5 + $0x2a0] ss:$12 sps:$4 sm:$0xff]  }
 0x2fa   : > { %v8192_v59 = vpack.i.bf16 %v1253_v58, %v1244_v61  ;;  %2125 = vmatprep.subr.bf16.mxu0 %v8935_v32  ;;  %2088 = vmatprep.subr.bf16.mxu1 %v8938_v38  ;;  %v8171_v61 = vunpack.i.h.bf16 %v10475_v22  ;;  %v8952_v22 = vld [vmem:[%s15103_s5 + $0xf0] ss:$12 sps:$4 sm:$0xff]   ;;  %v8959_v63 = vld [vmem:[%s15103_s5 + $0x28c] ss:$12 sps:$4 sm:$0xff]   ;;  %v1220_v62 = vsel %vm15199_vm7, %v8156_v55, %v8161_v15 }
 0x2fb   : > { %v8207_v30 = vpack.i.bf16 %v10516_v35, %v10513_v7  ;;  %2089 = vmatpush2.bf16.msra.mxu1 %v8940_v21  ;;  %v1221_v58 = vsel %vm15199_vm7, %v8161_v15, %v8170_v1  ;;  %v8953_v49 = vld [vmem:[%s15103_s5 + $0x2a4] ss:$12 sps:$4 sm:$0xff]  }
 0x2fc   : > { %v8174_v48 = vpop.permute.xlu1 %8173  ;;  %8193 = vrot.lane.b32.xlu0 %v8192_v59, %s15115_s28  ;;  %v10598_v52 = vmax.f32 %v10283_v40, %v1221_v58  ;;  %v1222_v50 = vsel %vm15199_vm7, %v8170_v1, %v8171_v61  ;;  %s15154_s28 = smov 116   ;;  %v8958_v40 = vld [vmem:[%s15103_s5 + $0xd8] ss:$12 sps:$4 sm:$0xff]   ;;  %v1258_v23 = vmax.f32 %v10309_v3, %v8171_v61  ;;  %v8969_v3 = vld [vmem:[%s15103_s5 + $0x25c] ss:$12 sps:$4 sm:$0xff]  }
 0x2fd   : > { %v8176_v13 = vunpack.i.h.bf16 %v8174_v48  ;;  %v8175_v14 = vunpack.i.l.bf16 %v8174_v48  ;;  %2126 = vmatpush2.bf16.msra.mxu0 %v8937_v44  ;;  %v8965_v48 = vld [vmem:[%s15103_s5 + $0x274] ss:$12 sps:$4 sm:$0xff]   ;;  %v8972_v32 = vld [vmem:[%s15103_s5 + $0x258] ss:$12 sps:$4 sm:$0xff]   ;;  %v1255_v44 = vmax.f32 %v10292_v31, %v1220_v62  ;;  %v8980_v31 = vld [vmem:[%s15103_s5 + $0x2f0] ss:$12 sps:$4 sm:$0xff]  }
 0x2fe   : > { %2127 = vmatprep.subr.bf16.mxu0 %v8941_v9  ;;  %v8242_v54 = vpack.i.bf16 %v10598_v52, %v10513_v7 }
 0x2ff   : > { %v1215_v51 = vsel %vm15199_vm7, %v8175_v14, %v8176_v13  ;;  %v1216_v12 = vsel %vm15199_vm7, %v8176_v13, %v8140_v36  ;;  %v8947_v36 = vld [vmem:[%s15103_s5 + $0x2bc] ss:$12 sps:$4 sm:$0xff]   ;;  %v8262_v21 = vpack.i.bf16 %v10598_v52, %v1255_v44 }
 0x300   : > { %8203 = vrot.lane.b32.xlu0 %v8192_v59, %s15113_s17  ;;  %v10525_v29 = vmax.f32 %v10327_v39, %v1215_v51  ;;  %v10541_v39 = vmax.f32 %v10267_v60, %v1212_v8  ;;  %v8944_v60 = vld [vmem:[%s15103_s5 + $0x10c] ss:$12 sps:$4 sm:$0xff]   ;;  %v1251_v16 = vmax.f32 %v10330_v57, %v1216_v12  ;;  %v8950_v57 = vld [vmem:[%s15103_s5 + $0xf4] ss:$12 sps:$4 sm:$0xff]   ;;  %v1219_v59 = vsel %vm15199_vm7, %v8155_v6, %v8156_v55  ;;  %s15121_s17 = smov 56  }
 0x301   : > { %2128 = vmatpush2.bf16.msra.mxu0 %v8943_v47  ;;  %2090 = vmatprep.subr.bf16.mxu1 %v8944_v60  ;;  %v1254_v6 = vmax.f32 %v10300_v11, %v1219_v59  ;;  %v8962_v11 = vld [vmem:[%s15103_s5 + $0xc4] ss:$12 sps:$4 sm:$0xff]   ;;  %v8977_v51 = vld [vmem:[%s15103_s5 + $0x240] ss:$12 sps:$4 sm:$0xff]  }
 0x302   : > { %v8177_v45 = vpack.i.bf16 %v10525_v29, %v10522_v2  ;;  %v8212_v41 = vpack.i.bf16 %v10541_v39, %v10552_v34  ;;  %2091 = vmatpush2.bf16.msra.mxu1 %v8946_v19  ;;  %2129 = vmatprep.subr.bf16.mxu0 %v8947_v36  ;;  %v8222_v28 = vpack.i.bf16 %v10513_v7, %v10541_v39  ;;  %v8974_v8 = vld [vmem:[%s15103_s5 + $0x244] ss:$12 sps:$4 sm:$0xff]  }
 0x303   : > { %v8197_v4 = vpack.i.bf16 %v1251_v16, %v1242_v25  ;;  %2092 = vmatprep.subr.bf16.mxu1 %v8950_v57  ;;  %v8227_v14 = vpack.i.bf16 %v1254_v6, %v10552_v34  ;;  %v8237_v38 = vpack.i.bf16 %v1255_v44, %v1254_v6  ;;  %v8257_v33 = vpack.i.bf16 %v1255_v44, %v10541_v39 }
 0x304   : > { %8178 = vrot.lane.b32.xlu1 %v8177_v45, %s15194_s24  ;;  %8208 = vrot.lane.b32.xlu0 %v8207_v30, %s15156_s29 }
 0x305   : > { %2130 = vmatpush2.bf16.msra.mxu0 %v8949_v18 }
 0x306   : > { %2093 = vmatpush2.bf16.msra.mxu1 %v8952_v22  ;;  %2131 = vmatprep.subr.bf16.mxu0 %v8953_v49 }
 0x308   : > { %8188 = vrot.lane.b32.xlu1 %v10398_v56, %s15117_s30  ;;  %8213 = vrot.lane.b32.xlu0 %v8212_v41, %s15204_s21  ;;  %v1249_v56 = vmax.f32 %v10272_v27, %v8160_v20  ;;  %v8956_v27 = vld [vmem:[%s15103_s5 + $0xdc] ss:$12 sps:$4 sm:$0xff]   ;;  %v1257_v20 = vmax.f32 %v10316_v53, %v1222_v50  ;;  %v8964_v53 = vld [vmem:[%s15103_s5 + $0xc0] ss:$12 sps:$4 sm:$0xff]   ;;  %s15125_s30 = smov 96  }
 0x309   : > { %2132 = vmatpush2.bf16.msra.mxu0 %v8955_v37  ;;  %2094 = vmatprep.subr.bf16.mxu1 %v8956_v27 }
 0x30a   : > { %v8217_v26 = vpack.i.bf16 %v1249_v56, %v10516_v35  ;;  %2095 = vmatpush2.bf16.msra.mxu1 %v8958_v40  ;;  %2133 = vmatprep.subr.bf16.mxu0 %v8959_v63  ;;  %v8247_v13 = vpack.i.bf16 %v1257_v20, %v10516_v35  ;;  %v8252_v7 = vpack.i.bf16 %v1258_v23, %v1257_v20 }
 0x30b   : > { %2096 = vmatprep.subr.bf16.mxu1 %v8962_v11  ;;  %v8232_v35 = vpack.i.bf16 %v1257_v20, %v10598_v52 }
 0x30c   : > { %8223 = vrot.lane.b32.xlu0 %v8222_v28, %s15154_s28  ;;  %8198 = vrot.lane.b32.xlu1 %v8197_v4, %s15121_s17  ;;  %s15279_s17 = smov 94  }
 0x30d   : > { %2134 = vmatpush2.bf16.msra.mxu0 %v8961_v24 }
 0x30e   : > { %2097 = vmatpush2.bf16.msra.mxu1 %v8964_v53  ;;  %2135 = vmatprep.subr.bf16.mxu0 %v8965_v48 }
 0x30f   : > { %7783 = vmatprep.subr.bf16.mxu1 %v8968_v43 }
 0x310   : > { %8243 = vrot.lane.b32.xlu0 %v8242_v54, %s15136_s11  ;;  %8218 = vrot.lane.b32.xlu1 %v8217_v26, %s15134_s12  ;;  %s15277_s11 = smov 59  }
 0x311   : > { %2136 = vmatpush2.bf16.msra.mxu0 %v8967_v0 }
 0x312   : > { %2137 = vmatprep.subr.bf16.mxu0 %v8969_v3 }
 0x314   : > { %8248 = vrot.lane.b32.xlu0 %v8247_v13, %s15132_s23  ;;  %8228 = vrot.lane.b32.xlu1 %v8227_v14, %s15125_s30  ;;  %s15152_s30 = smov 91   ;;  %s15148_s23 = smov 109  }
 0x315   : > { %2138 = vmatpush2.bf16.msra.mxu0 %v8972_v32 }
 0x316   : > { %2139 = vmatprep.subr.bf16.mxu0 %v8974_v8 }
 0x318   : > { %8253 = vrot.lane.b32.xlu0 %v8252_v7, %s15134_s12  ;;  %8233 = vrot.lane.b32.xlu1 %v8232_v35, %s15156_s29  ;;  %s15313_s29 = smov 76   ;;  %s15317_s12 = smov 100  }
 0x319   : > { %2140 = vmatpush2.bf16.msra.mxu0 %v8977_v51 }
 0x31a   : > { %7805 = vmatprep.subr.bf16.mxu0 %v8980_v31 }
 0x31c   : > { %8268 = vrot.lane.b32.xlu0 %v8197_v4, %s15130_s15  ;;  %8238 = vrot.lane.b32.xlu1 %v8237_v38, %s15204_s21  ;;  %s15192_s15 = smov 110  }
 0x320   : > { %8258 = vrot.lane.b32.xlu1 %v8257_v33, %s15128_s26  ;;  %s15278_s26 = smov 93  }
 0x324   : > { %8263 = vrot.lane.b32.xlu1 %v8262_v21, %s15154_s28  ;;  %s15314_s28 = smov 116  }
 0x343   : > { %v8184_v9 = vpop.permute.xlu0 %8183 }
 0x344   : > { %v8186_v60 = vunpack.i.h.bf16 %v8184_v9  ;;  %v8185_v15 = vunpack.i.l.bf16 %v8184_v9 }
 0x36e   : > { %v8194_v47 = vpop.permute.xlu0 %8193 }
 0x36f   : > { %v8196_v19 = vunpack.i.h.bf16 %v8194_v47  ;;  %v8195_v36 = vunpack.i.l.bf16 %v8194_v47 }
 0x372   : > { %v8204_v45 = vpop.permute.xlu0 %8203 }
 0x373   : > { %v8206_v41 = vunpack.i.h.bf16 %v8204_v45  ;;  %v8205_v55 = vunpack.i.l.bf16 %v8204_v45 }
 0x376   : > { %v8179_v30 = vpop.permute.xlu1 %8178  ;;  %v8209_v1 = vpop.permute.xlu0 %8208 }
 0x377   : > { %v8181_v28 = vunpack.i.h.bf16 %v8179_v30  ;;  %v8211_v4 = vunpack.i.h.bf16 %v8209_v1  ;;  %v8210_v59 = vunpack.i.l.bf16 %v8209_v1  ;;  %v8180_v63 = vunpack.i.l.bf16 %v8179_v30 }
 0x379   : > { %v1397_v6 = vsel %vm1395_vm12, %v10525_v29, %v8181_v28  ;;  %v1370_v20 = vsel %vm15140_vm14, %v8210_v59, %v8211_v4  ;;  %v1396_v32 = vsel %vm1395_vm12, %v10522_v2, %v8180_v63 }
 0x37a   : > { %v8189_v12 = vpop.permute.xlu1 %8188  ;;  %v10673_v34 = vpop.permute.xlu0 %8213 }
 0x37b   : > { %v8191_v39 = vunpack.i.h.bf16 %v8189_v12  ;;  %v8190_v17 = vunpack.i.l.bf16 %v8189_v12  ;;  %v8216_v29 = vunpack.i.h.bf16 %v10673_v34  ;;  %v8215_v35 = vunpack.i.l.bf16 %v10673_v34 }
 0x37d   : > { %v1404_v18 = vsel %vm1395_vm12, %v8185_v15, %v8190_v17  ;;  %v1405_v16 = vsel %vm1395_vm12, %v8186_v60, %v8191_v39  ;;  %v8971_v17 = vld [vmem:[%s15103_s5 + $0xb0] ss:$12 sps:$4 sm:$0xff]  }
 0x37e   : > { %v10677_v61 = vpop.permute.xlu0 %8223  ;;  %v8199_v58 = vpop.permute.xlu1 %8198  ;;  %v1406_v25 = vsel %vm15145_vm11, %v1404_v18, %v8195_v36  ;;  %v1407_v57 = vsel %vm15145_vm11, %v1405_v16, %v8196_v19 }
 0x37f   : > { %v1408_v22 = vsel %vm15142_vm13, %v1406_v25, %v8205_v55  ;;  %v1409_v49 = vsel %vm15142_vm13, %v1407_v57, %v8206_v41  ;;  %v8201_v54 = vunpack.i.h.bf16 %v8199_v58  ;;  %v8200_v26 = vunpack.i.l.bf16 %v8199_v58  ;;  %v8973_v41 = vld [vmem:[%s15103_s5 + $0x158] ss:$12 sps:$4 sm:$0xff]  }
 0x380   : > { %v10683_v37 = vpack.c.bf16 %v1409_v49, %v1408_v22  ;;  %v1328_v58 = vsel %vm549_vm2, %v8215_v35, %v8216_v29  ;;  %v8226_v25 = vunpack.i.h.bf16 %v10677_v61  ;;  %v8225_v57 = vunpack.i.l.bf16 %v10677_v61  ;;  %v8978_v61 = vld [vmem:[%s15103_s5 + $0x140] ss:$12 sps:$4 sm:$0xff]   ;;  %v8991_v29 = vld [vmem:[%s15103_s5 + $0x38] ss:$12 sps:$4 sm:$0xff]   ;;  %v8996_v35 = vld [vmem:[%s15103_s5 + $0x290] ss:$12 sps:$4 sm:$0xff]  }
 0x381   : > { %v1400_v8 = vsel %vm15145_vm11, %v1397_v6, %v8201_v54  ;;  %v1399_v21 = vsel %vm15145_vm11, %v1396_v32, %v8200_v26  ;;  %v8979_v6 = vld [vmem:[%s15103_s5 + $0x80] ss:$12 sps:$4 sm:$0xff]   ;;  %v8981_v26 = vld [vmem:[%s15103_s5 + $0x230] ss:$12 sps:$4 sm:$0xff]   ;;  %v8992_v32 = vld [vmem:[%s15103_s5 + $0x2a8] ss:$12 sps:$4 sm:$0xff]  }
 0x382   : > { %v8244_v56 = vpop.permute.xlu0 %8243  ;;  %v8219_v52 = vpop.permute.xlu1 %8218  ;;  %2098 = vmatprep.mubr.bf16.mxu1 %v10683_v37 }
 0x383   : > { %v8245_v40 = vunpack.i.l.bf16 %v8244_v56  ;;  %v8221_v48 = vunpack.i.h.bf16 %v8219_v52  ;;  %v8220_v0 = vunpack.i.l.bf16 %v8219_v52  ;;  %v8246_v14 = vunpack.i.h.bf16 %v8244_v56  ;;  %v8976_v56 = vld [vmem:[%s15103_s5 + $0x98] ss:$12 sps:$4 sm:$0xff]  }
 0x385   : > { %v1416_v62 = vsel %vm1395_vm12, %v8245_v40, %v1370_v20  ;;  %v1391_v2 = vsel %vm15127_vm15, %v8220_v0, %v8221_v48  ;;  %v8984_v48 = vld [vmem:[%s15103_s5 + $0x2d8] ss:$12 sps:$4 sm:$0xff]   ;;  %v8983_v0 = vld [vmem:[%s15103_s5 + $0x68] ss:$12 sps:$4 sm:$0xff]  }
 0x386   : > { %v8249_v50 = vpop.permute.xlu0 %8248  ;;  %v10686_v27 = vpop.permute.xlu1 %8228 }
 0x387   : > { %v8250_v24 = vunpack.i.l.bf16 %v8249_v50  ;;  %v8251_v51 = vunpack.i.h.bf16 %v8249_v50  ;;  %v8230_v19 = vunpack.i.l.bf16 %v10686_v27  ;;  %v8231_v52 = vunpack.i.h.bf16 %v10686_v27 }
 0x389   : > { %v1418_v7 = vsel %vm15145_vm11, %v1416_v62, %v8250_v24  ;;  %v1410_v28 = vsel %vm1395_vm12, %v8230_v19, %v1328_v58  ;;  %v8987_v62 = vld [vmem:[%s15103_s5 + $0x50] ss:$12 sps:$4 sm:$0xff]  }
 0x38a   : > { %v8254_v11 = vpop.permute.xlu0 %8253  ;;  %v8234_v53 = vpop.permute.xlu1 %8233  ;;  %v1420_v12 = vsel %vm15142_vm13, %v1418_v7, %v1391_v2  ;;  %v8994_v7 = vld [vmem:[%s15103_s5 + $0xe0] ss:$12 sps:$4 sm:$0xff]   ;;  %v9004_v2 = vld [vmem:[%s15103_s5 + $0x248] ss:$12 sps:$4 sm:$0xff]  }
 0x38b   : > { %v8236_v23 = vunpack.i.h.bf16 %v8234_v53  ;;  %v8235_v13 = vunpack.i.l.bf16 %v8234_v53  ;;  %v8256_v43 = vunpack.i.h.bf16 %v8254_v11  ;;  %v8255_v3 = vunpack.i.l.bf16 %v8254_v11  ;;  %v8982_v53 = vld [vmem:[%s15103_s5 + $0x128] ss:$12 sps:$4 sm:$0xff]  }
 0x38d   : > { %v1371_v44 = vsel %vm15140_vm14, %v8235_v13, %v8236_v23  ;;  %v1392_v30 = vsel %vm15127_vm15, %v8255_v3, %v8256_v43  ;;  %vm15138_vm15 = vcmask 949248   ;;  %v8985_v23 = vld [vmem:[%s15103_s5 + $0x218] ss:$12 sps:$4 sm:$0xff]   ;;  %v8986_v13 = vld [vmem:[%s15103_s5 + $0x110] ss:$12 sps:$4 sm:$0xff]   ;;  %vm15144_vm14 = vcmask 883712  }
 0x38e   : > { %v8269_v38 = vpop.permute.xlu0 %8268  ;;  %v8239_v31 = vpop.permute.xlu1 %8238  ;;  %v1417_v33 = vsel %vm1395_vm12, %v8246_v14, %v1371_v44  ;;  %v1349_v63 = vsel %vm15138_vm15, %v8225_v57, %v8226_v25  ;;  %v8988_v14 = vld [vmem:[%s15103_s5 + $0x2c0] ss:$12 sps:$4 sm:$0xff]   ;;  %v8990_v3 = vld [vmem:[%s15103_s5 + $0xf8] ss:$12 sps:$4 sm:$0xff]   ;;  %v8993_v44 = vld [vmem:[%s15103_s5 + $0x1e8] ss:$12 sps:$4 sm:$0xff]  }
 0x38f   : > { %v8271_v9 = vunpack.i.h.bf16 %v8269_v38  ;;  %v8270_v47 = vunpack.i.l.bf16 %v8269_v38  ;;  %v8241_v45 = vunpack.i.h.bf16 %v8239_v31  ;;  %v1419_v1 = vsel %vm15145_vm11, %v1417_v33, %v8251_v51  ;;  %v8989_v43 = vld [vmem:[%s15103_s5 + $0x200] ss:$12 sps:$4 sm:$0xff]   ;;  %v8997_v51 = vld [vmem:[%s15103_s5 + $0x1d0] ss:$12 sps:$4 sm:$0xff]   ;;  %v8998_v38 = vld [vmem:[%s15103_s5 + $0xc8] ss:$12 sps:$4 sm:$0xff]  }
 0x390   : > { %v8240_v15 = vunpack.i.l.bf16 %v8239_v31  ;;  %v1421_v39 = vsel %vm15142_vm13, %v1419_v1, %v1392_v30  ;;  %v9000_v31 = vld [vmem:[%s15103_s5 + $0x278] ss:$12 sps:$4 sm:$0xff]   ;;  %v8999_v33 = vld [vmem:[%s15103_s5 + $0x8] ss:$12 sps:$4 sm:$0xff]  }
 0x391   : > { %v1402_v34 = vsel %vm15142_vm13, %v1399_v21, %v8270_v47  ;;  %v1403_v60 = vsel %vm15142_vm13, %v1400_v8, %v8271_v9  ;;  %v1425_v18 = vpack.c.bf16 %v1421_v39, %v1420_v12  ;;  %v8995_v8 = vld [vmem:[%s15103_s5 + $0x20] ss:$12 sps:$4 sm:$0xff]   ;;  %v9001_v21 = vld [vmem:[%s15103_s5 + $0x1b8] ss:$12 sps:$4 sm:$0xff]  }
 0x392   : > { %v8259_v36 = vpop.permute.xlu1 %8258  ;;  %v10712_v16 = vpack.c.bf16 %v1403_v60, %v1402_v34  ;;  %v1329_v22 = vsel %vm549_vm2, %v8240_v15, %v8241_v45  ;;  %v9002_v9 = vld [vmem:[%s15103_s5 + $0x260] ss:$12 sps:$4 sm:$0xff]   ;;  %v9005_v45 = vld [vmem:[%s15103_s5 + $0x188] ss:$12 sps:$4 sm:$0xff]  }
 0x393   : > { %v8260_v55 = vunpack.i.l.bf16 %v8259_v36  ;;  %2141 = vmatprep.mubr.bf16.mxu0 %v1425_v18  ;;  %v8261_v49 = vunpack.i.h.bf16 %v8259_v36  ;;  %v9003_v47 = vld [vmem:[%s15103_s5 + $0x1a0] ss:$12 sps:$4 sm:$0xff]  }
 0x394   : > { %2099 = vmatmul.mubr.bf16.vlgmr.msra.gmra.mxu1 %v10712_v16 }
 0x395   : > { %7784 = vmatpush3.bf16.msra.mxu1 %v8971_v17  ;;  %2184 = vmatprep.mubr.bf16.mxu1 %v10683_v37  ;;  %v1412_v59 = vsel %vm15145_vm11, %v1410_v28, %v8260_v55  ;;  %v1411_v37 = vsel %vm1395_vm12, %v8231_v52, %v1329_v22 }
 0x396   : > { %v8264_v4 = vpop.permute.xlu1 %8263  ;;  %7785 = vmatprep.subr.bf16.mxu1 %v8973_v41  ;;  %v1413_v24 = vsel %vm15145_vm11, %v1411_v37, %v8261_v49  ;;  %v1414_v20 = vsel %vm15142_vm13, %v1412_v59, %v1349_v63  ;;  %vm2679_vm11 = vcmask 1046528  }
 0x397   : > { %v8266_v50 = vunpack.i.h.bf16 %v8264_v4  ;;  %v8265_v40 = vunpack.i.l.bf16 %v8264_v4 }
 0x399   : > { %v1350_v27 = vsel %vm15138_vm15, %v8265_v40, %v8266_v50  ;;  %7786 = vmatpush3.bf16.msra.mxu1 %v8976_v56  ;;  %vm15139_vm15 = vcmask 130048  }
 0x39a   : > { %7787 = vmatprep.subr.bf16.mxu1 %v8978_v61  ;;  %v1415_v54 = vsel %vm15142_vm13, %v1413_v24, %v1350_v27  ;;  %v10851_v24 = vld [vmem:[%s15273_s3] sm:$0xff]  ;;  %vm2268_vm13 = vcmask 900096   ;;  %s15352_s3 = smov 126  }
 0x39b   : > { %v1424_v11 = vpack.c.bf16 %v1415_v54, %v1414_v20  ;;  %v10855_v27 = vcombine.high %v10851_v24, %v10851_v24  ;;  %v2334_v54 = vld [vmem:[%s15275_s4] sm:$0xff]  ;;  %s15353_s4 = smov 127  }
 0x39d   : > { %7788 = vmatpush3.bf16.msra.mxu1 %v8979_v6  ;;  %2142 = vmatmul.mubr.bf16.vlgmr.msra.gmra.mxu0 %v1424_v11  ;;  %15274 = vst [vmem:[#allocation6_spill] sm:$0xff] %v10855_v27  ;;  %v7689_v6 = vld [vmem:[%s9757_s19 + $0x28] sm:$0xff] }
 0x39e   : > { %7806 = vmatpush3.bf16.msra.mxu0 %v8981_v26  ;;  %2225 = vmatprep.mubr.bf16.mxu0 %v1425_v18  ;;  %v10886_v20 = vcombine.high %v7689_v6, %v7689_v6  ;;  %v10891_v26 = vcombine.low %v7689_v6, %v7689_v6 }
 0x39f   : > { %7789 = vmatprep.subr.bf16.mxu1 %v8982_v53  ;;  %7807 = vmatprep.subr.bf16.mxu0 %v8984_v48 }
 0x3a1   : > { %7790 = vmatpush3.bf16.msra.mxu1 %v8983_v0 }
 0x3a2   : > { %7808 = vmatpush3.bf16.msra.mxu0 %v8985_v23  ;;  %7791 = vmatprep.subr.bf16.mxu1 %v8986_v13 }
 0x3a3   : > { %7809 = vmatprep.subr.bf16.mxu0 %v8988_v14 }
 0x3a5   : > { %7792 = vmatpush3.bf16.msra.mxu1 %v8987_v62 }
 0x3a6   : > { %7810 = vmatpush3.bf16.msra.mxu0 %v8989_v43  ;;  %7793 = vmatprep.subr.bf16.mxu1 %v8990_v3 }
 0x3a7   : > { %7811 = vmatprep.subr.bf16.mxu0 %v8992_v32 }
 0x3a9   : > { %7794 = vmatpush3.bf16.msra.mxu1 %v8991_v29 }
 0x3aa   : > { %7812 = vmatpush3.bf16.msra.mxu0 %v8993_v44  ;;  %7795 = vmatprep.subr.bf16.mxu1 %v8994_v7 }
 0x3ab   : > { %7813 = vmatprep.subr.bf16.mxu0 %v8996_v35 }
 0x3ad   : > { %7796 = vmatpush3.bf16.msra.mxu1 %v8995_v8 }
 0x3ae   : > { %7814 = vmatpush3.bf16.msra.mxu0 %v8997_v51  ;;  %7797 = vmatprep.subr.bf16.mxu1 %v8998_v38 }
 0x3af   : > { %7815 = vmatprep.subr.bf16.mxu0 %v9000_v31 }
 0x3b1   : > { %7798 = vmatpush3.bf16.msra.mxu1 %v8999_v33 }
 0x3b2   : > { %7816 = vmatpush3.bf16.msra.mxu0 %v9001_v21 }
 0x3b3   : > { %7817 = vmatprep.subr.bf16.mxu0 %v9002_v9 }
 0x3b4   : > { %2185 = vmatmul.mubr.bf16.vlgmr.msra.gmra.mxu1 %v10712_v16 }
 0x3b5   : > { %7652 = vmatprep.mubr.msk.bf16.mxu1 %vm15139_vm15, %v10855_v27 }
 0x3b6   : > { %7818 = vmatpush3.bf16.msra.mxu0 %v9003_v47 }
 0x3b7   : > { %7819 = vmatprep.subr.bf16.mxu0 %v9004_v2 }
 0x3ba   : > { %7820 = vmatpush3.bf16.msra.mxu0 %v9005_v45 }
 0x3bb   : > { %2391 = vmatprep.subr.bf16.mxu0 %v15160_v5 }
 0x3bd   : > { %2226 = vmatmul.mubr.bf16.vlgmr.msra.gmra.mxu0 %v1424_v11  ;;  %v10896_v11 = vld [vmem:[%s9757_s19 + $0x30] sm:$0xff] }
 0x3be   : > { %7653 = vmatprep.mubr.msk.bf16.mxu0 %vm15139_vm15, %v10855_v27  ;;  %v10902_v53 = vcombine.low %v10896_v11, %v10896_v11  ;;  %vm15141_vm15 = vcmask 744448  }
 0x3c0   : > { %15276 = vst [vmem:[#allocation7_spill] sm:$0xff] %v10902_v53 }
 0x454   : > { %v2100_v30 = vpop.f32.mrf.mxu1 }
 0x456   : > { %v2102_v1 = vpop.f32.mrf.mxu1 }
 0x458   : > { %v2104_v12 = vpop.f32.mrf.mxu1 }
 0x45a   : > { %v2106_v60 = vpop.f32.mrf.mxu1 }
 0x45d   : > { %v2143_v34 = vpop.f32.mrf.mxu0 }
 0x45e   : > { %v2144_v37 = vadd.f32 %v2143_v34, %v2100_v30 }
 0x45f   : > { %v2145_v15 = vpop.f32.mrf.mxu0 }
 0x460   : > { %v2146_v59 = vadd.f32 %v2145_v15, %v2102_v1 }
 0x461   : > { %v2147_v17 = vpop.f32.mrf.mxu0 }
 0x462   : > { %v2148_v50 = vadd.f32 %v2147_v17, %v2104_v12 }
 0x463   : > { %v2149_v36 = vpop.f32.mrf.mxu0 }
 0x464   : > { %v2150_v4 = vadd.f32 %v2149_v36, %v2106_v60  ;;  %v10830_v63 = vpack.c.bf16 %v2148_v50, %v2144_v37  ;;  %v10958_v60 = vcombine.low %v10851_v24, %v10851_v24 }
 0x466   : > { %v10824_v40 = vpack.c.bf16 %v2150_v4, %v2146_v59  ;;  %15280 = vst [vmem:[#allocation8_spill] sm:$0xff] %v10958_v60  ;;  %v9685_v4 = vmov 65535  }
 0x474   : > { %v7799_v39 = vpop.f32.mrf.mxu1 }
 0x476   : > { %v7800_v19 = vpop.f32.mrf.mxu1 }
 0x477   : > { %v7801_v22 = vadd.f32 %v7800_v19, %v7799_v39 }
 0x478   : > { %v7802_v18 = vpop.f32.mrf.mxu1 }
 0x47a   : > { %v7803_v55 = vpop.f32.mrf.mxu1 }
 0x47b   : > { %v7804_v49 = vadd.f32 %v7803_v55, %v7802_v18 }
 0x47d   : > { %v7821_v16 = vpop.f32.mrf.mxu0 }
 0x47f   : > { %v7822_v41 = vpop.f32.mrf.mxu0 }
 0x480   : > { %v7823_v25 = vadd.f32 %v7822_v41, %v7821_v16 }
 0x481   : > { %v7824_v58 = vpop.f32.mrf.mxu0 }
 0x482   : > { %v2228_v52 = vadd.f32 %v7823_v25, %v7801_v22 }
 0x483   : > { %v7825_v57 = vpop.f32.mrf.mxu0 }
 0x484   : > { %v7826_v56 = vadd.f32 %v7825_v57, %v7824_v58 }
 0x486   : > { %v2231_v28 = vadd.f32 %v7826_v56, %v7804_v49 }
 0x488   : > { %v10818_v61 = vpack.c.bf16 %v2231_v28, %v2228_v52  ;;  %v9015_v52 = vld [vmem:[%s15104_s6 + $0x104] ss:$8 sps:$4 sm:$0x7f]   ;;  %v9017_v28 = vld [vmem:[%s15104_s6 + $0x100] ss:$8 sps:$4 sm:$0x7f]  }
 0x48a   : > { %2302 = vrot.lane.b32.xlu0 %v10818_v61, %s15194_s24  ;;  %2313 = vrot.lane.b32.xlu1 %v10818_v61, %s15152_s30 }
 0x48e   : > { %2300 = vrot.lane.b32.xlu0 %v10824_v40, %s15194_s24  ;;  %2311 = vrot.lane.b32.xlu1 %v10824_v40, %s15152_s30 }
 0x492   : > { %2298 = vrot.lane.b32.xlu0 %v10830_v63, %s15194_s24  ;;  %2290 = vrot.lane.b32.xlu1 %v10818_v61, %s15150_s22 }
 0x496   : > { %2278 = vrot.lane.b32.xlu0 %v10818_v61, %s15148_s23  ;;  %2309 = vrot.lane.b32.xlu1 %v10830_v63, %s15152_s30  ;;  %s15309_s30 = smov 112  }
 0x49a   : > { %2266 = vrot.lane.b32.xlu0 %v10818_v61, %s15192_s15  ;;  %2288 = vrot.lane.b32.xlu1 %v10824_v40, %s15150_s22 }
 0x49e   : > { %2276 = vrot.lane.b32.xlu0 %v10824_v40, %s15148_s23  ;;  %2255 = vrot.lane.b32.xlu1 %v10818_v61, %s15188_s25 }
 0x4a2   : > { %2244 = vrot.lane.b32.xlu0 %v10818_v61, %s15190_s27  ;;  %2286 = vrot.lane.b32.xlu1 %v10830_v63, %s15150_s22  ;;  %s15310_s22 = smov 40  }
 0x4a6   : > { %2264 = vrot.lane.b32.xlu0 %v10824_v40, %s15192_s15  ;;  %2274 = vrot.lane.b32.xlu1 %v10830_v63, %s15148_s23  ;;  %s15315_s23 = smov 56  }
 0x4aa   : > { %2325 = vrot.lane.b32.xlu0 %v10818_v61, %s15146_s18  ;;  %2262 = vrot.lane.b32.xlu1 %v10830_v63, %s15192_s15 }
 0x4ae   : > { %2251 = vrot.lane.b32.xlu0 %v10830_v63, %s15188_s25  ;;  %2253 = vrot.lane.b32.xlu1 %v10824_v40, %s15188_s25 }
 0x4b2   : > { %2240 = vrot.lane.b32.xlu0 %v10830_v63, %s15190_s27  ;;  %2242 = vrot.lane.b32.xlu1 %v10824_v40, %s15190_s27 }
 0x4b6   : > { %2321 = vrot.lane.b32.xlu0 %v10830_v63, %s15146_s18  ;;  %2323 = vrot.lane.b32.xlu1 %v10824_v40, %s15146_s18  ;;  %s15316_s18 = smov 80  }
 0x4ba   : > { %2337 = vperm.xlu1 %8085, %v2334_v54   ;;  %3026 = vrot.lane.b32.xlu0 %v10886_v20, %s15186_s20 }
 0x4be   : > { %3024 = vrot.lane.b32.xlu1 %v10891_v26, %s15186_s20  ;;  %2968 = vrot.lane.b32.xlu0 %v10886_v20, %s15204_s21 }
 0x4c2   : > { %3028 = vrot.lane.b32.xlu1 %v10902_v53, %s15186_s20  ;;  %2997 = vrot.lane.b32.xlu0 %v10886_v20, %s15277_s11 }
 0x4c6   : > { %2970 = vrot.lane.b32.xlu1 %v10902_v53, %s15204_s21  ;;  %2966 = vrot.lane.b32.xlu0 %v10891_v26, %s15204_s21 }
 0x4ca   : > { %2999 = vrot.lane.b32.xlu1 %v10902_v53, %s15277_s11  ;;  %2914 = vrot.lane.b32.xlu0 %v10886_v20, %s15278_s26 }
 0x4ce   : > { %2995 = vrot.lane.b32.xlu1 %v10891_v26, %s15277_s11  ;;  %2940 = vrot.lane.b32.xlu0 %v10886_v20, %s15194_s24 }
 0x4d2   : > { %2916 = vrot.lane.b32.xlu1 %v10902_v53, %s15278_s26  ;;  %2912 = vrot.lane.b32.xlu0 %v10891_v26, %s15278_s26 }
 0x4d6   : > { %2942 = vrot.lane.b32.xlu1 %v10902_v53, %s15194_s24  ;;  %2862 = vrot.lane.b32.xlu0 %v10886_v20, %s15188_s25 }
 0x4da   : > { %2938 = vrot.lane.b32.xlu1 %v10891_v26, %s15194_s24  ;;  %2888 = vrot.lane.b32.xlu0 %v10886_v20, %s15279_s17 }
 0x4de   : > { %2864 = vrot.lane.b32.xlu1 %v10902_v53, %s15188_s25 }
 0x4e2   : > { %2890 = vrot.lane.b32.xlu1 %v10902_v53, %s15279_s17 }
 0x4fc   : > { %v2303_v48 = vpop.permute.xlu0 %2302  ;;  %v2314_v0 = vpop.permute.xlu1 %2313 }
 0x4fd   : > { %2392 = vmatpush1.bf16.msra.mxu0 %v2314_v0 }
 0x4fe   : > { %2393 = vmatprep.subr.bf16.mxu0 %v15160_v5 }
 0x500   : > { %v2301_v23 = vpop.permute.xlu0 %2300  ;;  %v2312_v13 = vpop.permute.xlu1 %2311 }
 0x501   : > { %2394 = vmatpush1.bf16.msra.mxu0 %v2303_v48  ;;  %v2317_v14 = vsel %vm15141_vm15, %v2312_v13, %v2314_v0  ;;  %v2305_v44 = vsel %vm518_vm5, %v2301_v23, %v2303_v48 }
 0x502   : > { %2350 = vmatprep.subr.bf16.mxu1 %v2317_v14  ;;  %2395 = vmatprep.subr.bf16.mxu0 %v15160_v5 }
 0x504   : > { %v2299_v62 = vpop.permute.xlu0 %2298  ;;  %v2291_v43 = vpop.permute.xlu1 %2290 }
 0x505   : > { %2396 = vmatpush1.bf16.msra.mxu0 %v2291_v43  ;;  %v2304_v8 = vsel %vm518_vm5, %v2299_v62, %v2301_v23 }
 0x506   : > { %2397 = vmatprep.subr.bf16.mxu0 %v15160_v5 }
 0x508   : > { %v2279_v3 = vpop.permute.xlu0 %2278  ;;  %v2310_v32 = vpop.permute.xlu1 %2309 }
 0x509   : > { %v2316_v29 = vsel %vm15141_vm15, %v2310_v32, %v2312_v13  ;;  %2398 = vmatpush1.bf16.msra.mxu0 %v2279_v3  ;;  %vm15143_vm15 = vcmask 891904  }
 0x50a   : > { %2351 = vmatpush1.bf16.msra.mxu1 %v2316_v29  ;;  %2399 = vmatprep.subr.bf16.mxu0 %v15160_v5 }
 0x50b   : > { %2352 = vmatprep.subr.bf16.mxu1 %v2305_v44 }
 0x50c   : > { %v2267_v7 = vpop.permute.xlu0 %2266  ;;  %v2289_v35 = vpop.permute.xlu1 %2288 }
 0x50d   : > { %2400 = vmatpush1.bf16.msra.mxu0 %v2267_v7  ;;  %v2294_v51 = vsel %vm15144_vm14, %v2289_v35, %v2291_v43 }
 0x50e   : > { %2353 = vmatpush1.bf16.msra.mxu1 %v2304_v8  ;;  %2401 = vmatprep.subr.bf16.mxu0 %v15160_v5  ;;  %v7691_v8 = vld [vmem:[%s9757_s19 + $0x38] sm:$0xff] }
 0x50f   : > { %2354 = vmatprep.subr.bf16.mxu1 %v2294_v51  ;;  %v11017_v51 = vcombine.low %v7691_v8, %v7691_v8 }
 0x510   : > { %v2277_v38 = vpop.permute.xlu0 %2276  ;;  %v2256_v31 = vpop.permute.xlu1 %2255 }
 0x511   : > { %2402 = vmatpush1.bf16.msra.mxu0 %v2256_v31  ;;  %v2282_v47 = vsel %vm15143_vm15, %v2277_v38, %v2279_v3  ;;  %15284 = vst [vmem:[#allocation12_spill] sm:$0xff] %v11017_v51 }
 0x512   : > { %2403 = vmatprep.subr.bf16.mxu0 %v15160_v5 }
 0x514   : > { %v2245_v33 = vpop.permute.xlu0 %2244  ;;  %v2287_v21 = vpop.permute.xlu1 %2286 }
 0x515   : > { %v2293_v9 = vsel %vm15144_vm14, %v2287_v21, %v2289_v35  ;;  %2404 = vmatpush1.bf16.msra.mxu0 %v2245_v33  ;;  %vm2678_vm14 = vcmask 1045504   ;;  %v9023_v21 = vld [vmem:[%s15104_s6 + $0x70] ss:$8 sps:$4 sm:$0xff]  }
 0x516   : > { %2355 = vmatpush1.bf16.msra.mxu1 %v2293_v9  ;;  %2405 = vmatprep.subr.bf16.mxu0 %v15160_v5  ;;  %v9024_v9 = vld [vmem:[%s15104_s6 + $0x64] ss:$8 sps:$4 sm:$0xff]  }
 0x517   : > { %2356 = vmatprep.subr.bf16.mxu1 %v2282_v47  ;;  %v11043_v47 = vcombine.high %v10896_v11, %v10896_v11  ;;  %v9029_v11 = vld [vmem:[%s15104_s6 + $0x50] ss:$8 sps:$4 sm:$0xff]  }
 0x518   : > { %v2265_v2 = vpop.permute.xlu0 %2264  ;;  %v2275_v45 = vpop.permute.xlu1 %2274 }
 0x519   : > { %v2281_v30 = vsel %vm15143_vm15, %v2275_v45, %v2277_v38  ;;  %2406 = vmatpush1.bf16.msra.mxu0 %v10818_v61  ;;  %v2270_v1 = vsel %vm2268_vm13, %v2265_v2, %v2267_v7  ;;  %vm2327_vm15 = vcmask 736256   ;;  %v2680_v61 = vsel %vm2678_vm14, 4294967295, %v9685_v4  ;;  %v11020_v38 = vld [vmem:[%s9757_s19 + $0x40] sm:$0xff]  ;;  %15286 = vst [vmem:[#allocation14_spill] sm:$0xff] %v11043_v47  ;;  %v9027_v45 = vld [vmem:[%s15104_s6 + $0x54] ss:$8 sps:$4 sm:$0xff]  }
 0x51a   : > { %2357 = vmatpush1.bf16.msra.mxu1 %v2281_v30  ;;  %2421 = vmatprep.subr.bf16.mxu0 %v15160_v5  ;;  %v2681_v59 = vsel %vm2679_vm11, %v2680_v61, 0  ;;  %v11055_v30 = vcombine.high %v7691_v8, %v7691_v8  ;;  %v9057_v4 = vld [vmem:[%s15104_s6 + $0xb4] ss:$8 sps:$4 sm:$0xff]   ;;  %v9059_v61 = vld [vmem:[%s15104_s6 + $0xb0] ss:$8 sps:$4 sm:$0xff]   ;;  %vm15201_vm11 = vcmask 105472  }
 0x51b   : > { %2358 = vmatprep.subr.bf16.mxu1 %v2270_v1  ;;  %v10986_v37 = vand.u32 %v9015_v52, %v2681_v59  ;;  %v9030_v1 = vld [vmem:[%s15104_s6 + $0x44] ss:$8 sps:$4 sm:$0xff]   ;;  %vm15322_vm14 = vcmask 523264  }
 0x51c   : > { %v2326_v12 = vpop.permute.xlu0 %2325  ;;  %v2263_v34 = vpop.permute.xlu1 %2262  ;;  %v9054_v52 = vld [vmem:[%s15104_s6 + $0xc4] ss:$8 sps:$4 sm:$0xff]  }
 0x51d   : > { %v2269_v15 = vsel %vm2268_vm13, %v2263_v34, %v2265_v2  ;;  %2422 = vmatpush2.bf16.msra.mxu0 %v2326_v12  ;;  %15282 = vst [vmem:[#allocation10_spill] sm:$0xff] %v10986_v37  ;;  %v9026_v2 = vld [vmem:[%s15104_s6 + $0x60] ss:$8 sps:$4 sm:$0xff]   ;;  %v9033_v34 = vld [vmem:[%s15104_s6 + $0x34] ss:$8 sps:$4 sm:$0xff]  }
 0x51e   : > { %2359 = vmatpush1.bf16.msra.mxu1 %v2269_v15  ;;  %2743 = vmatprep.subr.bf16.mxu0 %v10986_v37  ;;  %v9035_v15 = vld [vmem:[%s15104_s6 + $0x30] ss:$8 sps:$4 sm:$0xff]  }
 0x520   : > { %v2252_v39 = vpop.permute.xlu0 %2251  ;;  %2424 = vmatmul.mubr.bf16.vlgmr.msra.gmra.mxu0 %v10958_v60  ;;  %v2254_v17 = vpop.permute.xlu1 %2253 }
 0x521   : > { %v2258_v19 = vsel %vm437_vm6, %v2254_v17, %v2256_v31  ;;  %v2257_v36 = vsel %vm437_vm6, %v2252_v39, %v2254_v17  ;;  %2761 = vmatprep.mubr.bf16.mxu0 %v15160_v5  ;;  %v9020_v31 = vld [vmem:[%s15104_s6 + $0x74] ss:$8 sps:$4 sm:$0xff]   ;;  %v9036_v39 = vld [vmem:[%s15104_s6 + $0x24] ss:$8 sps:$4 sm:$0xff]   ;;  %v9038_v17 = vld [vmem:[%s15104_s6 + $0x20] ss:$8 sps:$4 sm:$0xff]  }
 0x522   : > { %2360 = vmatprep.subr.bf16.mxu1 %v2258_v19  ;;  %v9039_v19 = vld [vmem:[%s15104_s6 + $0x14] ss:$8 sps:$4 sm:$0xff]  }
 0x523   : > { %2361 = vmatpush1.bf16.msra.mxu1 %v2257_v36  ;;  %v9041_v36 = vld [vmem:[%s15104_s6 + $0x10] ss:$8 sps:$4 sm:$0xff]  }
 0x524   : > { %v2241_v18 = vpop.permute.xlu0 %2240  ;;  %v2243_v16 = vpop.permute.xlu1 %2242 }
 0x525   : > { %v2247_v41 = vsel %vm410_vm8, %v2243_v16, %v2245_v33  ;;  %v2246_v55 = vsel %vm410_vm8, %v2241_v18, %v2243_v16  ;;  %v11031_v33 = vcombine.low %v11020_v38, %v11020_v38  ;;  %v9042_v18 = vld [vmem:[%s15104_s6 + $0x4] ss:$8 sps:$4 sm:$0xff]   ;;  %v9044_v16 = vld [vmem:[%s15104_s6] ss:$8 sps:$4 sm:$0xff]  }
 0x526   : > { %2362 = vmatprep.subr.bf16.mxu1 %v2247_v41  ;;  %v9045_v41 = vld [vmem:[%s15104_s6 + $0xf4] ss:$8 sps:$4 sm:$0xff]  }
 0x527   : > { %2363 = vmatpush1.bf16.msra.mxu1 %v2246_v55  ;;  %15285 = vst [vmem:[#allocation13_spill] sm:$0xff] %v11031_v33  ;;  %v9047_v55 = vld [vmem:[%s15104_s6 + $0xf0] ss:$8 sps:$4 sm:$0xff]  }
 0x528   : > { %2364 = vmatprep.subr.bf16.mxu1 %v10824_v40  ;;  %v2324_v58 = vpop.permute.xlu1 %2323  ;;  %v2322_v25 = vpop.permute.xlu0 %2321 }
 0x529   : > { %v2329_v57 = vsel %vm2327_vm15, %v2324_v58, %v2326_v12  ;;  %v2328_v22 = vsel %vm2327_vm15, %v2322_v25, %v2324_v58  ;;  %v9032_v12 = vld [vmem:[%s15104_s6 + $0x40] ss:$8 sps:$4 sm:$0xff]   ;;  %v9048_v58 = vld [vmem:[%s15104_s6 + $0xe4] ss:$8 sps:$4 sm:$0xff]  }
 0x52a   : > { %v9050_v25 = vld [vmem:[%s15104_s6 + $0xe0] ss:$8 sps:$4 sm:$0xff]  }
 0x52b   : > { %2365 = vmatpush1.bf16.msra.mxu1 %v10830_v63  ;;  %v10988_v63 = vand.u32 %v9017_v28, %v2681_v59  ;;  %v9056_v28 = vld [vmem:[%s15104_s6 + $0xc0] ss:$8 sps:$4 sm:$0xff]   ;;  %v9060_v59 = vld [vmem:[%s15104_s6 + $0xa4] ss:$8 sps:$4 sm:$0xff]  }
 0x52c   : > { %2380 = vmatprep.subr.bf16.mxu1 %v2329_v57  ;;  %v10982_v50 = vpop.permute.xlu0 %3026  ;;  %v9051_v57 = vld [vmem:[%s15104_s6 + $0xd4] ss:$8 sps:$4 sm:$0xff]  }
 0x52d   : > { %15283 = vst [vmem:[#allocation11_spill] sm:$0xff] %v10988_v63  ;;  %2744 = vmatpush1.bf16.msra.mxu0 %v10988_v63 }
 0x52f   : > { %2381 = vmatpush2.bf16.msra.mxu1 %v2328_v22  ;;  %v9053_v22 = vld [vmem:[%s15104_s6 + $0xd0] ss:$8 sps:$4 sm:$0xff]  }
 0x530   : > { %2688 = vmatprep.subr.bf16.mxu1 %v9020_v31 }
 0x532   : > { %2383 = vmatmul.mubr.bf16.vlgmr.msra.gmra.mxu1 %v10958_v60 }
 0x533   : > { %2689 = vmatpush1.bf16.msra.mxu1 %v9023_v21 }
 0x534   : > { %2690 = vmatprep.subr.bf16.mxu1 %v9024_v9 }
 0x535   : > { %v10972_v49 = vpop.permute.xlu1 %2337 }
 0x536   : > { %15281 = vst [vmem:[#allocation9_spill] sm:$0xff] %v10972_v49 }
 0x537   : > { %2691 = vmatpush1.bf16.msra.mxu1 %v9026_v2 }
 0x538   : > { %2692 = vmatprep.subr.bf16.mxu1 %v9027_v45 }
 0x539   : > { %v10974_v56 = vpop.permute.xlu1 %3024 }
 0x53b   : > { %2693 = vmatpush1.bf16.msra.mxu1 %v9029_v11 }
 0x53c   : > { %2694 = vmatprep.subr.bf16.mxu1 %v9030_v1 }
 0x53d   : > { %v10984_v40 = vpop.permute.xlu1 %3028 }
 0x53e   : > { %v3045_v24 = vsel %vm15234_vm0, %v10982_v50, %v10984_v40 }
 0x53f   : > { %7704 = vmatprep.subr.msk.bf16.mxu0 %vm15203_vm1, %v3045_v24  ;;  %2695 = vmatpush1.bf16.msra.mxu1 %v9032_v12  ;;  %v9062_v24 = vld [vmem:[%s15104_s6 + $0xa0] ss:$8 sps:$4 sm:$0xff]  }
 0x540   : > { %2696 = vmatprep.subr.bf16.mxu1 %v9033_v34 }
 0x543   : > { %2697 = vmatpush1.bf16.msra.mxu1 %v9035_v15 }
 0x544   : > { %2698 = vmatprep.subr.bf16.mxu1 %v9036_v39 }
 0x547   : > { %2699 = vmatpush1.bf16.msra.mxu1 %v9038_v17 }
 0x548   : > { %2700 = vmatprep.subr.bf16.mxu1 %v9039_v19 }
 0x54b   : > { %2701 = vmatpush1.bf16.msra.mxu1 %v9041_v36 }
 0x54c   : > { %2702 = vmatprep.subr.bf16.mxu1 %v9042_v18  ;;  %v7693_v18 = vld [vmem:[%s9757_s19 + $0x48] sm:$0xff] }
 0x54f   : > { %2703 = vmatpush1.bf16.msra.mxu1 %v9044_v16 }
 0x550   : > { %2704 = vmatprep.subr.bf16.mxu1 %v9045_v41 }
 0x553   : > { %2705 = vmatpush2.bf16.msra.mxu1 %v9047_v55 }
 0x554   : > { %2706 = vmatprep.subr.bf16.mxu1 %v9048_v58 }
 0x557   : > { %2707 = vmatpush2.bf16.msra.mxu1 %v9050_v25 }
 0x558   : > { %2708 = vmatprep.subr.bf16.mxu1 %v9051_v57  ;;  %v11238_v57 = vcombine.low %v7693_v18, %v7693_v18 }
 0x55a   : > { %15287 = vst [vmem:[#allocation15_spill] sm:$0xff] %v11238_v57 }
 0x55b   : > { %2709 = vmatpush2.bf16.msra.mxu1 %v9053_v22 }
 0x55c   : > { %2710 = vmatprep.subr.bf16.mxu1 %v9054_v52 }
 0x55f   : > { %2711 = vmatpush2.bf16.msra.mxu1 %v9056_v28 }
 0x560   : > { %2712 = vmatprep.subr.bf16.mxu1 %v9057_v4 }
 0x563   : > { %2713 = vmatpush2.bf16.msra.mxu1 %v9059_v61 }
 0x564   : > { %2714 = vmatprep.subr.bf16.mxu1 %v9060_v59 }
 0x567   : > { %2715 = vmatpush2.bf16.msra.mxu1 %v9062_v24 }
 0x5e0   : > { %v2425_v6 = vpop.f32.mrf.mxu0 }
 0x5e1   : > { %v2426_v23 = vadd.f32 %v2425_v6, %v10972_v49  ;;  %v9063_v6 = vld [vmem:[%s15104_s6 + $0x94] ss:$8 sps:$4 sm:$0xff]  }
 0x5e2   : > { %v2427_v54 = vpop.f32.mrf.mxu0  ;;  %2716 = vmatprep.subr.bf16.mxu1 %v9063_v6 }
 0x5e3   : > { %v9065_v54 = vld [vmem:[%s15104_s6 + $0x90] ss:$8 sps:$4 sm:$0xff]  }
 0x5e4   : > { %v2428_v48 = vpop.f32.mrf.mxu0  ;;  %2717 = vmatpush2.bf16.msra.mxu1 %v9065_v54 }
 0x5e5   : > { %v9066_v48 = vld [vmem:[%s15104_s6 + $0x84] ss:$8 sps:$4 sm:$0xff]  }
 0x5e6   : > { %v2429_v0 = vpop.f32.mrf.mxu0  ;;  %2718 = vmatprep.subr.bf16.mxu1 %v9066_v48 }
 0x5e7   : > { %v11181_v0 = vpop.permute.xlu1 %2970 }
 0x5f2   : > { %v2384_v13 = vpop.f32.mrf.mxu1 }
 0x5f3   : > { %v2385_v14 = vadd.f32 %v2384_v13, %v10972_v49  ;;  %v11188_v13 = vpop.permute.xlu0 %2968 }
 0x5f4   : > { %v2386_v62 = vpop.f32.mrf.mxu1 }
 0x5f5   : > { %9127 = vtanh.f32 %v2385_v14  ;;  %v2387_v43 = vadd.f32 %v2386_v62, %v10972_v49  ;;  %v11190_v14 = vpop.permute.xlu1 %2999 }
 0x5f6   : > { %9129 = vtanh.f32 %v2426_v23  ;;  %v2388_v3 = vpop.f32.mrf.mxu1  ;;  %v9068_v23 = vld [vmem:[%s15104_s6 + $0x80] ss:$8 sps:$4 sm:$0xff]  }
 0x5f7   : > { %9131 = vtanh.f32 %v2387_v43  ;;  %2719 = vmatpush2.bf16.msra.mxu1 %v9068_v23  ;;  %v11192_v62 = vpop.permute.xlu0 %2997 }
 0x5f8   : > { %v2389_v32 = vpop.f32.mrf.mxu1 }
 0x5f9   : > { %v11194_v43 = vpop.permute.xlu1 %2995 }
 0x5fb   : > { %v11196_v3 = vpop.permute.xlu0 %2966 }
 0x5fd   : > { %v11198_v32 = vpop.permute.xlu1 %2916 }
 0x601   : > { %v11202_v8 = vpop.permute.xlu1 %2942 }
 0x602   : > { %v10999_v29 = vpop.eup %9127 }
 0x603   : > { %v11001_v44 = vpop.eup %9129  ;;  %2437 = vrot.lane.b32.xlu1 %v10999_v29, %s15190_s27 }
 0x604   : > { %v11005_v7 = vpop.eup %9131 }
 0x605   : > { %v8272_v35 = vpack.i.bf16 %v11005_v7, %v11001_v44  ;;  %v11206_v21 = vpop.permute.xlu1 %2938 }
 0x607   : > { %8273 = vrot.lane.b32.xlu0 %v8272_v35, %s15190_s27  ;;  %2886 = vrot.lane.b32.xlu1 %v10891_v26, %s15279_s17  ;;  %v11200_v35 = vpop.permute.xlu0 %2914 }
 0x609   : > { %v11210_v2 = vpop.permute.xlu1 %2864 }
 0x60b   : > { %2860 = vrot.lane.b32.xlu0 %v10891_v26, %s15188_s25  ;;  %2838 = vrot.lane.b32.xlu1 %v10902_v53, %s15190_s27  ;;  %v11204_v31 = vpop.permute.xlu0 %2940 }
 0x60d   : > { %v11214_v11 = vpop.permute.xlu1 %2890 }
 0x60f   : > { %2836 = vrot.lane.b32.xlu0 %v10886_v20, %s15190_s27  ;;  %3032 = vrot.lane.b32.xlu1 %v11017_v51, %s15186_s20  ;;  %v11208_v9 = vpop.permute.xlu0 %2912 }
 0x613   : > { %2834 = vrot.lane.b32.xlu0 %v10891_v26, %s15190_s27  ;;  %3036 = vrot.lane.b32.xlu1 %v11031_v33, %s15186_s20  ;;  %v11212_v45 = vpop.permute.xlu0 %2862 }
 0x617   : > { %3030 = vrot.lane.b32.xlu0 %v11043_v47, %s15186_s20  ;;  %2974 = vrot.lane.b32.xlu1 %v11017_v51, %s15204_s21  ;;  %v11216_v1 = vpop.permute.xlu0 %2888 }
 0x61b   : > { %3034 = vrot.lane.b32.xlu0 %v11055_v30, %s15186_s20  ;;  %3003 = vrot.lane.b32.xlu1 %v11017_v51, %s15277_s11 }
 0x61f   : > { %2972 = vrot.lane.b32.xlu0 %v11043_v47, %s15204_s21  ;;  %2978 = vrot.lane.b32.xlu1 %v11031_v33, %s15204_s21 }
 0x623   : > { %3001 = vrot.lane.b32.xlu0 %v11043_v47, %s15277_s11  ;;  %3007 = vrot.lane.b32.xlu1 %v11031_v33, %s15277_s11 }
 0x627   : > { %2976 = vrot.lane.b32.xlu0 %v11055_v30, %s15204_s21  ;;  %2920 = vrot.lane.b32.xlu1 %v11017_v51, %s15278_s26 }
 0x62b   : > { %3005 = vrot.lane.b32.xlu0 %v11055_v30, %s15277_s11  ;;  %2946 = vrot.lane.b32.xlu1 %v11017_v51, %s15194_s24 }
 0x62f   : > { %2918 = vrot.lane.b32.xlu0 %v11043_v47, %s15278_s26  ;;  %2924 = vrot.lane.b32.xlu1 %v11031_v33, %s15278_s26 }
 0x633   : > { %2944 = vrot.lane.b32.xlu0 %v11043_v47, %s15194_s24  ;;  %2950 = vrot.lane.b32.xlu1 %v11031_v33, %s15194_s24 }
 0x637   : > { %2922 = vrot.lane.b32.xlu0 %v11055_v30, %s15278_s26  ;;  %2868 = vrot.lane.b32.xlu1 %v11017_v51, %s15188_s25 }
 0x63b   : > { %2948 = vrot.lane.b32.xlu0 %v11055_v30, %s15194_s24  ;;  %2894 = vrot.lane.b32.xlu1 %v11017_v51, %s15279_s17 }
 0x63f   : > { %2866 = vrot.lane.b32.xlu0 %v11043_v47, %s15188_s25  ;;  %2872 = vrot.lane.b32.xlu1 %v11031_v33, %s15188_s25 }
 0x643   : > { %2898 = vrot.lane.b32.xlu1 %v11031_v33, %s15279_s17 }
 0x647   : > { %2842 = vrot.lane.b32.xlu1 %v11017_v51, %s15190_s27 }
 0x64b   : > { %2846 = vrot.lane.b32.xlu1 %v11031_v33, %s15190_s27 }
 0x675   : > { %v2438_v12 = vpop.permute.xlu1 %2437 }
 0x679   : > { %v8274_v34 = vpop.permute.xlu0 %8273  ;;  %v11227_v41 = vpop.permute.xlu1 %2886 }
 0x67a   : > { %v8276_v15 = vunpack.i.h.bf16 %v8274_v34  ;;  %v8275_v39 = vunpack.i.l.bf16 %v8274_v34 }
 0x67c   : > { %v2443_v17 = vsel %vm410_vm8, %v2438_v12, %v8276_v15  ;;  %v2444_v19 = vsel %vm410_vm8, %v8276_v15, %v8275_v39  ;;  %v11221_v36 = vmax.f32 %v11001_v44, %v8275_v39 }
 0x67d   : > { %v11225_v16 = vmax.f32 %v11005_v7, %v2444_v19  ;;  %v11229_v55 = vpop.permute.xlu0 %2860  ;;  %v11232_v58 = vmax.f32 %v10999_v29, %v2443_v17  ;;  %v11243_v7 = vpop.permute.xlu1 %2838  ;;  %v11249_v29 = vcombine.high %v11020_v38, %v11020_v38  ;;  %v7703_v38 = vcombine.high %v7693_v18, %v7693_v18 }
 0x67f   : > { %2454 = vrot.lane.b32.xlu1 %v11232_v58, %s15192_s15  ;;  %v8277_v25 = vpack.i.bf16 %v11225_v16, %v11221_v36  ;;  %15288 = vst [vmem:[#allocation16_spill] sm:$0xff] %v11249_v29 }
 0x681   : > { %v11240_v44 = vpop.permute.xlu0 %2836  ;;  %8278 = vrot.lane.b32.xlu0 %v8277_v25, %s15192_s15  ;;  %v11257_v52 = vpop.permute.xlu1 %3032  ;;  %s15320_s15 = smov 20  }
 0x683   : > { %3040 = vrot.lane.b32.xlu1 %v11238_v57, %s15186_s20 }
 0x685   : > { %v11251_v22 = vpop.permute.xlu0 %2834  ;;  %2892 = vrot.lane.b32.xlu0 %v11043_v47, %s15279_s17  ;;  %v11267_v61 = vpop.permute.xlu1 %3036 }
 0x686   : > { %15289 = vst [vmem:[#allocation17_spill] sm:$0xff] %v11267_v61 }
 0x687   : > { %2980 = vrot.lane.b32.xlu1 %v11249_v29, %s15204_s21 }
 0x689   : > { %v11259_v28 = vpop.permute.xlu0 %3030  ;;  %2870 = vrot.lane.b32.xlu0 %v11055_v30, %s15188_s25  ;;  %v11290_v24 = vpop.permute.xlu1 %2974 }
 0x68b   : > { %3009 = vrot.lane.b32.xlu1 %v11249_v29, %s15277_s11 }
 0x68d   : > { %v3035_v4 = vpop.permute.xlu0 %3034  ;;  %2896 = vrot.lane.b32.xlu0 %v11055_v30, %s15279_s17  ;;  %v11296_v6 = vpop.permute.xlu1 %3003 }
 0x68e   : > { %v3049_v59 = vsel %vm15234_vm0, %v3035_v4, %v11267_v61 }
 0x68f   : > { %2984 = vrot.lane.b32.xlu1 %v7703_v38, %s15204_s21  ;;  %7708 = vmatprep.subr.msk.bf16.mxu1 %vm15203_vm1, %v3049_v59 }
 0x691   : > { %2840 = vrot.lane.b32.xlu0 %v11043_v47, %s15190_s27  ;;  %v11301_v54 = vpop.permute.xlu1 %2978  ;;  %v11315_v12 = vpop.permute.xlu0 %2972 }
 0x693   : > { %2926 = vrot.lane.b32.xlu1 %v11249_v29, %s15278_s26 }
 0x695   : > { %2844 = vrot.lane.b32.xlu0 %v11055_v30, %s15190_s27  ;;  %v11305_v48 = vpop.permute.xlu1 %3007  ;;  %v11319_v15 = vpop.permute.xlu0 %3001 }
 0x697   : > { %2952 = vrot.lane.b32.xlu1 %v11249_v29, %s15194_s24 }
 0x699   : > { %3038 = vrot.lane.b32.xlu0 %v11249_v29, %s15186_s20  ;;  %v11311_v23 = vpop.permute.xlu1 %2920  ;;  %v2977_v17 = vpop.permute.xlu0 %2976 }
 0x69b   : > { %2874 = vrot.lane.b32.xlu1 %v11249_v29, %s15188_s25 }
 0x69d   : > { %3042 = vrot.lane.b32.xlu0 %v7703_v38, %s15186_s20  ;;  %v11317_v34 = vpop.permute.xlu1 %2946  ;;  %v3006_v18 = vpop.permute.xlu0 %3005  ;;  %s15311_s20 = smov 4  }
 0x69f   : > { %2900 = vrot.lane.b32.xlu1 %v11249_v29, %s15279_s17 }
 0x6a1   : > { %2982 = vrot.lane.b32.xlu0 %v11238_v57, %s15204_s21  ;;  %v11321_v39 = vpop.permute.xlu1 %2924 }
 0x6a3   : > { %2848 = vrot.lane.b32.xlu1 %v11249_v29, %s15190_s27 }
 0x6a5   : > { %3011 = vrot.lane.b32.xlu0 %v11238_v57, %s15277_s11  ;;  %v11323_v19 = vpop.permute.xlu1 %2950 }
 0x6a9   : > { %3013 = vrot.lane.b32.xlu0 %v7703_v38, %s15277_s11  ;;  %v11325_v25 = vpop.permute.xlu1 %2868  ;;  %v11327_v38 = vpop.permute.xlu0 %2918 }
 0x6aa   : > { %15290 = vst [vmem:[#allocation18_spill] sm:$0xff] %v11327_v38 }
 0x6ad   : > { %2928 = vrot.lane.b32.xlu0 %v11238_v57, %s15278_s26  ;;  %v11329_v59 = vpop.permute.xlu1 %2894  ;;  %v11331_v46 = vpop.permute.xlu0 %2944 }
 0x6ae   : > { %15291 = vst [vmem:[#allocation19_spill] sm:$0xff] %v11331_v46  ;;  %v3044_v46 = vsel %vm15234_vm0, %v10974_v56, %v10982_v50 }
 0x6b1   : > { %2954 = vrot.lane.b32.xlu0 %v11238_v57, %s15194_s24  ;;  %v11333_v5 = vpop.permute.xlu1 %2872  ;;  %v2923_v49 = vpop.permute.xlu0 %2922 }
 0x6b5   : > { %2876 = vrot.lane.b32.xlu0 %v11238_v57, %s15188_s25  ;;  %v11335_v63 = vpop.permute.xlu1 %2898  ;;  %v2949_v60 = vpop.permute.xlu0 %2948  ;;  %s15312_s25 = smov 44  }
 0x6b9   : > { %2902 = vrot.lane.b32.xlu0 %v11238_v57, %s15279_s17  ;;  %v11337_v37 = vpop.permute.xlu1 %2842  ;;  %v11339_v27 = vpop.permute.xlu0 %2866 }
 0x6ba   : > { %15292 = vst [vmem:[#allocation20_spill] sm:$0xff] %v11339_v27 }
 0x6bd   : > { %2850 = vrot.lane.b32.xlu0 %v11238_v57, %s15190_s27  ;;  %v11341_v10 = vpop.permute.xlu1 %2846 }
 0x6f1   : > { %v2455_v57 = vpop.permute.xlu1 %2454 }
 0x6f3   : > { %v8279_v42 = vpop.permute.xlu0 %8278 }
 0x6f4   : > { %v8281_v33 = vunpack.i.h.bf16 %v8279_v42  ;;  %v8280_v29 = vunpack.i.l.bf16 %v8279_v42  ;;  %v2987_v42 = vsel %vm549_vm2, %v11188_v13, %v11181_v0 }
 0x6f6   : > { %v2461_v61 = vsel %vm2268_vm13, %v2455_v57, %v8281_v33  ;;  %v2468_v53 = vmax.f32 %v11221_v36, %v8280_v29  ;;  %v2462_v47 = vsel %vm2268_vm13, %v8281_v33, %v8280_v29  ;;  %v3016_v36 = vsel %vm15202_vm3, %v11192_v62, %v11190_v14 }
 0x6f7   : > { %v11349_v38 = vpop.permute.xlu0 %2892  ;;  %v2467_v27 = vmax.f32 %v11225_v16, %v2462_v47  ;;  %v2466_v51 = vmax.f32 %v11232_v58, %v2461_v61  ;;  %v3048_v57 = vsel %vm15234_vm0, %v11257_v52, %v3035_v4  ;;  %v2991_v29 = vsel %vm549_vm2, %v2977_v17, %v11301_v54  ;;  %v11380_v61 = vpop.permute.xlu1 %3040 }
 0x6f8   : > { %v2471_v33 = vpack.c.bf16 %v2468_v53, %v2468_v53  ;;  %v3020_v47 = vsel %vm15202_vm3, %v3006_v18, %v11305_v48  ;;  %v3198_v16 = vsel %vm15203_vm1, %v3044_v46, 0  ;;  %v2986_v58 = vsel %vm549_vm2, %v11196_v3, %v11188_v13 }
 0x6f9   : > { %v2470_v56 = vpack.c.bf16 %v2467_v27, %v2467_v27  ;;  %v2469_v50 = vpack.c.bf16 %v2466_v51, %v2466_v51  ;;  %v3015_v53 = vsel %vm15202_vm3, %v11194_v43, %v11192_v62  ;;  %v3167_v51 = vsel %vm15203_vm1, %v2987_v42, %v3016_v36 }
 0x6fa   : > { %7688 = vmatmul.mubr.msk.bf16.vlgmr.msra.gmra.mxu0 %vm15201_vm11, %v2471_v33  ;;  %v2931_v4 = vsel %vm15200_vm4, %v11200_v35, %v11198_v32  ;;  %v2957_v46 = vsel %vm518_vm5, %v11204_v31, %v11202_v8  ;;  %v3210_v13 = vsel %vm15203_vm1, %v3048_v57, 0  ;;  %v2990_v62 = vsel %vm549_vm2, %v11290_v24, %v2977_v17 }
 0x6fb   : > { %3231 = vmatpush1.bf16.msra.mxu0 %v3198_v16  ;;  %v2871_v27 = vpop.permute.xlu0 %2870  ;;  %2720 = vmatprep.mubr.bf16.mxu1 %v2470_v56  ;;  %v3019_v43 = vsel %vm15202_vm3, %v11296_v6, %v3006_v18  ;;  %v3183_v3 = vsel %vm15203_vm1, %v2991_v29, %v3020_v47  ;;  %v15293_v42 = vmov 0   ;;  %v2935_v36 = vsel %vm15200_vm4, %v2923_v49, %v11321_v39 }
 0x6fc   : > { %3232 = vmatprep.subr.bf16.mxu0 %v3167_v51  ;;  %2721 = vmatmul.mubr.bf16.vlgmr.msra.gmra.mxu1 %v2469_v50  ;;  %v2961_v33 = vsel %vm518_vm5, %v2949_v60, %v11323_v19  ;;  %v3163_v57 = vsel %vm15203_vm1, %v2986_v58, %v3015_v53  ;;  %v2930_v17 = vsel %vm15200_vm4, %v11208_v9, %v11200_v35  ;;  %v11414_v9 = vpop.permute.xlu1 %2980 }
 0x6fd   : > { %3317 = vmatpush1.bf16.msra.mxu1 %v3210_v13  ;;  %3256 = vmatprep.mubr.bf16.mxu0 %v15293_v42  ;;  %v2956_v18 = vsel %vm518_vm5, %v11206_v21, %v11204_v31  ;;  %v3131_v50 = vsel %vm15203_vm1, %v2931_v4, %v2957_v46  ;;  %v2879_v29 = vsel %vm437_vm6, %v11212_v45, %v11210_v2 }
 0x6fe   : > { %3318 = vmatprep.subr.bf16.mxu1 %v3183_v3  ;;  %3342 = vmatprep.mubr.bf16.mxu1 %v15293_v42  ;;  %v2905_v47 = vsel %vm15199_vm7, %v11216_v1, %v11214_v11  ;;  %v3179_v16 = vsel %vm15203_vm1, %v2990_v62, %v3019_v43  ;;  %v2934_v35 = vsel %vm15200_vm4, %v11311_v23, %v2923_v49 }
 0x6ff   : > { %3233 = vmatpush1.bf16.msra.mxu0 %v3163_v57  ;;  %v2897_v56 = vpop.permute.xlu0 %2896  ;;  %v2960_v31 = vsel %vm518_vm5, %v11317_v34, %v2949_v60  ;;  %v3147_v21 = vsel %vm15203_vm1, %v2935_v36, %v2961_v33  ;;  %v3127_v53 = vsel %vm15203_vm1, %v2930_v17, %v2956_v18  ;;  %v2878_v51 = vsel %vm437_vm6, %v11229_v55, %v11212_v45 }
 0x700   : > { %3234 = vmatprep.subr.bf16.mxu0 %v3131_v50  ;;  %v2909_v58 = vsel %vm15199_vm7, %v2897_v56, %v11335_v63  ;;  %v3095_v60 = vsel %vm15203_vm1, %v2879_v29, %v2905_v47  ;;  %v2853_v4 = vsel %vm410_vm8, %v11240_v44, %v11243_v7  ;;  %v2883_v46 = vsel %vm437_vm6, %v2871_v27, %v11333_v5  ;;  %v11474_v47 = vld [vmem:[%s15099_s1] sm:$0xff]  }
 0x701   : > { %3319 = vmatpush1.bf16.msra.mxu1 %v3179_v16  ;;  %v3143_v13 = vsel %vm15203_vm1, %v2934_v35, %v2960_v31  ;;  %v2904_v62 = vsel %vm15199_vm7, %v11227_v41, %v11216_v1  ;;  %v2908_v45 = vsel %vm15199_vm7, %v11329_v59, %v2897_v56  ;;  %v3111_v55 = vsel %vm15203_vm1, %v2883_v46, %v2909_v58  ;;  %v11445_v41 = vpop.permute.xlu1 %3009  ;;  %v15296_v35 = vld [vmem:[#allocation18_spill] sm:$0xff]  ;;  %v15298_v46 = vld [vmem:[#allocation20_spill] sm:$0xff] }
 0x702   : > { %3320 = vmatprep.subr.bf16.mxu1 %v3147_v21  ;;  %v3091_v43 = vsel %vm15203_vm1, %v2878_v51, %v2904_v62  ;;  %v2852_v3 = vsel %vm410_vm8, %v11251_v22, %v11240_v44  ;;  %v2882_v36 = vsel %vm437_vm6, %v11325_v25, %v2871_v27  ;;  %v3059_v1 = vsel %vm15203_vm1, %v10886_v20, %v2853_v4  ;;  %v15297_v21 = vld [vmem:[#allocation19_spill] sm:$0xff] }
 0x703   : > { %3235 = vmatpush1.bf16.msra.mxu0 %v3127_v53  ;;  %v11422_v49 = vpop.permute.xlu0 %2840  ;;  %v3107_v17 = vsel %vm15203_vm1, %v2882_v36, %v2908_v45  ;;  %v3055_v22 = vsel %vm15203_vm1, %v10891_v26, %v2852_v3  ;;  %v3046_v20 = vsel %vm15234_vm0, %v10984_v40, %v11259_v28  ;;  %v3047_v56 = vsel %vm15234_vm0, %v11259_v28, %v11257_v52  ;;  %v15294_v26 = vld [vmem:[#allocation12_spill] sm:$0xff]  ;;  %v15299_v3 = vld [vmem:[#allocation14_spill] sm:$0xff] }
 0x704   : > { %3236 = vmatprep.subr.bf16.mxu0 %v3095_v60  ;;  %v2989_v50 = vsel %vm549_vm2, %v11315_v12, %v11290_v24  ;;  %v3204_v52 = vsel %vm15203_vm1, %v3046_v20, 0  ;;  %v15295_v28 = vmov 0.0   ;;  %v3017_v24 = vsel %vm15202_vm3, %v11190_v14, %v11319_v15 }
 0x705   : > { %3321 = vmatpush1.bf16.msra.mxu1 %v3143_v13  ;;  %v2985_v40 = vpop.permute.xlu1 %2984  ;;  %v2933_v31 = vsel %vm15200_vm4, %v15296_v35, %v11311_v23  ;;  %v2959_v58 = vsel %vm518_vm5, %v15297_v21, %v11317_v34  ;;  %v2988_v14 = vsel %vm549_vm2, %v11181_v0, %v11315_v12  ;;  %v2958_v34 = vsel %vm518_vm5, %v11202_v8, %v15297_v21 }
 0x706   : > { %3322 = vmatprep.subr.bf16.mxu1 %v3111_v55  ;;  %v3171_v23 = vsel %vm15203_vm1, %v2988_v14, %v3017_v24  ;;  %v3139_v60 = vsel %vm15203_vm1, %v2933_v31, %v2959_v58  ;;  %v2907_v0 = vsel %vm15199_vm7, %v11349_v38, %v11329_v59  ;;  %v2932_v4 = vsel %vm15200_vm4, %v11198_v32, %v15296_v35 }
 0x707   : > { %3237 = vmatpush1.bf16.msra.mxu0 %v3091_v43  ;;  %v2845_v33 = vpop.permute.xlu0 %2844  ;;  %v2881_v8 = vsel %vm437_vm6, %v15298_v46, %v11325_v25  ;;  %v3135_v13 = vsel %vm15203_vm1, %v2932_v4, %v2958_v34  ;;  %v2906_v62 = vsel %vm15199_vm7, %v11214_v11, %v11349_v38  ;;  %v2855_v55 = vsel %vm410_vm8, %v11422_v49, %v11337_v37  ;;  %v15302_v34 = vld [vmem:[#allocation15_spill] sm:$0xff] }
 0x708   : > { %v2857_v57 = vsel %vm410_vm8, %v2845_v33, %v11341_v10  ;;  %3238 = vmatprep.subr.bf16.mxu0 %v3059_v1  ;;  %v2856_v18 = vsel %vm410_vm8, %v11337_v37, %v2845_v33  ;;  %v3103_v59 = vsel %vm15203_vm1, %v2881_v8, %v2907_v0  ;;  %v2880_v32 = vsel %vm437_vm6, %v11210_v2, %v15298_v46  ;;  %v15300_v2 = vld [vmem:[#allocation7_spill] sm:$0xff]  ;;  %v15304_v0 = vld [vmem:[#allocation13_spill] sm:$0xff]  ;;  %v9265_v8 = vld [vmem:[%s15103_s5 + $0x214] ss:$12 sps:$4 sm:$0xff]  }
 0x709   : > { %3323 = vmatpush1.bf16.msra.mxu1 %v3107_v17  ;;  %v3075_v44 = vsel %vm15203_vm1, %v11055_v30, %v2857_v57  ;;  %v3018_v30 = vsel %vm15202_vm3, %v11319_v15, %v11296_v6  ;;  %v3071_v29 = vsel %vm15203_vm1, %v15294_v26, %v2856_v18  ;;  %v2927_v12 = vpop.permute.xlu1 %2926  ;;  %v3099_v43 = vsel %vm15203_vm1, %v2880_v32, %v2906_v62  ;;  %v15301_v17 = vld [vmem:[#allocation17_spill] sm:$0xff]  ;;  %v9267_v62 = vld [vmem:[%s15103_s5 + $0x94] ss:$12 sps:$4 sm:$0xff]   ;;  %v9272_v32 = vld [vmem:[%s15103_s5 + $0x1f8] ss:$12 sps:$4 sm:$0xff]  }
 0x70a   : > { %3324 = vmatprep.subr.bf16.mxu1 %v3075_v44  ;;  %v3175_v16 = vsel %vm15203_vm1, %v2989_v50, %v3018_v30  ;;  %v2854_v11 = vsel %vm410_vm8, %v11243_v7, %v11422_v49  ;;  %v3067_v36 = vsel %vm15203_vm1, %v15299_v3, %v2855_v55  ;;  %v9262_v4 = vld [vmem:[%s15103_s5 + $0x22c] ss:$12 sps:$4 sm:$0xff]   ;;  %v9264_v46 = vld [vmem:[%s15103_s5 + $0x228] ss:$12 sps:$4 sm:$0xff]  }
 0x70b   : > { %3239 = vmatpush1.bf16.msra.mxu0 %v3055_v22  ;;  %v3039_v27 = vpop.permute.xlu0 %3038  ;;  %v3063_v57 = vsel %vm15203_vm1, %v15300_v2, %v2854_v11  ;;  %v9271_v55 = vld [vmem:[%s15103_s5 + $0x7c] ss:$12 sps:$4 sm:$0xff]   ;;  %v9275_v11 = vld [vmem:[%s15103_s5 + $0x64] ss:$12 sps:$4 sm:$0xff]   ;;  %v9277_v3 = vld [vmem:[%s15103_s5 + $0x1cc] ss:$12 sps:$4 sm:$0xff]  }
 0x70c   : > { %7706 = vmatprep.subr.msk.bf16.mxu0 %vm15203_vm1, %v3047_v56  ;;  %v3050_v18 = vsel %vm15234_vm0, %v15301_v17, %v3039_v27  ;;  %v3051_v49 = vsel %vm15234_vm0, %v3039_v27, %v11380_v61  ;;  %v9282_v2 = vld [vmem:[%s15103_s5 + $0x48] ss:$12 sps:$4 sm:$0xff]   ;;  %v9284_v17 = vld [vmem:[%s15103_s5 + $0x1b0] ss:$12 sps:$4 sm:$0xff]  }
 0x70d   : > { %3325 = vmatpush1.bf16.msra.mxu1 %v3071_v29  ;;  %v2953_v25 = vpop.permute.xlu1 %2952  ;;  %v3216_v56 = vsel %vm15203_vm1, %v3050_v18, 0  ;;  %v9285_v18 = vld [vmem:[%s15103_s5 + $0x19c] ss:$12 sps:$4 sm:$0xff]  }
 0x70e   : > { %7705 = vmatmul.mubr.msk.bf16.vlgmr.msra.gmra.mxu0 %vm15198_vm9, %v11474_v47  ;;  %7994 = vmatprep.subr.bf16.mxu1 %v15295_v28  ;;  %v2962_v24 = vsel %vm518_vm5, %v11323_v19, %v2953_v25 }
 0x70f   : > { %3274 = vmatpush1.bf16.msra.mxu0 %v3204_v52  ;;  %v3043_v6 = vpop.permute.xlu0 %3042  ;;  %3299 = vmatprep.mubr.bf16.mxu0 %v15293_v42 }
 0x710   : > { %v3052_v53 = vsel %vm15234_vm0, %v11380_v61, %v3043_v6  ;;  %3275 = vmatprep.subr.bf16.mxu0 %v3175_v16  ;;  %7709 = vmatmul.mubr.msk.bf16.vlgmr.msra.gmra.mxu1 %vm15198_vm9, %v11474_v47  ;;  %v3021_v61 = vsel %vm15202_vm3, %v11305_v48, %v11445_v41  ;;  %v2936_v16 = vsel %vm15200_vm4, %v11321_v39, %v2927_v12 }
 0x711   : > { %v3222_v15 = vsel %vm15203_vm1, %v3052_v53, 0  ;;  %8004 = vmatprep.mubr.msk.bf16.mxu1 %vm15196_vm10, %v15295_v28  ;;  %v2875_v44 = vpop.permute.xlu1 %2874  ;;  %v3151_v35 = vsel %vm15203_vm1, %v2936_v16, %v2962_v24  ;;  %v9302_v24 = vld [vmem:[%s15103_s5 + $0x150] ss:$12 sps:$4 sm:$0xff]   ;;  %v9304_v16 = vld [vmem:[%s15103_s5 + $0x2b8] ss:$12 sps:$4 sm:$0xff]   ;;  %vm15323_vm10 = vmmov %vm15322_vm14 }
 0x712   : > { %7995 = vmatpush3.bf16.msra.mxu1 %v3222_v15  ;;  %v2884_v53 = vsel %vm437_vm6, %v11333_v5, %v2875_v44  ;;  %v15303_v5 = vld [vmem:[#allocation16_spill] sm:$0xff] }
 0x713   : > { %3276 = vmatpush1.bf16.msra.mxu0 %v3171_v23  ;;  %v2983_v51 = vpop.permute.xlu0 %2982  ;;  %7996 = vmatprep.subr.bf16.mxu1 %v15295_v28 }
 0x714   : > { %3277 = vmatprep.subr.bf16.mxu0 %v3139_v60  ;;  %v2994_v33 = vsel %vm549_vm2, %v2983_v51, %v2985_v40  ;;  %v2993_v20 = vsel %vm549_vm2, %v11414_v9, %v2983_v51  ;;  %v2992_v40 = vsel %vm549_vm2, %v11301_v54, %v11414_v9 }
 0x715   : > { %v3187_v52 = vsel %vm15203_vm1, %v2992_v40, %v3021_v61  ;;  %v9292_v61 = vld [vmem:[%s15103_s5 + $0x180] ss:$12 sps:$4 sm:$0xff]   ;;  %v9298_v40 = vld [vmem:[%s15103_s5 + $0x168] ss:$12 sps:$4 sm:$0xff]  }
 0x717   : > { %3278 = vmatpush1.bf16.msra.mxu0 %v3135_v13  ;;  %v3012_v45 = vpop.permute.xlu0 %3011  ;;  %v9266_v13 = vld [vmem:[%s15103_s5 + $0xa8] ss:$12 sps:$4 sm:$0xff]  }
 0x718   : > { %3279 = vmatprep.subr.bf16.mxu0 %v3103_v59  ;;  %v3022_v22 = vsel %vm15202_vm3, %v11445_v41, %v3012_v45  ;;  %v2901_v41 = vpop.permute.xlu1 %2900  ;;  %v9270_v59 = vld [vmem:[%s15103_s5 + $0x90] ss:$12 sps:$4 sm:$0xff]  }
 0x719   : > { %v3191_v50 = vsel %vm15203_vm1, %v2993_v20, %v3022_v22  ;;  %v2910_v54 = vsel %vm15199_vm7, %v11335_v63, %v2901_v41  ;;  %v9289_v22 = vld [vmem:[%s15103_s5 + $0x184] ss:$12 sps:$4 sm:$0xff]  }
 0x71a   : > { %v3115_v14 = vsel %vm15203_vm1, %v2884_v53, %v2910_v54  ;;  %v9290_v20 = vld [vmem:[%s15103_s5 + $0x18] ss:$12 sps:$4 sm:$0xff]   ;;  %v9312_v53 = vld [vmem:[%s15103_s5 + $0x288] ss:$12 sps:$4 sm:$0xff]  }
 0x71b   : > { %3280 = vmatpush1.bf16.msra.mxu0 %v3099_v43  ;;  %v3014_v38 = vpop.permute.xlu0 %3013  ;;  %v9274_v43 = vld [vmem:[%s15103_s5 + $0x78] ss:$12 sps:$4 sm:$0xff]  }
 0x71c   : > { %v3023_v37 = vsel %vm15202_vm3, %v3012_v45, %v3014_v38  ;;  %3281 = vmatprep.subr.bf16.mxu0 %v3067_v36  ;;  %v2849_v31 = vpop.permute.xlu1 %2848  ;;  %v9268_v45 = vld [vmem:[%s15103_s5 + $0x210] ss:$12 sps:$4 sm:$0xff]   ;;  %v9276_v38 = vld [vmem:[%s15103_s5 + $0x1e0] ss:$12 sps:$4 sm:$0xff]   ;;  %v9306_v54 = vld [vmem:[%s15103_s5 + $0x138] ss:$12 sps:$4 sm:$0xff]  }
 0x71d   : > { %v3195_v1 = vsel %vm15203_vm1, %v2994_v33, %v3023_v37  ;;  %v2858_v63 = vsel %vm410_vm8, %v11341_v10, %v2849_v31  ;;  %v9263_v10 = vld [vmem:[%s15103_s5 + $0xac] ss:$12 sps:$4 sm:$0xff]   ;;  %v9280_v37 = vld [vmem:[%s15103_s5 + $0x1c8] ss:$12 sps:$4 sm:$0xff]  }
 0x71e   : > { %7997 = vmatpush3.bf16.msra.mxu1 %v3195_v1  ;;  %v9278_v36 = vld [vmem:[%s15103_s5 + $0x60] ss:$12 sps:$4 sm:$0xff]  }
 0x71f   : > { %3282 = vmatpush1.bf16.msra.mxu0 %v3063_v57  ;;  %v2929_v7 = vpop.permute.xlu0 %2928  ;;  %7998 = vmatprep.subr.bf16.mxu1 %v15295_v28  ;;  %v9279_v33 = vld [vmem:[%s15103_s5 + $0x4c] ss:$12 sps:$4 sm:$0xff]   ;;  %v9281_v1 = vld [vmem:[%s15103_s5 + $0x1b4] ss:$12 sps:$4 sm:$0xff]  }
 0x720   : > { %7710 = vmatprep.subr.msk.bf16.mxu0 %vm15203_vm1, %v3051_v49  ;;  %v2937_v30 = vsel %vm15200_vm4, %v2927_v12, %v2929_v7  ;;  %v3079_v12 = vsel %vm15203_vm1, %v15304_v0, %v2858_v63  ;;  %v9283_v57 = vld [vmem:[%s15103_s5 + $0x34] ss:$12 sps:$4 sm:$0xff]   ;;  %v9287_v49 = vld [vmem:[%s15103_s5 + $0x1c] ss:$12 sps:$4 sm:$0xff]   ;;  %v9322_v0 = vld [vmem:[%s15103_s5 + $0xd8] ss:$12 sps:$4 sm:$0xff]  }
 0x721   : > { %v9315_v63 = vld [vmem:[%s15103_s5 + $0xf4] ss:$12 sps:$4 sm:$0xff]   ;;  %vm15331_vm4 = vcmask 818176  }
 0x722   : > { %7707 = vmatmul.mubr.msk.bf16.vlgmr.msra.gmra.mxu0 %vm15198_vm9, %v11474_v47  ;;  %vm15332_vm11 = vmmov %vm15331_vm4 }
 0x723   : > { %3360 = vmatpush1.bf16.msra.mxu0 %v3216_v56  ;;  %v2955_v27 = vpop.permute.xlu0 %2954  ;;  %3385 = vmatprep.mubr.bf16.mxu0 %v15293_v42  ;;  %v9291_v56 = vld [vmem:[%s15103_s5 + $0x4] ss:$12 sps:$4 sm:$0xff]  }
 0x724   : > { %v2963_v26 = vsel %vm518_vm5, %v2953_v25, %v2955_v27  ;;  %3361 = vmatprep.subr.bf16.mxu0 %v3191_v50  ;;  %v3159_v29 = vsel %vm15203_vm1, %v2929_v7, %v2955_v27  ;;  %v9273_v25 = vld [vmem:[%s15103_s5 + $0x1e4] ss:$12 sps:$4 sm:$0xff]   ;;  %v9293_v27 = vld [vmem:[%s15103_s5 + $0x2ec] ss:$12 sps:$4 sm:$0xff]  }
 0x725   : > { %7999 = vmatpush3.bf16.msra.mxu1 %v3159_v29  ;;  %v3155_v48 = vsel %vm15203_vm1, %v2937_v30, %v2963_v26  ;;  %v9286_v7 = vld [vmem:[%s15103_s5 + $0x30] ss:$12 sps:$4 sm:$0xff]   ;;  %v9294_v50 = vld [vmem:[%s15103_s5] ss:$12 sps:$4 sm:$0xff]   ;;  %v9296_v26 = vld [vmem:[%s15103_s5 + $0x2e8] ss:$12 sps:$4 sm:$0xff]  }
 0x726   : > { %8000 = vmatprep.subr.bf16.mxu1 %v15295_v28  ;;  %v9295_v30 = vld [vmem:[%s15103_s5 + $0x16c] ss:$12 sps:$4 sm:$0xff]   ;;  %v9297_v29 = vld [vmem:[%s15103_s5 + $0x2d4] ss:$12 sps:$4 sm:$0xff]  }
 0x727   : > { %3362 = vmatpush1.bf16.msra.mxu0 %v3187_v52  ;;  %v2877_v6 = vpop.permute.xlu0 %2876  ;;  %v9301_v52 = vld [vmem:[%s15103_s5 + $0x2bc] ss:$12 sps:$4 sm:$0xff]  }
 0x728   : > { %3363 = vmatprep.subr.bf16.mxu0 %v3155_v48  ;;  %v2885_v21 = vsel %vm437_vm6, %v2875_v44, %v2877_v6  ;;  %v9288_v44 = vld [vmem:[%s15103_s5 + $0x198] ss:$12 sps:$4 sm:$0xff]   ;;  %v9299_v48 = vld [vmem:[%s15103_s5 + $0x154] ss:$12 sps:$4 sm:$0xff]  }
 0x72b   : > { %3364 = vmatpush1.bf16.msra.mxu0 %v3151_v35  ;;  %v2903_v9 = vpop.permute.xlu0 %2902  ;;  %v9305_v35 = vld [vmem:[%s15103_s5 + $0x2a4] ss:$12 sps:$4 sm:$0xff]  }
 0x72c   : > { %v2911_v58 = vsel %vm15199_vm7, %v2901_v41, %v2903_v9  ;;  %v3123_v19 = vsel %vm15203_vm1, %v2877_v6, %v2903_v9  ;;  %v9300_v41 = vld [vmem:[%s15103_s5 + $0x2d0] ss:$12 sps:$4 sm:$0xff]  }
 0x72d   : > { %8001 = vmatpush3.bf16.msra.mxu1 %v3123_v19  ;;  %v3119_v39 = vsel %vm15203_vm1, %v2885_v21, %v2911_v58  ;;  %v9303_v6 = vld [vmem:[%s15103_s5 + $0x13c] ss:$12 sps:$4 sm:$0xff]   ;;  %v9307_v9 = vld [vmem:[%s15103_s5 + $0x124] ss:$12 sps:$4 sm:$0xff]   ;;  %v9309_v21 = vld [vmem:[%s15103_s5 + $0x28c] ss:$12 sps:$4 sm:$0xff]  }
 0x72e   : > { %3365 = vmatprep.subr.bf16.mxu0 %v3119_v39  ;;  %8002 = vmatprep.subr.bf16.mxu1 %v15295_v28  ;;  %v9310_v58 = vld [vmem:[%s15103_s5 + $0x120] ss:$12 sps:$4 sm:$0xff]  }
 0x72f   : > { %v2851_v15 = vpop.permute.xlu0 %2850  ;;  %3366 = vmatpush1.bf16.msra.mxu0 %v3115_v14  ;;  %v9311_v19 = vld [vmem:[%s15103_s5 + $0x10c] ss:$12 sps:$4 sm:$0xff]   ;;  %v9313_v39 = vld [vmem:[%s15103_s5 + $0x274] ss:$12 sps:$4 sm:$0xff]  }
 0x730   : > { %v2859_v23 = vsel %vm410_vm8, %v2849_v31, %v2851_v15  ;;  %v3087_v51 = vsel %vm15203_vm1, %v15302_v34, %v2851_v15  ;;  %v9308_v31 = vld [vmem:[%s15103_s5 + $0x2a0] ss:$12 sps:$4 sm:$0xff]   ;;  %v9314_v14 = vld [vmem:[%s15103_s5 + $0x108] ss:$12 sps:$4 sm:$0xff]   ;;  %v9316_v15 = vld [vmem:[%s15103_s5 + $0x270] ss:$12 sps:$4 sm:$0xff]  }
 0x731   : > { %8003 = vmatpush3.bf16.msra.mxu1 %v3087_v51  ;;  %v3083_v60 = vsel %vm15203_vm1, %v15303_v5, %v2859_v23  ;;  %v9317_v23 = vld [vmem:[%s15103_s5 + $0x25c] ss:$12 sps:$4 sm:$0xff]   ;;  %v9320_v5 = vld [vmem:[%s15103_s5 + $0x258] ss:$12 sps:$4 sm:$0xff]  }
 0x732   : > { %3367 = vmatprep.subr.bf16.mxu0 %v3083_v60  ;;  %3870 = vmatprep.subr.bf16.mxu1 %v9262_v4  ;;  %v9318_v34 = vld [vmem:[%s15103_s5 + $0xf0] ss:$12 sps:$4 sm:$0xff]   ;;  %v9324_v4 = vld [vmem:[%s15103_s5 + $0x240] ss:$12 sps:$4 sm:$0xff]  }
 0x733   : > { %3368 = vmatpush1.bf16.msra.mxu0 %v3079_v12  ;;  %v9319_v51 = vld [vmem:[%s15103_s5 + $0xdc] ss:$12 sps:$4 sm:$0xff]   ;;  %v9321_v60 = vld [vmem:[%s15103_s5 + $0x244] ss:$12 sps:$4 sm:$0xff]  }
 0x734   : > { %8005 = vmatmul.mubr.msk.bf16.vlgmr.msra.gmra.mxu1 %vm15198_vm9, %v11474_v47  ;;  %3827 = vmatprep.subr.bf16.mxu0 %v9263_v10  ;;  %v9323_v12 = vld [vmem:[%s15103_s5 + $0xc4] ss:$12 sps:$4 sm:$0xff]  }
 0x735   : > { %3871 = vmatpush1.bf16.msra.mxu1 %v9264_v46  ;;  %v9325_v10 = vld [vmem:[%s15103_s5 + $0x2f0] ss:$12 sps:$4 sm:$0xff]   ;;  %v9326_v46 = vld [vmem:[%s15103_s5 + $0xc0] ss:$12 sps:$4 sm:$0xff]  }
 0x736   : > { %7711 = vmatmul.mubr.msk.bf16.vlgmr.msra.gmra.mxu0 %vm15198_vm9, %v11474_v47  ;;  %3872 = vmatprep.subr.bf16.mxu1 %v9265_v8  ;;  %v9269_v47 = vld [vmem:[%s15103_s5 + $0x1fc] ss:$12 sps:$4 sm:$0xff]   ;;  %vm15324_vm9 = vcmask 785408  }
 0x737   : > { %3828 = vmatpush1.bf16.msra.mxu0 %v9266_v13  ;;  %v9327_v8 = vld [vmem:[%s15103_s5 + $0x170] ss:$12 sps:$4 sm:$0xff]  }
 0x738   : > { %3829 = vmatprep.subr.bf16.mxu0 %v9267_v62 }
 0x739   : > { %3873 = vmatpush1.bf16.msra.mxu1 %v9268_v45 }
 0x73a   : > { %3874 = vmatprep.subr.bf16.mxu1 %v9269_v47 }
 0x73b   : > { %3830 = vmatpush1.bf16.msra.mxu0 %v9270_v59 }
 0x73c   : > { %3831 = vmatprep.subr.bf16.mxu0 %v9271_v55 }
 0x73d   : > { %3875 = vmatpush1.bf16.msra.mxu1 %v9272_v32 }
 0x73e   : > { %3876 = vmatprep.subr.bf16.mxu1 %v9273_v25 }
 0x73f   : > { %3832 = vmatpush1.bf16.msra.mxu0 %v9274_v43 }
 0x740   : > { %3833 = vmatprep.subr.bf16.mxu0 %v9275_v11 }
 0x741   : > { %3877 = vmatpush1.bf16.msra.mxu1 %v9276_v38 }
 0x742   : > { %3878 = vmatprep.subr.bf16.mxu1 %v9277_v3  ;;  %v15307_v3 = vld [vmem:[#allocation4_spill] sm:$0xff] }
 0x743   : > { %3834 = vmatpush1.bf16.msra.mxu0 %v9278_v36 }
 0x744   : > { %3835 = vmatprep.subr.bf16.mxu0 %v9279_v33 }
 0x745   : > { %3879 = vmatpush1.bf16.msra.mxu1 %v9280_v37 }
 0x746   : > { %3880 = vmatprep.subr.bf16.mxu1 %v9281_v1 }
 0x747   : > { %3836 = vmatpush1.bf16.msra.mxu0 %v9282_v2 }
 0x748   : > { %3837 = vmatprep.subr.bf16.mxu0 %v9283_v57  ;;  %v15308_v57 = vld [vmem:[#allocation5_spill] sm:$0xff] }
 0x749   : > { %3881 = vmatpush1.bf16.msra.mxu1 %v9284_v17 }
 0x74a   : > { %3882 = vmatprep.subr.bf16.mxu1 %v9285_v18 }
 0x74b   : > { %3838 = vmatpush1.bf16.msra.mxu0 %v9286_v7 }
 0x74c   : > { %3839 = vmatprep.subr.bf16.mxu0 %v9287_v49 }
 0x74d   : > { %3883 = vmatpush1.bf16.msra.mxu1 %v9288_v44 }
 0x74e   : > { %3884 = vmatprep.subr.bf16.mxu1 %v9289_v22 }
 0x74f   : > { %3840 = vmatpush1.bf16.msra.mxu0 %v9290_v20 }
 0x750   : > { %3841 = vmatprep.subr.bf16.mxu0 %v9291_v56 }
 0x751   : > { %3885 = vmatpush1.bf16.msra.mxu1 %v9292_v61 }
 0x752   : > { %3886 = vmatprep.subr.bf16.mxu1 %v9293_v27 }
 0x753   : > { %3842 = vmatpush1.bf16.msra.mxu0 %v9294_v50 }
 0x754   : > { %3843 = vmatprep.subr.bf16.mxu0 %v9295_v30 }
 0x755   : > { %3887 = vmatpush2.bf16.msra.mxu1 %v9296_v26 }
 0x756   : > { %3888 = vmatprep.subr.bf16.mxu1 %v9297_v29 }
 0x757   : > { %3844 = vmatpush2.bf16.msra.mxu0 %v9298_v40 }
 0x758   : > { %3845 = vmatprep.subr.bf16.mxu0 %v9299_v48 }
 0x759   : > { %3889 = vmatpush2.bf16.msra.mxu1 %v9300_v41 }
 0x75a   : > { %3890 = vmatprep.subr.bf16.mxu1 %v9301_v52 }
 0x75b   : > { %3846 = vmatpush2.bf16.msra.mxu0 %v9302_v24 }
 0x75c   : > { %3847 = vmatprep.subr.bf16.mxu0 %v9303_v6 }
 0x75d   : > { %3891 = vmatpush2.bf16.msra.mxu1 %v9304_v16 }
 0x75e   : > { %3892 = vmatprep.subr.bf16.mxu1 %v9305_v35 }
 0x75f   : > { %3848 = vmatpush2.bf16.msra.mxu0 %v9306_v54 }
 0x760   : > { %3849 = vmatprep.subr.bf16.mxu0 %v9307_v9 }
 0x761   : > { %3893 = vmatpush2.bf16.msra.mxu1 %v9308_v31 }
 0x762   : > { %3894 = vmatprep.subr.bf16.mxu1 %v9309_v21 }
 0x763   : > { %3850 = vmatpush2.bf16.msra.mxu0 %v9310_v58 }
 0x764   : > { %3851 = vmatprep.subr.bf16.mxu0 %v9311_v19 }
 0x765   : > { %3895 = vmatpush2.bf16.msra.mxu1 %v9312_v53 }
 0x766   : > { %3896 = vmatprep.subr.bf16.mxu1 %v9313_v39 }
 0x767   : > { %3852 = vmatpush2.bf16.msra.mxu0 %v9314_v14 }
 0x768   : > { %3853 = vmatprep.subr.bf16.mxu0 %v9315_v63 }
 0x769   : > { %3897 = vmatpush2.bf16.msra.mxu1 %v9316_v15 }
 0x76a   : > { %3898 = vmatprep.subr.bf16.mxu1 %v9317_v23 }
 0x76b   : > { %3854 = vmatpush2.bf16.msra.mxu0 %v9318_v34 }
 0x76c   : > { %3855 = vmatprep.subr.bf16.mxu0 %v9319_v51 }
 0x76d   : > { %3899 = vmatpush2.bf16.msra.mxu1 %v9320_v5 }
 0x76e   : > { %3900 = vmatprep.subr.bf16.mxu1 %v9321_v60 }
 0x76f   : > { %3856 = vmatpush2.bf16.msra.mxu0 %v9322_v0 }
 0x770   : > { %3857 = vmatprep.subr.bf16.mxu0 %v9323_v12 }
 0x771   : > { %3901 = vmatpush2.bf16.msra.mxu1 %v9324_v4 }
 0x772   : > { %7855 = vmatprep.subr.bf16.mxu1 %v9325_v10 }
 0x773   : > { %3858 = vmatpush2.bf16.msra.mxu0 %v9326_v46 }
 0x774   : > { %7833 = vmatprep.subr.bf16.mxu0 %v9327_v8 }
 0x7ba   : > { %v2763_v13 = vpop.f32.mrf.mxu0 }
 0x7bc   : > { %v2722_v62 = vpop.f32.mrf.mxu1  ;;  %v2765_v45 = vpop.f32.mrf.mxu0 }
 0x7bd   : > { %v11791_v47 = vadd.f32 %v2763_v13, %v2722_v62 }
 0x7be   : > { %v2724_v59 = vpop.f32.mrf.mxu1  ;;  %v2767_v55 = vpop.f32.mrf.mxu0 }
 0x7bf   : > { %15305 = vst [vmem:[#allocation12_spill] sm:$0xff] %v11791_v47  ;;  %v11793_v32 = vadd.f32 %v2765_v45, %v2724_v59 }
 0x7c0   : > { %v2726_v25 = vpop.f32.mrf.mxu1  ;;  %v2768_v43 = vpop.f32.mrf.mxu0 }
 0x7c1   : > { %15306 = vst [vmem:[#allocation18_spill] sm:$0xff] %v11793_v32 }
 0x7c2   : > { %v2727_v11 = vpop.f32.mrf.mxu1 }
 0x7ce   : > { %v3258_v1 = vpop.f32.mrf.mxu0 }
 0x7cf   : > { %v3259_v12 = vadd.f32 %v3258_v1, %v15307_v3 }
 0x7d0   : > { %v3344_v38 = vpop.f32.mrf.mxu1  ;;  %v3260_v49 = vpop.f32.mrf.mxu0 }
 0x7d1   : > { %v3345_v36 = vadd.f32 %v3344_v38, %v15307_v3  ;;  %v3261_v9 = vadd.f32 %v3260_v49, %v15307_v3 }
 0x7d2   : > { %v3346_v33 = vpop.f32.mrf.mxu1  ;;  %v3262_v44 = vpop.f32.mrf.mxu0 }
 0x7d3   : > { %v3347_v37 = vadd.f32 %v3346_v33, %v15307_v3  ;;  %9133 = vtanh.f32 %v3345_v36  ;;  %v3263_v8 = vadd.f32 %v3262_v44, %v15308_v57 }
 0x7d4   : > { %v3348_v2 = vpop.f32.mrf.mxu1  ;;  %v3264_v22 = vpop.f32.mrf.mxu0 }
 0x7d5   : > { %v3349_v17 = vadd.f32 %v3348_v2, %v15308_v57  ;;  %9135 = vtanh.f32 %v3347_v37  ;;  %v3265_v10 = vadd.f32 %v3264_v22, %v15308_v57 }
 0x7d6   : > { %v3350_v18 = vpop.f32.mrf.mxu1 }
 0x7d7   : > { %v3351_v7 = vadd.f32 %v3350_v18, %v15308_v57  ;;  %9137 = vtanh.f32 %v3349_v17 }
 0x7d9   : > { %9139 = vtanh.f32 %v3351_v7 }
 0x7e0   : > { %v11799_v20 = vpop.eup %9133 }
 0x7e2   : > { %v3301_v56 = vpop.f32.mrf.mxu0  ;;  %v11801_v61 = vpop.eup %9135 }
 0x7e3   : > { %v3302_v27 = vadd.f32 %v3301_v56, %v15307_v3  ;;  %v8282_v30 = vpack.i.bf16 %v11801_v61, %v11799_v20 }
 0x7e4   : > { %v3303_v50 = vpop.f32.mrf.mxu0  ;;  %v11806_v26 = vpop.eup %9137 }
 0x7e5   : > { %v3304_v29 = vadd.f32 %v3303_v50, %v15307_v3  ;;  %9141 = vtanh.f32 %v3302_v27  ;;  %8283 = vrot.lane.b32.xlu1 %v8282_v30, %s15190_s27 }
 0x7e6   : > { %v11809_v40 = vpop.eup %9139  ;;  %v3305_v48 = vpop.f32.mrf.mxu0 }
 0x7e7   : > { %9143 = vtanh.f32 %v3304_v29  ;;  %v3306_v41 = vadd.f32 %v3305_v48, %v15308_v57  ;;  %v8287_v52 = vpack.i.bf16 %v11809_v40, %v11806_v26 }
 0x7e8   : > { %v3307_v24 = vpop.f32.mrf.mxu0 }
 0x7e9   : > { %v3308_v6 = vadd.f32 %v3307_v24, %v15308_v57  ;;  %9145 = vtanh.f32 %v3306_v41  ;;  %8288 = vrot.lane.b32.xlu1 %v8287_v52, %s15190_s27 }
 0x7eb   : > { %9147 = vtanh.f32 %v3308_v6 }
 0x7ec   : > { %9149 = vtanh.f32 %v3261_v9 }
 0x7f2   : > { %v11817_v16 = vpop.eup %9141 }
 0x7f4   : > { %v11819_v35 = vpop.eup %9143  ;;  %v3430_v54 = vpop.f32.mrf.mxu1 }
 0x7f5   : > { %v8292_v31 = vpack.i.bf16 %v11819_v35, %v11817_v16  ;;  %v3431_v14 = vadd.f32 %v3430_v54, %v15307_v3 }
 0x7f6   : > { %v3387_v21 = vpop.f32.mrf.mxu0  ;;  %v8006_v58 = vpop.f32.mrf.mxu1 }
 0x7f7   : > { %v11824_v19 = vpop.eup %9145  ;;  %8293 = vrot.lane.b32.xlu0 %v8292_v31, %s15190_s27  ;;  %v3388_v53 = vadd.f32 %v3387_v21, %v15307_v3 }
 0x7f8   : > { %v11828_v39 = vpop.eup %9147  ;;  %v3389_v63 = vpop.f32.mrf.mxu0 }
 0x7f9   : > { %v3433_v15 = vpop.f32.mrf.mxu1  ;;  %v3390_v23 = vadd.f32 %v3389_v63, %v15307_v3  ;;  %v8297_v34 = vpack.i.bf16 %v11828_v39, %v11824_v19  ;;  %9151 = vtanh.f32 %v3388_v53  ;;  %v11841_v13 = vpop.eup %9149 }
 0x7fa   : > { %v3434_v51 = vadd.f32 %v3433_v15, %v15308_v57  ;;  %v3391_v5 = vpop.f32.mrf.mxu0 }
 0x7fb   : > { %v8007_v60 = vpop.f32.mrf.mxu1  ;;  %9153 = vtanh.f32 %v3390_v23  ;;  %8298 = vrot.lane.b32.xlu0 %v8297_v34, %s15190_s27  ;;  %v3392_v0 = vadd.f32 %v3391_v5, %v15308_v57 }
 0x7fc   : > { %9155 = vtanh.f32 %v3431_v14  ;;  %v3393_v4 = vpop.f32.mrf.mxu0 }
 0x7fd   : > { %9157 = vtanh.f32 %v3392_v0  ;;  %v3394_v46 = vadd.f32 %v3393_v4, %v15308_v57 }
 0x7fe   : > { %9159 = vtanh.f32 %v3434_v51 }
 0x7ff   : > { %9161 = vtanh.f32 %v3394_v46 }
 0x800   : > { %9163 = vtanh.f32 %v3259_v12 }
 0x801   : > { %9165 = vtanh.f32 %v3265_v10 }
 0x802   : > { %9167 = vtanh.f32 %v3263_v8 }
 0x806   : > { %v11843_v62 = vpop.eup %9151 }
 0x808   : > { %v9154_v45 = vpop.eup %9153 }
 0x809   : > { %v11845_v59 = vpop.eup %9155  ;;  %v8302_v55 = vpack.i.bf16 %v9154_v45, %v11843_v62 }
 0x80a   : > { %v11848_v25 = vpop.eup %9157 }
 0x80b   : > { %v11850_v43 = vpop.eup %9159  ;;  %8303 = vrot.lane.b32.xlu1 %v8302_v55, %s15190_s27  ;;  %v8307_v11 = vpack.i.bf16 %v11848_v25, %v11845_v59 }
 0x80c   : > { %v11855_v38 = vpop.eup %9161 }
 0x80d   : > { %v11857_v36 = vpop.eup %9163  ;;  %8308 = vrot.lane.b32.xlu0 %v8307_v11, %s15190_s27  ;;  %v8317_v33 = vpack.i.bf16 %v11850_v43, %v11855_v38 }
 0x80e   : > { %v11862_v37 = vpop.eup %9165  ;;  %v8312_v1 = vpack.i.bf16 %v11841_v13, %v11857_v36 }
 0x80f   : > { %8318 = vrot.lane.b32.xlu1 %v8317_v33, %s15190_s27  ;;  %v11867_v2 = vpop.eup %9167 }
 0x810   : > { %v8322_v17 = vpack.i.bf16 %v11862_v37, %v11867_v2 }
 0x811   : > { %8313 = vrot.lane.b32.xlu0 %v8312_v1, %s15190_s27 }
 0x813   : > { %8323 = vrot.lane.b32.xlu1 %v8322_v17, %s15190_s27  ;;  %s15319_s27 = smov 96  }
 0x857   : > { %v8284_v18 = vpop.permute.xlu1 %8283 }
 0x858   : > { %v8285_v49 = vunpack.i.l.bf16 %v8284_v18  ;;  %v8286_v21 = vunpack.i.h.bf16 %v8284_v18 }
 0x85a   : > { %v3513_v53 = vsel %vm410_vm8, %v8285_v49, %v8286_v21 }
 0x85b   : > { %v8289_v56 = vpop.permute.xlu1 %8288 }
 0x85c   : > { %v8290_v41 = vunpack.i.l.bf16 %v8289_v56  ;;  %v8291_v51 = vunpack.i.h.bf16 %v8289_v56 }
 0x869   : > { %v8294_v7 = vpop.permute.xlu0 %8293 }
 0x86a   : > { %v8296_v44 = vunpack.i.h.bf16 %v8294_v7  ;;  %v8295_v22 = vunpack.i.l.bf16 %v8294_v7 }
 0x86c   : > { %v3511_v27 = vsel %vm410_vm8, %v8295_v22, %v8296_v44  ;;  %v3512_v50 = vsel %vm410_vm8, %v8296_v44, %v8285_v49 }
 0x86d   : > { %v11876_v30 = vmax.f32 %v11817_v16, %v3511_v27  ;;  %v11879_v29 = vmax.f32 %v11819_v35, %v3512_v50  ;;  %v8299_v48 = vpop.permute.xlu0 %8298 }
 0x86e   : > { %v8301_v52 = vunpack.i.h.bf16 %v8299_v48  ;;  %v8300_v24 = vunpack.i.l.bf16 %v8299_v48 }
 0x86f   : > { %v8327_v6 = vpack.i.bf16 %v11879_v29, %v11876_v30 }
 0x870   : > { %v3519_v54 = vsel %vm410_vm8, %v8300_v24, %v8301_v52  ;;  %v3520_v9 = vsel %vm410_vm8, %v8301_v52, %v8290_v41 }
 0x871   : > { %v11886_v31 = vmax.f32 %v11824_v19, %v3519_v54  ;;  %v11889_v16 = vmax.f32 %v11828_v39, %v3520_v9  ;;  %8328 = vrot.lane.b32.xlu1 %v8327_v6, %s15279_s17  ;;  %v11898_v39 = vmax.f32 %v11799_v20, %v3513_v53 }
 0x873   : > { %v8332_v35 = vpack.i.bf16 %v11889_v16, %v11886_v31 }
 0x875   : > { %8333 = vrot.lane.b32.xlu1 %v8332_v35, %s15279_s17 }
 0x87d   : > { %v8304_v58 = vpop.permute.xlu1 %8303 }
 0x87e   : > { %v8306_v14 = vunpack.i.h.bf16 %v8304_v58  ;;  %v8305_v63 = vunpack.i.l.bf16 %v8304_v58 }
 0x87f   : > { %v8309_v15 = vpop.permute.xlu0 %8308 }
 0x880   : > { %v3514_v19 = vsel %vm410_vm8, %v8286_v21, %v8305_v63  ;;  %v8311_v23 = vunpack.i.h.bf16 %v8309_v15  ;;  %v8310_v34 = vunpack.i.l.bf16 %v8309_v15  ;;  %v3515_v0 = vsel %vm410_vm8, %v8305_v63, %v8306_v14 }
 0x881   : > { %v11901_v5 = vmax.f32 %v11801_v61, %v3514_v19  ;;  %v8319_v60 = vpop.permute.xlu1 %8318  ;;  %v3521_v61 = vsel %vm410_vm8, %v8290_v41, %v8291_v51  ;;  %v11912_v1 = vmax.f32 %v11843_v62, %v3515_v0 }
 0x882   : > { %v3516_v12 = vsel %vm410_vm8, %v8306_v14, %v8310_v34  ;;  %v8321_v10 = vunpack.i.h.bf16 %v8319_v60  ;;  %v8320_v46 = vunpack.i.l.bf16 %v8319_v60  ;;  %v3522_v20 = vsel %vm410_vm8, %v8291_v51, %v8311_v23 }
 0x883   : > { %v11905_v4 = vmax.f32 %v9154_v45, %v3516_v12  ;;  %v8314_v8 = vpop.permute.xlu0 %8313  ;;  %v8337_v55 = vpack.i.bf16 %v11901_v5, %v11898_v39  ;;  %v11917_v45 = vmax.f32 %v11845_v59, %v8310_v34  ;;  %v11925_v56 = vmax.f32 %v11809_v40, %v3522_v20 }
 0x884   : > { %v8316_v11 = vunpack.i.h.bf16 %v8314_v8  ;;  %v8315_v33 = vunpack.i.l.bf16 %v8314_v8  ;;  %v3523_v17 = vsel %vm410_vm8, %v8311_v23, %v8320_v46  ;;  %v3524_v62 = vsel %vm410_vm8, %v8320_v46, %v8321_v10 }
 0x885   : > { %v8324_v18 = vpop.permute.xlu1 %8323  ;;  %8338 = vrot.lane.b32.xlu0 %v8337_v55, %s15279_s17  ;;  %v11920_v7 = vmax.f32 %v11848_v25, %v3523_v17  ;;  %v8342_v50 = vpack.i.bf16 %v11905_v4, %v11912_v1  ;;  %v11939_v41 = vmax.f32 %v11806_v26, %v3521_v61  ;;  %v11944_v40 = vmax.f32 %v11850_v43, %v8321_v10 }
 0x886   : > { %v3510_v49 = vsel %vm410_vm8, %v8316_v11, %v8295_v22  ;;  %v3509_v44 = vsel %vm410_vm8, %v8315_v33, %v8316_v11  ;;  %v8326_v25 = vunpack.i.h.bf16 %v8324_v18  ;;  %v8325_v48 = vunpack.i.l.bf16 %v8324_v18 }
 0x887   : > { %v11929_v27 = vmax.f32 %v11841_v13, %v3510_v49  ;;  %v11934_v59 = vmax.f32 %v11857_v36, %v3509_v44  ;;  %v8352_v22 = vpack.i.bf16 %v11920_v7, %v11917_v45  ;;  %v11947_v13 = vmax.f32 %v11855_v38, %v3524_v62 }
 0x888   : > { %v8347_v36 = vpack.i.bf16 %v11925_v56, %v11939_v41  ;;  %v3518_v52 = vsel %vm410_vm8, %v8326_v25, %v8300_v24  ;;  %v3517_v6 = vsel %vm410_vm8, %v8325_v48, %v8326_v25 }
 0x889   : > { %8343 = vrot.lane.b32.xlu0 %v8342_v50, %s15279_s17  ;;  %8353 = vrot.lane.b32.xlu1 %v8352_v22, %s15279_s17  ;;  %v8357_v26 = vpack.i.bf16 %v11929_v27, %v11934_v59  ;;  %v11958_v43 = vmax.f32 %v11862_v37, %v3518_v52  ;;  %v3552_v38 = vmax.f32 %v11867_v2, %v3517_v6 }
 0x88a   : > { %v8362_v54 = vpack.i.bf16 %v11944_v40, %v11947_v13 }
 0x88b   : > { %v8367_v24 = vpack.i.bf16 %v11958_v43, %v3552_v38 }
 0x88d   : > { %8348 = vrot.lane.b32.xlu0 %v8347_v36, %s15279_s17  ;;  %8358 = vrot.lane.b32.xlu1 %v8357_v26, %s15279_s17 }
 0x891   : > { %8363 = vrot.lane.b32.xlu0 %v8362_v54, %s15279_s17 }
 0x895   : > { %8368 = vrot.lane.b32.xlu0 %v8367_v24, %s15279_s17 }
 0x8e3   : > { %v8329_v9 = vpop.permute.xlu1 %8328 }
 0x8e4   : > { %v8331_v35 = vunpack.i.h.bf16 %v8329_v9  ;;  %v8330_v21 = vunpack.i.l.bf16 %v8329_v9 }
 0x8e6   : > { %v3617_v53 = vsel %vm15199_vm7, %v8330_v21, %v8331_v35 }
 0x8e7   : > { %v8334_v58 = vpop.permute.xlu1 %8333  ;;  %v3651_v2 = vmax.f32 %v11876_v30, %v3617_v53 }
 0x8e8   : > { %v8336_v14 = vunpack.i.h.bf16 %v8334_v58  ;;  %v8335_v37 = vunpack.i.l.bf16 %v8334_v58 }
 0x8ea   : > { %v3625_v63 = vsel %vm15199_vm7, %v8335_v37, %v8336_v14 }
 0x8eb   : > { %v3660_v15 = vmax.f32 %v11886_v31, %v3625_v63 }
 0x8ed   : > { %v8377_v19 = vpack.i.bf16 %v3660_v15, %v3651_v2 }
 0x8ef   : > { %8378 = vrot.lane.b32.xlu1 %v8377_v19, %s15309_s30 }
 0x8f7   : > { %v8339_v23 = vpop.permute.xlu0 %8338 }
 0x8f8   : > { %v8340_v51 = vunpack.i.l.bf16 %v8339_v23  ;;  %v8341_v50 = vunpack.i.h.bf16 %v8339_v23 }
 0x8fa   : > { %v3618_v12 = vsel %vm15199_vm7, %v8331_v35, %v8340_v51  ;;  %v3619_v54 = vsel %vm15199_vm7, %v8340_v51, %v8341_v50 }
 0x8fb   : > { %v8344_v34 = vpop.permute.xlu0 %8343  ;;  %v11971_v60 = vpop.permute.xlu1 %8353  ;;  %v3652_v20 = vmax.f32 %v11879_v29, %v3618_v12  ;;  %v3653_v58 = vmax.f32 %v11898_v39, %v3619_v54 }
 0x8fc   : > { %v8346_v8 = vunpack.i.h.bf16 %v8344_v34  ;;  %v8345_v55 = vunpack.i.l.bf16 %v8344_v34  ;;  %v8355_v30 = vunpack.i.l.bf16 %v11971_v60 }
 0x8fe   : > { %v3621_v49 = vsel %vm15199_vm7, %v8345_v55, %v8346_v8  ;;  %v3622_v44 = vsel %vm15199_vm7, %v8346_v8, %v8355_v30  ;;  %v3620_v36 = vsel %vm15199_vm7, %v8341_v50, %v8345_v55  ;;  %v3657_v39 = vmax.f32 %v11917_v45, %v8355_v30 }
 0x8ff   : > { %v11973_v0 = vpop.permute.xlu0 %8348  ;;  %v8359_v46 = vpop.permute.xlu1 %8358  ;;  %v3655_v29 = vmax.f32 %v11912_v1, %v3621_v49  ;;  %v3654_v24 = vmax.f32 %v11901_v5, %v3620_v36 }
 0x900   : > { %v8350_v10 = vunpack.i.l.bf16 %v11973_v0  ;;  %v8361_v61 = vunpack.i.h.bf16 %v8359_v46  ;;  %v8360_v17 = vunpack.i.l.bf16 %v8359_v46 }
 0x901   : > { %v8407_v5 = vpack.i.bf16 %v3654_v24, %v3653_v58  ;;  %v8417_v23 = vpack.i.bf16 %v3655_v29, %v3654_v24 }
 0x902   : > { %v3626_v31 = vsel %vm15199_vm7, %v8336_v14, %v8350_v10  ;;  %v3615_v25 = vsel %vm15199_vm7, %v8360_v17, %v8361_v61  ;;  %v8351_v14 = vunpack.i.h.bf16 %v11973_v0 }
 0x903   : > { %v3661_v11 = vmax.f32 %v11889_v16, %v3626_v31  ;;  %v8364_v33 = vpop.permute.xlu0 %8363  ;;  %v3656_v16 = vmax.f32 %v11905_v4, %v3622_v44  ;;  %v11990_v6 = vmax.f32 %v11934_v59, %v3615_v25  ;;  %v8356_v59 = vunpack.i.h.bf16 %v11971_v60 }
 0x904   : > { %v8365_v4 = vunpack.i.l.bf16 %v8364_v33  ;;  %v8366_v63 = vunpack.i.h.bf16 %v8364_v33 }
 0x905   : > { %v8387_v18 = vpack.i.bf16 %v3661_v11, %v3652_v20  ;;  %v8402_v9 = vpack.i.bf16 %v3656_v16, %v3655_v29  ;;  %v8412_v60 = vpack.i.bf16 %v3657_v39, %v3656_v16  ;;  %v3628_v12 = vsel %vm15199_vm7, %v8351_v14, %v8356_v59 }
 0x906   : > { %v3629_v2 = vsel %vm15199_vm7, %v8356_v59, %v8365_v4  ;;  %v3630_v34 = vsel %vm15199_vm7, %v8365_v4, %v8366_v63  ;;  %v3666_v45 = vmax.f32 %v11944_v40, %v8366_v63 }
 0x907   : > { %v8369_v62 = vpop.permute.xlu0 %8368  ;;  %8388 = vrot.lane.b32.xlu1 %v8387_v18, %s15310_s22  ;;  %v3664_v15 = vmax.f32 %v11920_v7, %v3629_v2 }
 0x908   : > { %v8371_v48 = vunpack.i.h.bf16 %v8369_v62  ;;  %v8370_v22 = vunpack.i.l.bf16 %v8369_v62 }
 0x909   : > { %v8437_v51 = vpack.i.bf16 %v3664_v15, %v3655_v29 }
 0x90a   : > { %v3623_v52 = vsel %vm15199_vm7, %v8370_v22, %v8371_v48  ;;  %v3624_v35 = vsel %vm15199_vm7, %v8371_v48, %v8335_v37 }
 0x90b   : > { %v11992_v26 = vmax.f32 %v3552_v38, %v3623_v52  ;;  %8398 = vrot.lane.b32.xlu1 %v8387_v18, %s15311_s20  ;;  %v3616_v38 = vsel %vm15199_vm7, %v8361_v61, %v8330_v21  ;;  %v3659_v53 = vmax.f32 %v11958_v43, %v3624_v35  ;;  %v3627_v43 = vsel %vm15199_vm7, %v8350_v10, %v8351_v14  ;;  %vm15325_vm7 = vmmov %vm15324_vm9 }
 0x90c   : > { %v3650_v37 = vmax.f32 %v11929_v27, %v3616_v38  ;;  %v3662_v27 = vmax.f32 %v11939_v41, %v3627_v43  ;;  %v3663_v41 = vmax.f32 %v11925_v56, %v3628_v12 }
 0x90d   : > { %v8372_v1 = vpack.i.bf16 %v11992_v26, %v11990_v6 }
 0x90e   : > { %v8392_v21 = vpack.i.bf16 %v3659_v53, %v3650_v37  ;;  %v8422_v0 = vpack.i.bf16 %v3662_v27, %v3653_v58  ;;  %v8432_v46 = vpack.i.bf16 %v3663_v41, %v3662_v27  ;;  %v8452_v40 = vpack.i.bf16 %v3663_v41, %v3654_v24 }
 0x90f   : > { %8373 = vrot.lane.b32.xlu0 %v8372_v1, %s15194_s24  ;;  %8403 = vrot.lane.b32.xlu1 %v8402_v9, %s15312_s25  ;;  %s15321_s24 = smov 24   ;;  %v8457_v8 = vpack.i.bf16 %v3664_v15, %v3663_v41 }
 0x913   : > { %8383 = vrot.lane.b32.xlu0 %v8377_v19, %s15313_s29  ;;  %8408 = vrot.lane.b32.xlu1 %v8407_v5, %s15204_s21  ;;  %v3665_v19 = vmax.f32 %v11947_v13, %v3630_v34 }
 0x915   : > { %v8442_v7 = vpack.i.bf16 %v3665_v19, %v3656_v16  ;;  %v8447_v10 = vpack.i.bf16 %v3666_v45, %v3665_v19  ;;  %v8427_v13 = vpack.i.bf16 %v3665_v19, %v3664_v15 }
 0x917   : > { %8418 = vrot.lane.b32.xlu1 %v8417_v23, %s15314_s28  ;;  %8393 = vrot.lane.b32.xlu0 %v8392_v21, %s15315_s23 }
 0x91b   : > { %8438 = vrot.lane.b32.xlu1 %v8437_v51, %s15316_s18  ;;  %8413 = vrot.lane.b32.xlu0 %v8412_v60, %s15317_s12 }
 0x91f   : > { %8443 = vrot.lane.b32.xlu1 %v8442_v7, %s15318_s16  ;;  %8423 = vrot.lane.b32.xlu0 %v8422_v0, %s15319_s27  ;;  %s15482_s16 = smov 20  }
 0x923   : > { %8448 = vrot.lane.b32.xlu1 %v8447_v10, %s15317_s12  ;;  %8428 = vrot.lane.b32.xlu0 %v8427_v13, %s15312_s25  ;;  %s15481_s12 = smov 96  }
 0x927   : > { %8463 = vrot.lane.b32.xlu1 %v8392_v21, %s15320_s15  ;;  %8433 = vrot.lane.b32.xlu0 %v8432_v46, %s15204_s21  ;;  %s15349_s21 = smov 108   ;;  %s15510_s15 = smov 108  }
 0x92b   : > { %8453 = vrot.lane.b32.xlu0 %v8452_v40, %s15321_s24  ;;  %s15512_s24 = smov 90  }
 0x92f   : > { %8458 = vrot.lane.b32.xlu0 %v8457_v8, %s15314_s28 }
 0x961   : > { %v8379_v55 = vpop.permute.xlu1 %8378 }
 0x962   : > { %v8381_v61 = vunpack.i.h.bf16 %v8379_v55  ;;  %v8380_v17 = vunpack.i.l.bf16 %v8379_v55 }
 0x979   : > { %v8389_v30 = vpop.permute.xlu1 %8388 }
 0x97a   : > { %v8391_v44 = vunpack.i.h.bf16 %v8389_v30  ;;  %v8390_v62 = vunpack.i.l.bf16 %v8389_v30 }
 0x97d   : > { %v8399_v56 = vpop.permute.xlu1 %8398 }
 0x97e   : > { %v8401_v48 = vunpack.i.h.bf16 %v8399_v56  ;;  %v8400_v22 = vunpack.i.l.bf16 %v8399_v56 }
 0x981   : > { %v8374_v31 = vpop.permute.xlu0 %8373  ;;  %v8404_v20 = vpop.permute.xlu1 %8403 }
 0x982   : > { %v8376_v35 = vunpack.i.h.bf16 %v8374_v31  ;;  %v8406_v58 = vunpack.i.h.bf16 %v8404_v20  ;;  %v8405_v59 = vunpack.i.l.bf16 %v8404_v20  ;;  %v8375_v14 = vunpack.i.l.bf16 %v8374_v31 }
 0x984   : > { %v3800_v2 = vsel %vm1395_vm12, %v11992_v26, %v8376_v35  ;;  %v3799_v0 = vsel %vm1395_vm12, %v11990_v6, %v8375_v14 }
 0x985   : > { %v8384_v11 = vpop.permute.xlu0 %8383  ;;  %v12032_v33 = vpop.permute.xlu1 %8408 }
 0x986   : > { %v8386_v18 = vunpack.i.h.bf16 %v8384_v11  ;;  %v8385_v49 = vunpack.i.l.bf16 %v8384_v11  ;;  %v8411_v26 = vunpack.i.h.bf16 %v12032_v33  ;;  %v8410_v10 = vunpack.i.l.bf16 %v12032_v33 }
 0x988   : > { %v3805_v50 = vsel %vm1395_vm12, %v8380_v17, %v8385_v49  ;;  %v3806_v25 = vsel %vm1395_vm12, %v8381_v61, %v8386_v18 }
 0x989   : > { %v12036_v29 = vpop.permute.xlu1 %8418  ;;  %v8394_v16 = vpop.permute.xlu0 %8393  ;;  %v3807_v36 = vsel %vm15322_vm14, %v3805_v50, %v8390_v62  ;;  %v3808_v52 = vsel %vm15323_vm10, %v3806_v25, %v8391_v44  ;;  %vm15326_vm10 = vcmask 359424  }
 0x98a   : > { %v3809_v54 = vsel %vm15324_vm9, %v3807_v36, %v8400_v22  ;;  %v3810_v24 = vsel %vm15325_vm7, %v3808_v52, %v8401_v48  ;;  %v3775_v37 = vsel %vm15326_vm10, %v8405_v59, %v8406_v58  ;;  %v8396_v39 = vunpack.i.h.bf16 %v8394_v16  ;;  %vm15327_vm7 = vmmov %vm15326_vm10  ;;  %v9329_v59 = vld [vmem:[%s15103_s5 + $0x158] ss:$12 sps:$4 sm:$0xff]  }
 0x98b   : > { %v3824_v1 = vpack.c.bf16 %v3810_v24, %v3809_v54  ;;  %v8395_v15 = vunpack.i.l.bf16 %v8394_v16  ;;  %vm15328_vm9 = vmmov %vm15322_vm14  ;;  %v3735_v16 = vsel %vm549_vm2, %v8410_v10, %v8411_v26  ;;  %v8421_v36 = vunpack.i.h.bf16 %v12036_v29  ;;  %v9342_v26 = vld [vmem:[%s15103_s5 + $0xf8] ss:$12 sps:$4 sm:$0xff]   ;;  %v9345_v10 = vld [vmem:[%s15103_s5 + $0x1e8] ss:$12 sps:$4 sm:$0xff]  }
 0x98c   : > { %vm15329_vm14 = vmmov %vm15328_vm9  ;;  %v8420_v52 = vunpack.i.l.bf16 %v12036_v29 }
 0x98d   : > { %v8439_v9 = vpop.permute.xlu1 %8438  ;;  %v8414_v4 = vpop.permute.xlu0 %8413  ;;  %3859 = vmatprep.mubr.bf16.mxu0 %v3824_v1  ;;  %v3802_v13 = vsel %vm15329_vm14, %v3800_v2, %v8396_v39  ;;  %vm15330_vm10 = vmmov %vm15328_vm9  ;;  %v9330_v2 = vld [vmem:[%s15103_s5 + $0x98] ss:$12 sps:$4 sm:$0xff]  }
 0x98e   : > { %v8440_v5 = vunpack.i.l.bf16 %v8439_v9  ;;  %v8416_v43 = vunpack.i.h.bf16 %v8414_v4  ;;  %v8415_v34 = vunpack.i.l.bf16 %v8414_v4  ;;  %v8441_v51 = vunpack.i.h.bf16 %v8439_v9  ;;  %v9328_v9 = vld [vmem:[%s15103_s5 + $0xb0] ss:$12 sps:$4 sm:$0xff]  }
 0x98f   : > { %v3801_v30 = vsel %vm15330_vm10, %v3799_v0, %v8395_v15  ;;  %v9341_v0 = vld [vmem:[%s15103_s5 + $0x200] ss:$12 sps:$4 sm:$0xff]  }
 0x990   : > { %v3817_v60 = vsel %vm1395_vm12, %v8440_v5, %v3775_v37  ;;  %v3795_v6 = vsel %vm15331_vm4, %v8415_v34, %v8416_v43  ;;  %v9331_v37 = vld [vmem:[%s15103_s5 + $0x140] ss:$12 sps:$4 sm:$0xff]   ;;  %v9333_v43 = vld [vmem:[%s15103_s5 + $0x230] ss:$12 sps:$4 sm:$0xff]   ;;  %v9334_v34 = vld [vmem:[%s15103_s5 + $0x128] ss:$12 sps:$4 sm:$0xff]  }
 0x991   : > { %v8444_v38 = vpop.permute.xlu1 %8443  ;;  %v12042_v53 = vpop.permute.xlu0 %8423 }
 0x992   : > { %v8445_v63 = vunpack.i.l.bf16 %v8444_v38  ;;  %v8446_v46 = vunpack.i.h.bf16 %v8444_v38  ;;  %v8425_v62 = vunpack.i.l.bf16 %v12042_v53  ;;  %v8426_v4 = vunpack.i.h.bf16 %v12042_v53 }
 0x994   : > { %v3819_v41 = vsel %vm15328_vm9, %v3817_v60, %v8445_v63  ;;  %v3811_v35 = vsel %vm1395_vm12, %v8425_v62, %v3735_v16  ;;  %v9338_v60 = vld [vmem:[%s15103_s5 + $0x110] ss:$12 sps:$4 sm:$0xff]  }
 0x995   : > { %v8449_v23 = vpop.permute.xlu1 %8448  ;;  %v8429_v21 = vpop.permute.xlu0 %8428 }
 0x996   : > { %v8431_v27 = vunpack.i.h.bf16 %v8429_v21  ;;  %v8430_v19 = vunpack.i.l.bf16 %v8429_v21  ;;  %v8451_v45 = vunpack.i.h.bf16 %v8449_v23  ;;  %v8450_v7 = vunpack.i.l.bf16 %v8449_v23  ;;  %v9332_v21 = vld [vmem:[%s15103_s5 + $0x80] ss:$12 sps:$4 sm:$0xff]  }
 0x998   : > { %v3776_v12 = vsel %vm15327_vm7, %v8430_v19, %v8431_v27  ;;  %v3796_v11 = vsel %vm15332_vm11, %v8450_v7, %v8451_v45  ;;  %vm15333_vm7 = vmmov %vm15328_vm9  ;;  %vm15334_vm9 = vcmask 785408   ;;  %v9335_v27 = vld [vmem:[%s15103_s5 + $0x2d8] ss:$12 sps:$4 sm:$0xff]   ;;  %v9336_v19 = vld [vmem:[%s15103_s5 + $0x68] ss:$12 sps:$4 sm:$0xff]  }
 0x999   : > { %v8464_v40 = vpop.permute.xlu1 %8463  ;;  %v8434_v8 = vpop.permute.xlu0 %8433  ;;  %v3818_v55 = vsel %vm1395_vm12, %v8441_v51, %v3776_v12  ;;  %v3821_v33 = vsel %vm15334_vm9, %v3819_v41, %v3795_v6  ;;  %vm15335_vm3 = vmmov %vm15334_vm9  ;;  %v9337_v51 = vld [vmem:[%s15103_s5 + $0x218] ss:$12 sps:$4 sm:$0xff]   ;;  %v9339_v45 = vld [vmem:[%s15103_s5 + $0x2c0] ss:$12 sps:$4 sm:$0xff]  }
 0x99a   : > { %v8466_v56 = vunpack.i.h.bf16 %v8464_v40  ;;  %v8465_v31 = vunpack.i.l.bf16 %v8464_v40  ;;  %v8436_v20 = vunpack.i.h.bf16 %v8434_v8  ;;  %v3820_v61 = vsel %vm15333_vm7, %v3818_v55, %v8446_v46  ;;  %vm15336_vm14 = vmmov %vm15335_vm3  ;;  %v9340_v7 = vld [vmem:[%s15103_s5 + $0x50] ss:$12 sps:$4 sm:$0xff]   ;;  %v9343_v12 = vld [vmem:[%s15103_s5 + $0x2a8] ss:$12 sps:$4 sm:$0xff]  }
 0x99b   : > { %v8435_v49 = vunpack.i.l.bf16 %v8434_v8  ;;  %vm15337_vm1 = vmmov %vm15335_vm3  ;;  %v9344_v41 = vld [vmem:[%s15103_s5 + $0x38] ss:$12 sps:$4 sm:$0xff]   ;;  %v9347_v46 = vld [vmem:[%s15103_s5 + $0x290] ss:$12 sps:$4 sm:$0xff]  }
 0x99c   : > { %v3803_v17 = vsel %vm15335_vm3, %v3801_v30, %v8465_v31  ;;  %v3804_v18 = vsel %vm15336_vm14, %v3802_v13, %v8466_v56  ;;  %v3822_v44 = vsel %vm15337_vm1, %v3820_v61, %v3796_v11  ;;  %vm15338_vm1 = vmmov %vm15333_vm7  ;;  %vm15339_vm3 = vcmask 949248   ;;  %v9346_v13 = vld [vmem:[%s15103_s5 + $0xe0] ss:$12 sps:$4 sm:$0xff]   ;;  %v9349_v8 = vld [vmem:[%s15103_s5 + $0x1d0] ss:$12 sps:$4 sm:$0xff]  }
 0x99d   : > { %v8454_v50 = vpop.permute.xlu0 %8453  ;;  %v3826_v25 = vpack.c.bf16 %v3822_v44, %v3821_v33  ;;  %v12065_v48 = vpack.c.bf16 %v3804_v18, %v3803_v17  ;;  %v3736_v54 = vsel %vm549_vm2, %v8435_v49, %v8436_v20  ;;  %v3755_v63 = vsel %vm15339_vm3, %v8420_v52, %v8421_v36  ;;  %vm15340_vm4 = vmmov %vm15338_vm1  ;;  %v9348_v40 = vld [vmem:[%s15103_s5 + $0x20] ss:$12 sps:$4 sm:$0xff]   ;;  %v9350_v55 = vld [vmem:[%s15103_s5 + $0xc8] ss:$12 sps:$4 sm:$0xff]  }
 0x99e   : > { %v8455_v22 = vunpack.i.l.bf16 %v8454_v50  ;;  %v8456_v24 = vunpack.i.h.bf16 %v8454_v50  ;;  %v3812_v14 = vsel %vm1395_vm12, %v8426_v4, %v3736_v54  ;;  %vm15341_vm11 = vmmov %vm15339_vm3  ;;  %v9351_v30 = vld [vmem:[%s15103_s5 + $0x278] ss:$12 sps:$4 sm:$0xff]   ;;  %v9352_v56 = vld [vmem:[%s15103_s5 + $0x8] ss:$12 sps:$4 sm:$0xff]  }
 0x99f   : > { %3902 = vmatprep.mubr.bf16.mxu1 %v3826_v25  ;;  %3860 = vmatmul.mubr.bf16.vlgmr.msra.gmra.mxu0 %v12065_v48  ;;  %vm15342_vm10 = vmmov %vm15334_vm9  ;;  %v9353_v31 = vld [vmem:[%s15103_s5 + $0x1b8] ss:$12 sps:$4 sm:$0xff]   ;;  %v9354_v6 = vld [vmem:[%s15103_s5 + $0x260] ss:$12 sps:$4 sm:$0xff]  }
 0x9a0   : > { %7834 = vmatpush3.bf16.msra.mxu0 %v9328_v9  ;;  %3945 = vmatprep.mubr.bf16.mxu0 %v3824_v1  ;;  %v3813_v29 = vsel %vm15338_vm1, %v3811_v35, %v8455_v22  ;;  %v3814_v1 = vsel %vm15340_vm4, %v3812_v14, %v8456_v24  ;;  %vm15343_vm7 = vmmov %vm15334_vm9  ;;  %v15344_v20 = vld [vmem:[#allocation6_spill] sm:$0xff]  ;;  %vm15345_vm9 = vcmask 130048   ;;  %v9355_v11 = vld [vmem:[%s15103_s5 + $0x1a0] ss:$12 sps:$4 sm:$0xff]   ;;  %vm15358_vm1 = vcmask 744448  }
 0x9a1   : > { %v8459_v58 = vpop.permute.xlu0 %8458  ;;  %7835 = vmatprep.subr.bf16.mxu0 %v9329_v59  ;;  %v3815_v39 = vsel %vm15342_vm10, %v3813_v29, %v3755_v63  ;;  %v9356_v61 = vld [vmem:[%s15103_s5 + $0x248] ss:$12 sps:$4 sm:$0xff]   ;;  %vm15346_vm14 = vmmov %vm15345_vm9  ;;  %vm15360_vm4 = vcmask 883712   ;;  %vm15362_vm10 = vcmask 891904  }
 0x9a2   : > { %v8461_v38 = vunpack.i.h.bf16 %v8459_v58  ;;  %v8460_v5 = vunpack.i.l.bf16 %v8459_v58  ;;  %v9357_v33 = vld [vmem:[%s15103_s5 + $0x188] ss:$12 sps:$4 sm:$0xff]   ;;  %vm15359_vm3 = vmmov %vm15358_vm1 }
 0x9a4   : > { %v3756_v53 = vsel %vm15341_vm11, %v8460_v5, %v8461_v38  ;;  %7836 = vmatpush3.bf16.msra.mxu0 %v9330_v2  ;;  %vm15361_vm11 = vmmov %vm15360_vm4 }
 0x9a5   : > { %7837 = vmatprep.subr.bf16.mxu0 %v9331_v37  ;;  %v3816_v15 = vsel %vm15343_vm7, %v3814_v1, %v3756_v53  ;;  %vm15363_vm7 = vmmov %vm15362_vm10 }
 0x9a6   : > { %v3825_v23 = vpack.c.bf16 %v3816_v15, %v3815_v39  ;;  %v7716_v15 = vld [vmem:[%s9757_s19 + $0x50] sm:$0xff] }
 0x9a8   : > { %7838 = vmatpush3.bf16.msra.mxu0 %v9332_v21  ;;  %3903 = vmatmul.mubr.bf16.vlgmr.msra.gmra.mxu1 %v3825_v23  ;;  %v12234_v21 = vcombine.high %v7716_v15, %v7716_v15 }
 0x9a9   : > { %7856 = vmatpush3.bf16.msra.mxu1 %v9333_v43  ;;  %3986 = vmatprep.mubr.bf16.mxu1 %v3826_v25  ;;  %v12237_v43 = vld [vmem:[%s9757_s19 + $0x58] sm:$0xff] }
 0x9aa   : > { %7839 = vmatprep.subr.bf16.mxu0 %v9334_v34  ;;  %7857 = vmatprep.subr.bf16.mxu1 %v9335_v27  ;;  %v12243_v34 = vcombine.low %v12237_v43, %v12237_v43 }
 0x9ac   : > { %7840 = vmatpush3.bf16.msra.mxu0 %v9336_v19  ;;  %15356 = vst [vmem:[#allocation19_spill] sm:$0xff] %v12243_v34 }
 0x9ad   : > { %7858 = vmatpush3.bf16.msra.mxu1 %v9337_v51  ;;  %7841 = vmatprep.subr.bf16.mxu0 %v9338_v60 }
 0x9ae   : > { %7859 = vmatprep.subr.bf16.mxu1 %v9339_v45 }
 0x9b0   : > { %7842 = vmatpush3.bf16.msra.mxu0 %v9340_v7 }
 0x9b1   : > { %7860 = vmatpush3.bf16.msra.mxu1 %v9341_v0  ;;  %7843 = vmatprep.subr.bf16.mxu0 %v9342_v26 }
 0x9b2   : > { %7861 = vmatprep.subr.bf16.mxu1 %v9343_v12 }
 0x9b4   : > { %7844 = vmatpush3.bf16.msra.mxu0 %v9344_v41 }
 0x9b5   : > { %7862 = vmatpush3.bf16.msra.mxu1 %v9345_v10  ;;  %7845 = vmatprep.subr.bf16.mxu0 %v9346_v13 }
 0x9b6   : > { %7863 = vmatprep.subr.bf16.mxu1 %v9347_v46 }
 0x9b8   : > { %7846 = vmatpush3.bf16.msra.mxu0 %v9348_v40 }
 0x9b9   : > { %7864 = vmatpush3.bf16.msra.mxu1 %v9349_v8  ;;  %7847 = vmatprep.subr.bf16.mxu0 %v9350_v55 }
 0x9ba   : > { %7865 = vmatprep.subr.bf16.mxu1 %v9351_v30 }
 0x9bc   : > { %7848 = vmatpush3.bf16.msra.mxu0 %v9352_v56 }
 0x9bd   : > { %7866 = vmatpush3.bf16.msra.mxu1 %v9353_v31 }
 0x9be   : > { %7867 = vmatprep.subr.bf16.mxu1 %v9354_v6 }
 0x9bf   : > { %3946 = vmatmul.mubr.bf16.vlgmr.msra.gmra.mxu0 %v12065_v48 }
 0x9c0   : > { %7713 = vmatprep.mubr.msk.bf16.mxu0 %vm15345_vm9, %v15344_v20  ;;  %vm15367_vm9 = vcmask 1043456  }
 0x9c1   : > { %7868 = vmatpush3.bf16.msra.mxu1 %v9355_v11 }
 0x9c2   : > { %7869 = vmatprep.subr.bf16.mxu1 %v9356_v61 }
 0x9c5   : > { %7870 = vmatpush3.bf16.msra.mxu1 %v9357_v33 }
 0x9c6   : > { %4130 = vmatprep.subr.bf16.mxu1 %v15293_v42 }
 0x9c8   : > { %3987 = vmatmul.mubr.bf16.vlgmr.msra.gmra.mxu1 %v3825_v23  ;;  %v12232_v23 = vcombine.low %v7716_v15, %v7716_v15  ;;  %v9367_v15 = vld [vmem:[%s15104_s6 + $0x30] ss:$8 sps:$4 sm:$0xff]  }
 0x9c9   : > { %7714 = vmatprep.mubr.msk.bf16.mxu1 %vm15346_vm14, %v15344_v20  ;;  %vm15375_vm14 = vmmov %vm15367_vm9 }
 0xa5f   : > { %v3861_v17 = vpop.f32.mrf.mxu0 }
 0xa61   : > { %v3863_v18 = vpop.f32.mrf.mxu0 }
 0xa63   : > { %v3865_v49 = vpop.f32.mrf.mxu0 }
 0xa65   : > { %v3867_v62 = vpop.f32.mrf.mxu0 }
 0xa68   : > { %v3904_v44 = vpop.f32.mrf.mxu1 }
 0xa69   : > { %v3905_v37 = vadd.f32 %v3904_v44, %v3861_v17 }
 0xa6a   : > { %v3906_v50 = vpop.f32.mrf.mxu1 }
 0xa6b   : > { %v3907_v1 = vadd.f32 %v3906_v50, %v3863_v18  ;;  %v15364_v50 = vld [vmem:[#allocation10_spill] sm:$0xff] }
 0xa6c   : > { %v3908_v48 = vpop.f32.mrf.mxu1 }
 0xa6d   : > { %v3909_v53 = vadd.f32 %v3908_v48, %v3865_v49  ;;  %v15365_v48 = vld [vmem:[#allocation8_spill] sm:$0xff] }
 0xa6e   : > { %v3910_v16 = vpop.f32.mrf.mxu1 }
 0xa6f   : > { %v3911_v14 = vadd.f32 %v3910_v16, %v3867_v62  ;;  %v12189_v39 = vpack.c.bf16 %v3909_v53, %v3905_v37  ;;  %v9363_v53 = vld [vmem:[%s15104_s6 + $0x50] ss:$8 sps:$4 sm:$0xff]   ;;  %v9365_v37 = vld [vmem:[%s15104_s6 + $0x40] ss:$8 sps:$4 sm:$0xff]  }
 0xa71   : > { %v12183_v2 = vpack.c.bf16 %v3911_v14, %v3907_v1  ;;  %v9360_v14 = vld [vmem:[%s15104_s6 + $0x64] ss:$8 sps:$4 sm:$0xff]   ;;  %v9362_v1 = vld [vmem:[%s15104_s6 + $0x54] ss:$8 sps:$4 sm:$0xff]  }
 0xa7f   : > { %v7849_v25 = vpop.f32.mrf.mxu0 }
 0xa81   : > { %v7850_v22 = vpop.f32.mrf.mxu0 }
 0xa82   : > { %v7851_v58 = vadd.f32 %v7850_v22, %v7849_v25 }
 0xa83   : > { %v7852_v36 = vpop.f32.mrf.mxu0 }
 0xa85   : > { %v7853_v24 = vpop.f32.mrf.mxu0 }
 0xa86   : > { %v7854_v59 = vadd.f32 %v7853_v24, %v7852_v36 }
 0xa88   : > { %v7871_v52 = vpop.f32.mrf.mxu1 }
 0xa8a   : > { %v7872_v54 = vpop.f32.mrf.mxu1 }
 0xa8b   : > { %v7873_v4 = vadd.f32 %v7872_v54, %v7871_v52  ;;  %v15366_v52 = vld [vmem:[#allocation11_spill] sm:$0xff] }
 0xa8c   : > { %v7874_v9 = vpop.f32.mrf.mxu1 }
 0xa8d   : > { %v3989_v38 = vadd.f32 %v7873_v4, %v7851_v58 }
 0xa8e   : > { %v7875_v35 = vpop.f32.mrf.mxu1 }
 0xa8f   : > { %v7876_v29 = vadd.f32 %v7875_v35, %v7874_v9 }
 0xa91   : > { %v3992_v5 = vadd.f32 %v7876_v29, %v7854_v59 }
 0xa93   : > { %v12177_v63 = vpack.c.bf16 %v3992_v5, %v3989_v38  ;;  %v9358_v38 = vld [vmem:[%s15104_s6 + $0x74] ss:$8 sps:$4 sm:$0xff]   ;;  %v9359_v5 = vld [vmem:[%s15104_s6 + $0x70] ss:$8 sps:$4 sm:$0xff]  }
 0xa95   : > { %4060 = vrot.lane.b32.xlu1 %v12177_v63, %s15347_s14  ;;  %4071 = vrot.lane.b32.xlu0 %v12177_v63, %s15348_s0 }
 0xa99   : > { %4058 = vrot.lane.b32.xlu1 %v12183_v2, %s15347_s14  ;;  %4069 = vrot.lane.b32.xlu0 %v12183_v2, %s15348_s0 }
 0xa9d   : > { %4056 = vrot.lane.b32.xlu1 %v12189_v39, %s15347_s14  ;;  %4049 = vrot.lane.b32.xlu0 %v12177_v63, %s15349_s21 }
 0xaa1   : > { %4038 = vrot.lane.b32.xlu1 %v12177_v63, %s15350_s2  ;;  %4067 = vrot.lane.b32.xlu0 %v12189_v39, %s15348_s0 }
 0xaa5   : > { %4027 = vrot.lane.b32.xlu1 %v12177_v63, %s15351_s9  ;;  %4047 = vrot.lane.b32.xlu0 %v12183_v2, %s15349_s21 }
 0xaa9   : > { %4036 = vrot.lane.b32.xlu1 %v12183_v2, %s15350_s2  ;;  %4016 = vrot.lane.b32.xlu0 %v12177_v63, %s15352_s3 }
 0xaad   : > { %4005 = vrot.lane.b32.xlu1 %v12177_v63, %s15353_s4  ;;  %4045 = vrot.lane.b32.xlu0 %v12189_v39, %s15349_s21  ;;  %s15483_s21 = smov 24  }
 0xab1   : > { %4025 = vrot.lane.b32.xlu1 %v12183_v2, %s15351_s9  ;;  %4034 = vrot.lane.b32.xlu0 %v12189_v39, %s15350_s2  ;;  %s15511_s2 = smov 109  }
 0xab5   : > { %4082 = vrot.lane.b32.xlu1 %v12177_v63, %s15354_s13  ;;  %4023 = vrot.lane.b32.xlu0 %v12189_v39, %s15351_s9 }
 0xab9   : > { %4012 = vrot.lane.b32.xlu1 %v12189_v39, %s15352_s3  ;;  %4014 = vrot.lane.b32.xlu0 %v12183_v2, %s15352_s3 }
 0xabd   : > { %4001 = vrot.lane.b32.xlu1 %v12189_v39, %s15353_s4  ;;  %4003 = vrot.lane.b32.xlu0 %v12183_v2, %s15353_s4 }
 0xac1   : > { %4078 = vrot.lane.b32.xlu1 %v12189_v39, %s15354_s13  ;;  %4080 = vrot.lane.b32.xlu0 %v12183_v2, %s15354_s13  ;;  %s15480_s13 = smov 8  }
 0xac5   : > { %4549 = vrot.lane.b32.xlu1 %v12232_v23, %s15355_s7  ;;  %4551 = vrot.lane.b32.xlu0 %v12234_v21, %s15355_s7 }
 0xac9   : > { %4553 = vrot.lane.b32.xlu1 %v12243_v34, %s15355_s7  ;;  %4493 = vrot.lane.b32.xlu0 %v12234_v21, %s15357_s10 }
 0xacd   : > { %4495 = vrot.lane.b32.xlu1 %v12243_v34, %s15357_s10  ;;  %4522 = vrot.lane.b32.xlu0 %v12234_v21, %s15277_s11 }
 0xad1   : > { %4524 = vrot.lane.b32.xlu1 %v12243_v34, %s15277_s11  ;;  %4491 = vrot.lane.b32.xlu0 %v12232_v23, %s15357_s10 }
 0xad5   : > { %4520 = vrot.lane.b32.xlu1 %v12232_v23, %s15277_s11  ;;  %4439 = vrot.lane.b32.xlu0 %v12234_v21, %s15278_s26 }
 0xad9   : > { %4441 = vrot.lane.b32.xlu1 %v12243_v34, %s15278_s26  ;;  %4465 = vrot.lane.b32.xlu0 %v12234_v21, %s15347_s14 }
 0xadd   : > { %4467 = vrot.lane.b32.xlu1 %v12243_v34, %s15347_s14  ;;  %4437 = vrot.lane.b32.xlu0 %v12232_v23, %s15278_s26 }
 0xae1   : > { %4463 = vrot.lane.b32.xlu1 %v12232_v23, %s15347_s14  ;;  %4387 = vrot.lane.b32.xlu0 %v12234_v21, %s15352_s3 }
 0xae5   : > { %4389 = vrot.lane.b32.xlu1 %v12243_v34, %s15352_s3  ;;  %4413 = vrot.lane.b32.xlu0 %v12234_v21, %s15279_s17 }
 0xae9   : > { %4415 = vrot.lane.b32.xlu1 %v12243_v34, %s15279_s17 }
 0xb07   : > { %v4061_v27 = vpop.permute.xlu1 %4060  ;;  %v4072_v19 = vpop.permute.xlu0 %4071 }
 0xb08   : > { %4131 = vmatpush1.bf16.msra.mxu1 %v4072_v19 }
 0xb09   : > { %4132 = vmatprep.subr.bf16.mxu1 %v15293_v42 }
 0xb0b   : > { %v4059_v51 = vpop.permute.xlu1 %4058  ;;  %v4070_v60 = vpop.permute.xlu0 %4069 }
 0xb0c   : > { %4133 = vmatpush1.bf16.msra.mxu1 %v4061_v27  ;;  %v4074_v45 = vsel %vm15358_vm1, %v4070_v60, %v4072_v19  ;;  %v4063_v10 = vsel %vm518_vm5, %v4059_v51, %v4061_v27  ;;  %v9368_v27 = vld [vmem:[%s15104_s6 + $0x24] ss:$8 sps:$4 sm:$0xff]   ;;  %v9369_v19 = vld [vmem:[%s15104_s6 + $0x20] ss:$8 sps:$4 sm:$0xff]   ;;  %vm15380_vm1 = vcmask 482304  }
 0xb0d   : > { %4089 = vmatprep.subr.bf16.mxu0 %v4074_v45  ;;  %4134 = vmatprep.subr.bf16.mxu1 %v15293_v42  ;;  %v9372_v45 = vld [vmem:[%s15104_s6 + $0x4] ss:$8 sps:$4 sm:$0xff]  }
 0xb0f   : > { %v4057_v7 = vpop.permute.xlu1 %4056  ;;  %v4050_v0 = vpop.permute.xlu0 %4049 }
 0xb10   : > { %4135 = vmatpush1.bf16.msra.mxu1 %v4050_v0  ;;  %v4062_v40 = vsel %vm518_vm5, %v4057_v7, %v4059_v51  ;;  %v9370_v51 = vld [vmem:[%s15104_s6 + $0x14] ss:$8 sps:$4 sm:$0xff]   ;;  %v9373_v7 = vld [vmem:[%s15104_s6] ss:$8 sps:$4 sm:$0xff]  }
 0xb11   : > { %4136 = vmatprep.subr.bf16.mxu1 %v15293_v42 }
 0xb13   : > { %v4039_v26 = vpop.permute.xlu1 %4038  ;;  %v4068_v12 = vpop.permute.xlu0 %4067 }
 0xb14   : > { %v4073_v41 = vsel %vm15359_vm3, %v4068_v12, %v4070_v60  ;;  %4137 = vmatpush1.bf16.msra.mxu1 %v4039_v26  ;;  %v9371_v60 = vld [vmem:[%s15104_s6 + $0x10] ss:$8 sps:$4 sm:$0xff]   ;;  %v9376_v12 = vld [vmem:[%s15104_s6 + $0xe4] ss:$8 sps:$4 sm:$0xff]   ;;  %vm15381_vm3 = vmmov %vm15380_vm1 }
 0xb15   : > { %4090 = vmatpush1.bf16.msra.mxu0 %v4073_v41  ;;  %4138 = vmatprep.subr.bf16.mxu1 %v15293_v42  ;;  %v9377_v41 = vld [vmem:[%s15104_s6 + $0xe0] ss:$8 sps:$4 sm:$0xff]  }
 0xb16   : > { %4091 = vmatprep.subr.bf16.mxu0 %v4063_v10  ;;  %v9378_v10 = vld [vmem:[%s15104_s6 + $0xd4] ss:$8 sps:$4 sm:$0xff]  }
 0xb17   : > { %v4028_v13 = vpop.permute.xlu1 %4027  ;;  %v4048_v46 = vpop.permute.xlu0 %4047 }
 0xb18   : > { %4139 = vmatpush1.bf16.msra.mxu1 %v4028_v13  ;;  %v4052_v8 = vsel %vm15360_vm4, %v4048_v46, %v4050_v0  ;;  %v9374_v0 = vld [vmem:[%s15104_s6 + $0xf4] ss:$8 sps:$4 sm:$0xff]   ;;  %vm15382_vm4 = vcmask 105472  }
 0xb19   : > { %4092 = vmatpush1.bf16.msra.mxu0 %v4062_v40  ;;  %4140 = vmatprep.subr.bf16.mxu1 %v15293_v42  ;;  %v9381_v40 = vld [vmem:[%s15104_s6 + $0xc0] ss:$8 sps:$4 sm:$0xff]  }
 0xb1a   : > { %4093 = vmatprep.subr.bf16.mxu0 %v4052_v8  ;;  %v9382_v8 = vld [vmem:[%s15104_s6 + $0xb4] ss:$8 sps:$4 sm:$0xff]  }
 0xb1b   : > { %v4037_v55 = vpop.permute.xlu1 %4036  ;;  %v4017_v30 = vpop.permute.xlu0 %4016 }
 0xb1c   : > { %4141 = vmatpush1.bf16.msra.mxu1 %v4017_v30  ;;  %v4041_v11 = vsel %vm15362_vm10, %v4037_v55, %v4039_v26  ;;  %v9375_v26 = vld [vmem:[%s15104_s6 + $0xf0] ss:$8 sps:$4 sm:$0xff]   ;;  %vm15384_vm10 = vmmov %vm15380_vm1 }
 0xb1d   : > { %4142 = vmatprep.subr.bf16.mxu1 %v15293_v42 }
 0xb1f   : > { %v4006_v56 = vpop.permute.xlu1 %4005  ;;  %v4046_v31 = vpop.permute.xlu0 %4045 }
 0xb20   : > { %v4051_v6 = vsel %vm15361_vm11, %v4046_v31, %v4048_v46  ;;  %4143 = vmatpush1.bf16.msra.mxu1 %v4006_v56  ;;  %v9380_v46 = vld [vmem:[%s15104_s6 + $0xc4] ss:$8 sps:$4 sm:$0xff]   ;;  %v9386_v31 = vld [vmem:[%s15104_s6 + $0x94] ss:$8 sps:$4 sm:$0xff]   ;;  %vm15383_vm11 = vmmov %vm15367_vm9 }
 0xb21   : > { %4094 = vmatpush1.bf16.msra.mxu0 %v4051_v6  ;;  %4144 = vmatprep.subr.bf16.mxu1 %v15293_v42  ;;  %v9387_v6 = vld [vmem:[%s15104_s6 + $0x90] ss:$8 sps:$4 sm:$0xff]  }
 0xb22   : > { %4095 = vmatprep.subr.bf16.mxu0 %v4041_v11  ;;  %v9388_v11 = vld [vmem:[%s15104_s6 + $0x84] ss:$8 sps:$4 sm:$0xff]  }
 0xb23   : > { %v4026_v61 = vpop.permute.xlu1 %4025  ;;  %v4035_v33 = vpop.permute.xlu0 %4034 }
 0xb24   : > { %v4040_v17 = vsel %vm15363_vm7, %v4035_v33, %v4037_v55  ;;  %4145 = vmatpush1.bf16.msra.mxu1 %v12177_v63  ;;  %v4030_v18 = vsel %vm2268_vm13, %v4026_v61, %v4028_v13  ;;  %v9361_v63 = vld [vmem:[%s15104_s6 + $0x60] ss:$8 sps:$4 sm:$0xff]   ;;  %v9379_v13 = vld [vmem:[%s15104_s6 + $0xd0] ss:$8 sps:$4 sm:$0xff]   ;;  %vm15385_vm7 = vmmov %vm15367_vm9 }
 0xb25   : > { %4096 = vmatpush1.bf16.msra.mxu0 %v4040_v17  ;;  %4160 = vmatprep.subr.bf16.mxu1 %v15293_v42  ;;  %v9383_v55 = vld [vmem:[%s15104_s6 + $0xb0] ss:$8 sps:$4 sm:$0xff]  }
 0xb26   : > { %4097 = vmatprep.subr.bf16.mxu0 %v4030_v18 }
 0xb27   : > { %v4083_v49 = vpop.permute.xlu1 %4082  ;;  %v4024_v44 = vpop.permute.xlu0 %4023 }
 0xb28   : > { %v4029_v62 = vsel %vm2268_vm13, %v4024_v44, %v4026_v61  ;;  %4161 = vmatpush2.bf16.msra.mxu1 %v4083_v49  ;;  %v9389_v61 = vld [vmem:[%s15104_s6 + $0x80] ss:$8 sps:$4 sm:$0xff]  }
 0xb29   : > { %4098 = vmatpush1.bf16.msra.mxu0 %v4029_v62  ;;  %4268 = vmatprep.subr.bf16.mxu1 %v15364_v50 }
 0xb2b   : > { %v4013_v25 = vpop.permute.xlu1 %4012  ;;  %4163 = vmatmul.mubr.bf16.vlgmr.msra.gmra.mxu1 %v15365_v48  ;;  %v4015_v22 = vpop.permute.xlu0 %4014 }
 0xb2c   : > { %v4019_v16 = vsel %vm437_vm6, %v4015_v22, %v4017_v30  ;;  %v4018_v36 = vsel %vm437_vm6, %v4013_v25, %v4015_v22  ;;  %4269 = vmatpush1.bf16.msra.mxu1 %v15366_v52  ;;  %4286 = vmatprep.mubr.bf16.mxu1 %v15293_v42  ;;  %v9384_v30 = vld [vmem:[%s15104_s6 + $0xa4] ss:$8 sps:$4 sm:$0xff]  }
 0xb2d   : > { %4099 = vmatprep.subr.bf16.mxu0 %v4019_v16  ;;  %v15368_v16 = vld [vmem:[#allocation9_spill] sm:$0xff] }
 0xb2e   : > { %4100 = vmatpush1.bf16.msra.mxu0 %v4018_v36 }
 0xb2f   : > { %v4002_v54 = vpop.permute.xlu1 %4001  ;;  %v4004_v24 = vpop.permute.xlu0 %4003 }
 0xb30   : > { %v4008_v9 = vsel %vm410_vm8, %v4004_v24, %v4006_v56  ;;  %v4007_v4 = vsel %vm410_vm8, %v4002_v54, %v4004_v24  ;;  %v9385_v56 = vld [vmem:[%s15104_s6 + $0xa0] ss:$8 sps:$4 sm:$0xff]  }
 0xb31   : > { %4101 = vmatprep.subr.bf16.mxu0 %v4008_v9 }
 0xb32   : > { %4102 = vmatpush1.bf16.msra.mxu0 %v4007_v4 }
 0xb33   : > { %4103 = vmatprep.subr.bf16.mxu0 %v12183_v2  ;;  %v4081_v35 = vpop.permute.xlu0 %4080  ;;  %v4079_v58 = vpop.permute.xlu1 %4078  ;;  %v9364_v2 = vld [vmem:[%s15104_s6 + $0x44] ss:$8 sps:$4 sm:$0xff]  }
 0xb34   : > { %v4085_v59 = vsel %vm2327_vm15, %v4081_v35, %v4083_v49  ;;  %v4084_v29 = vsel %vm2327_vm15, %v4079_v58, %v4081_v35 }
 0xb36   : > { %4104 = vmatpush1.bf16.msra.mxu0 %v12189_v39  ;;  %v9366_v39 = vld [vmem:[%s15104_s6 + $0x34] ss:$8 sps:$4 sm:$0xff]  }
 0xb37   : > { %4119 = vmatprep.subr.bf16.mxu0 %v4085_v59  ;;  %v12409_v33 = vpop.permute.xlu1 %4549  ;;  %v12413_v18 = vpop.permute.xlu0 %4551 }
 0xb38   : > { %v4569_v28 = vsel %vm15234_vm0, %v12409_v33, %v12413_v18 }
 0xb3a   : > { %4120 = vmatpush2.bf16.msra.mxu0 %v4084_v29 }
 0xb3b   : > { %4213 = vmatprep.subr.bf16.mxu0 %v9358_v38  ;;  %v12411_v17 = vpop.permute.xlu1 %4553 }
 0xb3c   : > { %v4570_v49 = vsel %vm15234_vm0, %v12413_v18, %v12411_v17 }
 0xb3d   : > { %4122 = vmatmul.mubr.bf16.vlgmr.msra.gmra.mxu0 %v15365_v48  ;;  %7731 = vmatprep.subr.msk.bf16.mxu1 %vm15367_vm9, %v4570_v49  ;;  %vm15386_vm9 = vcmask 760832  }
 0xb3e   : > { %4214 = vmatpush1.bf16.msra.mxu0 %v9359_v5 }
 0xb3f   : > { %4215 = vmatprep.subr.bf16.mxu0 %v9360_v14  ;;  %v7718_v14 = vld [vmem:[%s9757_s19 + $0x60] sm:$0xff] }
 0xb42   : > { %4216 = vmatpush1.bf16.msra.mxu0 %v9361_v63  ;;  %v12440_v63 = vcombine.low %v7718_v14, %v7718_v14 }
 0xb43   : > { %4217 = vmatprep.subr.bf16.mxu0 %v9362_v1  ;;  %v12443_v1 = vld [vmem:[%s9757_s19 + $0x68] sm:$0xff] }
 0xb44   : > { %15369 = vst [vmem:[#allocation20_spill] sm:$0xff] %v12440_v63 }
 0xb46   : > { %4218 = vmatpush1.bf16.msra.mxu0 %v9363_v53  ;;  %v12451_v53 = vcombine.low %v12443_v1, %v12443_v1 }
 0xb47   : > { %4219 = vmatprep.subr.bf16.mxu0 %v9364_v2  ;;  %v12457_v2 = vcombine.high %v12237_v43, %v12237_v43  ;;  %v12511_v43 = vpop.permute.xlu1 %4495 }
 0xb48   : > { %15370 = vst [vmem:[#allocation14_spill] sm:$0xff] %v12451_v53 }
 0xb49   : > { %15371 = vst [vmem:[#allocation7_spill] sm:$0xff] %v12457_v2 }
 0xb4a   : > { %4220 = vmatpush1.bf16.msra.mxu0 %v9365_v37  ;;  %v12463_v37 = vcombine.high %v7718_v14, %v7718_v14 }
 0xb4b   : > { %4221 = vmatprep.subr.bf16.mxu0 %v9366_v39  ;;  %v12515_v39 = vpop.permute.xlu0 %4493 }
 0xb4e   : > { %4222 = vmatpush1.bf16.msra.mxu0 %v9367_v15  ;;  %v12517_v15 = vpop.permute.xlu1 %4524 }
 0xb4f   : > { %4223 = vmatprep.subr.bf16.mxu0 %v9368_v27  ;;  %v12519_v27 = vpop.permute.xlu0 %4522 }
 0xb52   : > { %4224 = vmatpush1.bf16.msra.mxu0 %v9369_v19  ;;  %v12521_v19 = vpop.permute.xlu1 %4520 }
 0xb53   : > { %4225 = vmatprep.subr.bf16.mxu0 %v9370_v51  ;;  %v12523_v51 = vpop.permute.xlu0 %4491 }
 0xb56   : > { %4226 = vmatpush1.bf16.msra.mxu0 %v9371_v60  ;;  %v12525_v60 = vpop.permute.xlu1 %4441 }
 0xb57   : > { %4227 = vmatprep.subr.bf16.mxu0 %v9372_v45  ;;  %v12527_v45 = vpop.permute.xlu0 %4439 }
 0xb5a   : > { %4228 = vmatpush1.bf16.msra.mxu0 %v9373_v7  ;;  %v12529_v7 = vpop.permute.xlu1 %4467 }
 0xb5b   : > { %4229 = vmatprep.subr.bf16.mxu0 %v9374_v0  ;;  %v12531_v0 = vpop.permute.xlu0 %4465 }
 0xb5e   : > { %4230 = vmatpush2.bf16.msra.mxu0 %v9375_v26  ;;  %v12533_v26 = vpop.permute.xlu1 %4463 }
 0xb5f   : > { %4231 = vmatprep.subr.bf16.mxu0 %v9376_v12  ;;  %v12535_v12 = vpop.permute.xlu0 %4437 }
 0xb62   : > { %4232 = vmatpush2.bf16.msra.mxu0 %v9377_v41  ;;  %v12537_v41 = vpop.permute.xlu1 %4389 }
 0xb63   : > { %4233 = vmatprep.subr.bf16.mxu0 %v9378_v10  ;;  %v12539_v10 = vpop.permute.xlu0 %4387 }
 0xb66   : > { %4234 = vmatpush2.bf16.msra.mxu0 %v9379_v13  ;;  %v12541_v13 = vpop.permute.xlu1 %4415 }
 0xb67   : > { %4235 = vmatprep.subr.bf16.mxu0 %v9380_v46  ;;  %v12543_v46 = vpop.permute.xlu0 %4413 }
 0xb6a   : > { %4236 = vmatpush2.bf16.msra.mxu0 %v9381_v40 }
 0xb6b   : > { %4237 = vmatprep.subr.bf16.mxu0 %v9382_v8 }
 0xb6e   : > { %4238 = vmatpush2.bf16.msra.mxu0 %v9383_v55 }
 0xb6f   : > { %4239 = vmatprep.subr.bf16.mxu0 %v9384_v30 }
 0xb72   : > { %4240 = vmatpush2.bf16.msra.mxu0 %v9385_v56 }
 0xb73   : > { %4241 = vmatprep.subr.bf16.mxu0 %v9386_v31 }
 0xb76   : > { %4242 = vmatpush2.bf16.msra.mxu0 %v9387_v6 }
 0xb77   : > { %4243 = vmatprep.subr.bf16.mxu0 %v9388_v11  ;;  %v7720_v11 = vld [vmem:[%s9757_s19 + $0x70] sm:$0xff] }
 0xb7a   : > { %4244 = vmatpush2.bf16.msra.mxu0 %v9389_v61 }
 0xbeb   : > { %v4164_v44 = vpop.f32.mrf.mxu1 }
 0xbec   : > { %v4165_v36 = vadd.f32 %v4164_v44, %v15368_v16 }
 0xbed   : > { %v4166_v62 = vpop.f32.mrf.mxu1 }
 0xbef   : > { %v4167_v25 = vpop.f32.mrf.mxu1 }
 0xbf1   : > { %v4168_v22 = vpop.f32.mrf.mxu1 }
 0xbf2   : > { %v12565_v22 = vcombine.low %v7720_v11, %v7720_v11 }
 0xbf4   : > { %15372 = vst [vmem:[#allocation17_spill] sm:$0xff] %v12565_v22 }
 0xbfd   : > { %v4123_v54 = vpop.f32.mrf.mxu0 }
 0xbfe   : > { %v4124_v24 = vadd.f32 %v4123_v54, %v15368_v16 }
 0xbff   : > { %v4125_v9 = vpop.f32.mrf.mxu0 }
 0xc00   : > { %9169 = vtanh.f32 %v4124_v24  ;;  %v4126_v4 = vadd.f32 %v4125_v9, %v15368_v16  ;;  %v12576_v24 = vcombine.high %v12443_v1, %v12443_v1 }
 0xc01   : > { %9171 = vtanh.f32 %v4165_v36  ;;  %v4127_v35 = vpop.f32.mrf.mxu0 }
 0xc02   : > { %9173 = vtanh.f32 %v4126_v4  ;;  %15373 = vst [vmem:[#allocation15_spill] sm:$0xff] %v12576_v24 }
 0xc03   : > { %v4128_v58 = vpop.f32.mrf.mxu0 }
 0xc04   : > { %v7730_v58 = vcombine.high %v7720_v11, %v7720_v11 }
 0xc0d   : > { %v12422_v59 = vpop.eup %9169 }
 0xc0e   : > { %v12424_v29 = vpop.eup %9171  ;;  %4176 = vrot.lane.b32.xlu1 %v12422_v59, %s15353_s4 }
 0xc0f   : > { %v12428_v38 = vpop.eup %9173 }
 0xc10   : > { %v8467_v5 = vpack.i.bf16 %v12428_v38, %v12424_v29 }
 0xc12   : > { %8468 = vrot.lane.b32.xlu0 %v8467_v5, %s15353_s4  ;;  %4411 = vrot.lane.b32.xlu1 %v12232_v23, %s15279_s17 }
 0xc16   : > { %4385 = vrot.lane.b32.xlu0 %v12232_v23, %s15352_s3  ;;  %4363 = vrot.lane.b32.xlu1 %v12243_v34, %s15353_s4 }
 0xc1a   : > { %4361 = vrot.lane.b32.xlu0 %v12234_v21, %s15353_s4  ;;  %4557 = vrot.lane.b32.xlu1 %v12440_v63, %s15355_s7 }
 0xc1e   : > { %4359 = vrot.lane.b32.xlu0 %v12232_v23, %s15353_s4  ;;  %4561 = vrot.lane.b32.xlu1 %v12451_v53, %s15355_s7 }
 0xc22   : > { %4555 = vrot.lane.b32.xlu0 %v12457_v2, %s15355_s7  ;;  %4499 = vrot.lane.b32.xlu1 %v12440_v63, %s15357_s10 }
 0xc26   : > { %4559 = vrot.lane.b32.xlu0 %v12463_v37, %s15355_s7  ;;  %4528 = vrot.lane.b32.xlu1 %v12440_v63, %s15277_s11 }
 0xc2a   : > { %4497 = vrot.lane.b32.xlu0 %v12457_v2, %s15357_s10  ;;  %4503 = vrot.lane.b32.xlu1 %v12451_v53, %s15357_s10 }
 0xc2e   : > { %4526 = vrot.lane.b32.xlu0 %v12457_v2, %s15277_s11  ;;  %4532 = vrot.lane.b32.xlu1 %v12451_v53, %s15277_s11 }
 0xc32   : > { %4501 = vrot.lane.b32.xlu0 %v12463_v37, %s15357_s10  ;;  %4445 = vrot.lane.b32.xlu1 %v12440_v63, %s15278_s26 }
 0xc36   : > { %4530 = vrot.lane.b32.xlu0 %v12463_v37, %s15277_s11  ;;  %4471 = vrot.lane.b32.xlu1 %v12440_v63, %s15347_s14 }
 0xc3a   : > { %4443 = vrot.lane.b32.xlu0 %v12457_v2, %s15278_s26  ;;  %4449 = vrot.lane.b32.xlu1 %v12451_v53, %s15278_s26 }
 0xc3e   : > { %4469 = vrot.lane.b32.xlu0 %v12457_v2, %s15347_s14  ;;  %4475 = vrot.lane.b32.xlu1 %v12451_v53, %s15347_s14 }
 0xc42   : > { %4447 = vrot.lane.b32.xlu0 %v12463_v37, %s15278_s26  ;;  %4393 = vrot.lane.b32.xlu1 %v12440_v63, %s15352_s3 }
 0xc46   : > { %4473 = vrot.lane.b32.xlu0 %v12463_v37, %s15347_s14  ;;  %4419 = vrot.lane.b32.xlu1 %v12440_v63, %s15279_s17 }
 0xc4a   : > { %4391 = vrot.lane.b32.xlu0 %v12457_v2, %s15352_s3  ;;  %4397 = vrot.lane.b32.xlu1 %v12451_v53, %s15352_s3 }
 0xc4e   : > { %4423 = vrot.lane.b32.xlu1 %v12451_v53, %s15279_s17 }
 0xc52   : > { %4367 = vrot.lane.b32.xlu1 %v12440_v63, %s15353_s4 }
 0xc56   : > { %4371 = vrot.lane.b32.xlu1 %v12451_v53, %s15353_s4 }
 0xc80   : > { %v4177_v40 = vpop.permute.xlu1 %4176 }
 0xc84   : > { %v8469_v8 = vpop.permute.xlu0 %8468  ;;  %v12551_v61 = vpop.permute.xlu1 %4411 }
 0xc85   : > { %v8471_v55 = vunpack.i.h.bf16 %v8469_v8  ;;  %v8470_v30 = vunpack.i.l.bf16 %v8469_v8 }
 0xc87   : > { %v4182_v56 = vsel %vm410_vm8, %v4177_v40, %v8471_v55  ;;  %v4183_v31 = vsel %vm410_vm8, %v8471_v55, %v8470_v30  ;;  %v12548_v6 = vmax.f32 %v12424_v29, %v8470_v30 }
 0xc88   : > { %v12554_v49 = vmax.f32 %v12428_v38, %v4183_v31  ;;  %v12556_v44 = vpop.permute.xlu0 %4385  ;;  %v12559_v62 = vmax.f32 %v12422_v59, %v4182_v56  ;;  %v12570_v54 = vpop.permute.xlu1 %4363 }
 0xc8a   : > { %4193 = vrot.lane.b32.xlu1 %v12559_v62, %s15351_s9  ;;  %v8472_v25 = vpack.i.bf16 %v12554_v49, %v12548_v6 }
 0xc8c   : > { %v12567_v36 = vpop.permute.xlu0 %4361  ;;  %8473 = vrot.lane.b32.xlu0 %v8472_v25, %s15351_s9  ;;  %v12584_v4 = vpop.permute.xlu1 %4557 }
 0xc8e   : > { %4565 = vrot.lane.b32.xlu1 %v12565_v22, %s15355_s7 }
 0xc90   : > { %v12578_v9 = vpop.permute.xlu0 %4359  ;;  %4417 = vrot.lane.b32.xlu0 %v12457_v2, %s15279_s17  ;;  %v12594_v29 = vpop.permute.xlu1 %4561 }
 0xc91   : > { %15374 = vst [vmem:[#allocation16_spill] sm:$0xff] %v12594_v29 }
 0xc92   : > { %4505 = vrot.lane.b32.xlu1 %v12576_v24, %s15357_s10 }
 0xc94   : > { %v12586_v35 = vpop.permute.xlu0 %4555  ;;  %4395 = vrot.lane.b32.xlu0 %v12463_v37, %s15352_s3  ;;  %v12617_v5 = vpop.permute.xlu1 %4499 }
 0xc96   : > { %4534 = vrot.lane.b32.xlu1 %v12576_v24, %s15277_s11 }
 0xc98   : > { %v4560_v59 = vpop.permute.xlu0 %4559  ;;  %4421 = vrot.lane.b32.xlu0 %v12463_v37, %s15279_s17  ;;  %v12623_v14 = vpop.permute.xlu1 %4528 }
 0xc99   : > { %v4574_v38 = vsel %vm15234_vm0, %v4560_v59, %v12594_v29 }
 0xc9a   : > { %4509 = vrot.lane.b32.xlu1 %v7730_v58, %s15357_s10  ;;  %7735 = vmatprep.subr.msk.bf16.mxu0 %vm15375_vm14, %v4574_v38  ;;  %vm15387_vm14 = vmmov %vm15385_vm7 }
 0xc9c   : > { %4365 = vrot.lane.b32.xlu0 %v12457_v2, %s15353_s4  ;;  %v12628_v1 = vpop.permute.xlu1 %4503  ;;  %v12642_v55 = vpop.permute.xlu0 %4497 }
 0xc9e   : > { %4451 = vrot.lane.b32.xlu1 %v12576_v24, %s15278_s26 }
 0xca0   : > { %4369 = vrot.lane.b32.xlu0 %v12463_v37, %s15353_s4  ;;  %v12632_v40 = vpop.permute.xlu1 %4532  ;;  %v12646_v56 = vpop.permute.xlu0 %4526 }
 0xca1   : > { %15376 = vst [vmem:[#allocation13_spill] sm:$0xff] %v12646_v56 }
 0xca2   : > { %4477 = vrot.lane.b32.xlu1 %v12576_v24, %s15347_s14 }
 0xca4   : > { %4563 = vrot.lane.b32.xlu0 %v12576_v24, %s15355_s7  ;;  %v12638_v8 = vpop.permute.xlu1 %4445  ;;  %v4502_v11 = vpop.permute.xlu0 %4501 }
 0xca5   : > { %v4516_v18 = vsel %vm549_vm2, %v4502_v11, %v12628_v1 }
 0xca6   : > { %4399 = vrot.lane.b32.xlu1 %v12576_v24, %s15352_s3 }
 0xca8   : > { %4567 = vrot.lane.b32.xlu0 %v7730_v58, %s15355_s7  ;;  %v12644_v30 = vpop.permute.xlu1 %4471 }
 0xcaa   : > { %4425 = vrot.lane.b32.xlu1 %v12576_v24, %s15279_s17 }
 0xcac   : > { %4507 = vrot.lane.b32.xlu0 %v12565_v22, %s15357_s10  ;;  %v12648_v31 = vpop.permute.xlu1 %4449 }
 0xcae   : > { %4373 = vrot.lane.b32.xlu1 %v12576_v24, %s15353_s4 }
 0xcb0   : > { %4536 = vrot.lane.b32.xlu0 %v12565_v22, %s15277_s11  ;;  %v12650_v25 = vpop.permute.xlu1 %4475 }
 0xcb4   : > { %4538 = vrot.lane.b32.xlu0 %v7730_v58, %s15277_s11  ;;  %v4531_v58 = vpop.permute.xlu0 %4530  ;;  %v12652_v38 = vpop.permute.xlu1 %4393 }
 0xcb8   : > { %4453 = vrot.lane.b32.xlu0 %v12565_v22, %s15278_s26  ;;  %v12654_v32 = vpop.permute.xlu0 %4443  ;;  %v12656_v47 = vpop.permute.xlu1 %4419 }
 0xcb9   : > { %15377 = vst [vmem:[#allocation21_spill] sm:$0xff] %v12654_v32 }
 0xcbc   : > { %4479 = vrot.lane.b32.xlu0 %v12565_v22, %s15347_s14  ;;  %v12658_v16 = vpop.permute.xlu0 %4469  ;;  %v12660_v52 = vpop.permute.xlu1 %4397 }
 0xcbd   : > { %15378 = vst [vmem:[#allocation22_spill] sm:$0xff] %v12658_v16 }
 0xcc0   : > { %4401 = vrot.lane.b32.xlu0 %v12565_v22, %s15352_s3  ;;  %v4448_v48 = vpop.permute.xlu0 %4447  ;;  %v12662_v50 = vpop.permute.xlu1 %4423 }
 0xcc4   : > { %4427 = vrot.lane.b32.xlu0 %v12565_v22, %s15279_s17  ;;  %v4474_v20 = vpop.permute.xlu0 %4473  ;;  %v12664_v57 = vpop.permute.xlu1 %4367 }
 0xcc8   : > { %4375 = vrot.lane.b32.xlu0 %v12565_v22, %s15353_s4  ;;  %v12666_v3 = vpop.permute.xlu0 %4391  ;;  %v12668_v53 = vpop.permute.xlu1 %4371 }
 0xcc9   : > { %15379 = vst [vmem:[#allocation23_spill] sm:$0xff] %v12666_v3 }
 0xcfc   : > { %v4194_v34 = vpop.permute.xlu1 %4193 }
 0xcfe   : > { %v8474_v24 = vpop.permute.xlu0 %8473 }
 0xcff   : > { %v8476_v22 = vunpack.i.h.bf16 %v8474_v24  ;;  %v8475_v29 = vunpack.i.l.bf16 %v8474_v24  ;;  %v4512_v24 = vsel %vm549_vm2, %v12515_v39, %v12511_v43 }
 0xd01   : > { %v4199_v2 = vsel %vm2268_vm13, %v4194_v34, %v8476_v22  ;;  %v4206_v16 = vmax.f32 %v12548_v6, %v8475_v29  ;;  %v4200_v32 = vsel %vm2268_vm13, %v8476_v22, %v8475_v29  ;;  %v4541_v34 = vsel %vm15380_vm1, %v12519_v27, %v12517_v15 }
 0xd02   : > { %v12676_v63 = vpop.permute.xlu0 %4417  ;;  %v4205_v3 = vmax.f32 %v12554_v49, %v4200_v32  ;;  %v4204_v56 = vmax.f32 %v12559_v62, %v4199_v2  ;;  %v4573_v22 = vsel %vm15234_vm0, %v12584_v4, %v4560_v59  ;;  %v4545_v32 = vsel %vm15381_vm3, %v4531_v58, %v12632_v40  ;;  %vm15388_vm3 = vmmov %vm15385_vm7 }
 0xd03   : > { %v4209_v6 = vpack.c.bf16 %v4206_v16, %v4206_v16  ;;  %v4723_v2 = vsel %vm15383_vm11, %v4569_v28, 0  ;;  %v4540_v49 = vsel %vm15384_vm10, %v12521_v19, %v12519_v27  ;;  %v4511_v16 = vsel %vm549_vm2, %v12523_v51, %v12515_v39  ;;  %vm15390_vm11 = vmmov %vm15388_vm3 }
 0xd04   : > { %v4208_v29 = vpack.c.bf16 %v4205_v3, %v4205_v3  ;;  %v4207_v33 = vpack.c.bf16 %v4204_v56, %v4204_v56  ;;  %v4692_v62 = vsel %vm15385_vm7, %v4512_v24, %v4541_v34  ;;  %v4456_v59 = vsel %vm15386_vm9, %v12527_v45, %v12525_v60  ;;  %v12707_v56 = vpop.permute.xlu1 %4565  ;;  %vm15392_vm7 = vmmov %vm15388_vm3 }
 0xd05   : > { %7715 = vmatmul.mubr.msk.bf16.vlgmr.msra.gmra.mxu1 %vm15382_vm4, %v4209_v6  ;;  %v4482_v28 = vsel %vm518_vm5, %v12531_v0, %v12529_v7  ;;  %v4735_v27 = vsel %vm15387_vm14, %v4573_v22, 0  ;;  %v4515_v39 = vsel %vm549_vm2, %v12617_v5, %v4502_v11  ;;  %v4544_v19 = vsel %vm15380_vm1, %v12623_v14, %v4531_v58  ;;  %vm15389_vm4 = vmmov %vm15386_vm9 }
 0xd06   : > { %4756 = vmatpush1.bf16.msra.mxu1 %v4723_v2  ;;  %v4396_v3 = vpop.permute.xlu0 %4395  ;;  %4245 = vmatprep.mubr.bf16.mxu0 %v4208_v29  ;;  %v4708_v51 = vsel %vm15388_vm3, %v4516_v18, %v4545_v32  ;;  %v4460_v24 = vsel %vm15389_vm4, %v4448_v48, %v12648_v31  ;;  %v4486_v34 = vsel %vm518_vm5, %v4474_v20, %v12650_v25  ;;  %vm15391_vm10 = vmmov %vm15389_vm4  ;;  %vm15393_vm9 = vcmask 769024  }
 0xd07   : > { %4757 = vmatprep.subr.bf16.mxu1 %v4692_v62  ;;  %4246 = vmatmul.mubr.bf16.vlgmr.msra.gmra.mxu0 %v4207_v33  ;;  %v4688_v6 = vsel %vm15390_vm11, %v4511_v16, %v4540_v49  ;;  %v4481_v11 = vsel %vm518_vm5, %v12533_v26, %v12531_v0  ;;  %v4455_v58 = vsel %vm15391_vm10, %v12535_v12, %v12527_v45  ;;  %vm15394_vm14 = vmmov %vm15388_vm3 }
 0xd08   : > { %4842 = vmatpush1.bf16.msra.mxu0 %v4735_v27  ;;  %4781 = vmatprep.mubr.bf16.mxu1 %v15293_v42  ;;  %v4656_v29 = vsel %vm15392_vm7, %v4456_v59, %v4482_v28  ;;  %v4404_v33 = vsel %vm437_vm6, %v12539_v10, %v12537_v41  ;;  %v4430_v18 = vsel %vm15393_vm9, %v12543_v46, %v12541_v13  ;;  %vm15395_vm1 = vmmov %vm15389_vm4  ;;  %v12741_v12 = vpop.permute.xlu1 %4505 }
 0xd09   : > { %4843 = vmatprep.subr.bf16.mxu0 %v4708_v51  ;;  %4867 = vmatprep.mubr.bf16.mxu0 %v15293_v42  ;;  %v4704_v32 = vsel %vm15394_vm14, %v4515_v39, %v4544_v19  ;;  %v4459_v0 = vsel %vm15395_vm1, %v12638_v8, %v4448_v48  ;;  %v4485_v45 = vsel %vm518_vm5, %v12644_v30, %v4474_v20  ;;  %vm15396_vm4 = vmmov %vm15393_vm9 }
 0xd0a   : > { %4758 = vmatpush1.bf16.msra.mxu1 %v4688_v6  ;;  %v4422_v22 = vpop.permute.xlu0 %4421  ;;  %v4672_v26 = vsel %vm15388_vm3, %v4460_v24, %v4486_v34  ;;  %vm15397_vm11 = vmmov %vm15388_vm3  ;;  %v4403_v16 = vsel %vm437_vm6, %v12556_v44, %v12539_v10  ;;  %v4378_v62 = vsel %vm410_vm8, %v12567_v36, %v12570_v54  ;;  %v4408_v59 = vsel %vm437_vm6, %v4396_v3, %v12660_v52 }
 0xd0b   : > { %4759 = vmatprep.subr.bf16.mxu1 %v4656_v29  ;;  %v4434_v2 = vsel %vm15396_vm4, %v4422_v22, %v12662_v50  ;;  %v4652_v49 = vsel %vm15397_vm11, %v4455_v58, %v4481_v11  ;;  %vm15398_vm10 = vmmov %vm15388_vm3  ;;  %v4377_v19 = vsel %vm410_vm8, %v12578_v9, %v12567_v36  ;;  %v4407_v51 = vsel %vm437_vm6, %v12652_v38, %v4396_v3 }
 0xd0c   : > { %4844 = vmatpush1.bf16.msra.mxu0 %v4704_v32  ;;  %v4620_v20 = vsel %vm15398_vm10, %v4404_v33, %v4430_v18  ;;  %vm15399_vm7 = vmmov %vm15388_vm3  ;;  %v4572_v58 = vsel %vm15234_vm0, %v12586_v35, %v12584_v4  ;;  %v12801_v18 = vld [vmem:[%s15099_s1] sm:$0xff]  }
 0xd0d   : > { %4845 = vmatprep.subr.bf16.mxu0 %v4672_v26  ;;  %v4668_v28 = vsel %vm15399_vm7, %v4459_v0, %v4485_v45  ;;  %vm15400_vm9 = vmmov %vm15396_vm4  ;;  %v15417_v0 = vld [vmem:[#allocation21_spill] sm:$0xff]  ;;  %v15419_v26 = vld [vmem:[#allocation22_spill] sm:$0xff] }
 0xd0e   : > { %4760 = vmatpush1.bf16.msra.mxu1 %v4652_v49  ;;  %v12749_v48 = vpop.permute.xlu0 %4365  ;;  %v4429_v27 = vsel %vm15400_vm9, %v12551_v61, %v12543_v46  ;;  %vm15401_vm14 = vmmov %vm15396_vm4  ;;  %v12772_v61 = vpop.permute.xlu1 %4534  ;;  %vm15409_vm9 = vcmask 482304  }
 0xd0f   : > { %4761 = vmatprep.subr.bf16.mxu1 %v4620_v20  ;;  %v4433_v10 = vsel %vm15401_vm14, %v12656_v47, %v4422_v22  ;;  %vm15402_vm1 = vmmov %vm15388_vm3  ;;  %v4514_v22 = vsel %vm549_vm2, %v12642_v55, %v12617_v5 }
 0xd10   : > { %4846 = vmatpush1.bf16.msra.mxu0 %v4668_v28  ;;  %v4636_v44 = vsel %vm15402_vm1, %v4408_v59, %v4434_v2  ;;  %vm15403_vm3 = vmmov %vm15402_vm1  ;;  %v4484_v2 = vsel %vm518_vm5, %v15419_v26, %v12644_v30  ;;  %v4483_v30 = vsel %vm518_vm5, %v12529_v7, %v15419_v26  ;;  %v15427_v28 = vld [vmem:[#allocation23_spill] sm:$0xff] }
 0xd11   : > { %4847 = vmatprep.subr.bf16.mxu0 %v4636_v44  ;;  %v4616_v39 = vsel %vm15403_vm3, %v4403_v16, %v4429_v27  ;;  %vm15404_vm4 = vmmov %vm15402_vm1  ;;  %vm15412_vm3 = vcmask 588800   ;;  %v4406_v7 = vsel %vm437_vm6, %v15427_v28, %v12652_v38 }
 0xd12   : > { %4762 = vmatpush1.bf16.msra.mxu1 %v4616_v39  ;;  %v4370_v24 = vpop.permute.xlu0 %4369  ;;  %v4584_v46 = vsel %vm15404_vm4, %v12234_v21, %v4378_v62  ;;  %vm15405_vm11 = vmmov %vm15402_vm1  ;;  %v4571_v21 = vsel %vm15234_vm0, %v12411_v17, %v12586_v35  ;;  %v4510_v17 = vpop.permute.xlu1 %4509  ;;  %v15414_v35 = vmov 0.0   ;;  %v4380_v39 = vsel %vm410_vm8, %v12749_v48, %v12664_v57 }
 0xd13   : > { %v4382_v34 = vsel %vm410_vm8, %v4370_v24, %v12668_v53  ;;  %4763 = vmatprep.subr.bf16.mxu1 %v4584_v46  ;;  %v4632_v6 = vsel %vm15405_vm11, %v4407_v51, %v4433_v10  ;;  %v4381_v11 = vsel %vm410_vm8, %v12664_v57, %v4370_v24  ;;  %vm15406_vm10 = vmmov %vm15402_vm1  ;;  %v15431_v51 = vld [vmem:[#allocation7_spill] sm:$0xff] }
 0xd14   : > { %4848 = vmatpush1.bf16.msra.mxu0 %v4632_v6  ;;  %v4600_v36 = vsel %vm15406_vm10, %v12463_v37, %v4382_v34  ;;  %vm15407_vm7 = vmmov %vm15402_vm1  ;;  %v15408_v37 = vld [vmem:[#allocation13_spill] sm:$0xff] }
 0xd15   : > { %v4580_v9 = vsel %vm15407_vm7, %v12232_v23, %v4377_v19  ;;  %4849 = vmatprep.subr.bf16.mxu0 %v4600_v36  ;;  %v4543_v29 = vsel %vm15409_vm9, %v15408_v37, %v12623_v14  ;;  %vm15410_vm14 = vmmov %vm15402_vm1  ;;  %v15411_v23 = vld [vmem:[#allocation20_spill] sm:$0xff]  ;;  %vm15418_vm7 = vcmask 760832  }
 0xd16   : > { %4764 = vmatpush1.bf16.msra.mxu1 %v4580_v9  ;;  %v4564_v3 = vpop.permute.xlu0 %4563  ;;  %v4596_v33 = vsel %vm15402_vm1, %v15411_v23, %v4381_v11  ;;  %vm15413_vm4 = vmmov %vm15402_vm1  ;;  %v4458_v45 = vsel %vm15418_vm7, %v15417_v0, %v12638_v8  ;;  %v15437_v11 = vld [vmem:[#allocation16_spill] sm:$0xff] }
 0xd17   : > { %7733 = vmatprep.subr.msk.bf16.mxu1 %vm15410_vm14, %v4572_v58  ;;  %v4729_v4 = vsel %vm15413_vm4, %v4571_v21, 0  ;;  %vm15415_vm11 = vmmov %vm15409_vm9  ;;  %v4575_v36 = vsel %vm15234_vm0, %v15437_v11, %v4564_v3  ;;  %v9413_v11 = vld [vmem:[%s15103_s5 + $0x1b0] ss:$12 sps:$4 sm:$0xff]  }
 0xd18   : > { %4850 = vmatpush1.bf16.msra.mxu0 %v4596_v33  ;;  %v4542_v5 = vsel %vm15415_vm11, %v12517_v15, %v15408_v37  ;;  %vm15416_vm10 = vmmov %vm15402_vm1  ;;  %v4513_v15 = vsel %vm549_vm2, %v12511_v43, %v12642_v55  ;;  %vm15425_vm11 = vcmask 769024   ;;  %v4452_v55 = vpop.permute.xlu1 %4451 }
 0xd19   : > { %7732 = vmatmul.mubr.msk.bf16.vlgmr.msra.gmra.mxu1 %vm15412_vm3, %v12801_v18  ;;  %8008 = vmatprep.subr.bf16.mxu0 %v15414_v35  ;;  %v4700_v32 = vsel %vm15416_vm10, %v4514_v22, %v4543_v29  ;;  %vm15420_vm9 = vmmov %vm15412_vm3  ;;  %v4432_v43 = vsel %vm15425_vm11, %v12676_v63, %v12656_v47 }
 0xd1a   : > { %4799 = vmatpush1.bf16.msra.mxu1 %v4729_v4  ;;  %v4568_v14 = vpop.permute.xlu0 %4567  ;;  %4824 = vmatprep.mubr.bf16.mxu1 %v15293_v42  ;;  %vm15421_vm14 = vmmov %vm15402_vm1  ;;  %vm15422_vm1 = vmmov 0  }
 0xd1b   : > { %v4577_v49 = vsel %vm15234_vm0, %v12707_v56, %v4568_v14  ;;  %4800 = vmatprep.subr.bf16.mxu1 %v4700_v32  ;;  %7736 = vmatmul.mubr.msk.bf16.vlgmr.msra.gmra.mxu0 %vm15420_vm9, %v12801_v18  ;;  %vm15423_vm3 = vmmov %vm15413_vm4 }
 0xd1c   : > { %v4747_v16 = vsel %vm15421_vm14, %v4577_v49, 0  ;;  %8018 = vmatprep.mubr.msk.bf16.mxu0 %vm15422_vm1, %v15414_v35  ;;  %v4696_v8 = vsel %vm15423_vm3, %v4513_v15, %v4542_v5  ;;  %vm15424_vm4 = vmmov %vm15423_vm3  ;;  %v4478_v38 = vpop.permute.xlu1 %4477 }
 0xd1d   : > { %8009 = vmatpush3.bf16.msra.mxu0 %v4747_v16  ;;  %v4664_v62 = vsel %vm15424_vm4, %v4458_v45, %v4484_v2  ;;  %vm15426_vm10 = vmmov %vm15418_vm7  ;;  %v4487_v5 = vsel %vm518_vm5, %v12650_v25, %v4478_v38 }
 0xd1e   : > { %4801 = vmatpush1.bf16.msra.mxu1 %v4696_v8  ;;  %v4508_v20 = vpop.permute.xlu0 %4507  ;;  %8010 = vmatprep.subr.bf16.mxu0 %v15414_v35  ;;  %v4457_v59 = vsel %vm15426_vm10, %v12525_v60, %v15417_v0  ;;  %vm15428_vm7 = vmmov %vm15423_vm3  ;;  %v4405_v60 = vsel %vm437_vm6, %v12537_v41, %v15427_v28  ;;  %v15435_v41 = vld [vmem:[#allocation19_spill] sm:$0xff]  ;;  %v9393_v28 = vld [vmem:[%s15103_s5 + $0x228] ss:$12 sps:$4 sm:$0xff]  }
 0xd1f   : > { %4802 = vmatprep.subr.bf16.mxu1 %v4664_v62  ;;  %v4660_v27 = vsel %vm15428_vm7, %v4457_v59, %v4483_v30  ;;  %vm15429_vm9 = vmmov %vm15425_vm11  ;;  %v4519_v46 = vsel %vm549_vm2, %v4508_v20, %v4510_v17  ;;  %vm15433_vm11 = vcmask 482304   ;;  %v4518_v58 = vsel %vm549_vm2, %v12741_v12, %v4508_v20  ;;  %v15453_v30 = vld [vmem:[#allocation17_spill] sm:$0xff] }
 0xd20   : > { %v4431_v10 = vsel %vm15429_vm9, %v12541_v13, %v12676_v63  ;;  %vm15430_vm14 = vmmov %vm15423_vm3  ;;  %v4379_v63 = vsel %vm410_vm8, %v12570_v54, %v12749_v48  ;;  %v4576_v48 = vsel %vm15234_vm0, %v4564_v3, %v12707_v56  ;;  %v4400_v9 = vpop.permute.xlu1 %4399  ;;  %v4517_v17 = vsel %vm549_vm2, %v12628_v1, %v12741_v12  ;;  %v9391_v59 = vld [vmem:[%s15103_s5 + $0x22c] ss:$12 sps:$4 sm:$0xff]  }
 0xd21   : > { %v4628_v47 = vsel %vm15430_vm14, %v4406_v7, %v4432_v43  ;;  %v4624_v19 = vsel %vm15423_vm3, %v4405_v60, %v4431_v10  ;;  %vm15432_vm4 = vmmov %vm15423_vm3  ;;  %v4409_v49 = vsel %vm437_vm6, %v12660_v52, %v4400_v9  ;;  %v15455_v52 = vld [vmem:[#allocation15_spill] sm:$0xff]  ;;  %v15457_v43 = vld [vmem:[#allocation14_spill] sm:$0xff] }
 0xd22   : > { %4803 = vmatpush1.bf16.msra.mxu1 %v4660_v27  ;;  %v4537_v44 = vpop.permute.xlu0 %4536  ;;  %v4592_v24 = vsel %vm15432_vm4, %v15431_v51, %v4380_v39  ;;  %vm15434_vm10 = vmmov %vm15423_vm3  ;;  %v4741_v22 = vsel %vm15432_vm4, %v4575_v36, 0  ;;  %v9394_v7 = vld [vmem:[%s15103_s5 + $0x214] ss:$12 sps:$4 sm:$0xff]   ;;  %v9400_v39 = vld [vmem:[%s15103_s5 + $0x7c] ss:$12 sps:$4 sm:$0xff]  }
 0xd23   : > { %4804 = vmatprep.subr.bf16.mxu1 %v4628_v47  ;;  %vm15436_vm7 = vmmov %vm15423_vm3  ;;  %v9395_v27 = vld [vmem:[%s15103_s5 + $0xa8] ss:$12 sps:$4 sm:$0xff]   ;;  %v9399_v47 = vld [vmem:[%s15103_s5 + $0x90] ss:$12 sps:$4 sm:$0xff]  }
 0xd24   : > { %v4588_v6 = vsel %vm15436_vm7, %v15435_v41, %v4379_v63  ;;  %vm15438_vm9 = vmmov %vm15433_vm11  ;;  %vm15443_vm7 = vcmask 760832   ;;  %v9396_v10 = vld [vmem:[%s15103_s5 + $0x94] ss:$12 sps:$4 sm:$0xff]   ;;  %v9401_v60 = vld [vmem:[%s15103_s5 + $0x1f8] ss:$12 sps:$4 sm:$0xff]  }
 0xd25   : > { %v4547_v21 = vsel %vm15438_vm9, %v12772_v61, %v4537_v44  ;;  %vm15439_vm14 = vmmov %vm15423_vm3  ;;  %vm15440_vm3 = vcmask 588800   ;;  %v9404_v63 = vld [vmem:[%s15103_s5 + $0x64] ss:$12 sps:$4 sm:$0xff]   ;;  %v9406_v51 = vld [vmem:[%s15103_s5 + $0x1cc] ss:$12 sps:$4 sm:$0xff]  }
 0xd26   : > { %4805 = vmatpush1.bf16.msra.mxu1 %v4624_v19  ;;  %v4539_v13 = vpop.permute.xlu0 %4538  ;;  %v9403_v19 = vld [vmem:[%s15103_s5 + $0x78] ss:$12 sps:$4 sm:$0xff]   ;;  %v9411_v41 = vld [vmem:[%s15103_s5 + $0x48] ss:$12 sps:$4 sm:$0xff]  }
 0xd27   : > { %v4548_v57 = vsel %vm15433_vm11, %v4537_v44, %v4539_v13  ;;  %4806 = vmatprep.subr.bf16.mxu1 %v4592_v24  ;;  %vm15441_vm11 = vmmov %vm15438_vm9  ;;  %v9397_v44 = vld [vmem:[%s15103_s5 + $0x210] ss:$12 sps:$4 sm:$0xff]   ;;  %v9405_v13 = vld [vmem:[%s15103_s5 + $0x1e0] ss:$12 sps:$4 sm:$0xff]  }
 0xd28   : > { %v4720_v34 = vsel %vm15434_vm10, %v4519_v46, %v4548_v57  ;;  %v4546_v56 = vsel %vm15441_vm11, %v12632_v40, %v12772_v61  ;;  %vm15442_vm10 = vmmov %vm15432_vm4  ;;  %v4426_v61 = vpop.permute.xlu1 %4425  ;;  %v9407_v24 = vld [vmem:[%s15103_s5 + $0x60] ss:$12 sps:$4 sm:$0xff]   ;;  %v9409_v57 = vld [vmem:[%s15103_s5 + $0x1c8] ss:$12 sps:$4 sm:$0xff]  }
 0xd29   : > { %8011 = vmatpush3.bf16.msra.mxu0 %v4720_v34  ;;  %v4716_v37 = vsel %vm15442_vm10, %v4518_v58, %v4547_v21  ;;  %vm15444_vm9 = vmmov %vm15432_vm4  ;;  %vm15449_vm10 = vcmask 769024   ;;  %v9408_v46 = vld [vmem:[%s15103_s5 + $0x4c] ss:$12 sps:$4 sm:$0xff]   ;;  %v9410_v34 = vld [vmem:[%s15103_s5 + $0x1b4] ss:$12 sps:$4 sm:$0xff]  }
 0xd2a   : > { %4807 = vmatpush1.bf16.msra.mxu1 %v4588_v6  ;;  %v4454_v54 = vpop.permute.xlu0 %4453  ;;  %8012 = vmatprep.subr.bf16.mxu0 %v15414_v35  ;;  %v4435_v1 = vsel %vm15449_vm10, %v12662_v50, %v4426_v61  ;;  %v9412_v6 = vld [vmem:[%s15103_s5 + $0x34] ss:$12 sps:$4 sm:$0xff]   ;;  %v9414_v36 = vld [vmem:[%s15103_s5 + $0x19c] ss:$12 sps:$4 sm:$0xff]   ;;  %v9418_v21 = vld [vmem:[%s15103_s5 + $0x184] ss:$12 sps:$4 sm:$0xff]  }
 0xd2b   : > { %7737 = vmatprep.subr.msk.bf16.mxu1 %vm15439_vm14, %v4576_v48  ;;  %v4462_v29 = vsel %vm15443_vm7, %v4452_v55, %v4454_v54  ;;  %vm15445_vm14 = vmmov %vm15432_vm4  ;;  %v9416_v48 = vld [vmem:[%s15103_s5 + $0x1c] ss:$12 sps:$4 sm:$0xff]   ;;  %v9419_v58 = vld [vmem:[%s15103_s5 + $0x18] ss:$12 sps:$4 sm:$0xff]  }
 0xd2c   : > { %v4374_v45 = vpop.permute.xlu1 %4373 }
 0xd2d   : > { %7734 = vmatmul.mubr.msk.bf16.vlgmr.msra.gmra.mxu1 %vm15440_vm3, %v12801_v18  ;;  %vm15446_vm3 = vmmov %vm15432_vm4  ;;  %v4383_v50 = vsel %vm410_vm8, %v12668_v53, %v4374_v45  ;;  %v9392_v53 = vld [vmem:[%s15103_s5 + $0xac] ss:$12 sps:$4 sm:$0xff]  }
 0xd2e   : > { %4885 = vmatpush1.bf16.msra.mxu1 %v4741_v22  ;;  %v4480_v3 = vpop.permute.xlu0 %4479  ;;  %4910 = vmatprep.mubr.bf16.mxu1 %v15293_v42  ;;  %v4712_v4 = vsel %vm15446_vm3, %v4517_v17, %v4546_v56  ;;  %vm15447_vm4 = vmmov %vm15443_vm7  ;;  %v4640_v15 = vsel %vm15446_vm3, %v4409_v49, %v4435_v1  ;;  %v9420_v22 = vld [vmem:[%s15103_s5 + $0x4] ss:$12 sps:$4 sm:$0xff]   ;;  %v9421_v56 = vld [vmem:[%s15103_s5 + $0x180] ss:$12 sps:$4 sm:$0xff]  }
 0xd2f   : > { %v4488_v23 = vsel %vm518_vm5, %v4478_v38, %v4480_v3  ;;  %4886 = vmatprep.subr.bf16.mxu1 %v4716_v37  ;;  %v4684_v33 = vsel %vm15444_vm9, %v4454_v54, %v4480_v3  ;;  %v4461_v32 = vsel %vm15447_vm4, %v12648_v31, %v4452_v55  ;;  %vm15448_vm11 = vmmov %vm15446_vm3  ;;  %v9402_v38 = vld [vmem:[%s15103_s5 + $0x1e4] ss:$12 sps:$4 sm:$0xff]   ;;  %v9422_v3 = vld [vmem:[%s15103_s5 + $0x2ec] ss:$12 sps:$4 sm:$0xff]  }
 0xd30   : > { %8013 = vmatpush3.bf16.msra.mxu0 %v4684_v33  ;;  %v4680_v40 = vsel %vm15445_vm14, %v4462_v29, %v4488_v23  ;;  %v4676_v0 = vsel %vm15448_vm11, %v4461_v32, %v4487_v5  ;;  %vm15450_vm7 = vmmov %vm15449_vm10  ;;  %v9415_v54 = vld [vmem:[%s15103_s5 + $0x30] ss:$12 sps:$4 sm:$0xff]   ;;  %v9423_v37 = vld [vmem:[%s15103_s5] ss:$12 sps:$4 sm:$0xff]  }
 0xd31   : > { %8014 = vmatprep.subr.bf16.mxu0 %v15414_v35  ;;  %vm15451_vm9 = vmmov %vm15446_vm3  ;;  %v9424_v29 = vld [vmem:[%s15103_s5 + $0x16c] ss:$12 sps:$4 sm:$0xff]   ;;  %v9425_v23 = vld [vmem:[%s15103_s5 + $0x2e8] ss:$12 sps:$4 sm:$0xff]  }
 0xd32   : > { %4887 = vmatpush1.bf16.msra.mxu1 %v4712_v4  ;;  %v4402_v14 = vpop.permute.xlu0 %4401  ;;  %vm15452_vm14 = vmmov %vm15446_vm3  ;;  %v9426_v33 = vld [vmem:[%s15103_s5 + $0x2d4] ss:$12 sps:$4 sm:$0xff]   ;;  %v9430_v4 = vld [vmem:[%s15103_s5 + $0x2bc] ss:$12 sps:$4 sm:$0xff]  }
 0xd33   : > { %4888 = vmatprep.subr.bf16.mxu1 %v4680_v40  ;;  %v4410_v26 = vsel %vm437_vm6, %v4400_v9, %v4402_v14  ;;  %vm15454_vm4 = vmmov %vm15446_vm3  ;;  %v9417_v9 = vld [vmem:[%s15103_s5 + $0x198] ss:$12 sps:$4 sm:$0xff]   ;;  %v9427_v17 = vld [vmem:[%s15103_s5 + $0x168] ss:$12 sps:$4 sm:$0xff]  }
 0xd34   : > { %vm15456_vm11 = vmmov %vm15446_vm3  ;;  %v9428_v40 = vld [vmem:[%s15103_s5 + $0x154] ss:$12 sps:$4 sm:$0xff]   ;;  %v9431_v5 = vld [vmem:[%s15103_s5 + $0x150] ss:$12 sps:$4 sm:$0xff]  }
 0xd35   : > { %vm15458_vm10 = vmmov %vm15446_vm3  ;;  %v9433_v32 = vld [vmem:[%s15103_s5 + $0x2b8] ss:$12 sps:$4 sm:$0xff]   ;;  %v9441_v49 = vld [vmem:[%s15103_s5 + $0x288] ss:$12 sps:$4 sm:$0xff]  }
 0xd36   : > { %4889 = vmatpush1.bf16.msra.mxu1 %v4676_v0  ;;  %v4428_v12 = vpop.permute.xlu0 %4427  ;;  %v4604_v55 = vsel %vm15458_vm10, %v15457_v43, %v4383_v50  ;;  %v9434_v0 = vld [vmem:[%s15103_s5 + $0x2a4] ss:$12 sps:$4 sm:$0xff]   ;;  %v9444_v50 = vld [vmem:[%s15103_s5 + $0xf4] ss:$12 sps:$4 sm:$0xff]  }
 0xd37   : > { %v4436_v2 = vsel %vm15450_vm7, %v4426_v61, %v4428_v12  ;;  %v4648_v25 = vsel %vm15451_vm9, %v4402_v14, %v4428_v12  ;;  %vm15459_vm7 = vcmask 588800   ;;  %v9429_v61 = vld [vmem:[%s15103_s5 + $0x2d0] ss:$12 sps:$4 sm:$0xff]   ;;  %v9435_v1 = vld [vmem:[%s15103_s5 + $0x138] ss:$12 sps:$4 sm:$0xff]  }
 0xd38   : > { %8015 = vmatpush3.bf16.msra.mxu0 %v4648_v25  ;;  %v4644_v31 = vsel %vm15452_vm14, %v4410_v26, %v4436_v2  ;;  %vm15460_vm9 = vmmov %vm15459_vm7  ;;  %v9432_v14 = vld [vmem:[%s15103_s5 + $0x13c] ss:$12 sps:$4 sm:$0xff]   ;;  %v9436_v12 = vld [vmem:[%s15103_s5 + $0x124] ss:$12 sps:$4 sm:$0xff]   ;;  %vm15465_vm14 = vcmask 769024  }
 0xd39   : > { %4890 = vmatprep.subr.bf16.mxu1 %v4644_v31  ;;  %8016 = vmatprep.subr.bf16.mxu0 %v15414_v35  ;;  %v9438_v26 = vld [vmem:[%s15103_s5 + $0x28c] ss:$12 sps:$4 sm:$0xff]   ;;  %v9442_v31 = vld [vmem:[%s15103_s5 + $0x274] ss:$12 sps:$4 sm:$0xff]   ;;  %vm15466_vm3 = vmmov %vm15465_vm14 }
 0xd3a   : > { %v4376_v16 = vpop.permute.xlu0 %4375  ;;  %4891 = vmatpush1.bf16.msra.mxu1 %v4640_v15  ;;  %v9439_v2 = vld [vmem:[%s15103_s5 + $0x120] ss:$12 sps:$4 sm:$0xff]   ;;  %v9443_v15 = vld [vmem:[%s15103_s5 + $0x108] ss:$12 sps:$4 sm:$0xff]   ;;  %v9451_v43 = vld [vmem:[%s15103_s5 + $0xd8] ss:$12 sps:$4 sm:$0xff]  }
 0xd3b   : > { %v4384_v8 = vsel %vm410_vm8, %v4374_v45, %v4376_v16  ;;  %v4612_v20 = vsel %vm15454_vm4, %v15453_v30, %v4376_v16  ;;  %v9437_v45 = vld [vmem:[%s15103_s5 + $0x2a0] ss:$12 sps:$4 sm:$0xff]   ;;  %v9445_v16 = vld [vmem:[%s15103_s5 + $0x270] ss:$12 sps:$4 sm:$0xff]   ;;  %vm15467_vm4 = vmmov %vm15466_vm3 }
 0xd3c   : > { %8017 = vmatpush3.bf16.msra.mxu0 %v4612_v20  ;;  %v4608_v62 = vsel %vm15456_vm11, %v15455_v52, %v4384_v8  ;;  %v9440_v25 = vld [vmem:[%s15103_s5 + $0x10c] ss:$12 sps:$4 sm:$0xff]   ;;  %v9446_v8 = vld [vmem:[%s15103_s5 + $0x25c] ss:$12 sps:$4 sm:$0xff]   ;;  %vm15468_vm11 = vmmov %vm15466_vm3 }
 0xd3d   : > { %4892 = vmatprep.subr.bf16.mxu1 %v4608_v62  ;;  %5395 = vmatprep.subr.bf16.mxu0 %v9391_v59  ;;  %v9447_v30 = vld [vmem:[%s15103_s5 + $0xf0] ss:$12 sps:$4 sm:$0xff]   ;;  %v9449_v52 = vld [vmem:[%s15103_s5 + $0x258] ss:$12 sps:$4 sm:$0xff]   ;;  %v9453_v59 = vld [vmem:[%s15103_s5 + $0x240] ss:$12 sps:$4 sm:$0xff]  }
 0xd3e   : > { %4893 = vmatpush1.bf16.msra.mxu1 %v4604_v55  ;;  %v9448_v20 = vld [vmem:[%s15103_s5 + $0xdc] ss:$12 sps:$4 sm:$0xff]   ;;  %v9450_v62 = vld [vmem:[%s15103_s5 + $0x244] ss:$12 sps:$4 sm:$0xff]   ;;  %vm15469_vm10 = vmmov %vm15466_vm3 }
 0xd3f   : > { %8019 = vmatmul.mubr.msk.bf16.vlgmr.msra.gmra.mxu0 %vm15459_vm7, %v12801_v18  ;;  %5352 = vmatprep.subr.bf16.mxu1 %v9392_v53  ;;  %v9452_v55 = vld [vmem:[%s15103_s5 + $0xc4] ss:$12 sps:$4 sm:$0xff]   ;;  %vm15470_vm7 = vmmov %vm15466_vm3 }
 0xd40   : > { %5396 = vmatpush1.bf16.msra.mxu0 %v9393_v28  ;;  %v9454_v53 = vld [vmem:[%s15103_s5 + $0x2f0] ss:$12 sps:$4 sm:$0xff]   ;;  %v9455_v28 = vld [vmem:[%s15103_s5 + $0xc0] ss:$12 sps:$4 sm:$0xff]  }
 0xd41   : > { %7738 = vmatmul.mubr.msk.bf16.vlgmr.msra.gmra.mxu1 %vm15460_vm9, %v12801_v18  ;;  %5397 = vmatprep.subr.bf16.mxu0 %v9394_v7  ;;  %v9398_v18 = vld [vmem:[%s15103_s5 + $0x1fc] ss:$12 sps:$4 sm:$0xff]   ;;  %vm15471_vm9 = vmmov %vm15466_vm3 }
 0xd42   : > { %5353 = vmatpush1.bf16.msra.mxu1 %v9395_v27  ;;  %v9456_v7 = vld [vmem:[%s15103_s5 + $0x170] ss:$12 sps:$4 sm:$0xff]  }
 0xd43   : > { %5354 = vmatprep.subr.bf16.mxu1 %v9396_v10 }
 0xd44   : > { %5398 = vmatpush1.bf16.msra.mxu0 %v9397_v44 }
 0xd45   : > { %5399 = vmatprep.subr.bf16.mxu0 %v9398_v18 }
 0xd46   : > { %5355 = vmatpush1.bf16.msra.mxu1 %v9399_v47 }
 0xd47   : > { %5356 = vmatprep.subr.bf16.mxu1 %v9400_v39 }
 0xd48   : > { %5400 = vmatpush1.bf16.msra.mxu0 %v9401_v60 }
 0xd49   : > { %5401 = vmatprep.subr.bf16.mxu0 %v9402_v38 }
 0xd4a   : > { %5357 = vmatpush1.bf16.msra.mxu1 %v9403_v19 }
 0xd4b   : > { %5358 = vmatprep.subr.bf16.mxu1 %v9404_v63 }
 0xd4c   : > { %5402 = vmatpush1.bf16.msra.mxu0 %v9405_v13 }
 0xd4d   : > { %5403 = vmatprep.subr.bf16.mxu0 %v9406_v51  ;;  %v15463_v51 = vld [vmem:[#allocation4_spill] sm:$0xff] }
 0xd4e   : > { %5359 = vmatpush1.bf16.msra.mxu1 %v9407_v24 }
 0xd4f   : > { %5360 = vmatprep.subr.bf16.mxu1 %v9408_v46 }
 0xd50   : > { %5404 = vmatpush1.bf16.msra.mxu0 %v9409_v57 }
 0xd51   : > { %5405 = vmatprep.subr.bf16.mxu0 %v9410_v34 }
 0xd52   : > { %5361 = vmatpush1.bf16.msra.mxu1 %v9411_v41 }
 0xd53   : > { %5362 = vmatprep.subr.bf16.mxu1 %v9412_v6  ;;  %v15464_v6 = vld [vmem:[#allocation5_spill] sm:$0xff] }
 0xd54   : > { %5406 = vmatpush1.bf16.msra.mxu0 %v9413_v11 }
 0xd55   : > { %5407 = vmatprep.subr.bf16.mxu0 %v9414_v36 }
 0xd56   : > { %5363 = vmatpush1.bf16.msra.mxu1 %v9415_v54 }
 0xd57   : > { %5364 = vmatprep.subr.bf16.mxu1 %v9416_v48 }
 0xd58   : > { %5408 = vmatpush1.bf16.msra.mxu0 %v9417_v9 }
 0xd59   : > { %5409 = vmatprep.subr.bf16.mxu0 %v9418_v21 }
 0xd5a   : > { %5365 = vmatpush1.bf16.msra.mxu1 %v9419_v58 }
 0xd5b   : > { %5366 = vmatprep.subr.bf16.mxu1 %v9420_v22 }
 0xd5c   : > { %5410 = vmatpush1.bf16.msra.mxu0 %v9421_v56 }
 0xd5d   : > { %5411 = vmatprep.subr.bf16.mxu0 %v9422_v3 }
 0xd5e   : > { %5367 = vmatpush1.bf16.msra.mxu1 %v9423_v37 }
 0xd5f   : > { %5368 = vmatprep.subr.bf16.mxu1 %v9424_v29 }
 0xd60   : > { %5412 = vmatpush2.bf16.msra.mxu0 %v9425_v23 }
 0xd61   : > { %5413 = vmatprep.subr.bf16.mxu0 %v9426_v33 }
 0xd62   : > { %5369 = vmatpush2.bf16.msra.mxu1 %v9427_v17 }
 0xd63   : > { %5370 = vmatprep.subr.bf16.mxu1 %v9428_v40 }
 0xd64   : > { %5414 = vmatpush2.bf16.msra.mxu0 %v9429_v61 }
 0xd65   : > { %5415 = vmatprep.subr.bf16.mxu0 %v9430_v4 }
 0xd66   : > { %5371 = vmatpush2.bf16.msra.mxu1 %v9431_v5 }
 0xd67   : > { %5372 = vmatprep.subr.bf16.mxu1 %v9432_v14 }
 0xd68   : > { %5416 = vmatpush2.bf16.msra.mxu0 %v9433_v32 }
 0xd69   : > { %5417 = vmatprep.subr.bf16.mxu0 %v9434_v0 }
 0xd6a   : > { %5373 = vmatpush2.bf16.msra.mxu1 %v9435_v1 }
 0xd6b   : > { %5374 = vmatprep.subr.bf16.mxu1 %v9436_v12 }
 0xd6c   : > { %5418 = vmatpush2.bf16.msra.mxu0 %v9437_v45 }
 0xd6d   : > { %5419 = vmatprep.subr.bf16.mxu0 %v9438_v26 }
 0xd6e   : > { %5375 = vmatpush2.bf16.msra.mxu1 %v9439_v2 }
 0xd6f   : > { %5376 = vmatprep.subr.bf16.mxu1 %v9440_v25 }
 0xd70   : > { %5420 = vmatpush2.bf16.msra.mxu0 %v9441_v49 }
 0xd71   : > { %5421 = vmatprep.subr.bf16.mxu0 %v9442_v31 }
 0xd72   : > { %5377 = vmatpush2.bf16.msra.mxu1 %v9443_v15 }
 0xd73   : > { %5378 = vmatprep.subr.bf16.mxu1 %v9444_v50 }
 0xd74   : > { %5422 = vmatpush2.bf16.msra.mxu0 %v9445_v16 }
 0xd75   : > { %5423 = vmatprep.subr.bf16.mxu0 %v9446_v8 }
 0xd76   : > { %5379 = vmatpush2.bf16.msra.mxu1 %v9447_v30 }
 0xd77   : > { %5380 = vmatprep.subr.bf16.mxu1 %v9448_v20 }
 0xd78   : > { %5424 = vmatpush2.bf16.msra.mxu0 %v9449_v52 }
 0xd79   : > { %5425 = vmatprep.subr.bf16.mxu0 %v9450_v62 }
 0xd7a   : > { %5381 = vmatpush2.bf16.msra.mxu1 %v9451_v43 }
 0xd7b   : > { %5382 = vmatprep.subr.bf16.mxu1 %v9452_v55 }
 0xd7c   : > { %5426 = vmatpush2.bf16.msra.mxu0 %v9453_v59 }
 0xd7d   : > { %7905 = vmatprep.subr.bf16.mxu0 %v9454_v53 }
 0xd7e   : > { %5383 = vmatpush2.bf16.msra.mxu1 %v9455_v28 }
 0xd7f   : > { %7883 = vmatprep.subr.bf16.mxu1 %v9456_v7 }
 0xdc5   : > { %v4288_v27 = vpop.f32.mrf.mxu1 }
 0xdc7   : > { %v4247_v10 = vpop.f32.mrf.mxu0  ;;  %v4290_v44 = vpop.f32.mrf.mxu1 }
 0xdc8   : > { %v13118_v18 = vadd.f32 %v4288_v27, %v4247_v10 }
 0xdc9   : > { %v4249_v47 = vpop.f32.mrf.mxu0  ;;  %v4292_v39 = vpop.f32.mrf.mxu1 }
 0xdca   : > { %15461 = vst [vmem:[#allocation13_spill] sm:$0xff] %v13118_v18  ;;  %v13120_v60 = vadd.f32 %v4290_v44, %v4249_v47 }
 0xdcb   : > { %v4251_v38 = vpop.f32.mrf.mxu0  ;;  %v4293_v19 = vpop.f32.mrf.mxu1 }
 0xdcc   : > { %15462 = vst [vmem:[#allocation20_spill] sm:$0xff] %v13120_v60 }
 0xdcd   : > { %v4252_v63 = vpop.f32.mrf.mxu0 }
 0xdd9   : > { %v4783_v34 = vpop.f32.mrf.mxu1 }
 0xdda   : > { %v4784_v55 = vadd.f32 %v4783_v34, %v15463_v51 }
 0xddb   : > { %v4869_v13 = vpop.f32.mrf.mxu0  ;;  %v4785_v48 = vpop.f32.mrf.mxu1 }
 0xddc   : > { %v4870_v24 = vadd.f32 %v4869_v13, %v15463_v51  ;;  %v4786_v12 = vadd.f32 %v4785_v48, %v15463_v51 }
 0xddd   : > { %v4871_v46 = vpop.f32.mrf.mxu0  ;;  %v4787_v9 = vpop.f32.mrf.mxu1 }
 0xdde   : > { %v4872_v57 = vadd.f32 %v4871_v46, %v15463_v51  ;;  %9175 = vtanh.f32 %v4870_v24  ;;  %v4788_v7 = vadd.f32 %v4787_v9, %v15464_v6 }
 0xddf   : > { %v4873_v41 = vpop.f32.mrf.mxu0  ;;  %v4789_v21 = vpop.f32.mrf.mxu1 }
 0xde0   : > { %v4874_v11 = vadd.f32 %v4873_v41, %v15464_v6  ;;  %9177 = vtanh.f32 %v4872_v57  ;;  %v4790_v53 = vadd.f32 %v4789_v21, %v15464_v6 }
 0xde1   : > { %v4875_v36 = vpop.f32.mrf.mxu0 }
 0xde2   : > { %v4876_v54 = vadd.f32 %v4875_v36, %v15464_v6  ;;  %9179 = vtanh.f32 %v4874_v11 }
 0xde4   : > { %9181 = vtanh.f32 %v4876_v54 }
 0xdeb   : > { %v13126_v58 = vpop.eup %9175 }
 0xded   : > { %v4826_v22 = vpop.f32.mrf.mxu1  ;;  %v13128_v56 = vpop.eup %9177 }
 0xdee   : > { %v4827_v3 = vadd.f32 %v4826_v22, %v15463_v51  ;;  %v8477_v29 = vpack.i.bf16 %v13128_v56, %v13126_v58 }
 0xdef   : > { %v4828_v37 = vpop.f32.mrf.mxu1  ;;  %v13133_v23 = vpop.eup %9179 }
 0xdf0   : > { %v4829_v33 = vadd.f32 %v4828_v37, %v15463_v51  ;;  %9183 = vtanh.f32 %v4827_v3  ;;  %8478 = vrot.lane.b32.xlu1 %v8477_v29, %s15353_s4 }
 0xdf1   : > { %v13136_v17 = vpop.eup %9181  ;;  %v4830_v40 = vpop.f32.mrf.mxu1 }
 0xdf2   : > { %9185 = vtanh.f32 %v4829_v33  ;;  %v4831_v61 = vadd.f32 %v4830_v40, %v15464_v6  ;;  %v8482_v4 = vpack.i.bf16 %v13136_v17, %v13133_v23 }
 0xdf3   : > { %v4832_v5 = vpop.f32.mrf.mxu1 }
 0xdf4   : > { %v4833_v14 = vadd.f32 %v4832_v5, %v15464_v6  ;;  %9187 = vtanh.f32 %v4831_v61  ;;  %8483 = vrot.lane.b32.xlu1 %v8482_v4, %s15353_s4 }
 0xdf6   : > { %9189 = vtanh.f32 %v4833_v14 }
 0xdf7   : > { %9191 = vtanh.f32 %v4786_v12 }
 0xdfd   : > { %v13144_v32 = vpop.eup %9183 }
 0xdff   : > { %v13146_v0 = vpop.eup %9185  ;;  %v4955_v1 = vpop.f32.mrf.mxu0 }
 0xe00   : > { %v8487_v45 = vpack.i.bf16 %v13146_v0, %v13144_v32  ;;  %v4956_v15 = vadd.f32 %v4955_v1, %v15463_v51 }
 0xe01   : > { %v4912_v26 = vpop.f32.mrf.mxu1  ;;  %v8020_v2 = vpop.f32.mrf.mxu0 }
 0xe02   : > { %v13151_v25 = vpop.eup %9187  ;;  %v4913_v49 = vadd.f32 %v4912_v26, %v15463_v51  ;;  %8488 = vrot.lane.b32.xlu0 %v8487_v45, %s15353_s4 }
 0xe03   : > { %v13155_v31 = vpop.eup %9189  ;;  %v4914_v50 = vpop.f32.mrf.mxu1 }
 0xe04   : > { %v4958_v16 = vpop.f32.mrf.mxu0  ;;  %v4915_v8 = vadd.f32 %v4914_v50, %v15463_v51  ;;  %v8492_v30 = vpack.i.bf16 %v13155_v31, %v13151_v25  ;;  %9193 = vtanh.f32 %v4913_v49  ;;  %v13168_v27 = vpop.eup %9191 }
 0xe05   : > { %v4959_v20 = vadd.f32 %v4958_v16, %v15464_v6  ;;  %v4916_v52 = vpop.f32.mrf.mxu1 }
 0xe06   : > { %v8021_v62 = vpop.f32.mrf.mxu0  ;;  %9195 = vtanh.f32 %v4915_v8  ;;  %v4917_v43 = vadd.f32 %v4916_v52, %v15464_v6  ;;  %8493 = vrot.lane.b32.xlu0 %v8492_v30, %s15353_s4 }
 0xe07   : > { %9197 = vtanh.f32 %v4956_v15  ;;  %v4918_v59 = vpop.f32.mrf.mxu1 }
 0xe08   : > { %9199 = vtanh.f32 %v4917_v43  ;;  %v4919_v28 = vadd.f32 %v4918_v59, %v15464_v6 }
 0xe09   : > { %9201 = vtanh.f32 %v4959_v20 }
 0xe0a   : > { %9203 = vtanh.f32 %v4919_v28 }
 0xe0b   : > { %9205 = vtanh.f32 %v4784_v55 }
 0xe0c   : > { %9207 = vtanh.f32 %v4790_v53 }
 0xe0d   : > { %9209 = vtanh.f32 %v4788_v7 }
 0xe11   : > { %v13170_v10 = vpop.eup %9193 }
 0xe13   : > { %v9196_v44 = vpop.eup %9195 }
 0xe14   : > { %v13172_v47 = vpop.eup %9197  ;;  %v8497_v39 = vpack.i.bf16 %v9196_v44, %v13170_v10 }
 0xe15   : > { %v13175_v38 = vpop.eup %9199 }
 0xe16   : > { %v13177_v19 = vpop.eup %9201  ;;  %8498 = vrot.lane.b32.xlu1 %v8497_v39, %s15353_s4  ;;  %v8502_v63 = vpack.i.bf16 %v13175_v38, %v13172_v47 }
 0xe17   : > { %v13182_v13 = vpop.eup %9203 }
 0xe18   : > { %v13184_v24 = vpop.eup %9205  ;;  %8503 = vrot.lane.b32.xlu0 %v8502_v63, %s15353_s4  ;;  %v8512_v46 = vpack.i.bf16 %v13177_v19, %v13182_v13 }
 0xe19   : > { %v13189_v57 = vpop.eup %9207  ;;  %v8507_v34 = vpack.i.bf16 %v13168_v27, %v13184_v24 }
 0xe1a   : > { %8513 = vrot.lane.b32.xlu1 %v8512_v46, %s15353_s4  ;;  %v13194_v41 = vpop.eup %9209 }
 0xe1b   : > { %v8517_v11 = vpack.i.bf16 %v13189_v57, %v13194_v41 }
 0xe1c   : > { %8508 = vrot.lane.b32.xlu0 %v8507_v34, %s15353_s4 }
 0xe1e   : > { %8518 = vrot.lane.b32.xlu1 %v8517_v11, %s15353_s4 }
 0xe62   : > { %v8479_v36 = vpop.permute.xlu1 %8478 }
 0xe63   : > { %v8480_v48 = vunpack.i.l.bf16 %v8479_v36  ;;  %v8481_v26 = vunpack.i.h.bf16 %v8479_v36 }
 0xe65   : > { %v5038_v49 = vsel %vm410_vm8, %v8480_v48, %v8481_v26 }
 0xe66   : > { %v8484_v22 = vpop.permute.xlu1 %8483 }
 0xe67   : > { %v8485_v61 = vunpack.i.l.bf16 %v8484_v22  ;;  %v8486_v20 = vunpack.i.h.bf16 %v8484_v22 }
 0xe74   : > { %v8489_v54 = vpop.permute.xlu0 %8488 }
 0xe75   : > { %v8491_v9 = vunpack.i.h.bf16 %v8489_v54  ;;  %v8490_v21 = vunpack.i.l.bf16 %v8489_v54 }
 0xe77   : > { %v5036_v3 = vsel %vm410_vm8, %v8490_v21, %v8491_v9  ;;  %v5037_v37 = vsel %vm410_vm8, %v8491_v9, %v8480_v48 }
 0xe78   : > { %v13203_v29 = vmax.f32 %v13144_v32, %v5036_v3  ;;  %v13206_v33 = vmax.f32 %v13146_v0, %v5037_v37  ;;  %v8494_v40 = vpop.permute.xlu0 %8493 }
 0xe79   : > { %v8496_v4 = vunpack.i.h.bf16 %v8494_v40  ;;  %v8495_v5 = vunpack.i.l.bf16 %v8494_v40 }
 0xe7a   : > { %v8522_v14 = vpack.i.bf16 %v13206_v33, %v13203_v29 }
 0xe7b   : > { %v5044_v1 = vsel %vm410_vm8, %v8495_v5, %v8496_v4  ;;  %v5045_v12 = vsel %vm410_vm8, %v8496_v4, %v8485_v61 }
 0xe7c   : > { %v13213_v45 = vmax.f32 %v13151_v25, %v5044_v1  ;;  %v13216_v32 = vmax.f32 %v13155_v31, %v5045_v12  ;;  %8523 = vrot.lane.b32.xlu1 %v8522_v14, %s15279_s17  ;;  %v13225_v31 = vmax.f32 %v13126_v58, %v5038_v49 }
 0xe7e   : > { %v8527_v0 = vpack.i.bf16 %v13216_v32, %v13213_v45 }
 0xe80   : > { %8528 = vrot.lane.b32.xlu1 %v8527_v0, %s15279_s17 }
 0xe88   : > { %v8499_v2 = vpop.permute.xlu1 %8498 }
 0xe89   : > { %v8501_v15 = vunpack.i.h.bf16 %v8499_v2  ;;  %v8500_v50 = vunpack.i.l.bf16 %v8499_v2 }
 0xe8a   : > { %v8504_v16 = vpop.permute.xlu0 %8503 }
 0xe8b   : > { %v5039_v25 = vsel %vm410_vm8, %v8481_v26, %v8500_v50  ;;  %v8506_v8 = vunpack.i.h.bf16 %v8504_v16  ;;  %v8505_v30 = vunpack.i.l.bf16 %v8504_v16  ;;  %v5040_v43 = vsel %vm410_vm8, %v8500_v50, %v8501_v15 }
 0xe8c   : > { %v13228_v52 = vmax.f32 %v13128_v56, %v5039_v25  ;;  %v8514_v62 = vpop.permute.xlu1 %8513  ;;  %v5046_v56 = vsel %vm410_vm8, %v8485_v61, %v8486_v20  ;;  %v13239_v34 = vmax.f32 %v13170_v10, %v5040_v43 }
 0xe8d   : > { %v5041_v55 = vsel %vm410_vm8, %v8501_v15, %v8505_v30  ;;  %v8516_v53 = vunpack.i.h.bf16 %v8514_v62  ;;  %v8515_v28 = vunpack.i.l.bf16 %v8514_v62  ;;  %v5047_v58 = vsel %vm410_vm8, %v8486_v20, %v8506_v8 }
 0xe8e   : > { %v13232_v59 = vmax.f32 %v9196_v44, %v5041_v55  ;;  %v8509_v7 = vpop.permute.xlu0 %8508  ;;  %v8532_v39 = vpack.i.bf16 %v13228_v52, %v13225_v31  ;;  %v13244_v44 = vmax.f32 %v13172_v47, %v8505_v30  ;;  %v13252_v22 = vmax.f32 %v13136_v17, %v5047_v58 }
 0xe8f   : > { %v8511_v63 = vunpack.i.h.bf16 %v8509_v7  ;;  %v8510_v46 = vunpack.i.l.bf16 %v8509_v7  ;;  %v5048_v11 = vsel %vm410_vm8, %v8506_v8, %v8515_v28  ;;  %v5049_v10 = vsel %vm410_vm8, %v8515_v28, %v8516_v53 }
 0xe90   : > { %v8519_v36 = vpop.permute.xlu1 %8518  ;;  %8533 = vrot.lane.b32.xlu0 %v8532_v39, %s15279_s17  ;;  %v13247_v54 = vmax.f32 %v13175_v38, %v5048_v11  ;;  %v8537_v37 = vpack.i.bf16 %v13232_v59, %v13239_v34  ;;  %v13266_v61 = vmax.f32 %v13133_v23, %v5046_v56  ;;  %v13271_v17 = vmax.f32 %v13177_v19, %v8516_v53 }
 0xe91   : > { %v5035_v48 = vsel %vm410_vm8, %v8511_v63, %v8490_v21  ;;  %v5034_v9 = vsel %vm410_vm8, %v8510_v46, %v8511_v63  ;;  %v8521_v38 = vunpack.i.h.bf16 %v8519_v36  ;;  %v8520_v40 = vunpack.i.l.bf16 %v8519_v36 }
 0xe92   : > { %v13256_v3 = vmax.f32 %v13168_v27, %v5035_v48  ;;  %v13261_v47 = vmax.f32 %v13184_v24, %v5034_v9  ;;  %v8547_v21 = vpack.i.bf16 %v13247_v54, %v13244_v44  ;;  %v13274_v27 = vmax.f32 %v13182_v13, %v5049_v10 }
 0xe93   : > { %v8542_v24 = vpack.i.bf16 %v13252_v22, %v13266_v61  ;;  %v5043_v4 = vsel %vm410_vm8, %v8521_v38, %v8495_v5  ;;  %v5042_v14 = vsel %vm410_vm8, %v8520_v40, %v8521_v38 }
 0xe94   : > { %8538 = vrot.lane.b32.xlu0 %v8537_v37, %s15279_s17  ;;  %8548 = vrot.lane.b32.xlu1 %v8547_v21, %s15279_s17  ;;  %v8552_v23 = vpack.i.bf16 %v13256_v3, %v13261_v47  ;;  %v13285_v19 = vmax.f32 %v13189_v57, %v5043_v4  ;;  %v5077_v13 = vmax.f32 %v13194_v41, %v5042_v14 }
 0xe95   : > { %v8557_v1 = vpack.i.bf16 %v13271_v17, %v13274_v27 }
 0xe96   : > { %v8562_v5 = vpack.i.bf16 %v13285_v19, %v5077_v13 }
 0xe98   : > { %8543 = vrot.lane.b32.xlu0 %v8542_v24, %s15279_s17  ;;  %8553 = vrot.lane.b32.xlu1 %v8552_v23, %s15279_s17 }
 0xe9c   : > { %8558 = vrot.lane.b32.xlu0 %v8557_v1, %s15279_s17 }
 0xea0   : > { %8563 = vrot.lane.b32.xlu0 %v8562_v5, %s15279_s17 }
 0xeee   : > { %v8524_v12 = vpop.permute.xlu1 %8523 }
 0xeef   : > { %v8526_v0 = vunpack.i.h.bf16 %v8524_v12  ;;  %v8525_v26 = vunpack.i.l.bf16 %v8524_v12 }
 0xef1   : > { %v5142_v49 = vsel %vm15465_vm14, %v8525_v26, %v8526_v0  ;;  %vm15472_vm14 = vmmov %vm15466_vm3 }
 0xef2   : > { %v8529_v2 = vpop.permute.xlu1 %8528  ;;  %v5176_v41 = vmax.f32 %v13203_v29, %v5142_v49 }
 0xef3   : > { %v8531_v15 = vunpack.i.h.bf16 %v8529_v2  ;;  %v8530_v57 = vunpack.i.l.bf16 %v8529_v2 }
 0xef5   : > { %v5150_v50 = vsel %vm15466_vm3, %v8530_v57, %v8531_v15 }
 0xef6   : > { %v5185_v16 = vmax.f32 %v13213_v45, %v5150_v50 }
 0xef8   : > { %v8572_v25 = vpack.i.bf16 %v5185_v16, %v5176_v41 }
 0xefa   : > { %8573 = vrot.lane.b32.xlu1 %v8572_v25, %s15309_s30 }
 0xf02   : > { %v8534_v8 = vpop.permute.xlu0 %8533 }
 0xf03   : > { %v8535_v20 = vunpack.i.l.bf16 %v8534_v8  ;;  %v8536_v37 = vunpack.i.h.bf16 %v8534_v8 }
 0xf05   : > { %v5143_v55 = vsel %vm15467_vm4, %v8526_v0, %v8535_v20  ;;  %vm15473_vm4 = vmmov %vm15466_vm3 }
 0xf06   : > { %v8539_v30 = vpop.permute.xlu0 %8538  ;;  %v13298_v62 = vpop.permute.xlu1 %8548  ;;  %v5177_v58 = vmax.f32 %v13206_v33, %v5143_v55  ;;  %v5144_v1 = vsel %vm15473_vm4, %v8535_v20, %v8536_v37  ;;  %vm15484_vm4 = vcmask 523264  }
 0xf07   : > { %v8541_v7 = vunpack.i.h.bf16 %v8539_v30  ;;  %v8540_v39 = vunpack.i.l.bf16 %v8539_v30  ;;  %v8550_v29 = vunpack.i.l.bf16 %v13298_v62  ;;  %v5178_v2 = vmax.f32 %v13225_v31, %v5144_v1 }
 0xf09   : > { %v5146_v48 = vsel %vm15469_vm10, %v8540_v39, %v8541_v7  ;;  %v5147_v9 = vsel %vm15470_vm7, %v8541_v7, %v8550_v29  ;;  %v5145_v24 = vsel %vm15472_vm14, %v8536_v37, %v8540_v39  ;;  %vm15475_vm10 = vmmov %vm15466_vm3  ;;  %v5182_v31 = vmax.f32 %v13244_v44, %v8550_v29 }
 0xf0a   : > { %v13300_v43 = vpop.permute.xlu0 %8543  ;;  %v8554_v28 = vpop.permute.xlu1 %8553  ;;  %v5180_v33 = vmax.f32 %v13239_v34, %v5146_v48  ;;  %v5179_v5 = vmax.f32 %v13228_v52, %v5145_v24  ;;  %vm15476_vm7 = vmmov %vm15466_vm3 }
 0xf0b   : > { %v8545_v53 = vunpack.i.l.bf16 %v13300_v43  ;;  %v8556_v56 = vunpack.i.h.bf16 %v8554_v28  ;;  %v8555_v11 = vunpack.i.l.bf16 %v8554_v28  ;;  %vm15478_vm14 = vmmov %vm15466_vm3 }
 0xf0c   : > { %v8602_v52 = vpack.i.bf16 %v5179_v5, %v5178_v2  ;;  %v8612_v8 = vpack.i.bf16 %v5180_v33, %v5179_v5 }
 0xf0d   : > { %v5151_v45 = vsel %vm15468_vm11, %v8531_v15, %v8545_v53  ;;  %v5140_v38 = vsel %vm15471_vm9, %v8555_v11, %v8556_v56  ;;  %vm15474_vm11 = vmmov %vm15466_vm3  ;;  %v8546_v15 = vunpack.i.h.bf16 %v13300_v43 }
 0xf0e   : > { %v5186_v63 = vmax.f32 %v13216_v32, %v5151_v45  ;;  %v8559_v46 = vpop.permute.xlu0 %8558  ;;  %v5181_v32 = vmax.f32 %v13232_v59, %v5147_v9  ;;  %v13317_v14 = vmax.f32 %v13261_v47, %v5140_v38  ;;  %v8551_v47 = vunpack.i.h.bf16 %v13298_v62  ;;  %vm15477_vm9 = vmmov %vm15466_vm3 }
 0xf0f   : > { %v8560_v59 = vunpack.i.l.bf16 %v8559_v46  ;;  %v8561_v50 = vunpack.i.h.bf16 %v8559_v46 }
 0xf10   : > { %v8582_v36 = vpack.i.bf16 %v5186_v63, %v5177_v58  ;;  %v8597_v12 = vpack.i.bf16 %v5181_v32, %v5180_v33  ;;  %v8607_v62 = vpack.i.bf16 %v5182_v31, %v5181_v32  ;;  %v5153_v55 = vsel %vm15466_vm3, %v8546_v15, %v8551_v47 }
 0xf11   : > { %v5154_v41 = vsel %vm15476_vm7, %v8551_v47, %v8560_v59  ;;  %v5155_v30 = vsel %vm15478_vm14, %v8560_v59, %v8561_v50  ;;  %v5191_v44 = vmax.f32 %v13271_v17, %v8561_v50 }
 0xf12   : > { %v8564_v10 = vpop.permute.xlu0 %8563  ;;  %8583 = vrot.lane.b32.xlu1 %v8582_v36, %s15310_s22  ;;  %v5189_v16 = vmax.f32 %v13247_v54, %v5154_v41 }
 0xf13   : > { %v8566_v40 = vunpack.i.h.bf16 %v8564_v10  ;;  %v8565_v21 = vunpack.i.l.bf16 %v8564_v10 }
 0xf14   : > { %v8632_v20 = vpack.i.bf16 %v5189_v16, %v5180_v33 }
 0xf15   : > { %v5148_v4 = vsel %vm15466_vm3, %v8565_v21, %v8566_v40  ;;  %v5149_v0 = vsel %vm15474_vm11, %v8566_v40, %v8530_v57  ;;  %vm15485_vm11 = vmmov %vm15484_vm4 }
 0xf16   : > { %v13319_v23 = vmax.f32 %v5077_v13, %v5148_v4  ;;  %8593 = vrot.lane.b32.xlu1 %v8582_v36, %s15311_s20  ;;  %v5141_v13 = vsel %vm15475_vm10, %v8556_v56, %v8525_v26  ;;  %v5184_v49 = vmax.f32 %v13285_v19, %v5149_v0  ;;  %v5152_v19 = vsel %vm15477_vm9, %v8545_v53, %v8546_v15  ;;  %vm15490_vm3 = vmmov %vm15484_vm4 }
 0xf17   : > { %v5175_v57 = vmax.f32 %v13256_v3, %v5141_v13  ;;  %v5187_v3 = vmax.f32 %v13266_v61, %v5152_v19  ;;  %v5188_v61 = vmax.f32 %v13252_v22, %v5153_v55  ;;  %vm15486_vm10 = vcmask 785408  }
 0xf18   : > { %v8567_v34 = vpack.i.bf16 %v13319_v23, %v13317_v14  ;;  %vm15487_vm7 = vmmov %vm15486_vm10  ;;  %vm15488_vm9 = vcmask 359424  }
 0xf19   : > { %v8587_v26 = vpack.i.bf16 %v5184_v49, %v5175_v57  ;;  %v8617_v43 = vpack.i.bf16 %v5187_v3, %v5178_v2  ;;  %v8627_v28 = vpack.i.bf16 %v5188_v61, %v5187_v3  ;;  %v8647_v17 = vpack.i.bf16 %v5188_v61, %v5179_v5  ;;  %vm15489_vm14 = vmmov %vm15488_vm9 }
 0xf1a   : > { %8568 = vrot.lane.b32.xlu0 %v8567_v34, %s15347_s14  ;;  %8598 = vrot.lane.b32.xlu1 %v8597_v12, %s15312_s25  ;;  %v8652_v7 = vpack.i.bf16 %v5189_v16, %v5188_v61 }
 0xf1e   : > { %8578 = vrot.lane.b32.xlu0 %v8572_v25, %s15313_s29  ;;  %8603 = vrot.lane.b32.xlu1 %v8602_v52, %s15357_s10  ;;  %v5190_v25 = vmax.f32 %v13274_v27, %v5155_v30 }
 0xf20   : > { %v8637_v54 = vpack.i.bf16 %v5190_v25, %v5181_v32  ;;  %v8642_v53 = vpack.i.bf16 %v5191_v44, %v5190_v25  ;;  %v8622_v27 = vpack.i.bf16 %v5190_v25, %v5189_v16 }
 0xf22   : > { %8613 = vrot.lane.b32.xlu1 %v8612_v8, %s15314_s28  ;;  %8588 = vrot.lane.b32.xlu0 %v8587_v26, %s15315_s23 }
 0xf26   : > { %8633 = vrot.lane.b32.xlu1 %v8632_v20, %s15316_s18  ;;  %8608 = vrot.lane.b32.xlu0 %v8607_v62, %s15479_s8 }
 0xf2a   : > { %8638 = vrot.lane.b32.xlu1 %v8637_v54, %s15480_s13  ;;  %8618 = vrot.lane.b32.xlu0 %v8617_v43, %s15481_s12  ;;  %s15670_s13 = smov 108  }
 0xf2e   : > { %8643 = vrot.lane.b32.xlu1 %v8642_v53, %s15479_s8  ;;  %8623 = vrot.lane.b32.xlu0 %v8622_v27, %s15312_s25  ;;  %s15509_s8 = smov 91  }
 0xf32   : > { %8658 = vrot.lane.b32.xlu1 %v8587_v26, %s15482_s16  ;;  %8628 = vrot.lane.b32.xlu0 %v8627_v28, %s15357_s10  ;;  %s15671_s16 = smov 109  }
 0xf36   : > { %8648 = vrot.lane.b32.xlu0 %v8647_v17, %s15483_s21  ;;  %s15688_s21 = sld [smem:[#allocation31_spill]] }
 0xf3a   : > { %8653 = vrot.lane.b32.xlu0 %v8652_v7, %s15314_s28 }
 0xf6c   : > { %v8574_v39 = vpop.permute.xlu1 %8573 }
 0xf6d   : > { %v8576_v56 = vunpack.i.h.bf16 %v8574_v39  ;;  %v8575_v11 = vunpack.i.l.bf16 %v8574_v39 }
 0xf84   : > { %v8584_v29 = vpop.permute.xlu1 %8583 }
 0xf85   : > { %v8586_v9 = vunpack.i.h.bf16 %v8584_v29  ;;  %v8585_v10 = vunpack.i.l.bf16 %v8584_v29 }
 0xf88   : > { %v8594_v22 = vpop.permute.xlu1 %8593 }
 0xf89   : > { %v8596_v40 = vunpack.i.h.bf16 %v8594_v22  ;;  %v8595_v21 = vunpack.i.l.bf16 %v8594_v22 }
 0xf8c   : > { %v8569_v45 = vpop.permute.xlu0 %8568  ;;  %v8599_v58 = vpop.permute.xlu1 %8598 }
 0xf8d   : > { %v8571_v0 = vunpack.i.h.bf16 %v8569_v45  ;;  %v8601_v2 = vunpack.i.h.bf16 %v8599_v58  ;;  %v8600_v47 = vunpack.i.l.bf16 %v8599_v58  ;;  %v8570_v15 = vunpack.i.l.bf16 %v8569_v45 }
 0xf8f   : > { %v5325_v41 = vsel %vm1395_vm12, %v13319_v23, %v8571_v0  ;;  %v5300_v57 = vsel %vm15488_vm9, %v8600_v47, %v8601_v2  ;;  %v5324_v43 = vsel %vm1395_vm12, %v13317_v14, %v8570_v15  ;;  %vm15495_vm9 = vmmov %vm15490_vm3  ;;  %v9458_v47 = vld [vmem:[%s15103_s5 + $0x158] ss:$12 sps:$4 sm:$0xff]  }
 0xf90   : > { %v8579_v63 = vpop.permute.xlu0 %8578  ;;  %v13359_v46 = vpop.permute.xlu1 %8603 }
 0xf91   : > { %v8581_v36 = vunpack.i.h.bf16 %v8579_v63  ;;  %v8580_v48 = vunpack.i.l.bf16 %v8579_v63  ;;  %v8606_v23 = vunpack.i.h.bf16 %v13359_v46  ;;  %v8605_v53 = vunpack.i.l.bf16 %v13359_v46 }
 0xf93   : > { %v5330_v37 = vsel %vm1395_vm12, %v8575_v11, %v8580_v48  ;;  %v5331_v38 = vsel %vm1395_vm12, %v8576_v56, %v8581_v36 }
 0xf94   : > { %v13363_v33 = vpop.permute.xlu1 %8613  ;;  %v8589_v32 = vpop.permute.xlu0 %8588  ;;  %v5332_v24 = vsel %vm15484_vm4, %v5330_v37, %v8585_v10  ;;  %v5333_v4 = vsel %vm15485_vm11, %v5331_v38, %v8586_v9  ;;  %vm15491_vm4 = vmmov %vm15490_vm3 }
 0xf95   : > { %v5334_v1 = vsel %vm15486_vm10, %v5332_v24, %v8595_v21  ;;  %v5335_v5 = vsel %vm15487_vm7, %v5333_v4, %v8596_v40  ;;  %v8591_v31 = vunpack.i.h.bf16 %v8589_v32  ;;  %v8590_v16 = vunpack.i.l.bf16 %v8589_v32  ;;  %vm15492_vm11 = vmmov %vm15490_vm3 }
 0xf96   : > { %v5349_v34 = vpack.c.bf16 %v5335_v5, %v5334_v1  ;;  %vm15493_vm10 = vcmask 818176   ;;  %v5260_v32 = vsel %vm549_vm2, %v8605_v53, %v8606_v23  ;;  %v8616_v24 = vunpack.i.h.bf16 %v13363_v33  ;;  %v9471_v23 = vld [vmem:[%s15103_s5 + $0xf8] ss:$12 sps:$4 sm:$0xff]   ;;  %v9474_v53 = vld [vmem:[%s15103_s5 + $0x1e8] ss:$12 sps:$4 sm:$0xff]  }
 0xf97   : > { %v5327_v27 = vsel %vm15491_vm4, %v5325_v41, %v8591_v31  ;;  %v5326_v29 = vsel %vm15492_vm11, %v5324_v43, %v8590_v16  ;;  %vm15494_vm7 = vmmov %vm15493_vm10  ;;  %v8615_v4 = vunpack.i.l.bf16 %v13363_v33  ;;  %vm15501_vm11 = vcmask 949248   ;;  %v9459_v41 = vld [vmem:[%s15103_s5 + $0x98] ss:$12 sps:$4 sm:$0xff]   ;;  %v9470_v43 = vld [vmem:[%s15103_s5 + $0x200] ss:$12 sps:$4 sm:$0xff]  }
 0xf98   : > { %v8634_v12 = vpop.permute.xlu1 %8633  ;;  %v8609_v59 = vpop.permute.xlu0 %8608  ;;  %5384 = vmatprep.mubr.bf16.mxu1 %v5349_v34 }
 0xf99   : > { %v8635_v52 = vunpack.i.l.bf16 %v8634_v12  ;;  %v8611_v19 = vunpack.i.h.bf16 %v8609_v59  ;;  %v8610_v30 = vunpack.i.l.bf16 %v8609_v59  ;;  %v8636_v20 = vunpack.i.h.bf16 %v8634_v12  ;;  %v9457_v12 = vld [vmem:[%s15103_s5 + $0xb0] ss:$12 sps:$4 sm:$0xff]  }
 0xf9b   : > { %v5342_v62 = vsel %vm1395_vm12, %v8635_v52, %v5300_v57  ;;  %v5320_v14 = vsel %vm15493_vm10, %v8610_v30, %v8611_v19  ;;  %v9460_v57 = vld [vmem:[%s15103_s5 + $0x140] ss:$12 sps:$4 sm:$0xff]   ;;  %v9462_v19 = vld [vmem:[%s15103_s5 + $0x230] ss:$12 sps:$4 sm:$0xff]   ;;  %v9463_v30 = vld [vmem:[%s15103_s5 + $0x128] ss:$12 sps:$4 sm:$0xff]  }
 0xf9c   : > { %v8639_v13 = vpop.permute.xlu1 %8638  ;;  %v13369_v49 = vpop.permute.xlu0 %8618 }
 0xf9d   : > { %v8640_v50 = vunpack.i.l.bf16 %v8639_v13  ;;  %v8641_v28 = vunpack.i.h.bf16 %v8639_v13  ;;  %v8620_v10 = vunpack.i.l.bf16 %v13369_v49  ;;  %v8621_v59 = vunpack.i.h.bf16 %v13369_v49 }
 0xf9f   : > { %v5344_v61 = vsel %vm15490_vm3, %v5342_v62, %v8640_v50  ;;  %v5336_v0 = vsel %vm1395_vm12, %v8620_v10, %v5260_v32  ;;  %v5280_v50 = vsel %vm15501_vm11, %v8615_v4, %v8616_v24  ;;  %v9467_v62 = vld [vmem:[%s15103_s5 + $0x110] ss:$12 sps:$4 sm:$0xff]  }
 0xfa0   : > { %v8644_v8 = vpop.permute.xlu1 %8643  ;;  %v8624_v26 = vpop.permute.xlu0 %8623 }
 0xfa1   : > { %v8626_v3 = vunpack.i.h.bf16 %v8624_v26  ;;  %v8625_v25 = vunpack.i.l.bf16 %v8624_v26  ;;  %v8646_v44 = vunpack.i.h.bf16 %v8644_v8  ;;  %v8645_v54 = vunpack.i.l.bf16 %v8644_v8  ;;  %v9461_v26 = vld [vmem:[%s15103_s5 + $0x80] ss:$12 sps:$4 sm:$0xff]  }
 0xfa3   : > { %v5301_v55 = vsel %vm15489_vm14, %v8625_v25, %v8626_v3  ;;  %v5321_v63 = vsel %vm15494_vm7, %v8645_v54, %v8646_v44  ;;  %vm15496_vm14 = vcmask 785408   ;;  %vm15503_vm7 = vmmov %vm15501_vm11  ;;  %v9464_v3 = vld [vmem:[%s15103_s5 + $0x2d8] ss:$12 sps:$4 sm:$0xff]   ;;  %v9465_v25 = vld [vmem:[%s15103_s5 + $0x68] ss:$12 sps:$4 sm:$0xff]  }
 0xfa4   : > { %v8659_v17 = vpop.permute.xlu1 %8658  ;;  %v8629_v7 = vpop.permute.xlu0 %8628  ;;  %v5343_v39 = vsel %vm1395_vm12, %v8636_v20, %v5301_v55  ;;  %v5346_v46 = vsel %vm15496_vm14, %v5344_v61, %v5320_v14  ;;  %vm15497_vm3 = vmmov %vm15496_vm14  ;;  %v9466_v20 = vld [vmem:[%s15103_s5 + $0x218] ss:$12 sps:$4 sm:$0xff]   ;;  %v9468_v44 = vld [vmem:[%s15103_s5 + $0x2c0] ss:$12 sps:$4 sm:$0xff]  }
 0xfa5   : > { %v8661_v22 = vunpack.i.h.bf16 %v8659_v17  ;;  %v8660_v45 = vunpack.i.l.bf16 %v8659_v17  ;;  %v8631_v58 = vunpack.i.h.bf16 %v8629_v7  ;;  %v5345_v56 = vsel %vm15495_vm9, %v5343_v39, %v8641_v28  ;;  %vm15498_vm4 = vmmov %vm15497_vm3  ;;  %v9469_v54 = vld [vmem:[%s15103_s5 + $0x50] ss:$12 sps:$4 sm:$0xff]   ;;  %v9472_v55 = vld [vmem:[%s15103_s5 + $0x2a8] ss:$12 sps:$4 sm:$0xff]  }
 0xfa6   : > { %v8630_v48 = vunpack.i.l.bf16 %v8629_v7  ;;  %vm15499_vm0 = vmmov %vm15497_vm3  ;;  %v9473_v61 = vld [vmem:[%s15103_s5 + $0x38] ss:$12 sps:$4 sm:$0xff]   ;;  %v9476_v28 = vld [vmem:[%s15103_s5 + $0x290] ss:$12 sps:$4 sm:$0xff]  }
 0xfa7   : > { %v5328_v11 = vsel %vm15497_vm3, %v5326_v29, %v8660_v45  ;;  %v5329_v36 = vsel %vm15498_vm4, %v5327_v27, %v8661_v22  ;;  %v5347_v9 = vsel %vm15499_vm0, %v5345_v56, %v5321_v63  ;;  %vm15500_vm0 = vmmov %vm15495_vm9  ;;  %v9475_v27 = vld [vmem:[%s15103_s5 + $0xe0] ss:$12 sps:$4 sm:$0xff]   ;;  %v9478_v7 = vld [vmem:[%s15103_s5 + $0x1d0] ss:$12 sps:$4 sm:$0xff]  }
 0xfa8   : > { %v8649_v37 = vpop.permute.xlu0 %8648  ;;  %v5351_v38 = vpack.c.bf16 %v5347_v9, %v5346_v46  ;;  %v13392_v40 = vpack.c.bf16 %v5329_v36, %v5328_v11  ;;  %v5261_v1 = vsel %vm549_vm2, %v8630_v48, %v8631_v58  ;;  %vm15502_vm10 = vmmov %vm15500_vm0  ;;  %v9477_v17 = vld [vmem:[%s15103_s5 + $0x20] ss:$12 sps:$4 sm:$0xff]   ;;  %v9479_v39 = vld [vmem:[%s15103_s5 + $0xc8] ss:$12 sps:$4 sm:$0xff]  }
 0xfa9   : > { %v8650_v21 = vunpack.i.l.bf16 %v8649_v37  ;;  %v8651_v5 = vunpack.i.h.bf16 %v8649_v37  ;;  %v5337_v15 = vsel %vm1395_vm12, %v8621_v59, %v5261_v1  ;;  %vm15504_vm9 = vmmov %vm15497_vm3  ;;  %v9480_v29 = vld [vmem:[%s15103_s5 + $0x278] ss:$12 sps:$4 sm:$0xff]   ;;  %v9481_v22 = vld [vmem:[%s15103_s5 + $0x8] ss:$12 sps:$4 sm:$0xff]  }
 0xfaa   : > { %5427 = vmatprep.mubr.bf16.mxu0 %v5351_v38  ;;  %5385 = vmatmul.mubr.bf16.vlgmr.msra.gmra.mxu1 %v13392_v40  ;;  %vm15505_vm14 = vmmov %vm15497_vm3  ;;  %v9482_v45 = vld [vmem:[%s15103_s5 + $0x1b8] ss:$12 sps:$4 sm:$0xff]   ;;  %v9483_v14 = vld [vmem:[%s15103_s5 + $0x260] ss:$12 sps:$4 sm:$0xff]   ;;  %vm15507_vm3 = vcmask 130048  }
 0xfab   : > { %7884 = vmatpush3.bf16.msra.mxu1 %v9457_v12  ;;  %5470 = vmatprep.mubr.bf16.mxu1 %v5349_v34  ;;  %v5338_v33 = vsel %vm15500_vm0, %v5336_v0, %v8650_v21  ;;  %v5339_v34 = vsel %vm15502_vm10, %v5337_v15, %v8651_v5  ;;  %v15506_v58 = vld [vmem:[#allocation6_spill] sm:$0xff]  ;;  %v9484_v63 = vld [vmem:[%s15103_s5 + $0x1a0] ss:$12 sps:$4 sm:$0xff]   ;;  %vm15508_vm4 = vmmov %vm15507_vm3  ;;  %vm15514_vm0 = vcmask 744448   ;;  %vm15516_vm10 = vcmask 883712  }
 0xfac   : > { %v8654_v2 = vpop.permute.xlu0 %8653  ;;  %7885 = vmatprep.subr.bf16.mxu1 %v9458_v47  ;;  %v5340_v31 = vsel %vm15504_vm9, %v5338_v33, %v5280_v50  ;;  %v9485_v56 = vld [vmem:[%s15103_s5 + $0x248] ss:$12 sps:$4 sm:$0xff]   ;;  %vm15515_vm11 = vmmov %vm15514_vm0  ;;  %vm15518_vm9 = vcmask 891904  }
 0xfad   : > { %v8656_v13 = vunpack.i.h.bf16 %v8654_v2  ;;  %v8655_v52 = vunpack.i.l.bf16 %v8654_v2  ;;  %v9486_v46 = vld [vmem:[%s15103_s5 + $0x188] ss:$12 sps:$4 sm:$0xff]  }
 0xfaf   : > { %v5281_v49 = vsel %vm15503_vm7, %v8655_v52, %v8656_v13  ;;  %7886 = vmatpush3.bf16.msra.mxu1 %v9459_v41  ;;  %vm15517_vm7 = vmmov %vm15516_vm10 }
 0xfb0   : > { %7887 = vmatprep.subr.bf16.mxu1 %v9460_v57  ;;  %v5341_v16 = vsel %vm15505_vm14, %v5339_v34, %v5281_v49  ;;  %vm15519_vm14 = vmmov %vm15518_vm9 }
 0xfb1   : > { %v5350_v8 = vpack.c.bf16 %v5341_v16, %v5340_v31  ;;  %v7743_v16 = vld [vmem:[%s9757_s19 + $0x78] sm:$0xff] }
 0xfb3   : > { %7888 = vmatpush3.bf16.msra.mxu1 %v9461_v26  ;;  %5428 = vmatmul.mubr.bf16.vlgmr.msra.gmra.mxu0 %v5350_v8  ;;  %v13561_v26 = vcombine.high %v7743_v16, %v7743_v16 }
 0xfb4   : > { %7906 = vmatpush3.bf16.msra.mxu0 %v9462_v19  ;;  %5511 = vmatprep.mubr.bf16.mxu0 %v5351_v38  ;;  %v13564_v19 = vld [vmem:[%s9757_s19 + $0x80] sm:$0xff] }
 0xfb5   : > { %7889 = vmatprep.subr.bf16.mxu1 %v9463_v30  ;;  %7907 = vmatprep.subr.bf16.mxu0 %v9464_v3  ;;  %v13570_v30 = vcombine.low %v13564_v19, %v13564_v19 }
 0xfb7   : > { %7890 = vmatpush3.bf16.msra.mxu1 %v9465_v25  ;;  %15513 = vst [vmem:[#allocation21_spill] sm:$0xff] %v13570_v30 }
 0xfb8   : > { %7908 = vmatpush3.bf16.msra.mxu0 %v9466_v20  ;;  %7891 = vmatprep.subr.bf16.mxu1 %v9467_v62 }
 0xfb9   : > { %7909 = vmatprep.subr.bf16.mxu0 %v9468_v44 }
 0xfbb   : > { %7892 = vmatpush3.bf16.msra.mxu1 %v9469_v54 }
 0xfbc   : > { %7910 = vmatpush3.bf16.msra.mxu0 %v9470_v43  ;;  %7893 = vmatprep.subr.bf16.mxu1 %v9471_v23 }
 0xfbd   : > { %7911 = vmatprep.subr.bf16.mxu0 %v9472_v55 }
 0xfbf   : > { %7894 = vmatpush3.bf16.msra.mxu1 %v9473_v61 }
 0xfc0   : > { %7912 = vmatpush3.bf16.msra.mxu0 %v9474_v53  ;;  %7895 = vmatprep.subr.bf16.mxu1 %v9475_v27 }
 0xfc1   : > { %7913 = vmatprep.subr.bf16.mxu0 %v9476_v28 }
 0xfc3   : > { %7896 = vmatpush3.bf16.msra.mxu1 %v9477_v17 }
 0xfc4   : > { %7914 = vmatpush3.bf16.msra.mxu0 %v9478_v7  ;;  %7897 = vmatprep.subr.bf16.mxu1 %v9479_v39 }
 0xfc5   : > { %7915 = vmatprep.subr.bf16.mxu0 %v9480_v29 }
 0xfc7   : > { %7898 = vmatpush3.bf16.msra.mxu1 %v9481_v22 }
 0xfc8   : > { %7916 = vmatpush3.bf16.msra.mxu0 %v9482_v45 }
 0xfc9   : > { %7917 = vmatprep.subr.bf16.mxu0 %v9483_v14 }
 0xfca   : > { %5471 = vmatmul.mubr.bf16.vlgmr.msra.gmra.mxu1 %v13392_v40 }
 0xfcb   : > { %7740 = vmatprep.mubr.msk.bf16.mxu1 %vm15507_vm3, %v15506_v58  ;;  %vm15523_vm3 = vcmask 474112  }
 0xfcc   : > { %7918 = vmatpush3.bf16.msra.mxu0 %v9484_v63 }
 0xfcd   : > { %7919 = vmatprep.subr.bf16.mxu0 %v9485_v56 }
 0xfd0   : > { %7920 = vmatpush3.bf16.msra.mxu0 %v9486_v46 }
 0xfd1   : > { %5655 = vmatprep.subr.bf16.mxu0 %v15293_v42 }
 0xfd3   : > { %5512 = vmatmul.mubr.bf16.vlgmr.msra.gmra.mxu0 %v5350_v8  ;;  %v13559_v8 = vcombine.low %v7743_v16, %v7743_v16  ;;  %v9496_v16 = vld [vmem:[%s15104_s6 + $0x30] ss:$8 sps:$4 sm:$0xff]  }
 0xfd4   : > { %7741 = vmatprep.mubr.msk.bf16.mxu0 %vm15508_vm4, %v15506_v58  ;;  %vm15524_vm4 = vcmask 1043456  }
0x106a   : > { %v5386_v11 = vpop.f32.mrf.mxu1 }
0x106c   : > { %v5388_v36 = vpop.f32.mrf.mxu1 }
0x106e   : > { %v5390_v48 = vpop.f32.mrf.mxu1 }
0x1070   : > { %v5392_v10 = vpop.f32.mrf.mxu1 }
0x1073   : > { %v5429_v9 = vpop.f32.mrf.mxu0 }
0x1074   : > { %v5430_v57 = vadd.f32 %v5429_v9, %v5386_v11 }
0x1075   : > { %v5431_v37 = vpop.f32.mrf.mxu0 }
0x1076   : > { %v5432_v34 = vadd.f32 %v5431_v37, %v5388_v36  ;;  %v15520_v37 = vld [vmem:[#allocation10_spill] sm:$0xff] }
0x1077   : > { %v5433_v40 = vpop.f32.mrf.mxu0 }
0x1078   : > { %v5434_v49 = vadd.f32 %v5433_v40, %v5390_v48  ;;  %v15521_v40 = vld [vmem:[#allocation8_spill] sm:$0xff] }
0x1079   : > { %v5435_v32 = vpop.f32.mrf.mxu0 }
0x107a   : > { %v5436_v15 = vadd.f32 %v5435_v32, %v5392_v10  ;;  %v13516_v31 = vpack.c.bf16 %v5434_v49, %v5430_v57  ;;  %v9492_v49 = vld [vmem:[%s15104_s6 + $0x50] ss:$8 sps:$4 sm:$0xff]   ;;  %v9494_v57 = vld [vmem:[%s15104_s6 + $0x40] ss:$8 sps:$4 sm:$0xff]  }
0x107c   : > { %v13510_v41 = vpack.c.bf16 %v5436_v15, %v5432_v34  ;;  %v9489_v15 = vld [vmem:[%s15104_s6 + $0x64] ss:$8 sps:$4 sm:$0xff]   ;;  %v9491_v34 = vld [vmem:[%s15104_s6 + $0x54] ss:$8 sps:$4 sm:$0xff]  }
0x108a   : > { %v7899_v38 = vpop.f32.mrf.mxu1 }
0x108c   : > { %v7900_v21 = vpop.f32.mrf.mxu1 }
0x108d   : > { %v7901_v2 = vadd.f32 %v7900_v21, %v7899_v38 }
0x108e   : > { %v7902_v24 = vpop.f32.mrf.mxu1 }
0x1090   : > { %v7903_v5 = vpop.f32.mrf.mxu1 }
0x1091   : > { %v7904_v47 = vadd.f32 %v7903_v5, %v7902_v24 }
0x1093   : > { %v7921_v4 = vpop.f32.mrf.mxu0 }
0x1095   : > { %v7922_v1 = vpop.f32.mrf.mxu0 }
0x1096   : > { %v7923_v59 = vadd.f32 %v7922_v1, %v7921_v4  ;;  %v15522_v4 = vld [vmem:[#allocation11_spill] sm:$0xff] }
0x1097   : > { %v7924_v12 = vpop.f32.mrf.mxu0 }
0x1098   : > { %v5514_v13 = vadd.f32 %v7923_v59, %v7901_v2 }
0x1099   : > { %v7925_v0 = vpop.f32.mrf.mxu0 }
0x109a   : > { %v7926_v33 = vadd.f32 %v7925_v0, %v7924_v12 }
0x109c   : > { %v5517_v52 = vadd.f32 %v7926_v33, %v7904_v47 }
0x109e   : > { %v13504_v50 = vpack.c.bf16 %v5517_v52, %v5514_v13  ;;  %v9487_v13 = vld [vmem:[%s15104_s6 + $0x74] ss:$8 sps:$4 sm:$0xff]   ;;  %v9488_v52 = vld [vmem:[%s15104_s6 + $0x70] ss:$8 sps:$4 sm:$0xff]  }
0x10a0   : > { %5585 = vrot.lane.b32.xlu1 %v13504_v50, %s15347_s14  ;;  %5596 = vrot.lane.b32.xlu0 %v13504_v50, %s15509_s8 }
0x10a4   : > { %5583 = vrot.lane.b32.xlu1 %v13510_v41, %s15347_s14  ;;  %5594 = vrot.lane.b32.xlu0 %v13510_v41, %s15509_s8 }
0x10a8   : > { %5581 = vrot.lane.b32.xlu1 %v13516_v31, %s15347_s14  ;;  %5574 = vrot.lane.b32.xlu0 %v13504_v50, %s15510_s15 }
0x10ac   : > { %5563 = vrot.lane.b32.xlu1 %v13504_v50, %s15511_s2  ;;  %5592 = vrot.lane.b32.xlu0 %v13516_v31, %s15509_s8 }
0x10b0   : > { %5552 = vrot.lane.b32.xlu1 %v13504_v50, %s15351_s9  ;;  %5572 = vrot.lane.b32.xlu0 %v13510_v41, %s15510_s15 }
0x10b4   : > { %5561 = vrot.lane.b32.xlu1 %v13510_v41, %s15511_s2  ;;  %5541 = vrot.lane.b32.xlu0 %v13504_v50, %s15352_s3 }
0x10b8   : > { %5530 = vrot.lane.b32.xlu1 %v13504_v50, %s15353_s4  ;;  %5570 = vrot.lane.b32.xlu0 %v13516_v31, %s15510_s15 }
0x10bc   : > { %5550 = vrot.lane.b32.xlu1 %v13510_v41, %s15351_s9  ;;  %5559 = vrot.lane.b32.xlu0 %v13516_v31, %s15511_s2 }
0x10c0   : > { %5607 = vrot.lane.b32.xlu1 %v13504_v50, %s15512_s24  ;;  %5548 = vrot.lane.b32.xlu0 %v13516_v31, %s15351_s9 }
0x10c4   : > { %5537 = vrot.lane.b32.xlu1 %v13516_v31, %s15352_s3  ;;  %5539 = vrot.lane.b32.xlu0 %v13510_v41, %s15352_s3 }
0x10c8   : > { %5526 = vrot.lane.b32.xlu1 %v13516_v31, %s15353_s4  ;;  %5528 = vrot.lane.b32.xlu0 %v13510_v41, %s15353_s4 }
0x10cc   : > { %5603 = vrot.lane.b32.xlu1 %v13516_v31, %s15512_s24  ;;  %5605 = vrot.lane.b32.xlu0 %v13510_v41, %s15512_s24 }
0x10d0   : > { %6074 = vrot.lane.b32.xlu1 %v13559_v8, %s15355_s7  ;;  %6076 = vrot.lane.b32.xlu0 %v13561_v26, %s15355_s7 }
0x10d4   : > { %6078 = vrot.lane.b32.xlu1 %v13570_v30, %s15355_s7  ;;  %6018 = vrot.lane.b32.xlu0 %v13561_v26, %s15357_s10 }
0x10d8   : > { %6020 = vrot.lane.b32.xlu1 %v13570_v30, %s15357_s10  ;;  %6047 = vrot.lane.b32.xlu0 %v13561_v26, %s15277_s11 }
0x10dc   : > { %6049 = vrot.lane.b32.xlu1 %v13570_v30, %s15277_s11  ;;  %6016 = vrot.lane.b32.xlu0 %v13559_v8, %s15357_s10 }
0x10e0   : > { %6045 = vrot.lane.b32.xlu1 %v13559_v8, %s15277_s11  ;;  %5964 = vrot.lane.b32.xlu0 %v13561_v26, %s15278_s26 }
0x10e4   : > { %5966 = vrot.lane.b32.xlu1 %v13570_v30, %s15278_s26  ;;  %5990 = vrot.lane.b32.xlu0 %v13561_v26, %s15347_s14 }
0x10e8   : > { %5992 = vrot.lane.b32.xlu1 %v13570_v30, %s15347_s14  ;;  %5962 = vrot.lane.b32.xlu0 %v13559_v8, %s15278_s26 }
0x10ec   : > { %5988 = vrot.lane.b32.xlu1 %v13559_v8, %s15347_s14  ;;  %5912 = vrot.lane.b32.xlu0 %v13561_v26, %s15352_s3 }
0x10f0   : > { %5914 = vrot.lane.b32.xlu1 %v13570_v30, %s15352_s3  ;;  %5938 = vrot.lane.b32.xlu0 %v13561_v26, %s15279_s17 }
0x10f4   : > { %5940 = vrot.lane.b32.xlu1 %v13570_v30, %s15279_s17 }
0x1112   : > { %v5586_v3 = vpop.permute.xlu1 %5585  ;;  %v5597_v25 = vpop.permute.xlu0 %5596 }
0x1113   : > { %5656 = vmatpush1.bf16.msra.mxu0 %v5597_v25 }
0x1114   : > { %5657 = vmatprep.subr.bf16.mxu0 %v15293_v42 }
0x1116   : > { %v5584_v20 = vpop.permute.xlu1 %5583  ;;  %v5595_v62 = vpop.permute.xlu0 %5594 }
0x1117   : > { %5658 = vmatpush1.bf16.msra.mxu0 %v5586_v3  ;;  %v5599_v44 = vsel %vm15514_vm0, %v5595_v62, %v5597_v25  ;;  %v5588_v53 = vsel %vm518_vm5, %v5584_v20, %v5586_v3  ;;  %v9497_v3 = vld [vmem:[%s15104_s6 + $0x24] ss:$8 sps:$4 sm:$0xff]   ;;  %v9498_v25 = vld [vmem:[%s15104_s6 + $0x20] ss:$8 sps:$4 sm:$0xff]   ;;  %vm15532_vm0 = vmmov %vm15523_vm3 }
0x1118   : > { %5614 = vmatprep.subr.bf16.mxu1 %v5599_v44  ;;  %5659 = vmatprep.subr.bf16.mxu0 %v15293_v42  ;;  %v9501_v44 = vld [vmem:[%s15104_s6 + $0x4] ss:$8 sps:$4 sm:$0xff]  }
0x111a   : > { %v5582_v54 = vpop.permute.xlu1 %5581  ;;  %v5575_v43 = vpop.permute.xlu0 %5574 }
0x111b   : > { %5660 = vmatpush1.bf16.msra.mxu0 %v5575_v43  ;;  %v5587_v17 = vsel %vm518_vm5, %v5582_v54, %v5584_v20  ;;  %v9499_v20 = vld [vmem:[%s15104_s6 + $0x14] ss:$8 sps:$4 sm:$0xff]   ;;  %v9502_v54 = vld [vmem:[%s15104_s6] ss:$8 sps:$4 sm:$0xff]  }
0x111c   : > { %5661 = vmatprep.subr.bf16.mxu0 %v15293_v42 }
0x111e   : > { %v5564_v23 = vpop.permute.xlu1 %5563  ;;  %v5593_v55 = vpop.permute.xlu0 %5592 }
0x111f   : > { %v5598_v61 = vsel %vm15515_vm11, %v5593_v55, %v5595_v62  ;;  %5662 = vmatpush1.bf16.msra.mxu0 %v5564_v23  ;;  %v9500_v62 = vld [vmem:[%s15104_s6 + $0x10] ss:$8 sps:$4 sm:$0xff]   ;;  %v9505_v55 = vld [vmem:[%s15104_s6 + $0xe4] ss:$8 sps:$4 sm:$0xff]   ;;  %vm15533_vm11 = vmmov %vm15524_vm4 }
0x1120   : > { %5615 = vmatpush1.bf16.msra.mxu1 %v5598_v61  ;;  %5663 = vmatprep.subr.bf16.mxu0 %v15293_v42  ;;  %v9506_v61 = vld [vmem:[%s15104_s6 + $0xe0] ss:$8 sps:$4 sm:$0xff]  }
0x1121   : > { %5616 = vmatprep.subr.bf16.mxu1 %v5588_v53  ;;  %v9507_v53 = vld [vmem:[%s15104_s6 + $0xd4] ss:$8 sps:$4 sm:$0xff]  }
0x1122   : > { %v5553_v27 = vpop.permute.xlu1 %5552  ;;  %v5573_v28 = vpop.permute.xlu0 %5572 }
0x1123   : > { %5664 = vmatpush1.bf16.msra.mxu0 %v5553_v27  ;;  %v5577_v7 = vsel %vm15516_vm10, %v5573_v28, %v5575_v43  ;;  %v9503_v43 = vld [vmem:[%s15104_s6 + $0xf4] ss:$8 sps:$4 sm:$0xff]   ;;  %vm15538_vm10 = vmmov %vm15532_vm0 }
0x1124   : > { %5617 = vmatpush1.bf16.msra.mxu1 %v5587_v17  ;;  %5665 = vmatprep.subr.bf16.mxu0 %v15293_v42  ;;  %v9510_v17 = vld [vmem:[%s15104_s6 + $0xc0] ss:$8 sps:$4 sm:$0xff]  }
0x1125   : > { %5618 = vmatprep.subr.bf16.mxu1 %v5577_v7  ;;  %v9511_v7 = vld [vmem:[%s15104_s6 + $0xb4] ss:$8 sps:$4 sm:$0xff]  }
0x1126   : > { %v5562_v39 = vpop.permute.xlu1 %5561  ;;  %v5542_v29 = vpop.permute.xlu0 %5541 }
0x1127   : > { %5666 = vmatpush1.bf16.msra.mxu0 %v5542_v29  ;;  %v5566_v63 = vsel %vm15518_vm9, %v5562_v39, %v5564_v23  ;;  %v9504_v23 = vld [vmem:[%s15104_s6 + $0xf0] ss:$8 sps:$4 sm:$0xff]   ;;  %vm15540_vm9 = vmmov %vm15532_vm0 }
0x1128   : > { %5667 = vmatprep.subr.bf16.mxu0 %v15293_v42 }
0x112a   : > { %v5531_v22 = vpop.permute.xlu1 %5530  ;;  %v5571_v45 = vpop.permute.xlu0 %5570 }
0x112b   : > { %v5576_v14 = vsel %vm15517_vm7, %v5571_v45, %v5573_v28  ;;  %5668 = vmatpush1.bf16.msra.mxu0 %v5531_v22  ;;  %v9509_v28 = vld [vmem:[%s15104_s6 + $0xc4] ss:$8 sps:$4 sm:$0xff]   ;;  %v9515_v45 = vld [vmem:[%s15104_s6 + $0x94] ss:$8 sps:$4 sm:$0xff]   ;;  %vm15539_vm7 = vcmask 482304  }
0x112c   : > { %5619 = vmatpush1.bf16.msra.mxu1 %v5576_v14  ;;  %5669 = vmatprep.subr.bf16.mxu0 %v15293_v42  ;;  %v9516_v14 = vld [vmem:[%s15104_s6 + $0x90] ss:$8 sps:$4 sm:$0xff]  }
0x112d   : > { %5620 = vmatprep.subr.bf16.mxu1 %v5566_v63  ;;  %v9517_v63 = vld [vmem:[%s15104_s6 + $0x84] ss:$8 sps:$4 sm:$0xff]  }
0x112e   : > { %v5551_v56 = vpop.permute.xlu1 %5550  ;;  %v5560_v46 = vpop.permute.xlu0 %5559 }
0x112f   : > { %v5565_v11 = vsel %vm15519_vm14, %v5560_v46, %v5562_v39  ;;  %5670 = vmatpush1.bf16.msra.mxu0 %v13504_v50  ;;  %v5555_v36 = vsel %vm2268_vm13, %v5551_v56, %v5553_v27  ;;  %v9490_v50 = vld [vmem:[%s15104_s6 + $0x60] ss:$8 sps:$4 sm:$0xff]   ;;  %v9508_v27 = vld [vmem:[%s15104_s6 + $0xd0] ss:$8 sps:$4 sm:$0xff]   ;;  %vm15541_vm14 = vmmov %vm15539_vm7 }
0x1130   : > { %5621 = vmatpush1.bf16.msra.mxu1 %v5565_v11  ;;  %5685 = vmatprep.subr.bf16.mxu0 %v15293_v42  ;;  %v9512_v39 = vld [vmem:[%s15104_s6 + $0xb0] ss:$8 sps:$4 sm:$0xff]  }
0x1131   : > { %5622 = vmatprep.subr.bf16.mxu1 %v5555_v36 }
0x1132   : > { %v5608_v48 = vpop.permute.xlu1 %5607  ;;  %v5549_v9 = vpop.permute.xlu0 %5548 }
0x1133   : > { %v5554_v10 = vsel %vm2268_vm13, %v5549_v9, %v5551_v56  ;;  %5686 = vmatpush2.bf16.msra.mxu0 %v5608_v48  ;;  %v9518_v56 = vld [vmem:[%s15104_s6 + $0x80] ss:$8 sps:$4 sm:$0xff]  }
0x1134   : > { %5623 = vmatpush1.bf16.msra.mxu1 %v5554_v10  ;;  %5793 = vmatprep.subr.bf16.mxu0 %v15520_v37 }
0x1136   : > { %v5538_v38 = vpop.permute.xlu1 %5537  ;;  %5688 = vmatmul.mubr.bf16.vlgmr.msra.gmra.mxu0 %v15521_v40  ;;  %v5540_v21 = vpop.permute.xlu0 %5539 }
0x1137   : > { %v5544_v32 = vsel %vm437_vm6, %v5540_v21, %v5542_v29  ;;  %v5543_v24 = vsel %vm437_vm6, %v5538_v38, %v5540_v21  ;;  %5794 = vmatpush1.bf16.msra.mxu0 %v15522_v4  ;;  %5811 = vmatprep.mubr.bf16.mxu0 %v15293_v42  ;;  %v9513_v29 = vld [vmem:[%s15104_s6 + $0xa4] ss:$8 sps:$4 sm:$0xff]  }
0x1138   : > { %5624 = vmatprep.subr.bf16.mxu1 %v5544_v32  ;;  %v15525_v32 = vld [vmem:[#allocation9_spill] sm:$0xff] }
0x1139   : > { %5625 = vmatpush1.bf16.msra.mxu1 %v5543_v24 }
0x113a   : > { %v5527_v1 = vpop.permute.xlu1 %5526  ;;  %v5529_v5 = vpop.permute.xlu0 %5528 }
0x113b   : > { %v5533_v12 = vsel %vm410_vm8, %v5529_v5, %v5531_v22  ;;  %v5532_v59 = vsel %vm410_vm8, %v5527_v1, %v5529_v5  ;;  %v9514_v22 = vld [vmem:[%s15104_s6 + $0xa0] ss:$8 sps:$4 sm:$0xff]  }
0x113c   : > { %5626 = vmatprep.subr.bf16.mxu1 %v5533_v12 }
0x113d   : > { %5627 = vmatpush1.bf16.msra.mxu1 %v5532_v59 }
0x113e   : > { %5628 = vmatprep.subr.bf16.mxu1 %v13510_v41  ;;  %v5606_v0 = vpop.permute.xlu0 %5605  ;;  %v5604_v2 = vpop.permute.xlu1 %5603  ;;  %v9493_v41 = vld [vmem:[%s15104_s6 + $0x44] ss:$8 sps:$4 sm:$0xff]  }
0x113f   : > { %v5610_v47 = vsel %vm2327_vm15, %v5606_v0, %v5608_v48  ;;  %v5609_v33 = vsel %vm2327_vm15, %v5604_v2, %v5606_v0 }
0x1141   : > { %5629 = vmatpush1.bf16.msra.mxu1 %v13516_v31  ;;  %v9495_v31 = vld [vmem:[%s15104_s6 + $0x34] ss:$8 sps:$4 sm:$0xff]  }
0x1142   : > { %5644 = vmatprep.subr.bf16.mxu1 %v5610_v47  ;;  %v13736_v46 = vpop.permute.xlu1 %6074  ;;  %v13740_v36 = vpop.permute.xlu0 %6076 }
0x1143   : > { %v6094_v35 = vsel %vm15538_vm10, %v13736_v46, %v13740_v36  ;;  %vm15545_vm10 = vcmask 760832  }
0x1145   : > { %5645 = vmatpush2.bf16.msra.mxu1 %v5609_v33 }
0x1146   : > { %5738 = vmatprep.subr.bf16.mxu1 %v9487_v13  ;;  %v13738_v11 = vpop.permute.xlu1 %6078 }
0x1147   : > { %v6095_v48 = vsel %vm15523_vm3, %v13740_v36, %v13738_v11  ;;  %vm15542_vm3 = vcmask 105472  }
0x1148   : > { %5647 = vmatmul.mubr.bf16.vlgmr.msra.gmra.mxu1 %v15521_v40  ;;  %7758 = vmatprep.subr.msk.bf16.mxu0 %vm15524_vm4, %v6095_v48 }
0x1149   : > { %5739 = vmatpush1.bf16.msra.mxu1 %v9488_v52 }
0x114a   : > { %5740 = vmatprep.subr.bf16.mxu1 %v9489_v15  ;;  %v7745_v15 = vld [vmem:[%s9757_s19 + $0x88] sm:$0xff] }
0x114d   : > { %5741 = vmatpush1.bf16.msra.mxu1 %v9490_v50  ;;  %v13767_v50 = vcombine.low %v7745_v15, %v7745_v15 }
0x114e   : > { %5742 = vmatprep.subr.bf16.mxu1 %v9491_v34  ;;  %v13770_v34 = vld [vmem:[%s9757_s19 + $0x90] sm:$0xff] }
0x114f   : > { %15526 = vst [vmem:[#allocation22_spill] sm:$0xff] %v13767_v50 }
0x1151   : > { %5743 = vmatpush1.bf16.msra.mxu1 %v9492_v49  ;;  %v13778_v49 = vcombine.low %v13770_v34, %v13770_v34 }
0x1152   : > { %5744 = vmatprep.subr.bf16.mxu1 %v9493_v41  ;;  %v13784_v41 = vcombine.high %v13564_v19, %v13564_v19  ;;  %v13838_v19 = vpop.permute.xlu1 %6020 }
0x1153   : > { %15527 = vst [vmem:[#allocation23_spill] sm:$0xff] %v13778_v49 }
0x1154   : > { %15528 = vst [vmem:[#allocation7_spill] sm:$0xff] %v13784_v41 }
0x1155   : > { %5745 = vmatpush1.bf16.msra.mxu1 %v9494_v57  ;;  %v13790_v57 = vcombine.high %v7745_v15, %v7745_v15 }
0x1156   : > { %5746 = vmatprep.subr.bf16.mxu1 %v9495_v31  ;;  %v13842_v31 = vpop.permute.xlu0 %6018 }
0x1159   : > { %5747 = vmatpush1.bf16.msra.mxu1 %v9496_v16  ;;  %v13844_v16 = vpop.permute.xlu1 %6049 }
0x115a   : > { %5748 = vmatprep.subr.bf16.mxu1 %v9497_v3  ;;  %v13846_v3 = vpop.permute.xlu0 %6047 }
0x115d   : > { %5749 = vmatpush1.bf16.msra.mxu1 %v9498_v25  ;;  %v13848_v25 = vpop.permute.xlu1 %6045 }
0x115e   : > { %5750 = vmatprep.subr.bf16.mxu1 %v9499_v20  ;;  %v13850_v20 = vpop.permute.xlu0 %6016 }
0x1161   : > { %5751 = vmatpush1.bf16.msra.mxu1 %v9500_v62  ;;  %v13852_v62 = vpop.permute.xlu1 %5966 }
0x1162   : > { %5752 = vmatprep.subr.bf16.mxu1 %v9501_v44  ;;  %v13854_v44 = vpop.permute.xlu0 %5964 }
0x1165   : > { %5753 = vmatpush1.bf16.msra.mxu1 %v9502_v54  ;;  %v13856_v54 = vpop.permute.xlu1 %5992 }
0x1166   : > { %5754 = vmatprep.subr.bf16.mxu1 %v9503_v43  ;;  %v13858_v43 = vpop.permute.xlu0 %5990 }
0x1169   : > { %5755 = vmatpush2.bf16.msra.mxu1 %v9504_v23  ;;  %v13860_v23 = vpop.permute.xlu1 %5988 }
0x116a   : > { %5756 = vmatprep.subr.bf16.mxu1 %v9505_v55  ;;  %v13862_v55 = vpop.permute.xlu0 %5962 }
0x116d   : > { %5757 = vmatpush2.bf16.msra.mxu1 %v9506_v61  ;;  %v13864_v61 = vpop.permute.xlu1 %5914 }
0x116e   : > { %5758 = vmatprep.subr.bf16.mxu1 %v9507_v53  ;;  %v13866_v53 = vpop.permute.xlu0 %5912 }
0x1171   : > { %5759 = vmatpush2.bf16.msra.mxu1 %v9508_v27  ;;  %v13868_v27 = vpop.permute.xlu1 %5940 }
0x1172   : > { %5760 = vmatprep.subr.bf16.mxu1 %v9509_v28  ;;  %v13870_v28 = vpop.permute.xlu0 %5938 }
0x1175   : > { %5761 = vmatpush2.bf16.msra.mxu1 %v9510_v17 }
0x1176   : > { %5762 = vmatprep.subr.bf16.mxu1 %v9511_v7 }
0x1179   : > { %5763 = vmatpush2.bf16.msra.mxu1 %v9512_v39 }
0x117a   : > { %5764 = vmatprep.subr.bf16.mxu1 %v9513_v29 }
0x117d   : > { %5765 = vmatpush2.bf16.msra.mxu1 %v9514_v22 }
0x117e   : > { %5766 = vmatprep.subr.bf16.mxu1 %v9515_v45 }
0x1181   : > { %5767 = vmatpush2.bf16.msra.mxu1 %v9516_v14 }
0x1182   : > { %5768 = vmatprep.subr.bf16.mxu1 %v9517_v63  ;;  %v7747_v63 = vld [vmem:[%s9757_s19 + $0x98] sm:$0xff] }
0x1185   : > { %5769 = vmatpush2.bf16.msra.mxu1 %v9518_v56 }
0x11f6   : > { %v5689_v9 = vpop.f32.mrf.mxu0 }
0x11f7   : > { %v5690_v24 = vadd.f32 %v5689_v9, %v15525_v32 }
0x11f8   : > { %v5691_v10 = vpop.f32.mrf.mxu0 }
0x11fa   : > { %v5692_v38 = vpop.f32.mrf.mxu0 }
0x11fc   : > { %v5693_v21 = vpop.f32.mrf.mxu0 }
0x11fd   : > { %v13892_v21 = vcombine.low %v7747_v63, %v7747_v63 }
0x11ff   : > { %15529 = vst [vmem:[#allocation19_spill] sm:$0xff] %v13892_v21 }
0x1208   : > { %v5648_v1 = vpop.f32.mrf.mxu1 }
0x1209   : > { %v5649_v5 = vadd.f32 %v5648_v1, %v15525_v32 }
0x120a   : > { %v5650_v12 = vpop.f32.mrf.mxu1 }
0x120b   : > { %9211 = vtanh.f32 %v5649_v5  ;;  %v5651_v59 = vadd.f32 %v5650_v12, %v15525_v32  ;;  %v13903_v5 = vcombine.high %v13770_v34, %v13770_v34 }
0x120c   : > { %9213 = vtanh.f32 %v5690_v24  ;;  %v5652_v0 = vpop.f32.mrf.mxu1 }
0x120d   : > { %9215 = vtanh.f32 %v5651_v59  ;;  %15530 = vst [vmem:[#allocation16_spill] sm:$0xff] %v13903_v5 }
0x120e   : > { %v5653_v2 = vpop.f32.mrf.mxu1 }
0x120f   : > { %v7757_v2 = vcombine.high %v7747_v63, %v7747_v63 }
0x1218   : > { %v13749_v47 = vpop.eup %9211 }
0x1219   : > { %v13751_v33 = vpop.eup %9213  ;;  %5701 = vrot.lane.b32.xlu1 %v13749_v47, %s15353_s4 }
0x121a   : > { %v13755_v13 = vpop.eup %9215 }
0x121b   : > { %v8662_v52 = vpack.i.bf16 %v13755_v13, %v13751_v33 }
0x121d   : > { %8663 = vrot.lane.b32.xlu0 %v8662_v52, %s15353_s4  ;;  %5936 = vrot.lane.b32.xlu1 %v13559_v8, %s15279_s17 }
0x1221   : > { %5910 = vrot.lane.b32.xlu0 %v13559_v8, %s15352_s3  ;;  %5888 = vrot.lane.b32.xlu1 %v13570_v30, %s15353_s4 }
0x1225   : > { %5886 = vrot.lane.b32.xlu0 %v13561_v26, %s15353_s4  ;;  %6082 = vrot.lane.b32.xlu1 %v13767_v50, %s15355_s7 }
0x1229   : > { %5884 = vrot.lane.b32.xlu0 %v13559_v8, %s15353_s4  ;;  %6086 = vrot.lane.b32.xlu1 %v13778_v49, %s15355_s7 }
0x122d   : > { %6080 = vrot.lane.b32.xlu0 %v13784_v41, %s15355_s7  ;;  %6024 = vrot.lane.b32.xlu1 %v13767_v50, %s15357_s10 }
0x1231   : > { %6084 = vrot.lane.b32.xlu0 %v13790_v57, %s15355_s7  ;;  %6053 = vrot.lane.b32.xlu1 %v13767_v50, %s15277_s11 }
0x1235   : > { %6022 = vrot.lane.b32.xlu0 %v13784_v41, %s15357_s10  ;;  %6028 = vrot.lane.b32.xlu1 %v13778_v49, %s15357_s10 }
0x1239   : > { %6051 = vrot.lane.b32.xlu0 %v13784_v41, %s15277_s11  ;;  %6057 = vrot.lane.b32.xlu1 %v13778_v49, %s15277_s11 }
0x123d   : > { %6026 = vrot.lane.b32.xlu0 %v13790_v57, %s15357_s10  ;;  %5970 = vrot.lane.b32.xlu1 %v13767_v50, %s15278_s26 }
0x1241   : > { %6055 = vrot.lane.b32.xlu0 %v13790_v57, %s15277_s11  ;;  %5996 = vrot.lane.b32.xlu1 %v13767_v50, %s15347_s14 }
0x1245   : > { %5968 = vrot.lane.b32.xlu0 %v13784_v41, %s15278_s26  ;;  %5974 = vrot.lane.b32.xlu1 %v13778_v49, %s15278_s26 }
0x1249   : > { %5994 = vrot.lane.b32.xlu0 %v13784_v41, %s15347_s14  ;;  %6000 = vrot.lane.b32.xlu1 %v13778_v49, %s15347_s14 }
0x124d   : > { %5972 = vrot.lane.b32.xlu0 %v13790_v57, %s15278_s26  ;;  %5918 = vrot.lane.b32.xlu1 %v13767_v50, %s15352_s3 }
0x1251   : > { %5998 = vrot.lane.b32.xlu0 %v13790_v57, %s15347_s14  ;;  %5944 = vrot.lane.b32.xlu1 %v13767_v50, %s15279_s17 }
0x1255   : > { %5916 = vrot.lane.b32.xlu0 %v13784_v41, %s15352_s3  ;;  %5922 = vrot.lane.b32.xlu1 %v13778_v49, %s15352_s3 }
0x1259   : > { %5948 = vrot.lane.b32.xlu1 %v13778_v49, %s15279_s17 }
0x125d   : > { %5892 = vrot.lane.b32.xlu1 %v13767_v50, %s15353_s4 }
0x1261   : > { %5896 = vrot.lane.b32.xlu1 %v13778_v49, %s15353_s4 }
0x128b   : > { %v5702_v17 = vpop.permute.xlu1 %5701 }
0x128f   : > { %v8664_v7 = vpop.permute.xlu0 %8663  ;;  %v13878_v56 = vpop.permute.xlu1 %5936 }
0x1290   : > { %v8666_v39 = vunpack.i.h.bf16 %v8664_v7  ;;  %v8665_v29 = vunpack.i.l.bf16 %v8664_v7 }
0x1292   : > { %v5707_v22 = vsel %vm410_vm8, %v5702_v17, %v8666_v39  ;;  %v5708_v45 = vsel %vm410_vm8, %v8666_v39, %v8665_v29  ;;  %v13875_v14 = vmax.f32 %v13751_v33, %v8665_v29 }
0x1293   : > { %v13881_v48 = vmax.f32 %v13755_v13, %v5708_v45  ;;  %v13883_v9 = vpop.permute.xlu0 %5910  ;;  %v13886_v10 = vmax.f32 %v13749_v47, %v5707_v22  ;;  %v13897_v1 = vpop.permute.xlu1 %5888 }
0x1295   : > { %5718 = vrot.lane.b32.xlu1 %v13886_v10, %s15351_s9  ;;  %v8667_v38 = vpack.i.bf16 %v13881_v48, %v13875_v14 }
0x1297   : > { %v13894_v24 = vpop.permute.xlu0 %5886  ;;  %8668 = vrot.lane.b32.xlu0 %v8667_v38, %s15351_s9  ;;  %v13911_v59 = vpop.permute.xlu1 %6082 }
0x1299   : > { %6090 = vrot.lane.b32.xlu1 %v13892_v21, %s15355_s7 }
0x129b   : > { %v13905_v12 = vpop.permute.xlu0 %5884  ;;  %5942 = vrot.lane.b32.xlu0 %v13784_v41, %s15279_s17  ;;  %v13921_v33 = vpop.permute.xlu1 %6086 }
0x129c   : > { %15531 = vst [vmem:[#allocation17_spill] sm:$0xff] %v13921_v33 }
0x129d   : > { %6030 = vrot.lane.b32.xlu1 %v13903_v5, %s15357_s10 }
0x129f   : > { %v13913_v0 = vpop.permute.xlu0 %6080  ;;  %5920 = vrot.lane.b32.xlu0 %v13790_v57, %s15352_s3  ;;  %v13944_v52 = vpop.permute.xlu1 %6024 }
0x12a1   : > { %6059 = vrot.lane.b32.xlu1 %v13903_v5, %s15277_s11 }
0x12a3   : > { %v6085_v47 = vpop.permute.xlu0 %6084  ;;  %5946 = vrot.lane.b32.xlu0 %v13790_v57, %s15279_s17  ;;  %v13950_v15 = vpop.permute.xlu1 %6053 }
0x12a4   : > { %v6099_v13 = vsel %vm15532_vm0, %v6085_v47, %v13921_v33  ;;  %vm15543_vm0 = vmmov %vm15539_vm7 }
0x12a5   : > { %6034 = vrot.lane.b32.xlu1 %v7757_v2, %s15357_s10  ;;  %7762 = vmatprep.subr.msk.bf16.mxu1 %vm15533_vm11, %v6099_v13  ;;  %vm15544_vm11 = vmmov %vm15524_vm4 }
0x12a7   : > { %5890 = vrot.lane.b32.xlu0 %v13784_v41, %s15353_s4  ;;  %v13955_v34 = vpop.permute.xlu1 %6028  ;;  %v13969_v39 = vpop.permute.xlu0 %6022 }
0x12a9   : > { %5976 = vrot.lane.b32.xlu1 %v13903_v5, %s15278_s26 }
0x12ab   : > { %5894 = vrot.lane.b32.xlu0 %v13790_v57, %s15353_s4  ;;  %v13959_v17 = vpop.permute.xlu1 %6057  ;;  %v13973_v22 = vpop.permute.xlu0 %6051 }
0x12ac   : > { %15534 = vst [vmem:[#allocation15_spill] sm:$0xff] %v13973_v22 }
0x12ad   : > { %6002 = vrot.lane.b32.xlu1 %v13903_v5, %s15347_s14 }
0x12af   : > { %6088 = vrot.lane.b32.xlu0 %v13903_v5, %s15355_s7  ;;  %v13965_v7 = vpop.permute.xlu1 %5970  ;;  %v6027_v63 = vpop.permute.xlu0 %6026 }
0x12b0   : > { %v6041_v36 = vsel %vm549_vm2, %v6027_v63, %v13955_v34 }
0x12b1   : > { %5924 = vrot.lane.b32.xlu1 %v13903_v5, %s15352_s3 }
0x12b3   : > { %6092 = vrot.lane.b32.xlu0 %v7757_v2, %s15355_s7  ;;  %v13971_v29 = vpop.permute.xlu1 %5996  ;;  %s15669_s7 = smov 91  }
0x12b5   : > { %5950 = vrot.lane.b32.xlu1 %v13903_v5, %s15279_s17 }
0x12b7   : > { %6032 = vrot.lane.b32.xlu0 %v13892_v21, %s15357_s10  ;;  %v13975_v45 = vpop.permute.xlu1 %5974 }
0x12b9   : > { %5898 = vrot.lane.b32.xlu1 %v13903_v5, %s15353_s4 }
0x12bb   : > { %6061 = vrot.lane.b32.xlu0 %v13892_v21, %s15277_s11  ;;  %v13977_v38 = vpop.permute.xlu1 %6000 }
0x12bf   : > { %6063 = vrot.lane.b32.xlu0 %v7757_v2, %s15277_s11  ;;  %v6056_v2 = vpop.permute.xlu0 %6055  ;;  %v13979_v13 = vpop.permute.xlu1 %5918 }
0x12c3   : > { %5978 = vrot.lane.b32.xlu0 %v13892_v21, %s15278_s26  ;;  %v13981_v60 = vpop.permute.xlu0 %5968  ;;  %v13983_v18 = vpop.permute.xlu1 %5944 }
0x12c4   : > { %15535 = vst [vmem:[#allocation14_spill] sm:$0xff] %v13981_v60 }
0x12c7   : > { %6004 = vrot.lane.b32.xlu0 %v13892_v21, %s15347_s14  ;;  %v13985_v32 = vpop.permute.xlu0 %5994  ;;  %v13987_v4 = vpop.permute.xlu1 %5922 }
0x12c8   : > { %15536 = vst [vmem:[#allocation24_spill] sm:$0xff] %v13985_v32 }
0x12cb   : > { %5926 = vrot.lane.b32.xlu0 %v13892_v21, %s15352_s3  ;;  %v5973_v40 = vpop.permute.xlu0 %5972  ;;  %v13989_v37 = vpop.permute.xlu1 %5948 }
0x12cf   : > { %5952 = vrot.lane.b32.xlu0 %v13892_v21, %s15279_s17  ;;  %v5999_v58 = vpop.permute.xlu0 %5998  ;;  %v13991_v6 = vpop.permute.xlu1 %5892 }
0x12d3   : > { %5900 = vrot.lane.b32.xlu0 %v13892_v21, %s15353_s4  ;;  %v13993_v51 = vpop.permute.xlu0 %5916  ;;  %v13995_v49 = vpop.permute.xlu1 %5896 }
0x12d4   : > { %15537 = vst [vmem:[#allocation25_spill] sm:$0xff] %v13993_v51 }
0x1307   : > { %v5719_v30 = vpop.permute.xlu1 %5718 }
0x1309   : > { %v8669_v5 = vpop.permute.xlu0 %8668 }
0x130a   : > { %v8671_v21 = vunpack.i.h.bf16 %v8669_v5  ;;  %v8670_v33 = vunpack.i.l.bf16 %v8669_v5  ;;  %v6037_v5 = vsel %vm549_vm2, %v13842_v31, %v13838_v19 }
0x130c   : > { %v5724_v41 = vsel %vm2268_vm13, %v5719_v30, %v8671_v21  ;;  %v5731_v32 = vmax.f32 %v13875_v14, %v8670_v33  ;;  %v5725_v60 = vsel %vm2268_vm13, %v8671_v21, %v8670_v33  ;;  %v6066_v30 = vsel %vm15539_vm7, %v13846_v3, %v13844_v16  ;;  %vm15546_vm7 = vmmov %vm15524_vm4 }
0x130d   : > { %v14003_v50 = vpop.permute.xlu0 %5942  ;;  %v5730_v51 = vmax.f32 %v13881_v48, %v5725_v60  ;;  %v5729_v22 = vmax.f32 %v13886_v10, %v5724_v41  ;;  %v6098_v21 = vsel %vm15540_vm9, %v13911_v59, %v6085_v47  ;;  %v6070_v60 = vsel %vm15541_vm14, %v6056_v2, %v13959_v17  ;;  %vm15547_vm9 = vmmov %vm15543_vm0 }
0x130e   : > { %v5734_v14 = vpack.c.bf16 %v5731_v32, %v5731_v32  ;;  %v6248_v41 = vsel %vm15524_vm4, %v6094_v35, 0  ;;  %v6065_v48 = vsel %vm15543_vm0, %v13848_v25, %v13846_v3  ;;  %v6036_v32 = vsel %vm549_vm2, %v13850_v20, %v13842_v31  ;;  %vm15548_vm14 = vmmov %vm15524_vm4 }
0x130f   : > { %v5733_v33 = vpack.c.bf16 %v5730_v51, %v5730_v51  ;;  %v5732_v46 = vpack.c.bf16 %v5729_v22, %v5729_v22  ;;  %v6217_v10 = vsel %vm15544_vm11, %v6037_v5, %v6066_v30  ;;  %v5981_v47 = vsel %vm15545_vm10, %v13854_v44, %v13852_v62  ;;  %v14034_v22 = vpop.permute.xlu1 %6090  ;;  %vm15551_vm11 = vmmov %vm15524_vm4 }
0x1310   : > { %7742 = vmatmul.mubr.msk.bf16.vlgmr.msra.gmra.mxu0 %vm15542_vm3, %v5734_v14  ;;  %v6007_v35 = vsel %vm518_vm5, %v13858_v43, %v13856_v54  ;;  %v6260_v3 = vsel %vm15546_vm7, %v6098_v21, 0  ;;  %v6040_v31 = vsel %vm549_vm2, %v13944_v52, %v6027_v63  ;;  %v6069_v25 = vsel %vm15547_vm9, %v13950_v15, %v6056_v2  ;;  %vm15549_vm3 = vmmov %vm15545_vm10 }
0x1311   : > { %6281 = vmatpush1.bf16.msra.mxu0 %v6248_v41  ;;  %v5921_v51 = vpop.permute.xlu0 %5920  ;;  %5770 = vmatprep.mubr.bf16.mxu1 %v5733_v33  ;;  %v6233_v20 = vsel %vm15548_vm14, %v6041_v36, %v6070_v60  ;;  %v5985_v5 = vsel %vm15549_vm3, %v5973_v40, %v13975_v45  ;;  %v6011_v30 = vsel %vm518_vm5, %v5999_v58, %v13977_v38  ;;  %vm15550_vm0 = vmmov %vm15549_vm3  ;;  %vm15552_vm10 = vcmask 769024  }
0x1312   : > { %6282 = vmatprep.subr.bf16.mxu0 %v6217_v10  ;;  %5771 = vmatmul.mubr.bf16.vlgmr.msra.gmra.mxu1 %v5732_v46  ;;  %v6213_v14 = vsel %vm15524_vm4, %v6036_v32, %v6065_v48  ;;  %v6006_v63 = vsel %vm518_vm5, %v13860_v23, %v13858_v43  ;;  %v5980_v2 = vsel %vm15550_vm0, %v13862_v55, %v13854_v44  ;;  %vm15553_vm7 = vmmov %vm15524_vm4 }
0x1313   : > { %6367 = vmatpush1.bf16.msra.mxu1 %v6260_v3  ;;  %6306 = vmatprep.mubr.bf16.mxu0 %v15293_v42  ;;  %v6181_v33 = vsel %vm15551_vm11, %v5981_v47, %v6007_v35  ;;  %v5929_v46 = vsel %vm437_vm6, %v13866_v53, %v13864_v61  ;;  %v5955_v36 = vsel %vm15552_vm10, %v13870_v28, %v13868_v27  ;;  %vm15554_vm9 = vmmov %vm15550_vm0  ;;  %v14068_v55 = vpop.permute.xlu1 %6030 }
0x1314   : > { %6368 = vmatprep.subr.bf16.mxu1 %v6233_v20  ;;  %6392 = vmatprep.mubr.bf16.mxu1 %v15293_v42  ;;  %v6229_v60 = vsel %vm15553_vm7, %v6040_v31, %v6069_v25  ;;  %v5984_v43 = vsel %vm15554_vm9, %v13965_v7, %v5973_v40  ;;  %v6010_v44 = vsel %vm518_vm5, %v13971_v29, %v5999_v58  ;;  %vm15555_vm14 = vmmov %vm15524_vm4 }
0x1315   : > { %6283 = vmatpush1.bf16.msra.mxu0 %v6213_v14  ;;  %v5947_v21 = vpop.permute.xlu0 %5946  ;;  %v6197_v23 = vsel %vm15555_vm14, %v5985_v5, %v6011_v30  ;;  %vm15556_vm3 = vmmov %vm15552_vm10  ;;  %v6177_v48 = vsel %vm15524_vm4, %v5980_v2, %v6006_v63  ;;  %v5928_v32 = vsel %vm437_vm6, %v13883_v9, %v13866_v53  ;;  %v5903_v10 = vsel %vm410_vm8, %v13894_v24, %v13897_v1 }
0x1316   : > { %6284 = vmatprep.subr.bf16.mxu0 %v6181_v33  ;;  %v5959_v41 = vsel %vm15556_vm3, %v5947_v21, %v13989_v37  ;;  %vm15557_vm0 = vmmov %vm15524_vm4  ;;  %v5933_v47 = vsel %vm437_vm6, %v5921_v51, %v13987_v4  ;;  %v5902_v25 = vsel %vm410_vm8, %v13905_v12, %v13894_v24  ;;  %v5932_v20 = vsel %vm437_vm6, %v13979_v13, %v5921_v51 }
0x1317   : > { %6369 = vmatpush1.bf16.msra.mxu1 %v6229_v60  ;;  %v6145_v58 = vsel %vm15557_vm0, %v5929_v46, %v5955_v36  ;;  %vm15558_vm11 = vmmov %vm15557_vm0  ;;  %v14128_v36 = vld [vmem:[%s15099_s1] sm:$0xff]  }
0x1318   : > { %6370 = vmatprep.subr.bf16.mxu1 %v6197_v23  ;;  %v6193_v35 = vsel %vm15558_vm11, %v5984_v43, %v6010_v44  ;;  %vm15559_vm10 = vmmov %vm15556_vm3  ;;  %v15577_v43 = vld [vmem:[#allocation14_spill] sm:$0xff]  ;;  %v15579_v23 = vld [vmem:[#allocation24_spill] sm:$0xff] }
0x1319   : > { %6285 = vmatpush1.bf16.msra.mxu0 %v6177_v48  ;;  %v14076_v40 = vpop.permute.xlu0 %5890  ;;  %v5954_v3 = vsel %vm15559_vm10, %v13878_v56, %v13870_v28  ;;  %vm15560_vm7 = vmmov %vm15556_vm3  ;;  %v14099_v56 = vpop.permute.xlu1 %6059  ;;  %vm15566_vm10 = vcmask 474112  }
0x131a   : > { %6286 = vmatprep.subr.bf16.mxu0 %v6145_v58  ;;  %v5958_v53 = vsel %vm15560_vm7, %v13983_v18, %v5947_v21  ;;  %vm15561_vm9 = vmmov %vm15557_vm0  ;;  %v6039_v21 = vsel %vm549_vm2, %v13969_v39, %v13944_v52 }
0x131b   : > { %6371 = vmatpush1.bf16.msra.mxu1 %v6193_v35  ;;  %v6161_v9 = vsel %vm15561_vm9, %v5933_v47, %v5959_v41  ;;  %vm15562_vm14 = vmmov %vm15557_vm0  ;;  %vm15569_vm9 = vcmask 482304   ;;  %v6009_v41 = vsel %vm518_vm5, %v15579_v23, %v13971_v29  ;;  %v6008_v29 = vsel %vm518_vm5, %v13856_v54, %v15579_v23  ;;  %v15586_v35 = vld [vmem:[#allocation25_spill] sm:$0xff] }
0x131c   : > { %6372 = vmatprep.subr.bf16.mxu1 %v6161_v9  ;;  %v6141_v31 = vsel %vm15562_vm14, %v5928_v32, %v5954_v3  ;;  %vm15563_vm3 = vmmov %vm15557_vm0  ;;  %v5931_v54 = vsel %vm437_vm6, %v15586_v35, %v13979_v13 }
0x131d   : > { %6287 = vmatpush1.bf16.msra.mxu0 %v6141_v31  ;;  %v5895_v5 = vpop.permute.xlu0 %5894  ;;  %v6109_v28 = vsel %vm15563_vm3, %v13561_v26, %v5903_v10  ;;  %vm15564_vm4 = vmmov %vm15557_vm0  ;;  %v6096_v26 = vsel %vm15566_vm10, %v13738_v11, %v13913_v0  ;;  %v6035_v11 = vpop.permute.xlu1 %6034  ;;  %v5905_v31 = vsel %vm410_vm8, %v14076_v40, %v13991_v6 }
0x131e   : > { %v5907_v30 = vsel %vm410_vm8, %v5895_v5, %v13995_v49  ;;  %6288 = vmatprep.subr.bf16.mxu0 %v6109_v28  ;;  %v6157_v14 = vsel %vm15564_vm4, %v5932_v20, %v5958_v53  ;;  %v5906_v63 = vsel %vm410_vm8, %v13991_v6, %v5895_v5  ;;  %vm15565_vm11 = vmmov %vm15557_vm0  ;;  %vm15573_vm4 = vcmask 588800   ;;  %v15591_v20 = vld [vmem:[#allocation7_spill] sm:$0xff] }
0x131f   : > { %6373 = vmatpush1.bf16.msra.mxu1 %v6157_v14  ;;  %v6125_v24 = vsel %vm15557_vm0, %v13790_v57, %v5907_v30  ;;  %v6105_v12 = vsel %vm15565_vm11, %v13559_v8, %v5902_v25  ;;  %vm15567_vm7 = vmmov %vm15566_vm10  ;;  %v15568_v57 = vld [vmem:[#allocation15_spill] sm:$0xff]  ;;  %v15571_v8 = vld [vmem:[#allocation22_spill] sm:$0xff] }
0x1320   : > { %6374 = vmatprep.subr.bf16.mxu1 %v6125_v24  ;;  %v6097_v2 = vsel %vm15567_vm7, %v13913_v0, %v13911_v59  ;;  %v6068_v33 = vsel %vm15569_vm9, %v15568_v57, %v13950_v15  ;;  %vm15570_vm14 = vmmov %vm15557_vm0  ;;  %v6254_v59 = vsel %vm15557_vm0, %v6096_v26, 0  ;;  %v15574_v0 = vmov 0.0  }
0x1321   : > { %6289 = vmatpush1.bf16.msra.mxu0 %v6105_v12  ;;  %v6089_v51 = vpop.permute.xlu0 %6088  ;;  %vm15572_vm3 = vmmov %vm15557_vm0  ;;  %vm15578_vm7 = vcmask 760832  }
0x1322   : > { %7760 = vmatprep.subr.msk.bf16.mxu0 %vm15570_vm14, %v6097_v2  ;;  %v6121_v46 = vsel %vm15572_vm3, %v15571_v8, %v5906_v63  ;;  %vm15575_vm11 = vmmov %vm15569_vm9  ;;  %v5983_v44 = vsel %vm15578_vm7, %v15577_v43, %v13965_v7  ;;  %vm15580_vm9 = vcmask 474112   ;;  %v15597_v63 = vld [vmem:[#allocation17_spill] sm:$0xff] }
0x1323   : > { %6375 = vmatpush1.bf16.msra.mxu1 %v6121_v46  ;;  %v6067_v52 = vsel %vm15575_vm11, %v13844_v16, %v15568_v57  ;;  %vm15576_vm10 = vmmov %vm15557_vm0  ;;  %v6038_v16 = vsel %vm549_vm2, %v13838_v19, %v13969_v39  ;;  %v6189_v10 = vsel %vm15557_vm0, %v5983_v44, %v6009_v41  ;;  %vm15584_vm11 = vcmask 769024   ;;  %v5977_v39 = vpop.permute.xlu1 %5976 }
0x1324   : > { %7759 = vmatmul.mubr.msk.bf16.vlgmr.msra.gmra.mxu0 %vm15573_vm4, %v14128_v36  ;;  %8022 = vmatprep.subr.bf16.mxu1 %v15574_v0  ;;  %v6225_v60 = vsel %vm15576_vm10, %v6039_v21, %v6068_v33  ;;  %vm15581_vm14 = vmmov %vm15573_vm4  ;;  %v5957_v19 = vsel %vm15584_vm11, %v14003_v50, %v13983_v18 }
0x1325   : > { %6324 = vmatpush1.bf16.msra.mxu0 %v6254_v59  ;;  %v6093_v15 = vpop.permute.xlu0 %6092  ;;  %6349 = vmatprep.mubr.bf16.mxu0 %v15293_v42  ;;  %vm15582_vm3 = vmmov %vm15557_vm0 }
0x1326   : > { %v6102_v48 = vsel %vm15580_vm9, %v14034_v22, %v6093_v15  ;;  %6325 = vmatprep.subr.bf16.mxu0 %v6225_v60  ;;  %7763 = vmatmul.mubr.msk.bf16.vlgmr.msra.gmra.mxu1 %vm15581_vm14, %v14128_v36  ;;  %vm15583_vm4 = vmmov %vm15557_vm0 }
0x1327   : > { %v6272_v32 = vsel %vm15582_vm3, %v6102_v48, 0  ;;  %8032 = vmatprep.mubr.msk.bf16.mxu1 %vm15422_vm1, %v15574_v0  ;;  %v6221_v7 = vsel %vm15583_vm4, %v6038_v16, %v6067_v52  ;;  %vm15585_vm10 = vmmov %vm15578_vm7  ;;  %v6003_v13 = vpop.permute.xlu1 %6002 }
0x1328   : > { %8023 = vmatpush3.bf16.msra.mxu1 %v6272_v32  ;;  %v5982_v47 = vsel %vm15585_vm10, %v13852_v62, %v15577_v43  ;;  %vm15587_vm7 = vmmov %vm15557_vm0  ;;  %v5930_v62 = vsel %vm437_vm6, %v13864_v61, %v15586_v35  ;;  %v15595_v61 = vld [vmem:[#allocation21_spill] sm:$0xff]  ;;  %v6012_v52 = vsel %vm518_vm5, %v13977_v38, %v6003_v13 }
0x1329   : > { %6326 = vmatpush1.bf16.msra.mxu0 %v6221_v7  ;;  %v6033_v58 = vpop.permute.xlu0 %6032  ;;  %8024 = vmatprep.subr.bf16.mxu1 %v15574_v0  ;;  %v6185_v3 = vsel %vm15587_vm7, %v5982_v47, %v6008_v29  ;;  %vm15588_vm9 = vmmov %vm15584_vm11  ;;  %vm15598_vm7 = vcmask 474112   ;;  %v15615_v29 = vld [vmem:[#allocation19_spill] sm:$0xff]  ;;  %v9522_v35 = vld [vmem:[%s15103_s5 + $0x228] ss:$12 sps:$4 sm:$0xff]  }
0x132a   : > { %6327 = vmatprep.subr.bf16.mxu0 %v6189_v10  ;;  %v5956_v53 = vsel %vm15588_vm9, %v13868_v27, %v14003_v50  ;;  %vm15589_vm14 = vmmov %vm15557_vm0  ;;  %v5904_v50 = vsel %vm410_vm8, %v13897_v1, %v14076_v40  ;;  %v6044_v28 = vsel %vm549_vm2, %v6033_v58, %v6035_v11  ;;  %v6100_v24 = vsel %vm15598_vm7, %v15597_v63, %v6089_v51  ;;  %v9520_v47 = vld [vmem:[%s15103_s5 + $0x22c] ss:$12 sps:$4 sm:$0xff]   ;;  %v9542_v63 = vld [vmem:[%s15103_s5 + $0x1b0] ss:$12 sps:$4 sm:$0xff]  }
0x132b   : > { %v6153_v18 = vsel %vm15589_vm14, %v5931_v54, %v5957_v19  ;;  %vm15590_vm3 = vmmov %vm15557_vm0  ;;  %v5925_v12 = vpop.permute.xlu1 %5924  ;;  %v6043_v2 = vsel %vm549_vm2, %v14068_v55, %v6033_v58  ;;  %v6042_v11 = vsel %vm549_vm2, %v13955_v34, %v14068_v55  ;;  %v15619_v19 = vld [vmem:[#allocation23_spill] sm:$0xff]  ;;  %v9523_v54 = vld [vmem:[%s15103_s5 + $0x214] ss:$12 sps:$4 sm:$0xff]  }
0x132c   : > { %v6149_v25 = vsel %vm15590_vm3, %v5930_v62, %v5956_v53  ;;  %vm15592_vm4 = vmmov %vm15557_vm0  ;;  %vm15593_vm0 = vcmask 482304   ;;  %v5934_v48 = vsel %vm437_vm6, %v13987_v4, %v5925_v12  ;;  %v15617_v4 = vld [vmem:[#allocation16_spill] sm:$0xff] }
0x132d   : > { %6328 = vmatpush1.bf16.msra.mxu0 %v6185_v3  ;;  %v6062_v9 = vpop.permute.xlu0 %6061  ;;  %v6117_v5 = vsel %vm15592_vm4, %v15591_v20, %v5905_v31  ;;  %vm15594_vm11 = vmmov %vm15590_vm3  ;;  %vm15601_vm4 = vcmask 588800   ;;  %v9524_v3 = vld [vmem:[%s15103_s5 + $0xa8] ss:$12 sps:$4 sm:$0xff]   ;;  %v9530_v62 = vld [vmem:[%s15103_s5 + $0x1f8] ss:$12 sps:$4 sm:$0xff]  }
0x132e   : > { %6329 = vmatprep.subr.bf16.mxu0 %v6153_v18  ;;  %vm15596_vm10 = vmmov %vm15590_vm3  ;;  %v9525_v53 = vld [vmem:[%s15103_s5 + $0x94] ss:$12 sps:$4 sm:$0xff]   ;;  %v9528_v18 = vld [vmem:[%s15103_s5 + $0x90] ss:$12 sps:$4 sm:$0xff]  }
0x132f   : > { %v6113_v14 = vsel %vm15596_vm10, %v15595_v61, %v5904_v50  ;;  %vm15599_vm9 = vmmov %vm15598_vm7  ;;  %vm15605_vm7 = vcmask 760832   ;;  %v9529_v31 = vld [vmem:[%s15103_s5 + $0x7c] ss:$12 sps:$4 sm:$0xff]   ;;  %v9533_v50 = vld [vmem:[%s15103_s5 + $0x64] ss:$12 sps:$4 sm:$0xff]  }
0x1330   : > { %v6101_v40 = vsel %vm15599_vm9, %v6089_v51, %v14034_v22  ;;  %vm15600_vm14 = vmmov %vm15593_vm0  ;;  %v9535_v20 = vld [vmem:[%s15103_s5 + $0x1cc] ss:$12 sps:$4 sm:$0xff]   ;;  %v9540_v61 = vld [vmem:[%s15103_s5 + $0x48] ss:$12 sps:$4 sm:$0xff]  }
0x1331   : > { %6330 = vmatpush1.bf16.msra.mxu0 %v6149_v25  ;;  %v6064_v27 = vpop.permute.xlu0 %6063  ;;  %v6072_v26 = vsel %vm15600_vm14, %v14099_v56, %v6062_v9  ;;  %v9532_v25 = vld [vmem:[%s15103_s5 + $0x78] ss:$12 sps:$4 sm:$0xff]  }
0x1332   : > { %v6073_v6 = vsel %vm15593_vm0, %v6062_v9, %v6064_v27  ;;  %6331 = vmatprep.subr.bf16.mxu0 %v6117_v5  ;;  %vm15602_vm0 = vmmov %vm15590_vm3  ;;  %v9526_v9 = vld [vmem:[%s15103_s5 + $0x210] ss:$12 sps:$4 sm:$0xff]   ;;  %v9534_v27 = vld [vmem:[%s15103_s5 + $0x1e0] ss:$12 sps:$4 sm:$0xff]  }
0x1333   : > { %v6245_v30 = vsel %vm15594_vm11, %v6044_v28, %v6073_v6  ;;  %v6266_v21 = vsel %vm15602_vm0, %v6100_v24, 0  ;;  %vm15603_vm11 = vmmov %vm15600_vm14  ;;  %v9536_v5 = vld [vmem:[%s15103_s5 + $0x60] ss:$12 sps:$4 sm:$0xff]   ;;  %v9538_v6 = vld [vmem:[%s15103_s5 + $0x1c8] ss:$12 sps:$4 sm:$0xff]  }
0x1334   : > { %8025 = vmatpush3.bf16.msra.mxu1 %v6245_v30  ;;  %v6071_v22 = vsel %vm15603_vm11, %v13959_v17, %v14099_v56  ;;  %vm15604_vm10 = vmmov %vm15602_vm0  ;;  %v5951_v56 = vpop.permute.xlu1 %5950  ;;  %vm15610_vm11 = vcmask 769024   ;;  %v9537_v28 = vld [vmem:[%s15103_s5 + $0x4c] ss:$12 sps:$4 sm:$0xff]   ;;  %v9539_v30 = vld [vmem:[%s15103_s5 + $0x1b4] ss:$12 sps:$4 sm:$0xff]  }
0x1335   : > { %6332 = vmatpush1.bf16.msra.mxu0 %v6113_v14  ;;  %v5979_v1 = vpop.permute.xlu0 %5978  ;;  %8026 = vmatprep.subr.bf16.mxu1 %v15574_v0  ;;  %v6241_v57 = vsel %vm15604_vm10, %v6043_v2, %v6072_v26  ;;  %vm15606_vm9 = vmmov %vm15602_vm0  ;;  %v5960_v34 = vsel %vm15610_vm11, %v13989_v37, %v5951_v56  ;;  %v9541_v14 = vld [vmem:[%s15103_s5 + $0x34] ss:$12 sps:$4 sm:$0xff]   ;;  %v9543_v24 = vld [vmem:[%s15103_s5 + $0x19c] ss:$12 sps:$4 sm:$0xff]  }
0x1336   : > { %7764 = vmatprep.subr.msk.bf16.mxu0 %vm15590_vm3, %v6101_v40  ;;  %v5987_v33 = vsel %vm15605_vm7, %v5977_v39, %v5979_v1  ;;  %vm15607_vm14 = vmmov %vm15602_vm0  ;;  %v9545_v40 = vld [vmem:[%s15103_s5 + $0x1c] ss:$12 sps:$4 sm:$0xff]   ;;  %v9547_v26 = vld [vmem:[%s15103_s5 + $0x184] ss:$12 sps:$4 sm:$0xff]  }
0x1337   : > { %vm15608_vm3 = vmmov %vm15602_vm0  ;;  %v9548_v2 = vld [vmem:[%s15103_s5 + $0x18] ss:$12 sps:$4 sm:$0xff]  }
0x1338   : > { %7761 = vmatmul.mubr.msk.bf16.vlgmr.msra.gmra.mxu0 %vm15601_vm4, %v14128_v36  ;;  %v6237_v59 = vsel %vm15608_vm3, %v6042_v11, %v6071_v22  ;;  %vm15609_vm4 = vmmov %vm15605_vm7  ;;  %v5899_v44 = vpop.permute.xlu1 %5898  ;;  %v9550_v22 = vld [vmem:[%s15103_s5 + $0x180] ss:$12 sps:$4 sm:$0xff]   ;;  %v9556_v11 = vld [vmem:[%s15103_s5 + $0x168] ss:$12 sps:$4 sm:$0xff]  }
0x1339   : > { %6410 = vmatpush1.bf16.msra.mxu0 %v6266_v21  ;;  %v6005_v51 = vpop.permute.xlu0 %6004  ;;  %6435 = vmatprep.mubr.bf16.mxu0 %v15293_v42  ;;  %v5986_v60 = vsel %vm15609_vm4, %v13975_v45, %v5977_v39  ;;  %vm15611_vm10 = vmmov %vm15610_vm11  ;;  %v5908_v37 = vsel %vm410_vm8, %v13995_v49, %v5899_v44  ;;  %vm15620_vm11 = vcmask 588800   ;;  %v9521_v49 = vld [vmem:[%s15103_s5 + $0xac] ss:$12 sps:$4 sm:$0xff]   ;;  %v9549_v21 = vld [vmem:[%s15103_s5 + $0x4] ss:$12 sps:$4 sm:$0xff]  }
0x133a   : > { %v6013_v8 = vsel %vm518_vm5, %v6003_v13, %v6005_v51  ;;  %v6209_v46 = vsel %vm15606_vm9, %v5979_v1, %v6005_v51  ;;  %6411 = vmatprep.subr.bf16.mxu0 %v6241_v57  ;;  %v6201_v43 = vsel %vm15602_vm0, %v5986_v60, %v6012_v52  ;;  %vm15612_vm7 = vmmov %vm15602_vm0  ;;  %v6129_v39 = vsel %vm15602_vm0, %v15619_v19, %v5908_v37  ;;  %v9531_v13 = vld [vmem:[%s15103_s5 + $0x1e4] ss:$12 sps:$4 sm:$0xff]   ;;  %v9551_v51 = vld [vmem:[%s15103_s5 + $0x2ec] ss:$12 sps:$4 sm:$0xff]  }
0x133b   : > { %8027 = vmatpush3.bf16.msra.mxu1 %v6209_v46  ;;  %v6205_v17 = vsel %vm15607_vm14, %v5987_v33, %v6013_v8  ;;  %vm15613_vm9 = vmmov %vm15602_vm0  ;;  %v9544_v1 = vld [vmem:[%s15103_s5 + $0x30] ss:$12 sps:$4 sm:$0xff]   ;;  %v9552_v57 = vld [vmem:[%s15103_s5] ss:$12 sps:$4 sm:$0xff]  }
0x133c   : > { %8028 = vmatprep.subr.bf16.mxu1 %v15574_v0  ;;  %vm15614_vm14 = vmmov %vm15602_vm0  ;;  %v9553_v33 = vld [vmem:[%s15103_s5 + $0x16c] ss:$12 sps:$4 sm:$0xff]   ;;  %v9554_v8 = vld [vmem:[%s15103_s5 + $0x2e8] ss:$12 sps:$4 sm:$0xff]  }
0x133d   : > { %6412 = vmatpush1.bf16.msra.mxu0 %v6237_v59  ;;  %v5927_v15 = vpop.permute.xlu0 %5926  ;;  %v6165_v16 = vsel %vm15614_vm14, %v5934_v48, %v5960_v34  ;;  %vm15616_vm3 = vmmov %vm15602_vm0  ;;  %v9555_v46 = vld [vmem:[%s15103_s5 + $0x2d4] ss:$12 sps:$4 sm:$0xff]   ;;  %v9559_v59 = vld [vmem:[%s15103_s5 + $0x2bc] ss:$12 sps:$4 sm:$0xff]  }
0x133e   : > { %6413 = vmatprep.subr.bf16.mxu0 %v6205_v17  ;;  %v5935_v23 = vsel %vm437_vm6, %v5925_v12, %v5927_v15  ;;  %vm15618_vm4 = vmmov %vm15602_vm0  ;;  %v9546_v12 = vld [vmem:[%s15103_s5 + $0x198] ss:$12 sps:$4 sm:$0xff]   ;;  %v9557_v17 = vld [vmem:[%s15103_s5 + $0x154] ss:$12 sps:$4 sm:$0xff]  }
0x133f   : > { %v9560_v52 = vld [vmem:[%s15103_s5 + $0x150] ss:$12 sps:$4 sm:$0xff]   ;;  %v9562_v60 = vld [vmem:[%s15103_s5 + $0x2b8] ss:$12 sps:$4 sm:$0xff]   ;;  %v9570_v48 = vld [vmem:[%s15103_s5 + $0x288] ss:$12 sps:$4 sm:$0xff]  }
0x1340   : > { %v9564_v34 = vld [vmem:[%s15103_s5 + $0x138] ss:$12 sps:$4 sm:$0xff]   ;;  %v9573_v37 = vld [vmem:[%s15103_s5 + $0xf4] ss:$12 sps:$4 sm:$0xff]  }
0x1341   : > { %6414 = vmatpush1.bf16.msra.mxu0 %v6201_v43  ;;  %v5953_v55 = vpop.permute.xlu0 %5952  ;;  %v9563_v43 = vld [vmem:[%s15103_s5 + $0x2a4] ss:$12 sps:$4 sm:$0xff]  }
0x1342   : > { %v5961_v41 = vsel %vm15611_vm10, %v5951_v56, %v5953_v55  ;;  %v6173_v38 = vsel %vm15612_vm7, %v5927_v15, %v5953_v55  ;;  %vm15621_vm10 = vmmov %vm15620_vm11  ;;  %v9558_v56 = vld [vmem:[%s15103_s5 + $0x2d0] ss:$12 sps:$4 sm:$0xff]   ;;  %v9580_v19 = vld [vmem:[%s15103_s5 + $0xd8] ss:$12 sps:$4 sm:$0xff]   ;;  %vm15624_vm7 = vcmask 769024  }
0x1343   : > { %8029 = vmatpush3.bf16.msra.mxu1 %v6173_v38  ;;  %v6169_v45 = vsel %vm15613_vm9, %v5935_v23, %v5961_v41  ;;  %v9561_v15 = vld [vmem:[%s15103_s5 + $0x13c] ss:$12 sps:$4 sm:$0xff]   ;;  %v9565_v55 = vld [vmem:[%s15103_s5 + $0x124] ss:$12 sps:$4 sm:$0xff]   ;;  %v9567_v23 = vld [vmem:[%s15103_s5 + $0x28c] ss:$12 sps:$4 sm:$0xff]  }
0x1344   : > { %6415 = vmatprep.subr.bf16.mxu0 %v6169_v45  ;;  %8030 = vmatprep.subr.bf16.mxu1 %v15574_v0  ;;  %v9568_v41 = vld [vmem:[%s15103_s5 + $0x120] ss:$12 sps:$4 sm:$0xff]   ;;  %vm15625_vm9 = vmmov %vm15624_vm7 }
0x1345   : > { %v5901_v32 = vpop.permute.xlu0 %5900  ;;  %6416 = vmatpush1.bf16.msra.mxu0 %v6165_v16  ;;  %v9569_v38 = vld [vmem:[%s15103_s5 + $0x10c] ss:$12 sps:$4 sm:$0xff]   ;;  %v9571_v45 = vld [vmem:[%s15103_s5 + $0x274] ss:$12 sps:$4 sm:$0xff]   ;;  %vm15626_vm14 = vmmov %vm15624_vm7 }
0x1346   : > { %v5909_v7 = vsel %vm410_vm8, %v5899_v44, %v5901_v32  ;;  %v6137_v58 = vsel %vm15616_vm3, %v15615_v29, %v5901_v32  ;;  %v9566_v44 = vld [vmem:[%s15103_s5 + $0x2a0] ss:$12 sps:$4 sm:$0xff]   ;;  %v9572_v16 = vld [vmem:[%s15103_s5 + $0x108] ss:$12 sps:$4 sm:$0xff]   ;;  %v9574_v32 = vld [vmem:[%s15103_s5 + $0x270] ss:$12 sps:$4 sm:$0xff]  }
0x1347   : > { %8031 = vmatpush3.bf16.msra.mxu1 %v6137_v58  ;;  %v6133_v10 = vsel %vm15618_vm4, %v15617_v4, %v5909_v7  ;;  %v9575_v7 = vld [vmem:[%s15103_s5 + $0x25c] ss:$12 sps:$4 sm:$0xff]   ;;  %v9578_v4 = vld [vmem:[%s15103_s5 + $0x258] ss:$12 sps:$4 sm:$0xff]   ;;  %vm15627_vm3 = vmmov %vm15624_vm7 }
0x1348   : > { %6417 = vmatprep.subr.bf16.mxu0 %v6133_v10  ;;  %6920 = vmatprep.subr.bf16.mxu1 %v9520_v47  ;;  %v9576_v29 = vld [vmem:[%s15103_s5 + $0xf0] ss:$12 sps:$4 sm:$0xff]   ;;  %v9582_v47 = vld [vmem:[%s15103_s5 + $0x240] ss:$12 sps:$4 sm:$0xff]   ;;  %vm15628_vm4 = vmmov %vm15627_vm3 }
0x1349   : > { %6418 = vmatpush1.bf16.msra.mxu0 %v6129_v39  ;;  %v9577_v58 = vld [vmem:[%s15103_s5 + $0xdc] ss:$12 sps:$4 sm:$0xff]   ;;  %v9579_v10 = vld [vmem:[%s15103_s5 + $0x244] ss:$12 sps:$4 sm:$0xff]   ;;  %vm15629_vm0 = vmmov %vm15627_vm3 }
0x134a   : > { %8033 = vmatmul.mubr.msk.bf16.vlgmr.msra.gmra.mxu1 %vm15620_vm11, %v14128_v36  ;;  %6877 = vmatprep.subr.bf16.mxu0 %v9521_v49  ;;  %v9581_v39 = vld [vmem:[%s15103_s5 + $0xc4] ss:$12 sps:$4 sm:$0xff]   ;;  %vm15630_vm11 = vmmov %vm15629_vm0 }
0x134b   : > { %6921 = vmatpush1.bf16.msra.mxu1 %v9522_v35  ;;  %v9583_v49 = vld [vmem:[%s15103_s5 + $0x2f0] ss:$12 sps:$4 sm:$0xff]   ;;  %v9584_v35 = vld [vmem:[%s15103_s5 + $0xc0] ss:$12 sps:$4 sm:$0xff]  }
0x134c   : > { %7765 = vmatmul.mubr.msk.bf16.vlgmr.msra.gmra.mxu0 %vm15621_vm10, %v14128_v36  ;;  %6922 = vmatprep.subr.bf16.mxu1 %v9523_v54  ;;  %v9527_v36 = vld [vmem:[%s15103_s5 + $0x1fc] ss:$12 sps:$4 sm:$0xff]   ;;  %vm15631_vm10 = vmmov %vm15629_vm0 }
0x134d   : > { %6878 = vmatpush1.bf16.msra.mxu0 %v9524_v3  ;;  %v9585_v54 = vld [vmem:[%s15103_s5 + $0x170] ss:$12 sps:$4 sm:$0xff]  }
0x134e   : > { %6879 = vmatprep.subr.bf16.mxu0 %v9525_v53 }
0x134f   : > { %6923 = vmatpush1.bf16.msra.mxu1 %v9526_v9 }
0x1350   : > { %6924 = vmatprep.subr.bf16.mxu1 %v9527_v36 }
0x1351   : > { %6880 = vmatpush1.bf16.msra.mxu0 %v9528_v18 }
0x1352   : > { %6881 = vmatprep.subr.bf16.mxu0 %v9529_v31 }
0x1353   : > { %6925 = vmatpush1.bf16.msra.mxu1 %v9530_v62 }
0x1354   : > { %6926 = vmatprep.subr.bf16.mxu1 %v9531_v13 }
0x1355   : > { %6882 = vmatpush1.bf16.msra.mxu0 %v9532_v25 }
0x1356   : > { %6883 = vmatprep.subr.bf16.mxu0 %v9533_v50 }
0x1357   : > { %6927 = vmatpush1.bf16.msra.mxu1 %v9534_v27 }
0x1358   : > { %6928 = vmatprep.subr.bf16.mxu1 %v9535_v20  ;;  %v15622_v20 = vld [vmem:[#allocation4_spill] sm:$0xff] }
0x1359   : > { %6884 = vmatpush1.bf16.msra.mxu0 %v9536_v5 }
0x135a   : > { %6885 = vmatprep.subr.bf16.mxu0 %v9537_v28 }
0x135b   : > { %6929 = vmatpush1.bf16.msra.mxu1 %v9538_v6 }
0x135c   : > { %6930 = vmatprep.subr.bf16.mxu1 %v9539_v30 }
0x135d   : > { %6886 = vmatpush1.bf16.msra.mxu0 %v9540_v61 }
0x135e   : > { %6887 = vmatprep.subr.bf16.mxu0 %v9541_v14  ;;  %v15623_v14 = vld [vmem:[#allocation5_spill] sm:$0xff] }
0x135f   : > { %6931 = vmatpush1.bf16.msra.mxu1 %v9542_v63 }
0x1360   : > { %6932 = vmatprep.subr.bf16.mxu1 %v9543_v24 }
0x1361   : > { %6888 = vmatpush1.bf16.msra.mxu0 %v9544_v1 }
0x1362   : > { %6889 = vmatprep.subr.bf16.mxu0 %v9545_v40 }
0x1363   : > { %6933 = vmatpush1.bf16.msra.mxu1 %v9546_v12 }
0x1364   : > { %6934 = vmatprep.subr.bf16.mxu1 %v9547_v26 }
0x1365   : > { %6890 = vmatpush1.bf16.msra.mxu0 %v9548_v2 }
0x1366   : > { %6891 = vmatprep.subr.bf16.mxu0 %v9549_v21 }
0x1367   : > { %6935 = vmatpush1.bf16.msra.mxu1 %v9550_v22 }
0x1368   : > { %6936 = vmatprep.subr.bf16.mxu1 %v9551_v51 }
0x1369   : > { %6892 = vmatpush1.bf16.msra.mxu0 %v9552_v57 }
0x136a   : > { %6893 = vmatprep.subr.bf16.mxu0 %v9553_v33 }
0x136b   : > { %6937 = vmatpush2.bf16.msra.mxu1 %v9554_v8 }
0x136c   : > { %6938 = vmatprep.subr.bf16.mxu1 %v9555_v46 }
0x136d   : > { %6894 = vmatpush2.bf16.msra.mxu0 %v9556_v11 }
0x136e   : > { %6895 = vmatprep.subr.bf16.mxu0 %v9557_v17 }
0x136f   : > { %6939 = vmatpush2.bf16.msra.mxu1 %v9558_v56 }
0x1370   : > { %6940 = vmatprep.subr.bf16.mxu1 %v9559_v59 }
0x1371   : > { %6896 = vmatpush2.bf16.msra.mxu0 %v9560_v52 }
0x1372   : > { %6897 = vmatprep.subr.bf16.mxu0 %v9561_v15 }
0x1373   : > { %6941 = vmatpush2.bf16.msra.mxu1 %v9562_v60 }
0x1374   : > { %6942 = vmatprep.subr.bf16.mxu1 %v9563_v43 }
0x1375   : > { %6898 = vmatpush2.bf16.msra.mxu0 %v9564_v34 }
0x1376   : > { %6899 = vmatprep.subr.bf16.mxu0 %v9565_v55 }
0x1377   : > { %6943 = vmatpush2.bf16.msra.mxu1 %v9566_v44 }
0x1378   : > { %6944 = vmatprep.subr.bf16.mxu1 %v9567_v23 }
0x1379   : > { %6900 = vmatpush2.bf16.msra.mxu0 %v9568_v41 }
0x137a   : > { %6901 = vmatprep.subr.bf16.mxu0 %v9569_v38 }
0x137b   : > { %6945 = vmatpush2.bf16.msra.mxu1 %v9570_v48 }
0x137c   : > { %6946 = vmatprep.subr.bf16.mxu1 %v9571_v45 }
0x137d   : > { %6902 = vmatpush2.bf16.msra.mxu0 %v9572_v16 }
0x137e   : > { %6903 = vmatprep.subr.bf16.mxu0 %v9573_v37 }
0x137f   : > { %6947 = vmatpush2.bf16.msra.mxu1 %v9574_v32 }
0x1380   : > { %6948 = vmatprep.subr.bf16.mxu1 %v9575_v7 }
0x1381   : > { %6904 = vmatpush2.bf16.msra.mxu0 %v9576_v29 }
0x1382   : > { %6905 = vmatprep.subr.bf16.mxu0 %v9577_v58 }
0x1383   : > { %6949 = vmatpush2.bf16.msra.mxu1 %v9578_v4 }
0x1384   : > { %6950 = vmatprep.subr.bf16.mxu1 %v9579_v10 }
0x1385   : > { %6906 = vmatpush2.bf16.msra.mxu0 %v9580_v19 }
0x1386   : > { %6907 = vmatprep.subr.bf16.mxu0 %v9581_v39 }
0x1387   : > { %6951 = vmatpush2.bf16.msra.mxu1 %v9582_v47 }
0x1388   : > { %7955 = vmatprep.subr.bf16.mxu1 %v9583_v49 }
0x1389   : > { %6908 = vmatpush2.bf16.msra.mxu0 %v9584_v35 }
0x138a   : > { %7933 = vmatprep.subr.bf16.mxu0 %v9585_v54 }
0x13d0   : > { %v5813_v3 = vpop.f32.mrf.mxu0 }
0x13d2   : > { %v5772_v53 = vpop.f32.mrf.mxu1  ;;  %v5815_v9 = vpop.f32.mrf.mxu0 }
0x13d3   : > { %v14445_v36 = vadd.f32 %v5813_v3, %v5772_v53 }
0x13d4   : > { %v5774_v18 = vpop.f32.mrf.mxu1  ;;  %v5817_v31 = vpop.f32.mrf.mxu0 }
0x13d5   : > { %v14447_v62 = vadd.f32 %v5815_v9, %v5774_v18 }
0x13d6   : > { %v5776_v13 = vpop.f32.mrf.mxu1  ;;  %v5818_v25 = vpop.f32.mrf.mxu0 }
0x13d8   : > { %v5777_v50 = vpop.f32.mrf.mxu1 }
0x13e4   : > { %v6308_v30 = vpop.f32.mrf.mxu0 }
0x13e5   : > { %v6309_v39 = vadd.f32 %v6308_v30, %v15622_v20 }
0x13e6   : > { %v6394_v27 = vpop.f32.mrf.mxu1  ;;  %v6310_v40 = vpop.f32.mrf.mxu0 }
0x13e7   : > { %v6395_v5 = vadd.f32 %v6394_v27, %v15622_v20  ;;  %v6311_v55 = vadd.f32 %v6310_v40, %v15622_v20 }
0x13e8   : > { %v6396_v28 = vpop.f32.mrf.mxu1  ;;  %v6312_v12 = vpop.f32.mrf.mxu0 }
0x13e9   : > { %v6397_v6 = vadd.f32 %v6396_v28, %v15622_v20  ;;  %9217 = vtanh.f32 %v6395_v5  ;;  %v6313_v54 = vadd.f32 %v6312_v12, %v15623_v14 }
0x13ea   : > { %v6398_v61 = vpop.f32.mrf.mxu1  ;;  %v6314_v26 = vpop.f32.mrf.mxu0 }
0x13eb   : > { %v6399_v63 = vadd.f32 %v6398_v61, %v15623_v14  ;;  %9219 = vtanh.f32 %v6397_v6  ;;  %v6315_v49 = vadd.f32 %v6314_v26, %v15623_v14 }
0x13ec   : > { %v6400_v24 = vpop.f32.mrf.mxu1 }
0x13ed   : > { %v6401_v1 = vadd.f32 %v6400_v24, %v15623_v14  ;;  %9221 = vtanh.f32 %v6399_v63 }
0x13ef   : > { %9223 = vtanh.f32 %v6401_v1 }
0x13f6   : > { %v14453_v2 = vpop.eup %9217 }
0x13f8   : > { %v6351_v21 = vpop.f32.mrf.mxu0  ;;  %v14455_v22 = vpop.eup %9219 }
0x13f9   : > { %v6352_v51 = vadd.f32 %v6351_v21, %v15622_v20  ;;  %v8672_v33 = vpack.i.bf16 %v14455_v22, %v14453_v2 }
0x13fa   : > { %v6353_v57 = vpop.f32.mrf.mxu0  ;;  %v14460_v8 = vpop.eup %9221 }
0x13fb   : > { %v6354_v46 = vadd.f32 %v6353_v57, %v15622_v20  ;;  %9225 = vtanh.f32 %v6352_v51  ;;  %8673 = vrot.lane.b32.xlu1 %v8672_v33, %s15353_s4 }
0x13fc   : > { %v14463_v11 = vpop.eup %9223  ;;  %v6355_v17 = vpop.f32.mrf.mxu0 }
0x13fd   : > { %9227 = vtanh.f32 %v6354_v46  ;;  %v6356_v56 = vadd.f32 %v6355_v17, %v15623_v14  ;;  %v8677_v59 = vpack.i.bf16 %v14463_v11, %v14460_v8 }
0x13fe   : > { %v6357_v52 = vpop.f32.mrf.mxu0 }
0x13ff   : > { %v6358_v15 = vadd.f32 %v6357_v52, %v15623_v14  ;;  %9229 = vtanh.f32 %v6356_v56  ;;  %8678 = vrot.lane.b32.xlu1 %v8677_v59, %s15353_s4 }
0x1401   : > { %9231 = vtanh.f32 %v6358_v15 }
0x1402   : > { %9233 = vtanh.f32 %v6311_v55 }
0x1408   : > { %v14471_v60 = vpop.eup %9225 }
0x140a   : > { %v14473_v43 = vpop.eup %9227  ;;  %v6480_v34 = vpop.f32.mrf.mxu1 }
0x140b   : > { %v8682_v44 = vpack.i.bf16 %v14473_v43, %v14471_v60  ;;  %v6481_v16 = vadd.f32 %v6480_v34, %v15622_v20 }
0x140c   : > { %v6437_v23 = vpop.f32.mrf.mxu0  ;;  %v8034_v41 = vpop.f32.mrf.mxu1 }
0x140d   : > { %v14478_v38 = vpop.eup %9229  ;;  %v6438_v48 = vadd.f32 %v6437_v23, %v15622_v20  ;;  %8683 = vrot.lane.b32.xlu0 %v8682_v44, %s15353_s4 }
0x140e   : > { %v14482_v45 = vpop.eup %9231  ;;  %v6439_v37 = vpop.f32.mrf.mxu0 }
0x140f   : > { %v6483_v32 = vpop.f32.mrf.mxu1  ;;  %v6440_v7 = vadd.f32 %v6439_v37, %v15622_v20  ;;  %v8687_v29 = vpack.i.bf16 %v14482_v45, %v14478_v38  ;;  %9235 = vtanh.f32 %v6438_v48  ;;  %v14495_v3 = vpop.eup %9233 }
0x1410   : > { %v6484_v58 = vadd.f32 %v6483_v32, %v15623_v14  ;;  %v6441_v4 = vpop.f32.mrf.mxu0 }
0x1411   : > { %v8035_v10 = vpop.f32.mrf.mxu1  ;;  %9237 = vtanh.f32 %v6440_v7  ;;  %v6442_v19 = vadd.f32 %v6441_v4, %v15623_v14  ;;  %8688 = vrot.lane.b32.xlu0 %v8687_v29, %s15353_s4 }
0x1412   : > { %9239 = vtanh.f32 %v6481_v16  ;;  %v6443_v47 = vpop.f32.mrf.mxu0 }
0x1413   : > { %9241 = vtanh.f32 %v6442_v19  ;;  %v6444_v35 = vadd.f32 %v6443_v47, %v15623_v14 }
0x1414   : > { %9243 = vtanh.f32 %v6484_v58 }
0x1415   : > { %9245 = vtanh.f32 %v6444_v35 }
0x1416   : > { %9247 = vtanh.f32 %v6309_v39 }
0x1417   : > { %9249 = vtanh.f32 %v6315_v49 }
0x1418   : > { %9251 = vtanh.f32 %v6313_v54 }
0x141c   : > { %v14497_v53 = vpop.eup %9235 }
0x141e   : > { %v9238_v9 = vpop.eup %9237 }
0x141f   : > { %v14499_v18 = vpop.eup %9239  ;;  %v8692_v31 = vpack.i.bf16 %v9238_v9, %v14497_v53 }
0x1420   : > { %v14502_v13 = vpop.eup %9241 }
0x1421   : > { %v14504_v25 = vpop.eup %9243  ;;  %8693 = vrot.lane.b32.xlu1 %v8692_v31, %s15353_s4  ;;  %v8697_v50 = vpack.i.bf16 %v14502_v13, %v14499_v18 }
0x1422   : > { %v14509_v27 = vpop.eup %9245 }
0x1423   : > { %v14511_v20 = vpop.eup %9247  ;;  %8698 = vrot.lane.b32.xlu0 %v8697_v50, %s15353_s4  ;;  %v8707_v5 = vpack.i.bf16 %v14504_v25, %v14509_v27 }
0x1424   : > { %v14516_v28 = vpop.eup %9249  ;;  %v8702_v6 = vpack.i.bf16 %v14495_v3, %v14511_v20 }
0x1425   : > { %8708 = vrot.lane.b32.xlu1 %v8707_v5, %s15353_s4  ;;  %v14521_v30 = vpop.eup %9251 }
0x1426   : > { %v8712_v61 = vpack.i.bf16 %v14516_v28, %v14521_v30 }
0x1427   : > { %8703 = vrot.lane.b32.xlu0 %v8702_v6, %s15353_s4 }
0x1429   : > { %8713 = vrot.lane.b32.xlu1 %v8712_v61, %s15353_s4 }
0x146d   : > { %v8674_v14 = vpop.permute.xlu1 %8673 }
0x146e   : > { %v8675_v24 = vunpack.i.l.bf16 %v8674_v14  ;;  %v8676_v55 = vunpack.i.h.bf16 %v8674_v14 }
0x1470   : > { %v6563_v23 = vsel %vm410_vm8, %v8675_v24, %v8676_v55 }
0x1471   : > { %v8679_v12 = vpop.permute.xlu1 %8678 }
0x1472   : > { %v8680_v46 = vunpack.i.l.bf16 %v8679_v12  ;;  %v8681_v7 = vunpack.i.h.bf16 %v8679_v12 }
0x147f   : > { %v8684_v63 = vpop.permute.xlu0 %8683 }
0x1480   : > { %v8686_v1 = vunpack.i.h.bf16 %v8684_v63  ;;  %v8685_v40 = vunpack.i.l.bf16 %v8684_v63 }
0x1482   : > { %v6561_v26 = vsel %vm410_vm8, %v8685_v40, %v8686_v1  ;;  %v6562_v21 = vsel %vm410_vm8, %v8686_v1, %v8675_v24 }
0x1483   : > { %v14530_v51 = vmax.f32 %v14471_v60, %v6561_v26  ;;  %v14533_v57 = vmax.f32 %v14473_v43, %v6562_v21  ;;  %v8689_v33 = vpop.permute.xlu0 %8688 }
0x1484   : > { %v8691_v17 = vunpack.i.h.bf16 %v8689_v33  ;;  %v8690_v56 = vunpack.i.l.bf16 %v8689_v33 }
0x1485   : > { %v8717_v59 = vpack.i.bf16 %v14533_v57, %v14530_v51 }
0x1486   : > { %v6569_v52 = vsel %vm410_vm8, %v8690_v56, %v8691_v17  ;;  %v6570_v15 = vsel %vm410_vm8, %v8691_v17, %v8680_v46 }
0x1487   : > { %v14540_v34 = vmax.f32 %v14478_v38, %v6569_v52  ;;  %v14543_v60 = vmax.f32 %v14482_v45, %v6570_v15  ;;  %8718 = vrot.lane.b32.xlu1 %v8717_v59, %s15279_s17  ;;  %v14552_v45 = vmax.f32 %v14453_v2, %v6563_v23 }
0x1489   : > { %v8722_v43 = vpack.i.bf16 %v14543_v60, %v14540_v34 }
0x148b   : > { %8723 = vrot.lane.b32.xlu1 %v8722_v43, %s15279_s17 }
0x1493   : > { %v8694_v44 = vpop.permute.xlu1 %8693 }
0x1494   : > { %v8696_v41 = vunpack.i.h.bf16 %v8694_v44  ;;  %v8695_v48 = vunpack.i.l.bf16 %v8694_v44 }
0x1495   : > { %v8699_v16 = vpop.permute.xlu0 %8698 }
0x1496   : > { %v6564_v38 = vsel %vm410_vm8, %v8676_v55, %v8695_v48  ;;  %v8701_v37 = vunpack.i.h.bf16 %v8699_v16  ;;  %v8700_v32 = vunpack.i.l.bf16 %v8699_v16  ;;  %v6565_v4 = vsel %vm410_vm8, %v8695_v48, %v8696_v41 }
0x1497   : > { %v14555_v29 = vmax.f32 %v14455_v22, %v6564_v38  ;;  %v8709_v58 = vpop.permute.xlu1 %8708  ;;  %v6571_v22 = vsel %vm410_vm8, %v8680_v46, %v8681_v7  ;;  %v14566_v50 = vmax.f32 %v14497_v53, %v6565_v4 }
0x1498   : > { %v6566_v10 = vsel %vm410_vm8, %v8696_v41, %v8700_v32  ;;  %v8711_v39 = vunpack.i.h.bf16 %v8709_v58  ;;  %v8710_v47 = vunpack.i.l.bf16 %v8709_v58  ;;  %v6572_v2 = vsel %vm410_vm8, %v8681_v7, %v8701_v37 }
0x1499   : > { %v14559_v19 = vmax.f32 %v9238_v9, %v6566_v10  ;;  %v8704_v49 = vpop.permute.xlu0 %8703  ;;  %v8727_v35 = vpack.i.bf16 %v14555_v29, %v14552_v45  ;;  %v14571_v9 = vmax.f32 %v14499_v18, %v8700_v32  ;;  %v14579_v24 = vmax.f32 %v14463_v11, %v6572_v2 }
0x149a   : > { %v8706_v54 = vunpack.i.h.bf16 %v8704_v49  ;;  %v8705_v31 = vunpack.i.l.bf16 %v8704_v49  ;;  %v6573_v5 = vsel %vm410_vm8, %v8701_v37, %v8710_v47  ;;  %v6574_v53 = vsel %vm410_vm8, %v8710_v47, %v8711_v39 }
0x149b   : > { %v8714_v6 = vpop.permute.xlu1 %8713  ;;  %8728 = vrot.lane.b32.xlu0 %v8727_v35, %s15279_s17  ;;  %v14574_v61 = vmax.f32 %v14502_v13, %v6573_v5  ;;  %v8732_v12 = vpack.i.bf16 %v14559_v19, %v14566_v50  ;;  %v14593_v21 = vmax.f32 %v14460_v8, %v6571_v22  ;;  %v14598_v11 = vmax.f32 %v14504_v25, %v8711_v39 }
0x149c   : > { %v6560_v14 = vsel %vm410_vm8, %v8706_v54, %v8685_v40  ;;  %v6559_v63 = vsel %vm410_vm8, %v8705_v31, %v8706_v54  ;;  %v8716_v13 = vunpack.i.h.bf16 %v8714_v6  ;;  %v8715_v26 = vunpack.i.l.bf16 %v8714_v6 }
0x149d   : > { %v14583_v1 = vmax.f32 %v14495_v3, %v6560_v14  ;;  %v14588_v18 = vmax.f32 %v14511_v20, %v6559_v63  ;;  %v8742_v40 = vpack.i.bf16 %v14574_v61, %v14571_v9  ;;  %v14601_v3 = vmax.f32 %v14509_v27, %v6574_v53 }
0x149e   : > { %v8737_v20 = vpack.i.bf16 %v14579_v24, %v14593_v21  ;;  %v6568_v33 = vsel %vm410_vm8, %v8716_v13, %v8690_v56  ;;  %v6567_v46 = vsel %vm410_vm8, %v8715_v26, %v8716_v13 }
0x149f   : > { %8733 = vrot.lane.b32.xlu0 %v8732_v12, %s15279_s17  ;;  %8743 = vrot.lane.b32.xlu1 %v8742_v40, %s15279_s17  ;;  %v8747_v8 = vpack.i.bf16 %v14583_v1, %v14588_v18  ;;  %v8752_v25 = vpack.i.bf16 %v14598_v11, %v14601_v3  ;;  %v14614_v27 = vmax.f32 %v14516_v28, %v6568_v33 }
0x14a0   : > { %v6602_v17 = vmax.f32 %v14521_v30, %v6567_v46 }
0x14a2   : > { %v8757_v56 = vpack.i.bf16 %v14614_v27, %v6602_v17 }
0x14a3   : > { %8738 = vrot.lane.b32.xlu0 %v8737_v20, %s15279_s17  ;;  %8748 = vrot.lane.b32.xlu1 %v8747_v8, %s15279_s17 }
0x14a7   : > { %8753 = vrot.lane.b32.xlu0 %v8752_v25, %s15279_s17 }
0x14ab   : > { %8758 = vrot.lane.b32.xlu0 %v8757_v56, %s15279_s17  ;;  %s15638_s17 = smov 100  }
0x14f9   : > { %v8719_v59 = vpop.permute.xlu1 %8718 }
0x14fa   : > { %v8721_v52 = vunpack.i.h.bf16 %v8719_v59  ;;  %v8720_v15 = vunpack.i.l.bf16 %v8719_v59 }
0x14fc   : > { %v6667_v55 = vsel %vm15624_vm7, %v8720_v15, %v8721_v52  ;;  %vm15632_vm7 = vmmov %vm15629_vm0 }
0x14fd   : > { %v8724_v43 = vpop.permute.xlu1 %8723  ;;  %v6701_v28 = vmax.f32 %v14530_v51, %v6667_v55 }
0x14fe   : > { %v8726_v44 = vunpack.i.h.bf16 %v8724_v43  ;;  %v8725_v23 = vunpack.i.l.bf16 %v8724_v43 }
0x1500   : > { %v6675_v41 = vsel %vm15625_vm9, %v8725_v23, %v8726_v44  ;;  %vm15633_vm9 = vmmov %vm15629_vm0 }
0x1501   : > { %v6710_v30 = vmax.f32 %v14540_v34, %v6675_v41 }
0x1503   : > { %v8767_v48 = vpack.i.bf16 %v6710_v30, %v6701_v28 }
0x1505   : > { %8768 = vrot.lane.b32.xlu1 %v8767_v48, %s15309_s30  ;;  %s15640_s30 = smov 8  }
0x150d   : > { %v8729_v16 = vpop.permute.xlu0 %8728 }
0x150e   : > { %v8730_v37 = vunpack.i.l.bf16 %v8729_v16  ;;  %v8731_v63 = vunpack.i.h.bf16 %v8729_v16 }
0x1510   : > { %v6668_v58 = vsel %vm15626_vm14, %v8721_v52, %v8730_v37  ;;  %v6669_v46 = vsel %vm15633_vm9, %v8730_v37, %v8731_v63  ;;  %vm15634_vm14 = vmmov %vm15629_vm0 }
0x1511   : > { %v8734_v38 = vpop.permute.xlu0 %8733  ;;  %v14625_v32 = vpop.permute.xlu1 %8743  ;;  %v6702_v49 = vmax.f32 %v14533_v57, %v6668_v58  ;;  %v6703_v59 = vmax.f32 %v14552_v45, %v6669_v46 }
0x1512   : > { %v8736_v39 = vunpack.i.h.bf16 %v8734_v38  ;;  %v8735_v47 = vunpack.i.l.bf16 %v8734_v38  ;;  %v8745_v51 = vunpack.i.l.bf16 %v14625_v32 }
0x1514   : > { %v6671_v5 = vsel %vm15628_vm4, %v8735_v47, %v8736_v39  ;;  %v6672_v6 = vsel %vm15629_vm0, %v8736_v39, %v8745_v51  ;;  %v6670_v26 = vsel %vm15631_vm10, %v8731_v63, %v8735_v47  ;;  %vm15636_vm4 = vmmov %vm15629_vm0  ;;  %v6707_v45 = vmax.f32 %v14571_v9, %v8745_v51 }
0x1515   : > { %v14627_v7 = vpop.permute.xlu0 %8738  ;;  %v8749_v10 = vpop.permute.xlu1 %8748  ;;  %v6705_v57 = vmax.f32 %v14566_v50, %v6671_v5  ;;  %v6704_v8 = vmax.f32 %v14555_v29, %v6670_v26  ;;  %vm15639_vm10 = vmmov %vm15629_vm0 }
0x1516   : > { %v8740_v4 = vunpack.i.l.bf16 %v14627_v7  ;;  %v8751_v54 = vunpack.i.h.bf16 %v8749_v10  ;;  %v8750_v31 = vunpack.i.l.bf16 %v8749_v10  ;;  %v8741_v43 = vunpack.i.h.bf16 %v14627_v7 }
0x1517   : > { %v8797_v29 = vpack.i.bf16 %v6704_v8, %v6703_v59  ;;  %v8807_v28 = vpack.i.bf16 %v6705_v57, %v6704_v8 }
0x1518   : > { %v6676_v34 = vsel %vm15627_vm3, %v8726_v44, %v8740_v4  ;;  %v6665_v53 = vsel %vm15630_vm11, %v8750_v31, %v8751_v54  ;;  %vm15635_vm3 = vmmov %vm15629_vm0 }
0x1519   : > { %v6711_v35 = vmax.f32 %v14543_v60, %v6676_v34  ;;  %v8754_v2 = vpop.permute.xlu0 %8753  ;;  %v6706_v60 = vmax.f32 %v14559_v19, %v6672_v6  ;;  %v14644_v20 = vmax.f32 %v14588_v18, %v6665_v53  ;;  %v8746_v18 = vunpack.i.h.bf16 %v14625_v32  ;;  %vm15637_vm11 = vmmov %vm15629_vm0 }
0x151a   : > { %v8755_v19 = vunpack.i.l.bf16 %v8754_v2  ;;  %v8756_v55 = vunpack.i.h.bf16 %v8754_v2 }
0x151b   : > { %v8777_v22 = vpack.i.bf16 %v6711_v35, %v6702_v49  ;;  %v8792_v25 = vpack.i.bf16 %v6706_v60, %v6705_v57  ;;  %v8802_v16 = vpack.i.bf16 %v6707_v45, %v6706_v60  ;;  %v6678_v32 = vsel %vm15639_vm10, %v8741_v43, %v8746_v18 }
0x151c   : > { %v6679_v44 = vsel %vm15636_vm4, %v8746_v18, %v8755_v19  ;;  %v6680_v30 = vsel %vm15637_vm11, %v8755_v19, %v8756_v55  ;;  %v6716_v9 = vmax.f32 %v14598_v11, %v8756_v55  ;;  %v6713_v7 = vmax.f32 %v14579_v24, %v6678_v32 }
0x151d   : > { %v8759_v14 = vpop.permute.xlu0 %8758  ;;  %8778 = vrot.lane.b32.xlu1 %v8777_v22, %s15310_s22  ;;  %v6714_v41 = vmax.f32 %v14574_v61, %v6679_v44  ;;  %s15641_s22 = smov 96   ;;  %vm15648_vm4 = vcmask 359424  }
0x151e   : > { %v8761_v12 = vunpack.i.h.bf16 %v8759_v14  ;;  %v8760_v13 = vunpack.i.l.bf16 %v8759_v14  ;;  %v8842_v11 = vpack.i.bf16 %v6713_v7, %v6704_v8  ;;  %vm15650_vm11 = vmmov %vm15648_vm4 }
0x151f   : > { %v8827_v38 = vpack.i.bf16 %v6714_v41, %v6705_v57 }
0x1520   : > { %v6673_v40 = vsel %vm15632_vm7, %v8760_v13, %v8761_v12  ;;  %v6674_v56 = vsel %vm15634_vm14, %v8761_v12, %v8725_v23  ;;  %vm15644_vm7 = vcmask 523264   ;;  %vm15646_vm14 = vcmask 785408  }
0x1521   : > { %v14646_v33 = vmax.f32 %v6602_v17, %v6673_v40  ;;  %8788 = vrot.lane.b32.xlu1 %v8777_v22, %s15311_s20  ;;  %v6666_v17 = vsel %vm15635_vm3, %v8751_v54, %v8720_v15  ;;  %v6709_v52 = vmax.f32 %v14614_v27, %v6674_v56  ;;  %v6677_v27 = vsel %vm15629_vm0, %v8740_v4, %v8741_v43  ;;  %s15642_s20 = smov 20   ;;  %vm15645_vm9 = vmmov %vm15644_vm7 }
0x1522   : > { %v6700_v23 = vmax.f32 %v14583_v1, %v6666_v17  ;;  %v6712_v1 = vmax.f32 %v14593_v21, %v6677_v27  ;;  %v8847_v4 = vpack.i.bf16 %v6714_v41, %v6713_v7  ;;  %vm15647_vm3 = vmmov %vm15646_vm14 }
0x1523   : > { %v8762_v50 = vpack.i.bf16 %v14646_v33, %v14644_v20  ;;  %vm15649_vm0 = vmmov %vm15644_vm7 }
0x1524   : > { %v8782_v15 = vpack.i.bf16 %v6709_v52, %v6700_v23  ;;  %v8812_v37 = vpack.i.bf16 %v6712_v1, %v6703_v59  ;;  %vm15651_vm10 = vmmov %vm15649_vm0 }
0x1525   : > { %8763 = vrot.lane.b32.xlu0 %v8762_v50, %s15347_s14  ;;  %8793 = vrot.lane.b32.xlu1 %v8792_v25, %s15312_s25 }
0x1529   : > { %8773 = vrot.lane.b32.xlu0 %v8767_v48, %s15313_s29  ;;  %8798 = vrot.lane.b32.xlu1 %v8797_v29, %s15357_s10  ;;  %v6715_v48 = vmax.f32 %v14601_v3, %v6680_v30  ;;  %v8822_v3 = vpack.i.bf16 %v6713_v7, %v6712_v1  ;;  %s15643_s29 = smov 24  }
0x152b   : > { %v8832_v61 = vpack.i.bf16 %v6715_v48, %v6706_v60  ;;  %v8837_v21 = vpack.i.bf16 %v6716_v9, %v6715_v48  ;;  %v8817_v58 = vpack.i.bf16 %v6715_v48, %v6714_v41 }
0x152d   : > { %8808 = vrot.lane.b32.xlu1 %v8807_v28, %s15314_s28  ;;  %8783 = vrot.lane.b32.xlu0 %v8782_v15, %s15315_s23 }
0x1531   : > { %8828 = vrot.lane.b32.xlu1 %v8827_v38, %s15316_s18  ;;  %8803 = vrot.lane.b32.xlu0 %v8802_v16, %s15638_s17 }
0x1535   : > { %8833 = vrot.lane.b32.xlu1 %v8832_v61, %s15640_s30  ;;  %8813 = vrot.lane.b32.xlu0 %v8812_v37, %s15641_s22 }
0x1539   : > { %8838 = vrot.lane.b32.xlu1 %v8837_v21, %s15638_s17  ;;  %8818 = vrot.lane.b32.xlu0 %v8817_v58, %s15312_s25  ;;  %s15692_s17 = sld [smem:[#allocation33_spill]] }
0x153d   : > { %8853 = vrot.lane.b32.xlu1 %v8782_v15, %s15642_s20  ;;  %8823 = vrot.lane.b32.xlu0 %v8822_v3, %s15357_s10 }
0x1541   : > { %8843 = vrot.lane.b32.xlu0 %v8842_v11, %s15643_s29 }
0x1545   : > { %8848 = vrot.lane.b32.xlu0 %v8847_v4, %s15314_s28 }
0x1577   : > { %v8769_v10 = vpop.permute.xlu1 %8768 }
0x1578   : > { %v8771_v35 = vunpack.i.h.bf16 %v8769_v10  ;;  %v8770_v2 = vunpack.i.l.bf16 %v8769_v10 }
0x158f   : > { %v8779_v39 = vpop.permute.xlu1 %8778 }
0x1590   : > { %v8781_v22 = vunpack.i.h.bf16 %v8779_v39  ;;  %v8780_v5 = vunpack.i.l.bf16 %v8779_v39 }
0x1593   : > { %v8789_v24 = vpop.permute.xlu1 %8788 }
0x1594   : > { %v8791_v63 = vunpack.i.h.bf16 %v8789_v24  ;;  %v8790_v53 = vunpack.i.l.bf16 %v8789_v24 }
0x1597   : > { %v8764_v47 = vpop.permute.xlu0 %8763  ;;  %v8794_v51 = vpop.permute.xlu1 %8793 }
0x1598   : > { %v8766_v25 = vunpack.i.h.bf16 %v8764_v47  ;;  %v8796_v19 = vunpack.i.h.bf16 %v8794_v51  ;;  %v8795_v56 = vunpack.i.l.bf16 %v8794_v51  ;;  %v8765_v52 = vunpack.i.l.bf16 %v8764_v47 }
0x159a   : > { %v6850_v43 = vsel %vm1395_vm12, %v14646_v33, %v8766_v25  ;;  %v6825_v55 = vsel %vm15648_vm4, %v8795_v56, %v8796_v19  ;;  %v6849_v9 = vsel %vm1395_vm12, %v14644_v20, %v8765_v52  ;;  %vm15656_vm4 = vcmask 785408   ;;  %v9587_v25 = vld [vmem:[%s15103_s5 + $0x158] ss:$12 sps:$4 sm:$0xff]  }
0x159b   : > { %v8774_v34 = vpop.permute.xlu0 %8773  ;;  %v14686_v49 = vpop.permute.xlu1 %8798  ;;  %v9588_v52 = vld [vmem:[%s15103_s5 + $0x98] ss:$12 sps:$4 sm:$0xff]  }
0x159c   : > { %v8776_v54 = vunpack.i.h.bf16 %v8774_v34  ;;  %v8775_v31 = vunpack.i.l.bf16 %v8774_v34  ;;  %v8801_v33 = vunpack.i.h.bf16 %v14686_v49  ;;  %v8800_v32 = vunpack.i.l.bf16 %v14686_v49 }
0x159e   : > { %v6855_v6 = vsel %vm1395_vm12, %v8770_v2, %v8775_v31  ;;  %v6856_v14 = vsel %vm1395_vm12, %v8771_v35, %v8776_v54 }
0x159f   : > { %v14690_v12 = vpop.permute.xlu1 %8808  ;;  %v8784_v13 = vpop.permute.xlu0 %8783  ;;  %v6857_v57 = vsel %vm15644_vm7, %v6855_v6, %v8780_v5  ;;  %v6858_v60 = vsel %vm15645_vm9, %v6856_v14, %v8781_v22  ;;  %vm15652_vm7 = vmmov %vm15649_vm0  ;;  %vm15653_vm9 = vcmask 818176  }
0x15a0   : > { %v6859_v26 = vsel %vm15646_vm14, %v6857_v57, %v8790_v53  ;;  %v6860_v40 = vsel %vm15647_vm3, %v6858_v60, %v8791_v63  ;;  %v8786_v44 = vunpack.i.h.bf16 %v8784_v13  ;;  %v8785_v23 = vunpack.i.l.bf16 %v8784_v13  ;;  %vm15654_vm14 = vmmov %vm15653_vm9 }
0x15a1   : > { %v6874_v46 = vpack.c.bf16 %v6860_v40, %v6859_v26  ;;  %vm15655_vm3 = vmmov %vm15649_vm0  ;;  %v6785_v63 = vsel %vm549_vm2, %v8800_v32, %v8801_v33  ;;  %v8811_v53 = vunpack.i.h.bf16 %v14690_v12  ;;  %v8810_v13 = vunpack.i.l.bf16 %v14690_v12  ;;  %v9586_v26 = vld [vmem:[%s15103_s5 + $0xb0] ss:$12 sps:$4 sm:$0xff]   ;;  %v9602_v33 = vld [vmem:[%s15103_s5 + $0x38] ss:$12 sps:$4 sm:$0xff]  }
0x15a2   : > { %v6852_v7 = vsel %vm15651_vm10, %v6850_v43, %v8786_v44  ;;  %v6851_v4 = vsel %vm15652_vm7, %v6849_v9, %v8785_v23  ;;  %vm15660_vm7 = vmmov %vm15655_vm3  ;;  %v9590_v23 = vld [vmem:[%s15103_s5 + $0x80] ss:$12 sps:$4 sm:$0xff]   ;;  %v9601_v9 = vld [vmem:[%s15103_s5 + $0x2a8] ss:$12 sps:$4 sm:$0xff]  }
0x15a3   : > { %v8829_v8 = vpop.permute.xlu1 %8828  ;;  %v8804_v50 = vpop.permute.xlu0 %8803  ;;  %6909 = vmatprep.mubr.bf16.mxu0 %v6874_v46  ;;  %v9605_v32 = vld [vmem:[%s15103_s5 + $0x290] ss:$12 sps:$4 sm:$0xff]  }
0x15a4   : > { %v8830_v17 = vunpack.i.l.bf16 %v8829_v8  ;;  %v8806_v28 = vunpack.i.h.bf16 %v8804_v50  ;;  %v8805_v15 = vunpack.i.l.bf16 %v8804_v50  ;;  %v8831_v16 = vunpack.i.h.bf16 %v8829_v8 }
0x15a6   : > { %v6867_v1 = vsel %vm1395_vm12, %v8830_v17, %v6825_v55  ;;  %v6845_v10 = vsel %vm15653_vm9, %v8805_v15, %v8806_v28  ;;  %vm15662_vm9 = vmmov %vm15655_vm3  ;;  %v9593_v28 = vld [vmem:[%s15103_s5 + $0x2d8] ss:$12 sps:$4 sm:$0xff]   ;;  %v9594_v15 = vld [vmem:[%s15103_s5 + $0x68] ss:$12 sps:$4 sm:$0xff]  }
0x15a7   : > { %v8834_v59 = vpop.permute.xlu1 %8833  ;;  %v14696_v18 = vpop.permute.xlu0 %8813 }
0x15a8   : > { %v8835_v29 = vunpack.i.l.bf16 %v8834_v59  ;;  %v8836_v21 = vunpack.i.h.bf16 %v8834_v59  ;;  %v8815_v31 = vunpack.i.l.bf16 %v14696_v18  ;;  %v8816_v40 = vunpack.i.h.bf16 %v14696_v18 }
0x15aa   : > { %v6869_v61 = vsel %vm15649_vm0, %v6867_v1, %v8835_v29  ;;  %vm15657_vm0 = vmmov %vm15656_vm4  ;;  %v6861_v8 = vsel %vm1395_vm12, %v8815_v31, %v6785_v63  ;;  %v9589_v29 = vld [vmem:[%s15103_s5 + $0x140] ss:$12 sps:$4 sm:$0xff]   ;;  %v9598_v1 = vld [vmem:[%s15103_s5 + $0x50] ss:$12 sps:$4 sm:$0xff]  }
0x15ab   : > { %v8839_v45 = vpop.permute.xlu1 %8838  ;;  %v8819_v41 = vpop.permute.xlu0 %8818  ;;  %v6871_v34 = vsel %vm15656_vm4, %v6869_v61, %v6845_v10  ;;  %vm15659_vm10 = vmmov %vm15657_vm0  ;;  %v9603_v61 = vld [vmem:[%s15103_s5 + $0x1e8] ss:$12 sps:$4 sm:$0xff]   ;;  %v9612_v10 = vld [vmem:[%s15103_s5 + $0x260] ss:$12 sps:$4 sm:$0xff]  }
0x15ac   : > { %v8821_v27 = vunpack.i.h.bf16 %v8819_v41  ;;  %v8820_v30 = vunpack.i.l.bf16 %v8819_v41  ;;  %v8841_v48 = vunpack.i.h.bf16 %v8839_v45  ;;  %v8840_v38 = vunpack.i.l.bf16 %v8839_v45  ;;  %vm15665_vm4 = vmmov %vm15657_vm0  ;;  %v9591_v45 = vld [vmem:[%s15103_s5 + $0x230] ss:$12 sps:$4 sm:$0xff]   ;;  %v9592_v41 = vld [vmem:[%s15103_s5 + $0x128] ss:$12 sps:$4 sm:$0xff]  }
0x15ae   : > { %v6826_v37 = vsel %vm15650_vm11, %v8820_v30, %v8821_v27  ;;  %v6846_v24 = vsel %vm15654_vm14, %v8840_v38, %v8841_v48  ;;  %vm15658_vm11 = vmmov %vm15657_vm0  ;;  %v9595_v27 = vld [vmem:[%s15103_s5 + $0x218] ss:$12 sps:$4 sm:$0xff]   ;;  %v9596_v30 = vld [vmem:[%s15103_s5 + $0x110] ss:$12 sps:$4 sm:$0xff]  }
0x15af   : > { %v6868_v58 = vsel %vm1395_vm12, %v8831_v16, %v6826_v37  ;;  %v8854_v3 = vpop.permute.xlu1 %8853  ;;  %v8824_v11 = vpop.permute.xlu0 %8823  ;;  %v9597_v16 = vld [vmem:[%s15103_s5 + $0x2c0] ss:$12 sps:$4 sm:$0xff]   ;;  %v9600_v38 = vld [vmem:[%s15103_s5 + $0xf8] ss:$12 sps:$4 sm:$0xff]  }
0x15b0   : > { %v8856_v20 = vunpack.i.h.bf16 %v8854_v3  ;;  %v8855_v39 = vunpack.i.l.bf16 %v8854_v3  ;;  %v8826_v47 = vunpack.i.h.bf16 %v8824_v11  ;;  %v6870_v51 = vsel %vm15655_vm3, %v6868_v58, %v8836_v21  ;;  %vm15664_vm3 = vmmov %vm15657_vm0  ;;  %v9599_v48 = vld [vmem:[%s15103_s5 + $0x200] ss:$12 sps:$4 sm:$0xff]   ;;  %v9607_v21 = vld [vmem:[%s15103_s5 + $0x1d0] ss:$12 sps:$4 sm:$0xff]  }
0x15b1   : > { %v8825_v2 = vunpack.i.l.bf16 %v8824_v11  ;;  %v6872_v54 = vsel %vm15659_vm10, %v6870_v51, %v6846_v24  ;;  %v9604_v37 = vld [vmem:[%s15103_s5 + $0xe0] ss:$12 sps:$4 sm:$0xff]   ;;  %v9608_v58 = vld [vmem:[%s15103_s5 + $0xc8] ss:$12 sps:$4 sm:$0xff]   ;;  %v9609_v3 = vld [vmem:[%s15103_s5 + $0x278] ss:$12 sps:$4 sm:$0xff]  }
0x15b2   : > { %v6853_v49 = vsel %vm15657_vm0, %v6851_v4, %v8855_v39  ;;  %v6854_v35 = vsel %vm15658_vm11, %v6852_v7, %v8856_v20  ;;  %v6876_v6 = vpack.c.bf16 %v6872_v54, %v6871_v34  ;;  %v9606_v7 = vld [vmem:[%s15103_s5 + $0x20] ss:$12 sps:$4 sm:$0xff]   ;;  %v9610_v11 = vld [vmem:[%s15103_s5 + $0x8] ss:$12 sps:$4 sm:$0xff]   ;;  %v9611_v4 = vld [vmem:[%s15103_s5 + $0x1b8] ss:$12 sps:$4 sm:$0xff]  }
0x15b3   : > { %v14719_v22 = vpack.c.bf16 %v6854_v35, %v6853_v49  ;;  %v8844_v5 = vpop.permute.xlu0 %8843  ;;  %v6786_v57 = vsel %vm549_vm2, %v8825_v2, %v8826_v47  ;;  %vm15661_vm2 = vcmask 949248   ;;  %v15666_v20 = vld [vmem:[#allocation6_spill] sm:$0xff]  ;;  %vm15667_vm0 = vcmask 130048   ;;  %v9613_v39 = vld [vmem:[%s15103_s5 + $0x1a0] ss:$12 sps:$4 sm:$0xff]  }
0x15b4   : > { %v8845_v14 = vunpack.i.l.bf16 %v8844_v5  ;;  %6952 = vmatprep.mubr.bf16.mxu1 %v6876_v6  ;;  %v8846_v60 = vunpack.i.h.bf16 %v8844_v5  ;;  %v6862_v59 = vsel %vm1395_vm12, %v8816_v40, %v6786_v57  ;;  %v6805_v17 = vsel %vm15661_vm2, %v8810_v13, %v8811_v53  ;;  %vm15663_vm14 = vmmov %vm15661_vm2  ;;  %v9614_v24 = vld [vmem:[%s15103_s5 + $0x248] ss:$12 sps:$4 sm:$0xff]  }
0x15b5   : > { %6910 = vmatmul.mubr.bf16.vlgmr.msra.gmra.mxu0 %v14719_v22  ;;  %v9615_v47 = vld [vmem:[%s15103_s5 + $0x188] ss:$12 sps:$4 sm:$0xff]   ;;  %vm15668_vm11 = vmmov %vm15667_vm0  ;;  %vm15673_vm10 = vcmask 744448   ;;  %vm15675_vm2 = vcmask 883712  }
0x15b6   : > { %7934 = vmatpush3.bf16.msra.mxu0 %v9586_v26  ;;  %6995 = vmatprep.mubr.bf16.mxu0 %v6874_v46  ;;  %v6863_v12 = vsel %vm15660_vm7, %v6861_v8, %v8845_v14  ;;  %v6864_v46 = vsel %vm15662_vm9, %v6862_v59, %v8846_v60  ;;  %vm15674_vm7 = vmmov %vm15673_vm10 }
0x15b7   : > { %v8849_v50 = vpop.permute.xlu0 %8848  ;;  %7935 = vmatprep.subr.bf16.mxu0 %v9587_v25  ;;  %v6865_v43 = vsel %vm15664_vm3, %v6863_v12, %v6805_v17  ;;  %vm15676_vm9 = vmmov %vm15675_vm2 }
0x15b8   : > { %v8851_v19 = vunpack.i.h.bf16 %v8849_v50  ;;  %v8850_v56 = vunpack.i.l.bf16 %v8849_v50 }
0x15ba   : > { %v6806_v18 = vsel %vm15663_vm14, %v8850_v56, %v8851_v19  ;;  %7936 = vmatpush3.bf16.msra.mxu0 %v9588_v52  ;;  %vm15677_vm14 = vcmask 891904  }
0x15bb   : > { %7937 = vmatprep.subr.bf16.mxu0 %v9589_v29  ;;  %v6866_v55 = vsel %vm15665_vm4, %v6864_v46, %v6806_v18 }
0x15bc   : > { %v6875_v44 = vpack.c.bf16 %v6866_v55, %v6865_v43 }
0x15be   : > { %7938 = vmatpush3.bf16.msra.mxu0 %v9590_v23  ;;  %6953 = vmatmul.mubr.bf16.vlgmr.msra.gmra.mxu1 %v6875_v44 }
0x15bf   : > { %7956 = vmatpush3.bf16.msra.mxu1 %v9591_v45  ;;  %7036 = vmatprep.mubr.bf16.mxu1 %v6876_v6 }
0x15c0   : > { %7939 = vmatprep.subr.bf16.mxu0 %v9592_v41  ;;  %7957 = vmatprep.subr.bf16.mxu1 %v9593_v28 }
0x15c2   : > { %7940 = vmatpush3.bf16.msra.mxu0 %v9594_v15 }
0x15c3   : > { %7958 = vmatpush3.bf16.msra.mxu1 %v9595_v27  ;;  %7941 = vmatprep.subr.bf16.mxu0 %v9596_v30 }
0x15c4   : > { %7959 = vmatprep.subr.bf16.mxu1 %v9597_v16 }
0x15c6   : > { %7942 = vmatpush3.bf16.msra.mxu0 %v9598_v1 }
0x15c7   : > { %7960 = vmatpush3.bf16.msra.mxu1 %v9599_v48  ;;  %7943 = vmatprep.subr.bf16.mxu0 %v9600_v38 }
0x15c8   : > { %7961 = vmatprep.subr.bf16.mxu1 %v9601_v9 }
0x15ca   : > { %7944 = vmatpush3.bf16.msra.mxu0 %v9602_v33 }
0x15cb   : > { %7962 = vmatpush3.bf16.msra.mxu1 %v9603_v61  ;;  %7945 = vmatprep.subr.bf16.mxu0 %v9604_v37 }
0x15cc   : > { %7963 = vmatprep.subr.bf16.mxu1 %v9605_v32 }
0x15ce   : > { %7946 = vmatpush3.bf16.msra.mxu0 %v9606_v7 }
0x15cf   : > { %7964 = vmatpush3.bf16.msra.mxu1 %v9607_v21  ;;  %7947 = vmatprep.subr.bf16.mxu0 %v9608_v58 }
0x15d0   : > { %7965 = vmatprep.subr.bf16.mxu1 %v9609_v3 }
0x15d2   : > { %7948 = vmatpush3.bf16.msra.mxu0 %v9610_v11 }
0x15d3   : > { %7966 = vmatpush3.bf16.msra.mxu1 %v9611_v4 }
0x15d4   : > { %7967 = vmatprep.subr.bf16.mxu1 %v9612_v10 }
0x15d5   : > { %6996 = vmatmul.mubr.bf16.vlgmr.msra.gmra.mxu0 %v14719_v22 }
0x15d6   : > { %7767 = vmatprep.mubr.msk.bf16.mxu0 %vm15667_vm0, %v15666_v20 }
0x15d7   : > { %7968 = vmatpush3.bf16.msra.mxu1 %v9613_v39 }
0x15d8   : > { %7969 = vmatprep.subr.bf16.mxu1 %v9614_v24 }
0x15db   : > { %7970 = vmatpush3.bf16.msra.mxu1 %v9615_v47 }
0x15dc   : > { %7180 = vmatprep.subr.bf16.mxu1 %v15293_v42 }
0x15de   : > { %7037 = vmatmul.mubr.bf16.vlgmr.msra.gmra.mxu1 %v6875_v44 }
0x15df   : > { %7768 = vmatprep.mubr.msk.bf16.mxu1 %vm15668_vm11, %v15666_v20 }
0x1675   : > { %v6911_v51 = vpop.f32.mrf.mxu0 }
0x1677   : > { %v6913_v34 = vpop.f32.mrf.mxu0 }
0x1679   : > { %v6915_v35 = vpop.f32.mrf.mxu0 }
0x167b   : > { %v6917_v5 = vpop.f32.mrf.mxu0 }
0x167e   : > { %v6954_v49 = vpop.f32.mrf.mxu1 }
0x167f   : > { %v6955_v31 = vadd.f32 %v6954_v49, %v6911_v51 }
0x1680   : > { %v6956_v2 = vpop.f32.mrf.mxu1 }
0x1681   : > { %v6957_v53 = vadd.f32 %v6956_v2, %v6913_v34 }
0x1682   : > { %v6958_v54 = vpop.f32.mrf.mxu1 }
0x1683   : > { %v6959_v22 = vadd.f32 %v6958_v54, %v6915_v35 }
0x1684   : > { %v6960_v6 = vpop.f32.mrf.mxu1 }
0x1685   : > { %v14831_v14 = vpack.c.bf16 %v6959_v22, %v6955_v31  ;;  %v6961_v63 = vadd.f32 %v6960_v6, %v6917_v5  ;;  %v15679_v6 = vld [vmem:[#allocation10_spill] sm:$0xff] }
0x1687   : > { %7106 = vrot.lane.b32.xlu1 %v14831_v14, %s15347_s14  ;;  %7117 = vrot.lane.b32.xlu0 %v14831_v14, %s15669_s7  ;;  %v14837_v13 = vpack.c.bf16 %v6961_v63, %v6957_v53  ;;  %v15680_v63 = vld [vmem:[#allocation8_spill] sm:$0xff]  ;;  %v9616_v53 = vld [vmem:[%s15104_s6 + $0x74] ss:$8 sps:$4 sm:$0xff]  }
0x168b   : > { %7095 = vrot.lane.b32.xlu0 %v14831_v14, %s15670_s13  ;;  %7108 = vrot.lane.b32.xlu1 %v14837_v13, %s15347_s14 }
0x168f   : > { %7086 = vrot.lane.b32.xlu1 %v14837_v13, %s15671_s16  ;;  %7119 = vrot.lane.b32.xlu0 %v14837_v13, %s15669_s7 }
0x1693   : > { %7097 = vrot.lane.b32.xlu0 %v14837_v13, %s15670_s13 }
0x1695   : > { %v7949_v57 = vpop.f32.mrf.mxu0 }
0x1697   : > { %v7950_v60 = vpop.f32.mrf.mxu0 }
0x1698   : > { %v7951_v56 = vadd.f32 %v7950_v60, %v7949_v57  ;;  %v9618_v57 = vld [vmem:[%s15104_s6 + $0x64] ss:$8 sps:$4 sm:$0xff]   ;;  %v9619_v60 = vld [vmem:[%s15104_s6 + $0x60] ss:$8 sps:$4 sm:$0xff]  }
0x1699   : > { %v7952_v26 = vpop.f32.mrf.mxu0 }
0x169b   : > { %v7953_v50 = vpop.f32.mrf.mxu0 }
0x169c   : > { %v7954_v59 = vadd.f32 %v7953_v50, %v7952_v26  ;;  %v9621_v26 = vld [vmem:[%s15104_s6 + $0x50] ss:$8 sps:$4 sm:$0xff]   ;;  %v9624_v50 = vld [vmem:[%s15104_s6 + $0x34] ss:$8 sps:$4 sm:$0xff]  }
0x169e   : > { %v7971_v40 = vpop.f32.mrf.mxu1 }
0x16a0   : > { %v7972_v8 = vpop.f32.mrf.mxu1 }
0x16a1   : > { %v7973_v12 = vadd.f32 %v7972_v8, %v7971_v40  ;;  %v9622_v40 = vld [vmem:[%s15104_s6 + $0x44] ss:$8 sps:$4 sm:$0xff]   ;;  %v9623_v8 = vld [vmem:[%s15104_s6 + $0x40] ss:$8 sps:$4 sm:$0xff]  }
0x16a2   : > { %v7974_v25 = vpop.f32.mrf.mxu1 }
0x16a3   : > { %v7039_v46 = vadd.f32 %v7973_v12, %v7951_v56  ;;  %v9626_v12 = vld [vmem:[%s15104_s6 + $0x24] ss:$8 sps:$4 sm:$0xff]   ;;  %v9628_v56 = vld [vmem:[%s15104_s6 + $0x14] ss:$8 sps:$4 sm:$0xff]  }
0x16a4   : > { %v7975_v19 = vpop.f32.mrf.mxu1 }
0x16a5   : > { %v7976_v17 = vadd.f32 %v7975_v19, %v7974_v25  ;;  %v9625_v25 = vld [vmem:[%s15104_s6 + $0x30] ss:$8 sps:$4 sm:$0xff]   ;;  %v9627_v19 = vld [vmem:[%s15104_s6 + $0x20] ss:$8 sps:$4 sm:$0xff]  }
0x16a7   : > { %v7042_v18 = vadd.f32 %v7976_v17, %v7954_v59  ;;  %v9629_v59 = vld [vmem:[%s15104_s6 + $0x10] ss:$8 sps:$4 sm:$0xff]   ;;  %v9630_v17 = vld [vmem:[%s15104_s6 + $0x4] ss:$8 sps:$4 sm:$0xff]  }
0x16a9   : > { %v14849_v52 = vpack.c.bf16 %v7042_v18, %v7039_v46  ;;  %v9631_v46 = vld [vmem:[%s15104_s6] ss:$8 sps:$4 sm:$0xff]   ;;  %v9632_v18 = vld [vmem:[%s15104_s6 + $0xf4] ss:$8 sps:$4 sm:$0xff]  }
0x16ab   : > { %7121 = vrot.lane.b32.xlu1 %v14849_v52, %s15669_s7  ;;  %7110 = vrot.lane.b32.xlu0 %v14849_v52, %s15347_s14  ;;  %s15672_s14 = smov 90   ;;  %s15690_s7 = sld [smem:[#allocation30_spill]] }
0x16af   : > { %7084 = vrot.lane.b32.xlu1 %v14831_v14, %s15671_s16  ;;  %7075 = vrot.lane.b32.xlu0 %v14837_v13, %s15351_s9 }
0x16b3   : > { %7099 = vrot.lane.b32.xlu1 %v14849_v52, %s15670_s13  ;;  %7088 = vrot.lane.b32.xlu0 %v14849_v52, %s15671_s16 }
0x16b7   : > { %7064 = vrot.lane.b32.xlu1 %v14837_v13, %s15352_s3  ;;  %7073 = vrot.lane.b32.xlu0 %v14831_v14, %s15351_s9 }
0x16bb   : > { %7077 = vrot.lane.b32.xlu1 %v14849_v52, %s15351_s9  ;;  %7066 = vrot.lane.b32.xlu0 %v14849_v52, %s15352_s3 }
0x16bf   : > { %7062 = vrot.lane.b32.xlu1 %v14831_v14, %s15352_s3  ;;  %7053 = vrot.lane.b32.xlu0 %v14837_v13, %s15353_s4  ;;  %s15691_s3 = sld [smem:[#allocation32_spill]] }
0x16c3   : > { %7055 = vrot.lane.b32.xlu1 %v14849_v52, %s15353_s4  ;;  %7051 = vrot.lane.b32.xlu0 %v14831_v14, %s15353_s4 }
0x16c7   : > { %7130 = vrot.lane.b32.xlu1 %v14837_v13, %s15672_s14  ;;  %7132 = vrot.lane.b32.xlu0 %v14849_v52, %s15672_s14 }
0x16cb   : > { %7128 = vrot.lane.b32.xlu1 %v14831_v14, %s15672_s14 }
0x16f9   : > { %v7118_v29 = vpop.permute.xlu0 %7117  ;;  %v7107_v43 = vpop.permute.xlu1 %7106 }
0x16fd   : > { %v7096_v55 = vpop.permute.xlu0 %7095  ;;  %v7109_v44 = vpop.permute.xlu1 %7108 }
0x16fe   : > { %v7112_v38 = vsel %vm518_vm5, %v7107_v43, %v7109_v44  ;;  %v9635_v43 = vld [vmem:[%s15104_s6 + $0xe0] ss:$8 sps:$4 sm:$0xff]  }
0x1701   : > { %v7120_v23 = vpop.permute.xlu0 %7119  ;;  %v7087_v45 = vpop.permute.xlu1 %7086 }
0x1702   : > { %v7123_v30 = vsel %vm15674_vm7, %v7118_v29, %v7120_v23  ;;  %v9634_v29 = vld [vmem:[%s15104_s6 + $0xe4] ss:$8 sps:$4 sm:$0xff]  }
0x1705   : > { %v7098_v41 = vpop.permute.xlu0 %7097 }
0x1706   : > { %v7101_v37 = vsel %vm15676_vm9, %v7096_v55, %v7098_v41  ;;  %v9636_v55 = vld [vmem:[%s15104_s6 + $0xd4] ss:$8 sps:$4 sm:$0xff]  }
0x171d   : > { %v7122_v28 = vpop.permute.xlu1 %7121  ;;  %v7111_v15 = vpop.permute.xlu0 %7110 }
0x171e   : > { %7181 = vmatpush1.bf16.msra.mxu1 %v7122_v28  ;;  %v7124_v27 = vsel %vm15673_vm10, %v7120_v23, %v7122_v28  ;;  %v7113_v16 = vsel %vm518_vm5, %v7109_v44, %v7111_v15  ;;  %vm15678_vm5 = vmmov %vm15677_vm14  ;;  %v9637_v44 = vld [vmem:[%s15104_s6 + $0xd0] ss:$8 sps:$4 sm:$0xff]   ;;  %v9638_v23 = vld [vmem:[%s15104_s6 + $0xc4] ss:$8 sps:$4 sm:$0xff]  }
0x171f   : > { %7139 = vmatprep.subr.bf16.mxu0 %v7124_v27  ;;  %7182 = vmatprep.subr.bf16.mxu1 %v15293_v42  ;;  %v9641_v28 = vld [vmem:[%s15104_s6 + $0xb0] ss:$8 sps:$4 sm:$0xff]   ;;  %v9643_v27 = vld [vmem:[%s15104_s6 + $0xa0] ss:$8 sps:$4 sm:$0xff]  }
0x1720   : > { %7140 = vmatpush1.bf16.msra.mxu0 %v7123_v30  ;;  %v9644_v30 = vld [vmem:[%s15104_s6 + $0x94] ss:$8 sps:$4 sm:$0xff]  }
0x1721   : > { %v7085_v1 = vpop.permute.xlu1 %7084  ;;  %7141 = vmatprep.subr.bf16.mxu0 %v7113_v16  ;;  %v7076_v48 = vpop.permute.xlu0 %7075  ;;  %v9645_v16 = vld [vmem:[%s15104_s6 + $0x90] ss:$8 sps:$4 sm:$0xff]  }
0x1722   : > { %7183 = vmatpush1.bf16.msra.mxu1 %v7111_v15  ;;  %v7090_v58 = vsel %vm15678_vm5, %v7085_v1, %v7087_v45  ;;  %v9642_v15 = vld [vmem:[%s15104_s6 + $0xa4] ss:$8 sps:$4 sm:$0xff]  }
0x1723   : > { %7184 = vmatprep.subr.bf16.mxu1 %v15293_v42  ;;  %v9646_v1 = vld [vmem:[%s15104_s6 + $0x84] ss:$8 sps:$4 sm:$0xff]  }
0x1724   : > { %7142 = vmatpush1.bf16.msra.mxu0 %v7112_v38 }
0x1725   : > { %v7100_v9 = vpop.permute.xlu1 %7099  ;;  %v7089_v33 = vpop.permute.xlu0 %7088 }
0x1726   : > { %7185 = vmatpush1.bf16.msra.mxu1 %v7100_v9  ;;  %v7102_v61 = vsel %vm15675_vm2, %v7098_v41, %v7100_v9  ;;  %v7091_v32 = vsel %vm15677_vm14, %v7087_v45, %v7089_v33  ;;  %v9639_v45 = vld [vmem:[%s15104_s6 + $0xc0] ss:$8 sps:$4 sm:$0xff]   ;;  %v9640_v41 = vld [vmem:[%s15104_s6 + $0xb4] ss:$8 sps:$4 sm:$0xff]  }
0x1727   : > { %7143 = vmatprep.subr.bf16.mxu0 %v7102_v61  ;;  %7186 = vmatprep.subr.bf16.mxu1 %v15293_v42  ;;  %v15682_v9 = vld [vmem:[#allocation9_spill] sm:$0xff] }
0x1728   : > { %7144 = vmatpush1.bf16.msra.mxu0 %v7101_v37 }
0x1729   : > { %v7065_v7 = vpop.permute.xlu1 %7064  ;;  %7145 = vmatprep.subr.bf16.mxu0 %v7091_v32  ;;  %v7074_v21 = vpop.permute.xlu0 %7073 }
0x172a   : > { %7187 = vmatpush1.bf16.msra.mxu1 %v7089_v33  ;;  %v7079_v10 = vsel %vm2268_vm13, %v7074_v21, %v7076_v48 }
0x172b   : > { %7188 = vmatprep.subr.bf16.mxu1 %v15293_v42 }
0x172c   : > { %7146 = vmatpush1.bf16.msra.mxu0 %v7090_v58 }
0x172d   : > { %v7078_v3 = vpop.permute.xlu1 %7077  ;;  %v7067_v11 = vpop.permute.xlu0 %7066 }
0x172e   : > { %7189 = vmatpush1.bf16.msra.mxu1 %v7078_v3  ;;  %v7080_v4 = vsel %vm2268_vm13, %v7076_v48, %v7078_v3  ;;  %v7069_v20 = vsel %vm437_vm6, %v7065_v7, %v7067_v11  ;;  %v9647_v48 = vld [vmem:[%s15104_s6 + $0x80] ss:$8 sps:$4 sm:$0xff]  }
0x172f   : > { %7147 = vmatprep.subr.bf16.mxu0 %v7080_v4  ;;  %7190 = vmatprep.subr.bf16.mxu1 %v15293_v42 }
0x1730   : > { %7148 = vmatpush1.bf16.msra.mxu0 %v7079_v10 }
0x1731   : > { %v7063_v39 = vpop.permute.xlu1 %7062  ;;  %7149 = vmatprep.subr.bf16.mxu0 %v7069_v20  ;;  %v7054_v24 = vpop.permute.xlu0 %7053 }
0x1732   : > { %v7068_v47 = vsel %vm437_vm6, %v7063_v39, %v7065_v7  ;;  %7191 = vmatpush1.bf16.msra.mxu1 %v7067_v11  ;;  %vm15687_vm6 = vcmask 105472  }
0x1733   : > { %7192 = vmatprep.subr.bf16.mxu1 %v15293_v42 }
0x1734   : > { %7150 = vmatpush1.bf16.msra.mxu0 %v7068_v47 }
0x1735   : > { %v7056_v51 = vpop.permute.xlu1 %7055  ;;  %v7052_v34 = vpop.permute.xlu0 %7051 }
0x1736   : > { %v7057_v49 = vsel %vm410_vm8, %v7052_v34, %v7054_v24  ;;  %7193 = vmatpush1.bf16.msra.mxu1 %v7056_v51  ;;  %v7058_v35 = vsel %vm410_vm8, %v7054_v24, %v7056_v51 }
0x1737   : > { %7151 = vmatprep.subr.bf16.mxu0 %v7058_v35  ;;  %7194 = vmatprep.subr.bf16.mxu1 %v15293_v42 }
0x1738   : > { %7152 = vmatpush1.bf16.msra.mxu0 %v7057_v49 }
0x1739   : > { %v7131_v2 = vpop.permute.xlu1 %7130  ;;  %7153 = vmatprep.subr.bf16.mxu0 %v14837_v13  ;;  %v7133_v54 = vpop.permute.xlu0 %7132  ;;  %v15681_v13 = vld [vmem:[#allocation11_spill] sm:$0xff] }
0x173a   : > { %7195 = vmatpush1.bf16.msra.mxu1 %v14849_v52  ;;  %v7135_v31 = vsel %vm2327_vm15, %v7131_v2, %v7133_v54  ;;  %v9633_v52 = vld [vmem:[%s15104_s6 + $0xf0] ss:$8 sps:$4 sm:$0xff]  }
0x173b   : > { %7210 = vmatprep.subr.bf16.mxu1 %v15293_v42 }
0x173c   : > { %7154 = vmatpush1.bf16.msra.mxu0 %v14831_v14  ;;  %v9617_v14 = vld [vmem:[%s15104_s6 + $0x70] ss:$8 sps:$4 sm:$0xff]  }
0x173d   : > { %v7129_v22 = vpop.permute.xlu1 %7128  ;;  %7169 = vmatprep.subr.bf16.mxu0 %v7135_v31 }
0x173e   : > { %v7134_v5 = vsel %vm2327_vm15, %v7129_v22, %v7131_v2  ;;  %7211 = vmatpush2.bf16.msra.mxu1 %v7133_v54  ;;  %vm7393_vm15 = vcmask 1042432  }
0x173f   : > { %7318 = vmatprep.subr.bf16.mxu1 %v15679_v6  ;;  %v5821_v6 = vrot.slane %v14445_v36, 1 }
0x1740   : > { %7170 = vmatpush2.bf16.msra.mxu0 %v7134_v5 }
0x1741   : > { %7213 = vmatmul.mubr.bf16.vlgmr.msra.gmra.mxu1 %v15680_v63  ;;  %7263 = vmatprep.subr.bf16.mxu0 %v9616_v53 }
0x1742   : > { %7319 = vmatpush1.bf16.msra.mxu1 %v15681_v13  ;;  %7336 = vmatprep.mubr.bf16.mxu1 %v15293_v42  ;;  %v9620_v42 = vld [vmem:[%s15104_s6 + $0x54] ss:$8 sps:$4 sm:$0xff]  }
0x1743   : > { %7172 = vmatmul.mubr.bf16.vlgmr.msra.gmra.mxu0 %v15680_v63  ;;  %8036 = vmatprep.subr.bf16.mxu1 %v15574_v0  ;;  %v15683_v63 = vld [vmem:[#allocation13_spill] sm:$0xff] }
0x1744   : > { %7264 = vmatpush1.bf16.msra.mxu0 %v9617_v14  ;;  %v4296_v53 = vrot.slane %v15683_v63, 1  ;;  %v4301_v13 = vrot.slane %v15683_v63, 2  ;;  %v15684_v14 = vld [vmem:[#allocation12_spill] sm:$0xff] }
0x1745   : > { %7265 = vmatprep.subr.bf16.mxu0 %v9618_v57  ;;  %v2771_v57 = vrot.slane %v15684_v14, 1 }
0x1748   : > { %7266 = vmatpush1.bf16.msra.mxu0 %v9619_v60  ;;  %v5826_v60 = vrot.slane %v14445_v36, 2 }
0x1749   : > { %7267 = vmatprep.subr.bf16.mxu0 %v9620_v42  ;;  %v2776_v42 = vrot.slane %v15684_v14, 2 }
0x174c   : > { %7268 = vmatpush1.bf16.msra.mxu0 %v9621_v26  ;;  %v4306_v26 = vrot.slane %v15683_v63, 3 }
0x174d   : > { %7269 = vmatprep.subr.bf16.mxu0 %v9622_v40  ;;  %v2781_v40 = vrot.slane %v15684_v14, 3 }
0x1750   : > { %7270 = vmatpush1.bf16.msra.mxu0 %v9623_v8  ;;  %v5831_v8 = vrot.slane %v14445_v36, 3 }
0x1751   : > { %7271 = vmatprep.subr.bf16.mxu0 %v9624_v50  ;;  %v15685_v50 = vld [vmem:[#allocation20_spill] sm:$0xff] }
0x1754   : > { %7272 = vmatpush1.bf16.msra.mxu0 %v9625_v25  ;;  %v4315_v25 = vrot.slane %v15685_v50, 5 }
0x1755   : > { %7273 = vmatprep.subr.bf16.mxu0 %v9626_v12  ;;  %v5840_v12 = vrot.slane %v14447_v62, 5 }
0x1758   : > { %7274 = vmatpush1.bf16.msra.mxu0 %v9627_v19  ;;  %v15686_v19 = vld [vmem:[#allocation18_spill] sm:$0xff] }
0x1759   : > { %7275 = vmatprep.subr.bf16.mxu0 %v9628_v56  ;;  %v2790_v56 = vrot.slane %v15686_v19, 5 }
0x175c   : > { %7276 = vmatpush1.bf16.msra.mxu0 %v9629_v59  ;;  %v4320_v59 = vrot.slane %v15685_v50, 6 }
0x175d   : > { %7277 = vmatprep.subr.bf16.mxu0 %v9630_v17  ;;  %v2795_v17 = vrot.slane %v15686_v19, 6 }
0x1760   : > { %7278 = vmatpush1.bf16.msra.mxu0 %v9631_v46  ;;  %v5845_v46 = vrot.slane %v14447_v62, 6 }
0x1761   : > { %7279 = vmatprep.subr.bf16.mxu0 %v9632_v18  ;;  %v4325_v18 = vrot.slane %v15685_v50, 7 }
0x1764   : > { %7280 = vmatpush2.bf16.msra.mxu0 %v9633_v52 }
0x1765   : > { %7281 = vmatprep.subr.bf16.mxu0 %v9634_v29 }
0x1768   : > { %7282 = vmatpush2.bf16.msra.mxu0 %v9635_v43 }
0x1769   : > { %7283 = vmatprep.subr.bf16.mxu0 %v9636_v55 }
0x176c   : > { %7284 = vmatpush2.bf16.msra.mxu0 %v9637_v44 }
0x176d   : > { %7285 = vmatprep.subr.bf16.mxu0 %v9638_v23 }
0x1770   : > { %7286 = vmatpush2.bf16.msra.mxu0 %v9639_v45 }
0x1771   : > { %7287 = vmatprep.subr.bf16.mxu0 %v9640_v41 }
0x1774   : > { %7288 = vmatpush2.bf16.msra.mxu0 %v9641_v28 }
0x1775   : > { %7289 = vmatprep.subr.bf16.mxu0 %v9642_v15 }
0x1778   : > { %7290 = vmatpush2.bf16.msra.mxu0 %v9643_v27 }
0x1779   : > { %7291 = vmatprep.subr.bf16.mxu0 %v9644_v30 }
0x177c   : > { %7292 = vmatpush2.bf16.msra.mxu0 %v9645_v16 }
0x177d   : > { %7293 = vmatprep.subr.bf16.mxu0 %v9646_v1 }
0x1780   : > { %7294 = vmatpush2.bf16.msra.mxu0 %v9647_v48 }
0x1801   : > { %v7214_v38 = vpop.f32.mrf.mxu1 }
0x1802   : > { %v7215_v33 = vadd.f32 %v7214_v38, %v15682_v9 }
0x1803   : > { %v7173_v61 = vpop.f32.mrf.mxu0  ;;  %v7216_v37 = vpop.f32.mrf.mxu1 }
0x1804   : > { %v7174_v32 = vadd.f32 %v7173_v61, %v15682_v9 }
0x1805   : > { %v7175_v7 = vpop.f32.mrf.mxu0  ;;  %v7217_v21 = vpop.f32.mrf.mxu1 }
0x1806   : > { %9253 = vtanh.f32 %v7174_v32  ;;  %v7176_v58 = vadd.f32 %v7175_v7, %v15682_v9 }
0x1807   : > { %9255 = vtanh.f32 %v7215_v33  ;;  %v7177_v3 = vpop.f32.mrf.mxu0  ;;  %v7218_v11 = vpop.f32.mrf.mxu1 }
0x1808   : > { %9257 = vtanh.f32 %v7176_v58  ;;  %v5850_v3 = vrot.slane %v14447_v62, 7 }
0x1809   : > { %v7178_v4 = vpop.f32.mrf.mxu0 }
0x1813   : > { %v9254_v10 = vpop.eup %9253 }
0x1814   : > { %v9256_v20 = vpop.eup %9255  ;;  %7226 = vrot.lane.b32.xlu1 %v9254_v10, %s15353_s4 }
0x1815   : > { %v9258_v39 = vpop.eup %9257 }
0x1816   : > { %v8857_v24 = vpack.i.bf16 %v9256_v20, %v9258_v39 }
0x1818   : > { %8858 = vrot.lane.b32.xlu0 %v8857_v24, %s15353_s4  ;;  %s9686_s4 = smov 64   ;;  %v9090_v24 = vld [vmem:[%s15688_s21] sm:$0xff]  }
0x1886   : > { %v7227_v49 = vpop.permute.xlu1 %7226 }
0x188a   : > { %v8859_v47 = vpop.permute.xlu0 %8858 }
0x188b   : > { %v8861_v51 = vunpack.i.h.bf16 %v8859_v47  ;;  %v8860_v34 = vunpack.i.l.bf16 %v8859_v47  ;;  %v2800_v47 = vrot.slane %v15686_v19, 7 }
0x188d   : > { %v7239_v35 = vmax.f32 %v9256_v20, %v8861_v51  ;;  %v7233_v2 = vsel %vm410_vm8, %v8860_v34, %v8861_v51  ;;  %v7232_v54 = vsel %vm410_vm8, %v7227_v49, %v8860_v34  ;;  %vm7389_vm8 = vcmask 1040384  }
0x188e   : > { %v7238_v31 = vmax.f32 %v9258_v39, %v7233_v2  ;;  %v7237_v22 = vmax.f32 %v9254_v10, %v7232_v54  ;;  %v9089_v39 = vld [vmem:[%s15688_s21 + $0x8] sm:$0xff]  }
0x1890   : > { %v8862_v5 = vpack.i.bf16 %v7239_v35, %v7238_v31  ;;  %7243 = vrot.lane.b32.xlu1 %v7237_v22, %s15351_s9 }
0x1892   : > { %8863 = vrot.lane.b32.xlu0 %v8862_v5, %s15351_s9  ;;  %s9687_s9 = smov 32  }
0x1894   : > { %5822 = vrot.lane.b32.xlu1 %v5821_v6, %s15641_s22 }
0x1896   : > { %4297 = vrot.lane.b32.xlu0 %v4296_v53, %s15641_s22 }
0x1898   : > { %4302 = vrot.lane.b32.xlu1 %v4301_v13, %s9686_s4 }
0x189a   : > { %2772 = vrot.lane.b32.xlu0 %v2771_v57, %s15641_s22 }
0x189c   : > { %5827 = vrot.lane.b32.xlu1 %v5826_v60, %s9686_s4 }
0x189e   : > { %2777 = vrot.lane.b32.xlu0 %v2776_v42, %s9686_s4 }
0x18a0   : > { %4307 = vrot.lane.b32.xlu1 %v4306_v26, %s9687_s9 }
0x18a2   : > { %2782 = vrot.lane.b32.xlu0 %v2781_v40, %s9687_s9 }
0x18a4   : > { %5832 = vrot.lane.b32.xlu1 %v5831_v8, %s9687_s9 }
0x18a6   : > { %4316 = vrot.lane.b32.xlu0 %v4315_v25, %s15641_s22 }
0x18a8   : > { %5841 = vrot.lane.b32.xlu1 %v5840_v12, %s15641_s22 }
0x18aa   : > { %2791 = vrot.lane.b32.xlu0 %v2790_v56, %s15641_s22 }
0x18ac   : > { %4321 = vrot.lane.b32.xlu1 %v4320_v59, %s9686_s4 }
0x18ae   : > { %2796 = vrot.lane.b32.xlu0 %v2795_v17, %s9686_s4 }
0x18b0   : > { %5846 = vrot.lane.b32.xlu1 %v5845_v46, %s9686_s4 }
0x18b4   : > { %4326 = vrot.lane.b32.xlu1 %v4325_v18, %s9687_s9 }
0x1902   : > { %v7244_v55 = vpop.permute.xlu1 %7243 }
0x1904   : > { %v8864_v52 = vpop.permute.xlu0 %8863 }
0x1905   : > { %v8866_v29 = vunpack.i.h.bf16 %v8864_v52  ;;  %v8865_v43 = vunpack.i.l.bf16 %v8864_v52  ;;  %v5837_v52 = vrot.slane %v14447_v62, 4 }
0x1906   : > { %v5823_v51 = vpop.permute.xlu1 %5822 }
0x1907   : > { %v7256_v44 = vmax.f32 %v7239_v35, %v8866_v29  ;;  %v7249_v23 = vsel %vm2268_vm13, %v7244_v55, %v8865_v43  ;;  %v7250_v45 = vsel %vm2268_vm13, %v8865_v43, %v8866_v29  ;;  %v5825_v26 = vadd.f32 %v5823_v51, %v14445_v36 }
0x1908   : > { %v7254_v41 = vmax.f32 %v7237_v22, %v7249_v23  ;;  %v7255_v28 = vmax.f32 %v7238_v31, %v7250_v45  ;;  %v4298_v49 = vpop.permute.xlu0 %4297  ;;  %v4312_v55 = vrot.slane %v15685_v50, 4  ;;  %vm7391_vm13 = vcmask 1041408  }
0x1909   : > { %v7259_v15 = vpack.c.bf16 %v7256_v44, %v7256_v44  ;;  %v4300_v42 = vadd.f32 %v4298_v49, %v15683_v63  ;;  %v7771_v49 = vld [vmem:[%s15691_s3] ss:$0 sm:$0xff] }
0x190a   : > { %v7258_v27 = vpack.c.bf16 %v7255_v28, %v7255_v28  ;;  %v7257_v30 = vpack.c.bf16 %v7254_v41, %v7254_v41  ;;  %v4303_v34 = vpop.permute.xlu1 %4302 }
0x190b   : > { %7769 = vmatmul.mubr.msk.bf16.vlgmr.msra.gmra.mxu1 %vm15687_vm6, %v7259_v15  ;;  %v4305_v12 = vadd.f32 %v4303_v34, %v4300_v42 }
0x190c   : > { %7295 = vmatprep.mubr.bf16.mxu0 %v7258_v27  ;;  %8040 = vmatprep.mubr.msk.bf16.mxu1 %vm15422_vm1, %v15574_v0  ;;  %v2773_v2 = vpop.permute.xlu0 %2772  ;;  %vm7471_vm1 = vcmask 11264  }
0x190d   : > { %7296 = vmatmul.mubr.bf16.vlgmr.msra.gmra.mxu0 %v7257_v30  ;;  %8037 = vmatpush3.bf16.msra.mxu1 %v9089_v39  ;;  %v2775_v17 = vadd.f32 %v2773_v2, %v15684_v14  ;;  %v2787_v30 = vrot.slane %v15686_v19, 4 }
0x190e   : > { %8038 = vmatprep.subr.bf16.mxu1 %v15574_v0  ;;  %v5828_v35 = vpop.permute.xlu1 %5827 }
0x190f   : > { %v5830_v8 = vadd.f32 %v5828_v35, %v5825_v26 }
0x1910   : > { %v2778_v31 = vpop.permute.xlu0 %2777 }
0x1911   : > { %8039 = vmatpush3.bf16.msra.mxu1 %v9090_v24  ;;  %v2780_v43 = vadd.f32 %v2778_v31, %v2775_v17 }
0x1912   : > { %v4308_v54 = vpop.permute.xlu1 %4307 }
0x1913   : > { %v4310_v46 = vadd.f32 %v4308_v54, %v4305_v12 }
0x1914   : > { %v2783_v5 = vpop.permute.xlu0 %2782 }
0x1915   : > { %v2785_v23 = vadd.f32 %v2783_v5, %v2780_v43  ;;  %v4314_v36 = vadd.f32 %v4312_v55, %v4310_v46 }
0x1916   : > { %v5833_v22 = vpop.permute.xlu1 %5832 }
0x1917   : > { %v5835_v56 = vadd.f32 %v5833_v22, %v5830_v8 }
0x1918   : > { %v4317_v53 = vpop.permute.xlu0 %4316 }
0x1919   : > { %v5839_v63 = vadd.f32 %v5837_v52, %v5835_v56  ;;  %v4319_v27 = vadd.f32 %v4317_v53, %v4314_v36 }
0x191a   : > { %v5842_v6 = vpop.permute.xlu1 %5841 }
0x191c   : > { %v2792_v57 = vpop.permute.xlu0 %2791 }
0x191e   : > { %v4322_v13 = vpop.permute.xlu1 %4321 }
0x1920   : > { %v2797_v0 = vpop.permute.xlu0 %2796 }
0x1922   : > { %v5847_v60 = vpop.permute.xlu1 %5846 }
0x1926   : > { %v4327_v40 = vpop.permute.xlu1 %4326 }
0x19cb   : > { %v7338_v16 = vpop.f32.mrf.mxu1 }
0x19cd   : > { %v7297_v1 = vpop.f32.mrf.mxu0  ;;  %v7340_v48 = vpop.f32.mrf.mxu1 }
0x19ce   : > { %v7339_v38 = vadd.f32 %v7338_v16, %v7297_v1  ;;  %v5844_v16 = vadd.f32 %v5842_v6, %v5839_v63  ;;  %v2789_v1 = vadd.f32 %v2787_v30, %v2785_v23 }
0x19cf   : > { %v7299_v9 = vpop.f32.mrf.mxu0  ;;  %v7342_v33 = vpop.f32.mrf.mxu1 }
0x19d0   : > { %v7356_v61 = vrot.slane %v7339_v38, 3  ;;  %v7346_v37 = vrot.slane %v7339_v38, 1  ;;  %v7341_v58 = vadd.f32 %v7340_v48, %v7299_v9  ;;  %v7351_v11 = vrot.slane %v7339_v38, 2 }
0x19d1   : > { %v7301_v32 = vpop.f32.mrf.mxu0  ;;  %v7343_v7 = vpop.f32.mrf.mxu1  ;;  %v4324_v48 = vadd.f32 %v4322_v13, %v4319_v27  ;;  %v2794_v33 = vadd.f32 %v2792_v57, %v2789_v1 }
0x19d2   : > { %7357 = vrot.lane.b32.xlu1 %v7356_v61, %s9687_s9  ;;  %7347 = vrot.lane.b32.xlu0 %v7346_v37, %s15641_s22  ;;  %v7375_v4 = vrot.slane %v7341_v58, 7  ;;  %v7365_v10 = vrot.slane %v7341_v58, 5  ;;  %v7370_v20 = vrot.slane %v7341_v58, 6  ;;  %v7362_v41 = vrot.slane %v7341_v58, 4 }
0x19d3   : > { %v7302_v21 = vpop.f32.mrf.mxu0  ;;  %v4329_v50 = vadd.f32 %v4327_v40, %v4324_v48  ;;  %v2799_v7 = vadd.f32 %v2797_v0, %v2794_v33 }
0x19d6   : > { %5851 = vrot.lane.b32.xlu1 %v5850_v3, %s9687_s9  ;;  %7352 = vrot.lane.b32.xlu0 %v7351_v11, %s9686_s4  ;;  %v7381_v3 = vrot.slane %v4329_v50, 7 }
0x19da   : > { %7376 = vrot.lane.b32.xlu1 %v7375_v4, %s9687_s9  ;;  %7366 = vrot.lane.b32.xlu0 %v7365_v10, %s15641_s22  ;;  %s15689_s22 = sld [smem:[#allocation3_spill]]  ;;  %v7770_v10 = vld [vmem:[%s15690_s7] ss:$0 sm:$0xff] }
0x19de   : > { %7371 = vrot.lane.b32.xlu0 %v7370_v20, %s9686_s4 }
0x19e0   : > { %p359_p4 = scmp.lt.s32.totalorder %s15689_s22, 1 }
0x19e2   : > { %2801 = vrot.lane.b32.xlu0 %v2800_v47, %s9687_s9  ;;  %s15697_s22 = smov (!%p359_p4, %s15689_s22), 1 }
0x19e3   : > { %s7533_s13 = sshll.u32 %s15697_s22, 2 }
0x19e4   : > { %s362_s30 = scalar_lea.vmem %s15692_s17, %s7533_s13 }
0x1a44   : > { %v7348_v25 = vpop.permute.xlu0 %7347  ;;  %v7358_v59 = vpop.permute.xlu1 %7357 }
0x1a45   : > { %v7350_v18 = vadd.f32 %v7348_v25, %v7339_v38  ;;  %v5849_v38 = vadd.f32 %v5847_v60, %v5844_v16 }
0x1a48   : > { %v7353_v29 = vpop.permute.xlu0 %7352  ;;  %v5852_v28 = vpop.permute.xlu1 %5851 }
0x1a49   : > { %v7355_v44 = vadd.f32 %v7353_v29, %v7350_v18  ;;  %v5854_v37 = vadd.f32 %v5852_v28, %v5849_v38 }
0x1a4b   : > { %v7360_v45 = vadd.f32 %v7358_v59, %v7355_v44  ;;  %v7384_v11 = vrot.slane %v5854_v37, 6 }
0x1a4c   : > { %v7367_v15 = vpop.permute.xlu0 %7366  ;;  %v7377_v32 = vpop.permute.xlu1 %7376 }
0x1a4d   : > { %v7364_v14 = vadd.f32 %v7362_v41, %v7360_v45 }
0x1a4f   : > { %v7369_v62 = vadd.f32 %v7367_v15, %v7364_v14 }
0x1a50   : > { %v7372_v9 = vpop.permute.xlu0 %7371 }
0x1a51   : > { %v7374_v61 = vadd.f32 %v7372_v9, %v7369_v62 }
0x1a53   : > { %v7379_v21 = vadd.f32 %v7377_v32, %v7374_v61 }
0x1a54   : > { %v2802_v58 = vpop.permute.xlu0 %2801 }
0x1a55   : > { %v2804_v19 = vadd.f32 %v2802_v58, %v2799_v7  ;;  %v7387_v4 = vrot.slane %v7379_v21, 5 }
0x1a57   : > { %v7390_v20 = vsel %vm7389_vm8, %v2804_v19, %v7381_v3 }
0x1a58   : > { %v7392_v39 = vsel %vm7391_vm13, %v7390_v20, %v7384_v11 }
0x1a59   : > { %v7394_v24 = vsel %vm7393_vm15, %v7392_v39, %v7387_v4 }
0x1a5a   : > { %v7402_v47 = vadd.f32 %v7770_v10, %v7394_v24 }
0x1a5c   : > { %9259 = vtanh.f32 %v7402_v47 }
0x1a69   : > { %v9260_v51 = vpop.eup %9259 }
0x1a6a   : > { %v7404_v34 = vpack.c.bf16 %v9260_v51, %v9260_v51 }
0x1a6c   : > { %8041 = vmatmul.mubr.msk.bf16.vlgmr.msra.gmra.mxu1 %vm1395_vm12, %v7404_v34 }
0x1b2c   : > { %v7465_v35 = vpop.f32.mrf.mxu1 }
0x1b2d   : > { %v7466_v2 = vadd.f32 %v7771_v49, %v7465_v35 }
0x1b2e   : > { %v8042_v54 = vpop.f32.mrf.mxu1 }
0x1b2f   : > { %7472 = vst.msk [vmem:[%s362_s30] sm:$0xf] %vm7471_vm1, %v7466_v2 }
0x1b30   : > { %v7468_v31 = vpop.f32.mrf.mxu1 }
0x1b32   : > { %v8043_v22 = vpop.f32.mrf.mxu1 }
0x1b33 PF: > { %s15693_s20 = sld [smem:[#allocation2_spill]] }
0x1b39   : > { %s20_s13 = sadd.s32 1, %s15693_s20  }
0x1b3a   : > { %p17_p5 = scmp.ge.s32.totalorder %s20_s13, 4  }
0x1b3c   :  { %19 = sbr.rel (!%p17_p5) target bundleno = 9 (0x9), region = 93 }

</bundles_post_ra>
